<compile_context>
chip_gen: v7x
topology: tpu7x:2x2x1
jax: 0.10.0
libtpu: 0.0.40
codegen_flags: <defaults>
</compile_context>

<pallas_src>
import jax
import jax.numpy as jnp
from jax.experimental import pallas as pl
from jax.experimental.pallas import tpu as pltpu

# ---- small, module-consistent sizes ----
B        = 2          # batch
T        = 8          # context tokens (after extract_short_ctx)
EMBED    = 32          # config.embed_size == d_model (divisible by nhead=8)
NHEAD    = 8
HEAD_DIM = EMBED // NHEAD
DFF      = 2048        # nn.TransformerEncoderLayer default dim_feedforward
NLAYERS  = 4           # nn.TransformerEncoder(num_layers=4)
HIDDEN   = 128         # self.hidden_size
BS_SIZE  = 12          # corpus.bs_size
DB_SIZE  = 10          # corpus.db_size
ACT_DIM  = 16          # action_dim = config.y_size * config.k_size
VOCAB    = 100
S        = T + 3       # word tokens + bs + db + act "tokens"
LN_EPS   = 1e-5

f32  = jnp.float32
bf16 = jnp.bfloat16

# interleaved channel e holds standard channel (e % NHEAD) * HEAD_DIM + e // NHEAD
_HEAD_INTERLEAVE = tuple((e % NHEAD) * HEAD_DIM + e // NHEAD for e in range(EMBED))


# ---------------- shared math helpers (used by kernel AND reference) ----------------
def _dot(x, w):
    """bf16-operand matmul, f32 accumulation."""
    return jnp.dot(x.astype(bf16), w.astype(bf16), preferred_element_type=f32)


def _layer_norm(x, g, b):
    mu = jnp.mean(x, axis=-1, keepdims=True)
    var = jnp.mean(jnp.square(x - mu), axis=-1, keepdims=True)
    return (x - mu) * jax.lax.rsqrt(var + LN_EPS) * g + b


def _sigmoid(x):
    return 1.0 / (1.0 + jnp.exp(-x))


# --------------------------------- Pallas kernel ---------------------------------
def critic_kernel(
    act_ref, w_act_ref, b_act_ref,
    wqkv_ref, bqkv_ref, wo_ref, bo_ref,
    w1_ref, b1_ref, w2_ref, b2_ref,
    ln1g_ref, ln1b_ref, ln2g_ref, ln2b_ref,
    wih_ref, whh_ref, b_lstm_ref,
    wq11_ref, bq11_ref,
    q_out_ref,
):
    L = B                                   # module quirk: batch axis == seq axis
    scale = 1.0 / (HEAD_DIM ** 0.5)

    # act "token" embedding — the only column of `sa` that reaches q1.
    x = _dot(act_ref[...], w_act_ref[...]) + b_act_ref[...]            # (L, EMBED) f32

    # --- nn.TransformerEncoder: 4 post-norm layers, attention over axis 0 ---
    for l in range(NLAYERS):
        # qkv projection (head-interleaved channel layout, see wrapper).
        qkv = _dot(x, wqkv_ref[l]) + bqkv_ref[l][None, :]               # (L, 3E)
        q = qkv[:, 0:EMBED] * scale
        k = qkv[:, EMBED:2 * EMBED]
        v = qkv[:, 2 * EMBED:3 * EMBED]
        qk = q[:, None, :] * k[None, :, :]                              # (L, L, E)
        # per-head scores: head h owns lanes {h, h+8, h+16, h+24}
        s = (qk[:, :, 0 * NHEAD:1 * NHEAD] + qk[:, :, 1 * NHEAD:2 * NHEAD]
             + qk[:, :, 2 * NHEAD:3 * NHEAD] + qk[:, :, 3 * NHEAD:4 * NHEAD])  # (L, L, NHEAD)
        s = s - jnp.max(s, axis=1, keepdims=True)                       # softmax over keys (axis 1)
        p = jnp.exp(s)
        p = p / jnp.sum(p, axis=1, keepdims=True)
        p_full = jnp.concatenate([p] * HEAD_DIM, axis=-1)               # (L, L, E); lane e <-> head e % NHEAD
        attn = jnp.sum(p_full * v[None, :, :], axis=1)                  # (L, E), interleaved channels
        attn = _dot(attn, wo_ref[l]) + bo_ref[l][None, :]               # wo rows pre-permuted -> standard channels
        x = _layer_norm(x + attn, ln1g_ref[l][None, :], ln1b_ref[l][None, :])

        # feed forward (ReLU); hdn is only (B, DFF) = (2, 2048) -> no chunking needed.
        hdn = jnp.maximum(_dot(x, w1_ref[l]) + b1_ref[l][None, :], 0.0)
        ff = _dot(hdn, w2_ref[l]) + b2_ref[l][None, :]
        x = _layer_norm(x + ff, ln2g_ref[l][None, :], ln2b_ref[l][None, :])

    # --- nn.LSTM(EMBED -> 128): seq axis = B, single (act) batch column ---
    wih, whh, b_lstm = wih_ref[...], whh_ref[...], b_lstm_ref[...]
    h = jnp.zeros((1, HIDDEN), f32)
    c = jnp.zeros((1, HIDDEN), f32)
    hs = []
    for t in range(L):
        gates = _dot(x[t:t + 1, :], wih) + _dot(h, whh) + b_lstm        # (1, 4H), gate order i,f,g,o
        i_g = _sigmoid(gates[:, 0:HIDDEN])
        f_g = _sigmoid(gates[:, HIDDEN:2 * HIDDEN])
        g_g = jnp.tanh(gates[:, 2 * HIDDEN:3 * HIDDEN])
        o_g = _sigmoid(gates[:, 3 * HIDDEN:4 * HIDDEN])
        c = f_g * c + i_g * g_g
        h = o_g * jnp.tanh(c)
        hs.append(h)                                                    # output[t, -1, :]
    out_last = jnp.concatenate(hs, axis=0)                              # (B, HIDDEN)

    # q1 = sigmoid(q11(output[:, -1]))
    q_out_ref[...] = _sigmoid(_dot(out_last, wq11_ref[...]) + bq11_ref[...])


# ---------------------------------- parameters ----------------------------------
def init_params(key):
    keys = iter(jax.random.split(key, 48))

    def uni(shape, fan_in, dtype=f32):
        lim = 1.0 / (fan_in ** 0.5)
        return jax.random.uniform(next(keys), shape, f32, -lim, lim).astype(dtype)

    p = {}
    # state_encoder word embeddings + bs/db metadata embeddings (reference path only;
    # under the batch-second transformer/LSTM these columns provably never reach q1).
    p["emb_table"] = 0.1 * jax.random.normal(next(keys), (VOCAB, EMBED), f32)
    p["w_bs_t"], p["b_bs"] = uni((BS_SIZE, EMBED), BS_SIZE), uni((1, EMBED), BS_SIZE)
    p["w_db_t"], p["b_db"] = uni((DB_SIZE, EMBED), DB_SIZE), uni((1, EMBED), DB_SIZE)
    # act embedding
    p["w_act_t"] = uni((ACT_DIM, EMBED), ACT_DIM, bf16)
    p["b_act"] = uni((1, EMBED), ACT_DIM)
    # 4x TransformerEncoderLayer (pre-transposed, stacked over layers, bf16 weights)
    p["wqkv_t"] = uni((NLAYERS, EMBED, 3 * EMBED), EMBED, bf16)
    p["bqkv"] = uni((NLAYERS, 3 * EMBED), EMBED)
    p["wo_t"] = uni((NLAYERS, EMBED, EMBED), EMBED, bf16)
    p["bo"] = uni((NLAYERS, EMBED), EMBED)
    p["w1_t"] = uni((NLAYERS, EMBED, DFF), EMBED, bf16)
    p["b1"] = uni((NLAYERS, DFF), EMBED)
    p["w2_t"] = uni((NLAYERS, DFF, EMBED), DFF, bf16)
    p["b2"] = uni((NLAYERS, EMBED), DFF)
    p["ln1g"] = 1.0 + 0.05 * jax.random.normal(next(keys), (NLAYERS, EMBED), f32)
    p["ln1b"] = 0.05 * jax.random.normal(next(keys), (NLAYERS, EMBED), f32)
    p["ln2g"] = 1.0 + 0.05 * jax.random.normal(next(keys), (NLAYERS, EMBED), f32)
    p["ln2b"] = 0.05 * jax.random.normal(next(keys), (NLAYERS, EMBED), f32)
    # LSTM (gate order i,f,g,o); bias_ih + bias_hh folded into one bias
    p["wih_t"] = uni((EMBED, 4 * HIDDEN), HIDDEN, bf16)
    p["whh_t"] = uni((HIDDEN, 4 * HIDDEN), HIDDEN, bf16)
    p["b_lstm"] = uni((1, 4 * HIDDEN), HIDDEN) + uni((1, 4 * HIDDEN), HIDDEN)
    # q11 head
    p["wq11_t"] = uni((HIDDEN, 1), HIDDEN, bf16)
    p["bq11"] = uni((1, 1), HIDDEN)

    # Kernel-side copies of the attention weights with head channels interleaved
    # (head h owns lanes {h, h+8, h+16, h+24}) so the kernel's per-head reductions
    # are contiguous lane slices.  Free layout plumbing, done outside the kernel;
    # the reference uses the standard layout above.
    perm = jnp.asarray(_HEAD_INTERLEAVE, dtype=jnp.int32)
    wq, wk, wv = (p["wqkv_t"][:, :, i * EMBED:(i + 1) * EMBED][:, :, perm] for i in range(3))
    p["wqkv_k"] = jnp.concatenate([wq, wk, wv], axis=-1)
    bq, bk, bv = (p["bqkv"][:, i * EMBED:(i + 1) * EMBED][:, perm] for i in range(3))
    p["bqkv_k"] = jnp.concatenate([bq, bk, bv], axis=-1)
    p["wo_k"] = p["wo_t"][:, perm, :]
    return p


# ---------------------------------- entry points ----------------------------------
@jax.jit
def critic_forward(ctx_tokens, bs, db, act, params):
    # Because the transformer / LSTM are applied batch-second, q1 depends only on
    # the act column (validated against the full-path reference in __main__), so
    # only `act` and its downstream weights are fed to the kernel.
    # TODO(synk): the state_encoder (RnnUttEncoder) GRU summary / enc_outs are not
    # modeled — they are unused by this forward pass.
    del ctx_tokens, bs, db
    inputs = (
        act,
        params["w_act_t"], params["b_act"],
        params["wqkv_k"], params["bqkv_k"], params["wo_k"], params["bo"],
        params["w1_t"], params["b1"], params["w2_t"], params["b2"],
        params["ln1g"], params["ln1b"], params["ln2g"], params["ln2b"],
        params["wih_t"], params["whh_t"], params["b_lstm"],
        params["wq11_t"], params["bq11"],
    )
    return pl.pallas_call(
        critic_kernel,
        out_shape=jax.ShapeDtypeStruct((B, 1), jnp.float32),
        in_specs=[pl.BlockSpec(memory_space=pltpu.MemorySpace.VMEM)] * len(inputs),
        out_specs=pl.BlockSpec(memory_space=pltpu.MemorySpace.VMEM),
        compiler_params=pltpu.CompilerParams(vmem_limit_bytes=16 * 1024 * 1024),
    )(*inputs)


@jax.jit
def critic_forward_ref(ctx_tokens, bs, db, act, params):
    """Pure-JAX reference of the FULL original forward (word embeddings, bs/db/act
    token columns, batch-second transformer + LSTM, q11 head), with the same bf16
    matmul quantization as the kernel.  Validates the act-column reduction and the
    head-interleaved attention layout used inside the kernel."""
    word_emb = jnp.take(params["emb_table"], ctx_tokens, axis=0)        # (B, T, E)
    bs_e = _dot(bs, params["w_bs_t"]) + params["b_bs"]
    db_e = _dot(db, params["w_db_t"]) + params["b_db"]
    act_e = _dot(act, params["w_act_t"]) + params["b_act"]
    sa = jnp.concatenate([word_emb, bs_e[:, None, :], db_e[:, None, :],
                          act_e[:, None, :]], axis=1)                   # (B, S, E)

    # critic dropout p=0.0 and eval-mode transformer/LSTM dropouts are identity.
    x = sa                                   # module quirk: axis 0 (B) = seq, axis 1 (S) = batch
    L, N = x.shape[0], x.shape[1]
    scale = 1.0 / (HEAD_DIM ** 0.5)
    for l in range(NLAYERS):
        qkv = _dot(x, params["wqkv_t"][l]) + params["bqkv"][l]
        q4 = (qkv[..., 0:EMBED] * scale).reshape(L, N, NHEAD, HEAD_DIM)
        k4 = qkv[..., EMBED:2 * EMBED].reshape(L, N, NHEAD, HEAD_DIM)
        v4 = qkv[..., 2 * EMBED:3 * EMBED].reshape(L, N, NHEAD, HEAD_DIM)
        s = jnp.sum(q4[:, None] * k4[None, :], axis=-1)                 # (L, L, N, NHEAD)
        s = s - jnp.max(s, axis=1, keepdims=True)
        p = jnp.exp(s)
        p = p / jnp.sum(p, axis=1, keepdims=True)
        attn = jnp.sum(p[..., None] * v4[None, :], axis=1).reshape(L, N, EMBED)
        attn = _dot(attn, params["wo_t"][l]) + params["bo"][l]
        x = _layer_norm(x + attn, params["ln1g"][l], params["ln1b"][l])
        hdn = jnp.maximum(_dot(x, params["w1_t"][l]) + params["b1"][l], 0.0)
        ff = _dot(hdn, params["w2_t"][l]) + params["b2"][l]
        x = _layer_norm(x + ff, params["ln2g"][l], params["ln2b"][l])

    h = jnp.zeros((N, HIDDEN), f32)
    c = jnp.zeros((N, HIDDEN), f32)
    outs = []
    for t in range(L):                       # LSTM over the seq axis (= batch axis B)
        gates = _dot(x[t], params["wih_t"]) + _dot(h, params["whh_t"]) + params["b_lstm"]
        i_g = _sigmoid(gates[:, 0:HIDDEN])
        f_g = _sigmoid(gates[:, HIDDEN:2 * HIDDEN])
        g_g = jnp.tanh(gates[:, 2 * HIDDEN:3 * HIDDEN])
        o_g = _sigmoid(gates[:, 3 * HIDDEN:4 * HIDDEN])
        c = f_g * c + i_g * g_g
        h = o_g * jnp.tanh(c)
        outs.append(h[N - 1:N, :])           # output[t, -1, :]
    out_last = jnp.concatenate(outs, axis=0)                            # (B, HIDDEN)
    return _sigmoid(_dot(out_last, params["wq11_t"]) + params["bq11"])  # (B, 1)


if __name__ == "__main__":
    key = jax.random.PRNGKey(0)
    kp, kc, kb, kd, ka, k2 = jax.random.split(key, 6)
    params = init_params(kp)

    ctx_tokens = jax.random.randint(kc, (B, T), 0, VOCAB, dtype=jnp.int32)   # data_feed contexts
    bs  = jax.random.bernoulli(kb, 0.3, (B, BS_SIZE)).astype(jnp.float32)    # data_feed['bs']
    db  = jax.random.bernoulli(kd, 0.3, (B, DB_SIZE)).astype(jnp.float32)    # data_feed['db']
    act = jax.random.normal(ka, (B, ACT_DIM), jnp.float32)                   # act (latent action)

    q1 = jax.block_until_ready(critic_forward(ctx_tokens, bs, db, act, params))
    q1_ref = jax.block_until_ready(critic_forward_ref(ctx_tokens, bs, db, act, params))

    assert q1.shape == (B, 1)
    assert bool(jnp.all(jnp.isfinite(q1)))
    assert bool(jnp.all((q1 > 0.0) & (q1 < 1.0)))
    max_err = float(jnp.max(jnp.abs(q1 - q1_ref)))
    assert max_err < 2e-3, f"kernel vs full-path reference mismatch: {max_err}"

    # demonstrate (on the full reference) that q1 is independent of ctx/bs/db,
    # which is the property the kernel exploits.
    kc2, kb2, kd2 = jax.random.split(k2, 3)
    ctx2 = jax.random.randint(kc2, (B, T), 0, VOCAB, dtype=jnp.int32)
    bs2 = jax.random.bernoulli(kb2, 0.7, (B, BS_SIZE)).astype(jnp.float32)
    db2 = jax.random.bernoulli(kd2, 0.7, (B, DB_SIZE)).astype(jnp.float32)
    q1_ref2 = jax.block_until_ready(critic_forward_ref(ctx2, bs2, db2, act, params))
    assert float(jnp.max(jnp.abs(q1_ref - q1_ref2))) <= 1e-6

    print("KERNEL_OK")
</pallas_src>

<mosaic_0001>
module attributes {stable_mosaic.version = 11 : i64} {
  func.func @critic_kernel(%arg0: memref<2x16xf32, #tpu.memory_space<vmem>>, %arg1: memref<16x32xbf16, #tpu.memory_space<vmem>>, %arg2: memref<1x32xf32, #tpu.memory_space<vmem>>, %arg3: memref<4x32x96xbf16, #tpu.memory_space<vmem>>, %arg4: memref<4x96xf32, #tpu.memory_space<vmem>>, %arg5: memref<4x32x32xbf16, #tpu.memory_space<vmem>>, %arg6: memref<4x32xf32, #tpu.memory_space<vmem>>, %arg7: memref<4x32x2048xbf16, #tpu.memory_space<vmem>>, %arg8: memref<4x2048xf32, #tpu.memory_space<vmem>>, %arg9: memref<4x2048x32xbf16, #tpu.memory_space<vmem>>, %arg10: memref<4x32xf32, #tpu.memory_space<vmem>>, %arg11: memref<4x32xf32, #tpu.memory_space<vmem>>, %arg12: memref<4x32xf32, #tpu.memory_space<vmem>>, %arg13: memref<4x32xf32, #tpu.memory_space<vmem>>, %arg14: memref<4x32xf32, #tpu.memory_space<vmem>>, %arg15: memref<32x512xbf16, #tpu.memory_space<vmem>>, %arg16: memref<128x512xbf16, #tpu.memory_space<vmem>>, %arg17: memref<1x512xf32, #tpu.memory_space<vmem>>, %arg18: memref<128x1xbf16, #tpu.memory_space<vmem>>, %arg19: memref<1x1xf32, #tpu.memory_space<vmem>>, %arg20: memref<2x1xf32, #tpu.memory_space<vmem>>) attributes {dimension_semantics = [], scalar_prefetch = 0 : i64, scratch_operands = 0 : i64, tpu.core_type = #tpu.core_type<tc>} {
    %c0 = arith.constant 0 : index
    %c0_0 = arith.constant 0 : index
    %0 = vector.load %arg0[%c0, %c0_0] : memref<2x16xf32, #tpu.memory_space<vmem>>, vector<2x16xf32>
    %c0_1 = arith.constant 0 : index
    %c0_2 = arith.constant 0 : index
    %1 = vector.load %arg1[%c0_1, %c0_2] : memref<16x32xbf16, #tpu.memory_space<vmem>>, vector<16x32xbf16>
    %2 = arith.truncf %0 : vector<2x16xf32> to vector<2x16xbf16>
    %cst = arith.constant dense<0.000000e+00> : vector<2x32xf32>
    %3 = tpu.matmul %2, %1, %cst {dimension_numbers = #tpu.dot_dimension_numbers<[1], [0], [0], [1], [0, 0, 1, 1], [], []>} : vector<2x16xbf16>, vector<16x32xbf16>, vector<2x32xf32> -> vector<2x32xf32>
    %c0_3 = arith.constant 0 : index
    %c0_4 = arith.constant 0 : index
    %4 = vector.load %arg2[%c0_3, %c0_4] : memref<1x32xf32, #tpu.memory_space<vmem>>, vector<1x32xf32>
    %5 = vector.broadcast %4 : vector<1x32xf32> to vector<2x32xf32>
    %6 = arith.addf %3, %5 : vector<2x32xf32>
    %c0_5 = arith.constant 0 : index
    %c0_6 = arith.constant 0 : index
    %c0_7 = arith.constant 0 : index
    %7 = vector.load %arg3[%c0_5, %c0_6, %c0_7] : memref<4x32x96xbf16, #tpu.memory_space<vmem>>, vector<1x32x96xbf16>
    %8 = vector.shape_cast %7 : vector<1x32x96xbf16> to vector<32x96xbf16>
    %9 = arith.truncf %6 : vector<2x32xf32> to vector<2x32xbf16>
    %cst_8 = arith.constant dense<0.000000e+00> : vector<2x96xf32>
    %10 = tpu.matmul %9, %8, %cst_8 {dimension_numbers = #tpu.dot_dimension_numbers<[1], [0], [0], [1], [0, 0, 1, 1], [], []>} : vector<2x32xbf16>, vector<32x96xbf16>, vector<2x96xf32> -> vector<2x96xf32>
    %c0_9 = arith.constant 0 : index
    %c0_10 = arith.constant 0 : index
    %11 = vector.load %arg4[%c0_9, %c0_10] : memref<4x96xf32, #tpu.memory_space<vmem>>, vector<1x96xf32>
    %12 = vector.shape_cast %11 : vector<1x96xf32> to vector<96xf32>
    %13 = vector.shape_cast %12 : vector<96xf32> to vector<1x96xf32>
    %14 = vector.broadcast %13 : vector<1x96xf32> to vector<2x96xf32>
    %15 = arith.addf %10, %14 : vector<2x96xf32>
    %16 = vector.extract_strided_slice %15 {offsets = [0, 0], sizes = [2, 32], strides = [1, 1]} : vector<2x96xf32> to vector<2x32xf32>
    %cst_11 = arith.constant 5.000000e-01 : f32
    %17 = vector.broadcast %cst_11 : f32 to vector<2x32xf32>
    %18 = arith.mulf %16, %17 : vector<2x32xf32>
    %19 = vector.extract_strided_slice %15 {offsets = [0, 32], sizes = [2, 32], strides = [1, 1]} : vector<2x96xf32> to vector<2x32xf32>
    %20 = vector.extract_strided_slice %15 {offsets = [0, 64], sizes = [2, 32], strides = [1, 1]} : vector<2x96xf32> to vector<2x32xf32>
    %21 = vector.shape_cast %18 : vector<2x32xf32> to vector<2x1x32xf32>
    %22 = vector.shape_cast %19 : vector<2x32xf32> to vector<1x2x32xf32>
    %23 = vector.broadcast %21 : vector<2x1x32xf32> to vector<2x2x32xf32>
    %24 = vector.broadcast %22 : vector<1x2x32xf32> to vector<2x2x32xf32>
    %25 = arith.mulf %23, %24 : vector<2x2x32xf32>
    %26 = vector.extract_strided_slice %25 {offsets = [0, 0, 0], sizes = [2, 2, 8], strides = [1, 1, 1]} : vector<2x2x32xf32> to vector<2x2x8xf32>
    %27 = vector.extract_strided_slice %25 {offsets = [0, 0, 8], sizes = [2, 2, 8], strides = [1, 1, 1]} : vector<2x2x32xf32> to vector<2x2x8xf32>
    %28 = arith.addf %26, %27 : vector<2x2x8xf32>
    %29 = vector.extract_strided_slice %25 {offsets = [0, 0, 16], sizes = [2, 2, 8], strides = [1, 1, 1]} : vector<2x2x32xf32> to vector<2x2x8xf32>
    %30 = arith.addf %28, %29 : vector<2x2x8xf32>
    %31 = vector.extract_strided_slice %25 {offsets = [0, 0, 24], sizes = [2, 2, 8], strides = [1, 1, 1]} : vector<2x2x32xf32> to vector<2x2x8xf32>
    %32 = arith.addf %30, %31 : vector<2x2x8xf32>
    %cst_12 = arith.constant dense<0xFF800000> : vector<2x8xf32>
    %33 = vector.multi_reduction <maximumf>, %32, %cst_12 [1] : vector<2x2x8xf32> to vector<2x8xf32>
    %34 = vector.shape_cast %33 : vector<2x8xf32> to vector<2x1x8xf32>
    %35 = vector.broadcast %34 : vector<2x1x8xf32> to vector<2x2x8xf32>
    %36 = arith.subf %32, %35 : vector<2x2x8xf32>
    %37 = math.exp %36 : vector<2x2x8xf32>
    %cst_13 = arith.constant dense<0.000000e+00> : vector<2x8xf32>
    %38 = vector.multi_reduction <add>, %37, %cst_13 [1] : vector<2x2x8xf32> to vector<2x8xf32>
    %39 = vector.shape_cast %38 : vector<2x8xf32> to vector<2x1x8xf32>
    %40 = vector.broadcast %39 : vector<2x1x8xf32> to vector<2x2x8xf32>
    %41 = arith.divf %37, %40 : vector<2x2x8xf32>
    %42 = tpu.concatenate %41, %41, %41, %41 in 2 : vector<2x2x8xf32>, vector<2x2x8xf32>, vector<2x2x8xf32>, vector<2x2x8xf32> -> vector<2x2x32xf32>
    %43 = vector.shape_cast %20 : vector<2x32xf32> to vector<1x2x32xf32>
    %44 = vector.broadcast %43 : vector<1x2x32xf32> to vector<2x2x32xf32>
    %45 = arith.mulf %42, %44 : vector<2x2x32xf32>
    %cst_14 = arith.constant dense<0.000000e+00> : vector<2x32xf32>
    %46 = vector.multi_reduction <add>, %45, %cst_14 [1] : vector<2x2x32xf32> to vector<2x32xf32>
    %c0_15 = arith.constant 0 : index
    %c0_16 = arith.constant 0 : index
    %c0_17 = arith.constant 0 : index
    %47 = vector.load %arg5[%c0_15, %c0_16, %c0_17] : memref<4x32x32xbf16, #tpu.memory_space<vmem>>, vector<1x32x32xbf16>
    %48 = vector.shape_cast %47 : vector<1x32x32xbf16> to vector<32x32xbf16>
    %49 = arith.truncf %46 : vector<2x32xf32> to vector<2x32xbf16>
    %cst_18 = arith.constant dense<0.000000e+00> : vector<2x32xf32>
    %50 = tpu.matmul %49, %48, %cst_18 {dimension_numbers = #tpu.dot_dimension_numbers<[1], [0], [0], [1], [0, 0, 1, 1], [], []>} : vector<2x32xbf16>, vector<32x32xbf16>, vector<2x32xf32> -> vector<2x32xf32>
    %c0_19 = arith.constant 0 : index
    %c0_20 = arith.constant 0 : index
    %51 = vector.load %arg6[%c0_19, %c0_20] : memref<4x32xf32, #tpu.memory_space<vmem>>, vector<1x32xf32>
    %52 = vector.shape_cast %51 : vector<1x32xf32> to vector<32xf32>
    %53 = vector.shape_cast %52 : vector<32xf32> to vector<1x32xf32>
    %54 = vector.broadcast %53 : vector<1x32xf32> to vector<2x32xf32>
    %55 = arith.addf %50, %54 : vector<2x32xf32>
    %56 = arith.addf %6, %55 : vector<2x32xf32>
    %c0_21 = arith.constant 0 : index
    %c0_22 = arith.constant 0 : index
    %57 = vector.load %arg11[%c0_21, %c0_22] : memref<4x32xf32, #tpu.memory_space<vmem>>, vector<1x32xf32>
    %58 = vector.shape_cast %57 : vector<1x32xf32> to vector<32xf32>
    %59 = vector.shape_cast %58 : vector<32xf32> to vector<1x32xf32>
    %c0_23 = arith.constant 0 : index
    %c0_24 = arith.constant 0 : index
    %60 = vector.load %arg12[%c0_23, %c0_24] : memref<4x32xf32, #tpu.memory_space<vmem>>, vector<1x32xf32>
    %61 = vector.shape_cast %60 : vector<1x32xf32> to vector<32xf32>
    %62 = vector.shape_cast %61 : vector<32xf32> to vector<1x32xf32>
    %cst_25 = arith.constant dense<0.000000e+00> : vector<2xf32>
    %63 = vector.multi_reduction <add>, %56, %cst_25 [1] : vector<2x32xf32> to vector<2xf32>
    %64 = vector.shape_cast %63 : vector<2xf32> to vector<2x1xf32>
    %cst_26 = arith.constant 3.200000e+01 : f32
    %65 = vector.broadcast %cst_26 : f32 to vector<2x1xf32>
    %66 = arith.divf %64, %65 : vector<2x1xf32>
    %67 = vector.broadcast %66 : vector<2x1xf32> to vector<2x32xf32>
    %68 = arith.subf %56, %67 : vector<2x32xf32>
    %69 = arith.mulf %68, %68 : vector<2x32xf32>
    %cst_27 = arith.constant dense<0.000000e+00> : vector<2xf32>
    %70 = vector.multi_reduction <add>, %69, %cst_27 [1] : vector<2x32xf32> to vector<2xf32>
    %71 = vector.shape_cast %70 : vector<2xf32> to vector<2x1xf32>
    %cst_28 = arith.constant 3.200000e+01 : f32
    %72 = vector.broadcast %cst_28 : f32 to vector<2x1xf32>
    %73 = arith.divf %71, %72 : vector<2x1xf32>
    %74 = vector.broadcast %66 : vector<2x1xf32> to vector<2x32xf32>
    %75 = arith.subf %56, %74 : vector<2x32xf32>
    %cst_29 = arith.constant 9.99999974E-6 : f32
    %76 = vector.broadcast %cst_29 : f32 to vector<2x1xf32>
    %77 = arith.addf %73, %76 : vector<2x1xf32>
    %78 = math.rsqrt %77 : vector<2x1xf32>
    %79 = vector.broadcast %78 : vector<2x1xf32> to vector<2x32xf32>
    %80 = arith.mulf %75, %79 : vector<2x32xf32>
    %81 = vector.broadcast %59 : vector<1x32xf32> to vector<2x32xf32>
    %82 = arith.mulf %80, %81 : vector<2x32xf32>
    %83 = vector.broadcast %62 : vector<1x32xf32> to vector<2x32xf32>
    %84 = arith.addf %82, %83 : vector<2x32xf32>
    %c0_30 = arith.constant 0 : index
    %c0_31 = arith.constant 0 : index
    %c0_32 = arith.constant 0 : index
    %85 = vector.load %arg7[%c0_30, %c0_31, %c0_32] : memref<4x32x2048xbf16, #tpu.memory_space<vmem>>, vector<1x32x2048xbf16>
    %86 = vector.shape_cast %85 : vector<1x32x2048xbf16> to vector<32x2048xbf16>
    %87 = arith.truncf %84 : vector<2x32xf32> to vector<2x32xbf16>
    %cst_33 = arith.constant dense<0.000000e+00> : vector<2x2048xf32>
    %88 = tpu.matmul %87, %86, %cst_33 {dimension_numbers = #tpu.dot_dimension_numbers<[1], [0], [0], [1], [0, 0, 1, 1], [], []>} : vector<2x32xbf16>, vector<32x2048xbf16>, vector<2x2048xf32> -> vector<2x2048xf32>
    %c0_34 = arith.constant 0 : index
    %c0_35 = arith.constant 0 : index
    %89 = vector.load %arg8[%c0_34, %c0_35] : memref<4x2048xf32, #tpu.memory_space<vmem>>, vector<1x2048xf32>
    %90 = vector.shape_cast %89 : vector<1x2048xf32> to vector<2048xf32>
    %91 = vector.shape_cast %90 : vector<2048xf32> to vector<1x2048xf32>
    %92 = vector.broadcast %91 : vector<1x2048xf32> to vector<2x2048xf32>
    %93 = arith.addf %88, %92 : vector<2x2048xf32>
    %cst_36 = arith.constant 0.000000e+00 : f32
    %94 = vector.broadcast %cst_36 : f32 to vector<2x2048xf32>
    %95 = arith.maximumf %93, %94 : vector<2x2048xf32>
    %c0_37 = arith.constant 0 : index
    %c0_38 = arith.constant 0 : index
    %c0_39 = arith.constant 0 : index
    %96 = vector.load %arg9[%c0_37, %c0_38, %c0_39] : memref<4x2048x32xbf16, #tpu.memory_space<vmem>>, vector<1x2048x32xbf16>
    %97 = vector.shape_cast %96 : vector<1x2048x32xbf16> to vector<2048x32xbf16>
    %98 = arith.truncf %95 : vector<2x2048xf32> to vector<2x2048xbf16>
    %cst_40 = arith.constant dense<0.000000e+00> : vector<2x32xf32>
    %99 = tpu.matmul %98, %97, %cst_40 {dimension_numbers = #tpu.dot_dimension_numbers<[1], [0], [0], [1], [0, 0, 1, 1], [], []>} : vector<2x2048xbf16>, vector<2048x32xbf16>, vector<2x32xf32> -> vector<2x32xf32>
    %c0_41 = arith.constant 0 : index
    %c0_42 = arith.constant 0 : index
    %100 = vector.load %arg10[%c0_41, %c0_42] : memref<4x32xf32, #tpu.memory_space<vmem>>, vector<1x32xf32>
    %101 = vector.shape_cast %100 : vector<1x32xf32> to vector<32xf32>
    %102 = vector.shape_cast %101 : vector<32xf32> to vector<1x32xf32>
    %103 = vector.broadcast %102 : vector<1x32xf32> to vector<2x32xf32>
    %104 = arith.addf %99, %103 : vector<2x32xf32>
    %105 = arith.addf %84, %104 : vector<2x32xf32>
    %c0_43 = arith.constant 0 : index
    %c0_44 = arith.constant 0 : index
    %106 = vector.load %arg13[%c0_43, %c0_44] : memref<4x32xf32, #tpu.memory_space<vmem>>, vector<1x32xf32>
    %107 = vector.shape_cast %106 : vector<1x32xf32> to vector<32xf32>
    %108 = vector.shape_cast %107 : vector<32xf32> to vector<1x32xf32>
    %c0_45 = arith.constant 0 : index
    %c0_46 = arith.constant 0 : index
    %109 = vector.load %arg14[%c0_45, %c0_46] : memref<4x32xf32, #tpu.memory_space<vmem>>, vector<1x32xf32>
    %110 = vector.shape_cast %109 : vector<1x32xf32> to vector<32xf32>
    %111 = vector.shape_cast %110 : vector<32xf32> to vector<1x32xf32>
    %cst_47 = arith.constant dense<0.000000e+00> : vector<2xf32>
    %112 = vector.multi_reduction <add>, %105, %cst_47 [1] : vector<2x32xf32> to vector<2xf32>
    %113 = vector.shape_cast %112 : vector<2xf32> to vector<2x1xf32>
    %cst_48 = arith.constant 3.200000e+01 : f32
    %114 = vector.broadcast %cst_48 : f32 to vector<2x1xf32>
    %115 = arith.divf %113, %114 : vector<2x1xf32>
    %116 = vector.broadcast %115 : vector<2x1xf32> to vector<2x32xf32>
    %117 = arith.subf %105, %116 : vector<2x32xf32>
    %118 = arith.mulf %117, %117 : vector<2x32xf32>
    %cst_49 = arith.constant dense<0.000000e+00> : vector<2xf32>
    %119 = vector.multi_reduction <add>, %118, %cst_49 [1] : vector<2x32xf32> to vector<2xf32>
    %120 = vector.shape_cast %119 : vector<2xf32> to vector<2x1xf32>
    %cst_50 = arith.constant 3.200000e+01 : f32
    %121 = vector.broadcast %cst_50 : f32 to vector<2x1xf32>
    %122 = arith.divf %120, %121 : vector<2x1xf32>
    %123 = vector.broadcast %115 : vector<2x1xf32> to vector<2x32xf32>
    %124 = arith.subf %105, %123 : vector<2x32xf32>
    %cst_51 = arith.constant 9.99999974E-6 : f32
    %125 = vector.broadcast %cst_51 : f32 to vector<2x1xf32>
    %126 = arith.addf %122, %125 : vector<2x1xf32>
    %127 = math.rsqrt %126 : vector<2x1xf32>
    %128 = vector.broadcast %127 : vector<2x1xf32> to vector<2x32xf32>
    %129 = arith.mulf %124, %128 : vector<2x32xf32>
    %130 = vector.broadcast %108 : vector<1x32xf32> to vector<2x32xf32>
    %131 = arith.mulf %129, %130 : vector<2x32xf32>
    %132 = vector.broadcast %111 : vector<1x32xf32> to vector<2x32xf32>
    %133 = arith.addf %131, %132 : vector<2x32xf32>
    %c1 = arith.constant 1 : index
    %c0_52 = arith.constant 0 : index
    %c0_53 = arith.constant 0 : index
    %134 = vector.load %arg3[%c1, %c0_52, %c0_53] : memref<4x32x96xbf16, #tpu.memory_space<vmem>>, vector<1x32x96xbf16>
    %135 = vector.shape_cast %134 : vector<1x32x96xbf16> to vector<32x96xbf16>
    %136 = arith.truncf %133 : vector<2x32xf32> to vector<2x32xbf16>
    %cst_54 = arith.constant dense<0.000000e+00> : vector<2x96xf32>
    %137 = tpu.matmul %136, %135, %cst_54 {dimension_numbers = #tpu.dot_dimension_numbers<[1], [0], [0], [1], [0, 0, 1, 1], [], []>} : vector<2x32xbf16>, vector<32x96xbf16>, vector<2x96xf32> -> vector<2x96xf32>
    %c1_55 = arith.constant 1 : index
    %c0_56 = arith.constant 0 : index
    %138 = vector.load %arg4[%c1_55, %c0_56] : memref<4x96xf32, #tpu.memory_space<vmem>>, vector<1x96xf32>
    %139 = vector.shape_cast %138 : vector<1x96xf32> to vector<96xf32>
    %140 = vector.shape_cast %139 : vector<96xf32> to vector<1x96xf32>
    %141 = vector.broadcast %140 : vector<1x96xf32> to vector<2x96xf32>
    %142 = arith.addf %137, %141 : vector<2x96xf32>
    %143 = vector.extract_strided_slice %142 {offsets = [0, 0], sizes = [2, 32], strides = [1, 1]} : vector<2x96xf32> to vector<2x32xf32>
    %cst_57 = arith.constant 5.000000e-01 : f32
    %144 = vector.broadcast %cst_57 : f32 to vector<2x32xf32>
    %145 = arith.mulf %143, %144 : vector<2x32xf32>
    %146 = vector.extract_strided_slice %142 {offsets = [0, 32], sizes = [2, 32], strides = [1, 1]} : vector<2x96xf32> to vector<2x32xf32>
    %147 = vector.extract_strided_slice %142 {offsets = [0, 64], sizes = [2, 32], strides = [1, 1]} : vector<2x96xf32> to vector<2x32xf32>
    %148 = vector.shape_cast %145 : vector<2x32xf32> to vector<2x1x32xf32>
    %149 = vector.shape_cast %146 : vector<2x32xf32> to vector<1x2x32xf32>
    %150 = vector.broadcast %148 : vector<2x1x32xf32> to vector<2x2x32xf32>
    %151 = vector.broadcast %149 : vector<1x2x32xf32> to vector<2x2x32xf32>
    %152 = arith.mulf %150, %151 : vector<2x2x32xf32>
    %153 = vector.extract_strided_slice %152 {offsets = [0, 0, 0], sizes = [2, 2, 8], strides = [1, 1, 1]} : vector<2x2x32xf32> to vector<2x2x8xf32>
    %154 = vector.extract_strided_slice %152 {offsets = [0, 0, 8], sizes = [2, 2, 8], strides = [1, 1, 1]} : vector<2x2x32xf32> to vector<2x2x8xf32>
    %155 = arith.addf %153, %154 : vector<2x2x8xf32>
    %156 = vector.extract_strided_slice %152 {offsets = [0, 0, 16], sizes = [2, 2, 8], strides = [1, 1, 1]} : vector<2x2x32xf32> to vector<2x2x8xf32>
    %157 = arith.addf %155, %156 : vector<2x2x8xf32>
    %158 = vector.extract_strided_slice %152 {offsets = [0, 0, 24], sizes = [2, 2, 8], strides = [1, 1, 1]} : vector<2x2x32xf32> to vector<2x2x8xf32>
    %159 = arith.addf %157, %158 : vector<2x2x8xf32>
    %cst_58 = arith.constant dense<0xFF800000> : vector<2x8xf32>
    %160 = vector.multi_reduction <maximumf>, %159, %cst_58 [1] : vector<2x2x8xf32> to vector<2x8xf32>
    %161 = vector.shape_cast %160 : vector<2x8xf32> to vector<2x1x8xf32>
    %162 = vector.broadcast %161 : vector<2x1x8xf32> to vector<2x2x8xf32>
    %163 = arith.subf %159, %162 : vector<2x2x8xf32>
    %164 = math.exp %163 : vector<2x2x8xf32>
    %cst_59 = arith.constant dense<0.000000e+00> : vector<2x8xf32>
    %165 = vector.multi_reduction <add>, %164, %cst_59 [1] : vector<2x2x8xf32> to vector<2x8xf32>
    %166 = vector.shape_cast %165 : vector<2x8xf32> to vector<2x1x8xf32>
    %167 = vector.broadcast %166 : vector<2x1x8xf32> to vector<2x2x8xf32>
    %168 = arith.divf %164, %167 : vector<2x2x8xf32>
    %169 = tpu.concatenate %168, %168, %168, %168 in 2 : vector<2x2x8xf32>, vector<2x2x8xf32>, vector<2x2x8xf32>, vector<2x2x8xf32> -> vector<2x2x32xf32>
    %170 = vector.shape_cast %147 : vector<2x32xf32> to vector<1x2x32xf32>
    %171 = vector.broadcast %170 : vector<1x2x32xf32> to vector<2x2x32xf32>
    %172 = arith.mulf %169, %171 : vector<2x2x32xf32>
    %cst_60 = arith.constant dense<0.000000e+00> : vector<2x32xf32>
    %173 = vector.multi_reduction <add>, %172, %cst_60 [1] : vector<2x2x32xf32> to vector<2x32xf32>
    %c1_61 = arith.constant 1 : index
    %c0_62 = arith.constant 0 : index
    %c0_63 = arith.constant 0 : index
    %174 = vector.load %arg5[%c1_61, %c0_62, %c0_63] : memref<4x32x32xbf16, #tpu.memory_space<vmem>>, vector<1x32x32xbf16>
    %175 = vector.shape_cast %174 : vector<1x32x32xbf16> to vector<32x32xbf16>
    %176 = arith.truncf %173 : vector<2x32xf32> to vector<2x32xbf16>
    %cst_64 = arith.constant dense<0.000000e+00> : vector<2x32xf32>
    %177 = tpu.matmul %176, %175, %cst_64 {dimension_numbers = #tpu.dot_dimension_numbers<[1], [0], [0], [1], [0, 0, 1, 1], [], []>} : vector<2x32xbf16>, vector<32x32xbf16>, vector<2x32xf32> -> vector<2x32xf32>
    %c1_65 = arith.constant 1 : index
    %c0_66 = arith.constant 0 : index
    %178 = vector.load %arg6[%c1_65, %c0_66] : memref<4x32xf32, #tpu.memory_space<vmem>>, vector<1x32xf32>
    %179 = vector.shape_cast %178 : vector<1x32xf32> to vector<32xf32>
    %180 = vector.shape_cast %179 : vector<32xf32> to vector<1x32xf32>
    %181 = vector.broadcast %180 : vector<1x32xf32> to vector<2x32xf32>
    %182 = arith.addf %177, %181 : vector<2x32xf32>
    %183 = arith.addf %133, %182 : vector<2x32xf32>
    %c1_67 = arith.constant 1 : index
    %c0_68 = arith.constant 0 : index
    %184 = vector.load %arg11[%c1_67, %c0_68] : memref<4x32xf32, #tpu.memory_space<vmem>>, vector<1x32xf32>
    %185 = vector.shape_cast %184 : vector<1x32xf32> to vector<32xf32>
    %186 = vector.shape_cast %185 : vector<32xf32> to vector<1x32xf32>
    %c1_69 = arith.constant 1 : index
    %c0_70 = arith.constant 0 : index
    %187 = vector.load %arg12[%c1_69, %c0_70] : memref<4x32xf32, #tpu.memory_space<vmem>>, vector<1x32xf32>
    %188 = vector.shape_cast %187 : vector<1x32xf32> to vector<32xf32>
    %189 = vector.shape_cast %188 : vector<32xf32> to vector<1x32xf32>
    %cst_71 = arith.constant dense<0.000000e+00> : vector<2xf32>
    %190 = vector.multi_reduction <add>, %183, %cst_71 [1] : vector<2x32xf32> to vector<2xf32>
    %191 = vector.shape_cast %190 : vector<2xf32> to vector<2x1xf32>
    %cst_72 = arith.constant 3.200000e+01 : f32
    %192 = vector.broadcast %cst_72 : f32 to vector<2x1xf32>
    %193 = arith.divf %191, %192 : vector<2x1xf32>
    %194 = vector.broadcast %193 : vector<2x1xf32> to vector<2x32xf32>
    %195 = arith.subf %183, %194 : vector<2x32xf32>
    %196 = arith.mulf %195, %195 : vector<2x32xf32>
    %cst_73 = arith.constant dense<0.000000e+00> : vector<2xf32>
    %197 = vector.multi_reduction <add>, %196, %cst_73 [1] : vector<2x32xf32> to vector<2xf32>
    %198 = vector.shape_cast %197 : vector<2xf32> to vector<2x1xf32>
    %cst_74 = arith.constant 3.200000e+01 : f32
    %199 = vector.broadcast %cst_74 : f32 to vector<2x1xf32>
    %200 = arith.divf %198, %199 : vector<2x1xf32>
    %201 = vector.broadcast %193 : vector<2x1xf32> to vector<2x32xf32>
    %202 = arith.subf %183, %201 : vector<2x32xf32>
    %cst_75 = arith.constant 9.99999974E-6 : f32
    %203 = vector.broadcast %cst_75 : f32 to vector<2x1xf32>
    %204 = arith.addf %200, %203 : vector<2x1xf32>
    %205 = math.rsqrt %204 : vector<2x1xf32>
    %206 = vector.broadcast %205 : vector<2x1xf32> to vector<2x32xf32>
    %207 = arith.mulf %202, %206 : vector<2x32xf32>
    %208 = vector.broadcast %186 : vector<1x32xf32> to vector<2x32xf32>
    %209 = arith.mulf %207, %208 : vector<2x32xf32>
    %210 = vector.broadcast %189 : vector<1x32xf32> to vector<2x32xf32>
    %211 = arith.addf %209, %210 : vector<2x32xf32>
    %c1_76 = arith.constant 1 : index
    %c0_77 = arith.constant 0 : index
    %c0_78 = arith.constant 0 : index
    %212 = vector.load %arg7[%c1_76, %c0_77, %c0_78] : memref<4x32x2048xbf16, #tpu.memory_space<vmem>>, vector<1x32x2048xbf16>
    %213 = vector.shape_cast %212 : vector<1x32x2048xbf16> to vector<32x2048xbf16>
    %214 = arith.truncf %211 : vector<2x32xf32> to vector<2x32xbf16>
    %cst_79 = arith.constant dense<0.000000e+00> : vector<2x2048xf32>
    %215 = tpu.matmul %214, %213, %cst_79 {dimension_numbers = #tpu.dot_dimension_numbers<[1], [0], [0], [1], [0, 0, 1, 1], [], []>} : vector<2x32xbf16>, vector<32x2048xbf16>, vector<2x2048xf32> -> vector<2x2048xf32>
    %c1_80 = arith.constant 1 : index
    %c0_81 = arith.constant 0 : index
    %216 = vector.load %arg8[%c1_80, %c0_81] : memref<4x2048xf32, #tpu.memory_space<vmem>>, vector<1x2048xf32>
    %217 = vector.shape_cast %216 : vector<1x2048xf32> to vector<2048xf32>
    %218 = vector.shape_cast %217 : vector<2048xf32> to vector<1x2048xf32>
    %219 = vector.broadcast %218 : vector<1x2048xf32> to vector<2x2048xf32>
    %220 = arith.addf %215, %219 : vector<2x2048xf32>
    %cst_82 = arith.constant 0.000000e+00 : f32
    %221 = vector.broadcast %cst_82 : f32 to vector<2x2048xf32>
    %222 = arith.maximumf %220, %221 : vector<2x2048xf32>
    %c1_83 = arith.constant 1 : index
    %c0_84 = arith.constant 0 : index
    %c0_85 = arith.constant 0 : index
    %223 = vector.load %arg9[%c1_83, %c0_84, %c0_85] : memref<4x2048x32xbf16, #tpu.memory_space<vmem>>, vector<1x2048x32xbf16>
    %224 = vector.shape_cast %223 : vector<1x2048x32xbf16> to vector<2048x32xbf16>
    %225 = arith.truncf %222 : vector<2x2048xf32> to vector<2x2048xbf16>
    %cst_86 = arith.constant dense<0.000000e+00> : vector<2x32xf32>
    %226 = tpu.matmul %225, %224, %cst_86 {dimension_numbers = #tpu.dot_dimension_numbers<[1], [0], [0], [1], [0, 0, 1, 1], [], []>} : vector<2x2048xbf16>, vector<2048x32xbf16>, vector<2x32xf32> -> vector<2x32xf32>
    %c1_87 = arith.constant 1 : index
    %c0_88 = arith.constant 0 : index
    %227 = vector.load %arg10[%c1_87, %c0_88] : memref<4x32xf32, #tpu.memory_space<vmem>>, vector<1x32xf32>
    %228 = vector.shape_cast %227 : vector<1x32xf32> to vector<32xf32>
    %229 = vector.shape_cast %228 : vector<32xf32> to vector<1x32xf32>
    %230 = vector.broadcast %229 : vector<1x32xf32> to vector<2x32xf32>
    %231 = arith.addf %226, %230 : vector<2x32xf32>
    %232 = arith.addf %211, %231 : vector<2x32xf32>
    %c1_89 = arith.constant 1 : index
    %c0_90 = arith.constant 0 : index
    %233 = vector.load %arg13[%c1_89, %c0_90] : memref<4x32xf32, #tpu.memory_space<vmem>>, vector<1x32xf32>
    %234 = vector.shape_cast %233 : vector<1x32xf32> to vector<32xf32>
    %235 = vector.shape_cast %234 : vector<32xf32> to vector<1x32xf32>
    %c1_91 = arith.constant 1 : index
    %c0_92 = arith.constant 0 : index
    %236 = vector.load %arg14[%c1_91, %c0_92] : memref<4x32xf32, #tpu.memory_space<vmem>>, vector<1x32xf32>
    %237 = vector.shape_cast %236 : vector<1x32xf32> to vector<32xf32>
    %238 = vector.shape_cast %237 : vector<32xf32> to vector<1x32xf32>
    %cst_93 = arith.constant dense<0.000000e+00> : vector<2xf32>
    %239 = vector.multi_reduction <add>, %232, %cst_93 [1] : vector<2x32xf32> to vector<2xf32>
    %240 = vector.shape_cast %239 : vector<2xf32> to vector<2x1xf32>
    %cst_94 = arith.constant 3.200000e+01 : f32
    %241 = vector.broadcast %cst_94 : f32 to vector<2x1xf32>
    %242 = arith.divf %240, %241 : vector<2x1xf32>
    %243 = vector.broadcast %242 : vector<2x1xf32> to vector<2x32xf32>
    %244 = arith.subf %232, %243 : vector<2x32xf32>
    %245 = arith.mulf %244, %244 : vector<2x32xf32>
    %cst_95 = arith.constant dense<0.000000e+00> : vector<2xf32>
    %246 = vector.multi_reduction <add>, %245, %cst_95 [1] : vector<2x32xf32> to vector<2xf32>
    %247 = vector.shape_cast %246 : vector<2xf32> to vector<2x1xf32>
    %cst_96 = arith.constant 3.200000e+01 : f32
    %248 = vector.broadcast %cst_96 : f32 to vector<2x1xf32>
    %249 = arith.divf %247, %248 : vector<2x1xf32>
    %250 = vector.broadcast %242 : vector<2x1xf32> to vector<2x32xf32>
    %251 = arith.subf %232, %250 : vector<2x32xf32>
    %cst_97 = arith.constant 9.99999974E-6 : f32
    %252 = vector.broadcast %cst_97 : f32 to vector<2x1xf32>
    %253 = arith.addf %249, %252 : vector<2x1xf32>
    %254 = math.rsqrt %253 : vector<2x1xf32>
    %255 = vector.broadcast %254 : vector<2x1xf32> to vector<2x32xf32>
    %256 = arith.mulf %251, %255 : vector<2x32xf32>
    %257 = vector.broadcast %235 : vector<1x32xf32> to vector<2x32xf32>
    %258 = arith.mulf %256, %257 : vector<2x32xf32>
    %259 = vector.broadcast %238 : vector<1x32xf32> to vector<2x32xf32>
    %260 = arith.addf %258, %259 : vector<2x32xf32>
    %c2 = arith.constant 2 : index
    %c0_98 = arith.constant 0 : index
    %c0_99 = arith.constant 0 : index
    %261 = vector.load %arg3[%c2, %c0_98, %c0_99] : memref<4x32x96xbf16, #tpu.memory_space<vmem>>, vector<1x32x96xbf16>
    %262 = vector.shape_cast %261 : vector<1x32x96xbf16> to vector<32x96xbf16>
    %263 = arith.truncf %260 : vector<2x32xf32> to vector<2x32xbf16>
    %cst_100 = arith.constant dense<0.000000e+00> : vector<2x96xf32>
    %264 = tpu.matmul %263, %262, %cst_100 {dimension_numbers = #tpu.dot_dimension_numbers<[1], [0], [0], [1], [0, 0, 1, 1], [], []>} : vector<2x32xbf16>, vector<32x96xbf16>, vector<2x96xf32> -> vector<2x96xf32>
    %c2_101 = arith.constant 2 : index
    %c0_102 = arith.constant 0 : index
    %265 = vector.load %arg4[%c2_101, %c0_102] : memref<4x96xf32, #tpu.memory_space<vmem>>, vector<1x96xf32>
    %266 = vector.shape_cast %265 : vector<1x96xf32> to vector<96xf32>
    %267 = vector.shape_cast %266 : vector<96xf32> to vector<1x96xf32>
    %268 = vector.broadcast %267 : vector<1x96xf32> to vector<2x96xf32>
    %269 = arith.addf %264, %268 : vector<2x96xf32>
    %270 = vector.extract_strided_slice %269 {offsets = [0, 0], sizes = [2, 32], strides = [1, 1]} : vector<2x96xf32> to vector<2x32xf32>
    %cst_103 = arith.constant 5.000000e-01 : f32
    %271 = vector.broadcast %cst_103 : f32 to vector<2x32xf32>
    %272 = arith.mulf %270, %271 : vector<2x32xf32>
    %273 = vector.extract_strided_slice %269 {offsets = [0, 32], sizes = [2, 32], strides = [1, 1]} : vector<2x96xf32> to vector<2x32xf32>
    %274 = vector.extract_strided_slice %269 {offsets = [0, 64], sizes = [2, 32], strides = [1, 1]} : vector<2x96xf32> to vector<2x32xf32>
    %275 = vector.shape_cast %272 : vector<2x32xf32> to vector<2x1x32xf32>
    %276 = vector.shape_cast %273 : vector<2x32xf32> to vector<1x2x32xf32>
    %277 = vector.broadcast %275 : vector<2x1x32xf32> to vector<2x2x32xf32>
    %278 = vector.broadcast %276 : vector<1x2x32xf32> to vector<2x2x32xf32>
    %279 = arith.mulf %277, %278 : vector<2x2x32xf32>
    %280 = vector.extract_strided_slice %279 {offsets = [0, 0, 0], sizes = [2, 2, 8], strides = [1, 1, 1]} : vector<2x2x32xf32> to vector<2x2x8xf32>
    %281 = vector.extract_strided_slice %279 {offsets = [0, 0, 8], sizes = [2, 2, 8], strides = [1, 1, 1]} : vector<2x2x32xf32> to vector<2x2x8xf32>
    %282 = arith.addf %280, %281 : vector<2x2x8xf32>
    %283 = vector.extract_strided_slice %279 {offsets = [0, 0, 16], sizes = [2, 2, 8], strides = [1, 1, 1]} : vector<2x2x32xf32> to vector<2x2x8xf32>
    %284 = arith.addf %282, %283 : vector<2x2x8xf32>
    %285 = vector.extract_strided_slice %279 {offsets = [0, 0, 24], sizes = [2, 2, 8], strides = [1, 1, 1]} : vector<2x2x32xf32> to vector<2x2x8xf32>
    %286 = arith.addf %284, %285 : vector<2x2x8xf32>
    %cst_104 = arith.constant dense<0xFF800000> : vector<2x8xf32>
    %287 = vector.multi_reduction <maximumf>, %286, %cst_104 [1] : vector<2x2x8xf32> to vector<2x8xf32>
    %288 = vector.shape_cast %287 : vector<2x8xf32> to vector<2x1x8xf32>
    %289 = vector.broadcast %288 : vector<2x1x8xf32> to vector<2x2x8xf32>
    %290 = arith.subf %286, %289 : vector<2x2x8xf32>
    %291 = math.exp %290 : vector<2x2x8xf32>
    %cst_105 = arith.constant dense<0.000000e+00> : vector<2x8xf32>
    %292 = vector.multi_reduction <add>, %291, %cst_105 [1] : vector<2x2x8xf32> to vector<2x8xf32>
    %293 = vector.shape_cast %292 : vector<2x8xf32> to vector<2x1x8xf32>
    %294 = vector.broadcast %293 : vector<2x1x8xf32> to vector<2x2x8xf32>
    %295 = arith.divf %291, %294 : vector<2x2x8xf32>
    %296 = tpu.concatenate %295, %295, %295, %295 in 2 : vector<2x2x8xf32>, vector<2x2x8xf32>, vector<2x2x8xf32>, vector<2x2x8xf32> -> vector<2x2x32xf32>
    %297 = vector.shape_cast %274 : vector<2x32xf32> to vector<1x2x32xf32>
    %298 = vector.broadcast %297 : vector<1x2x32xf32> to vector<2x2x32xf32>
    %299 = arith.mulf %296, %298 : vector<2x2x32xf32>
    %cst_106 = arith.constant dense<0.000000e+00> : vector<2x32xf32>
    %300 = vector.multi_reduction <add>, %299, %cst_106 [1] : vector<2x2x32xf32> to vector<2x32xf32>
    %c2_107 = arith.constant 2 : index
    %c0_108 = arith.constant 0 : index
    %c0_109 = arith.constant 0 : index
    %301 = vector.load %arg5[%c2_107, %c0_108, %c0_109] : memref<4x32x32xbf16, #tpu.memory_space<vmem>>, vector<1x32x32xbf16>
    %302 = vector.shape_cast %301 : vector<1x32x32xbf16> to vector<32x32xbf16>
    %303 = arith.truncf %300 : vector<2x32xf32> to vector<2x32xbf16>
    %cst_110 = arith.constant dense<0.000000e+00> : vector<2x32xf32>
    %304 = tpu.matmul %303, %302, %cst_110 {dimension_numbers = #tpu.dot_dimension_numbers<[1], [0], [0], [1], [0, 0, 1, 1], [], []>} : vector<2x32xbf16>, vector<32x32xbf16>, vector<2x32xf32> -> vector<2x32xf32>
    %c2_111 = arith.constant 2 : index
    %c0_112 = arith.constant 0 : index
    %305 = vector.load %arg6[%c2_111, %c0_112] : memref<4x32xf32, #tpu.memory_space<vmem>>, vector<1x32xf32>
    %306 = vector.shape_cast %305 : vector<1x32xf32> to vector<32xf32>
    %307 = vector.shape_cast %306 : vector<32xf32> to vector<1x32xf32>
    %308 = vector.broadcast %307 : vector<1x32xf32> to vector<2x32xf32>
    %309 = arith.addf %304, %308 : vector<2x32xf32>
    %310 = arith.addf %260, %309 : vector<2x32xf32>
    %c2_113 = arith.constant 2 : index
    %c0_114 = arith.constant 0 : index
    %311 = vector.load %arg11[%c2_113, %c0_114] : memref<4x32xf32, #tpu.memory_space<vmem>>, vector<1x32xf32>
    %312 = vector.shape_cast %311 : vector<1x32xf32> to vector<32xf32>
    %313 = vector.shape_cast %312 : vector<32xf32> to vector<1x32xf32>
    %c2_115 = arith.constant 2 : index
    %c0_116 = arith.constant 0 : index
    %314 = vector.load %arg12[%c2_115, %c0_116] : memref<4x32xf32, #tpu.memory_space<vmem>>, vector<1x32xf32>
    %315 = vector.shape_cast %314 : vector<1x32xf32> to vector<32xf32>
    %316 = vector.shape_cast %315 : vector<32xf32> to vector<1x32xf32>
    %cst_117 = arith.constant dense<0.000000e+00> : vector<2xf32>
    %317 = vector.multi_reduction <add>, %310, %cst_117 [1] : vector<2x32xf32> to vector<2xf32>
    %318 = vector.shape_cast %317 : vector<2xf32> to vector<2x1xf32>
    %cst_118 = arith.constant 3.200000e+01 : f32
    %319 = vector.broadcast %cst_118 : f32 to vector<2x1xf32>
    %320 = arith.divf %318, %319 : vector<2x1xf32>
    %321 = vector.broadcast %320 : vector<2x1xf32> to vector<2x32xf32>
    %322 = arith.subf %310, %321 : vector<2x32xf32>
    %323 = arith.mulf %322, %322 : vector<2x32xf32>
    %cst_119 = arith.constant dense<0.000000e+00> : vector<2xf32>
    %324 = vector.multi_reduction <add>, %323, %cst_119 [1] : vector<2x32xf32> to vector<2xf32>
    %325 = vector.shape_cast %324 : vector<2xf32> to vector<2x1xf32>
    %cst_120 = arith.constant 3.200000e+01 : f32
    %326 = vector.broadcast %cst_120 : f32 to vector<2x1xf32>
    %327 = arith.divf %325, %326 : vector<2x1xf32>
    %328 = vector.broadcast %320 : vector<2x1xf32> to vector<2x32xf32>
    %329 = arith.subf %310, %328 : vector<2x32xf32>
    %cst_121 = arith.constant 9.99999974E-6 : f32
    %330 = vector.broadcast %cst_121 : f32 to vector<2x1xf32>
    %331 = arith.addf %327, %330 : vector<2x1xf32>
    %332 = math.rsqrt %331 : vector<2x1xf32>
    %333 = vector.broadcast %332 : vector<2x1xf32> to vector<2x32xf32>
    %334 = arith.mulf %329, %333 : vector<2x32xf32>
    %335 = vector.broadcast %313 : vector<1x32xf32> to vector<2x32xf32>
    %336 = arith.mulf %334, %335 : vector<2x32xf32>
    %337 = vector.broadcast %316 : vector<1x32xf32> to vector<2x32xf32>
    %338 = arith.addf %336, %337 : vector<2x32xf32>
    %c2_122 = arith.constant 2 : index
    %c0_123 = arith.constant 0 : index
    %c0_124 = arith.constant 0 : index
    %339 = vector.load %arg7[%c2_122, %c0_123, %c0_124] : memref<4x32x2048xbf16, #tpu.memory_space<vmem>>, vector<1x32x2048xbf16>
    %340 = vector.shape_cast %339 : vector<1x32x2048xbf16> to vector<32x2048xbf16>
    %341 = arith.truncf %338 : vector<2x32xf32> to vector<2x32xbf16>
    %cst_125 = arith.constant dense<0.000000e+00> : vector<2x2048xf32>
    %342 = tpu.matmul %341, %340, %cst_125 {dimension_numbers = #tpu.dot_dimension_numbers<[1], [0], [0], [1], [0, 0, 1, 1], [], []>} : vector<2x32xbf16>, vector<32x2048xbf16>, vector<2x2048xf32> -> vector<2x2048xf32>
    %c2_126 = arith.constant 2 : index
    %c0_127 = arith.constant 0 : index
    %343 = vector.load %arg8[%c2_126, %c0_127] : memref<4x2048xf32, #tpu.memory_space<vmem>>, vector<1x2048xf32>
    %344 = vector.shape_cast %343 : vector<1x2048xf32> to vector<2048xf32>
    %345 = vector.shape_cast %344 : vector<2048xf32> to vector<1x2048xf32>
    %346 = vector.broadcast %345 : vector<1x2048xf32> to vector<2x2048xf32>
    %347 = arith.addf %342, %346 : vector<2x2048xf32>
    %cst_128 = arith.constant 0.000000e+00 : f32
    %348 = vector.broadcast %cst_128 : f32 to vector<2x2048xf32>
    %349 = arith.maximumf %347, %348 : vector<2x2048xf32>
    %c2_129 = arith.constant 2 : index
    %c0_130 = arith.constant 0 : index
    %c0_131 = arith.constant 0 : index
    %350 = vector.load %arg9[%c2_129, %c0_130, %c0_131] : memref<4x2048x32xbf16, #tpu.memory_space<vmem>>, vector<1x2048x32xbf16>
    %351 = vector.shape_cast %350 : vector<1x2048x32xbf16> to vector<2048x32xbf16>
    %352 = arith.truncf %349 : vector<2x2048xf32> to vector<2x2048xbf16>
    %cst_132 = arith.constant dense<0.000000e+00> : vector<2x32xf32>
    %353 = tpu.matmul %352, %351, %cst_132 {dimension_numbers = #tpu.dot_dimension_numbers<[1], [0], [0], [1], [0, 0, 1, 1], [], []>} : vector<2x2048xbf16>, vector<2048x32xbf16>, vector<2x32xf32> -> vector<2x32xf32>
    %c2_133 = arith.constant 2 : index
    %c0_134 = arith.constant 0 : index
    %354 = vector.load %arg10[%c2_133, %c0_134] : memref<4x32xf32, #tpu.memory_space<vmem>>, vector<1x32xf32>
    %355 = vector.shape_cast %354 : vector<1x32xf32> to vector<32xf32>
    %356 = vector.shape_cast %355 : vector<32xf32> to vector<1x32xf32>
    %357 = vector.broadcast %356 : vector<1x32xf32> to vector<2x32xf32>
    %358 = arith.addf %353, %357 : vector<2x32xf32>
    %359 = arith.addf %338, %358 : vector<2x32xf32>
    %c2_135 = arith.constant 2 : index
    %c0_136 = arith.constant 0 : index
    %360 = vector.load %arg13[%c2_135, %c0_136] : memref<4x32xf32, #tpu.memory_space<vmem>>, vector<1x32xf32>
    %361 = vector.shape_cast %360 : vector<1x32xf32> to vector<32xf32>
    %362 = vector.shape_cast %361 : vector<32xf32> to vector<1x32xf32>
    %c2_137 = arith.constant 2 : index
    %c0_138 = arith.constant 0 : index
    %363 = vector.load %arg14[%c2_137, %c0_138] : memref<4x32xf32, #tpu.memory_space<vmem>>, vector<1x32xf32>
    %364 = vector.shape_cast %363 : vector<1x32xf32> to vector<32xf32>
    %365 = vector.shape_cast %364 : vector<32xf32> to vector<1x32xf32>
    %cst_139 = arith.constant dense<0.000000e+00> : vector<2xf32>
    %366 = vector.multi_reduction <add>, %359, %cst_139 [1] : vector<2x32xf32> to vector<2xf32>
    %367 = vector.shape_cast %366 : vector<2xf32> to vector<2x1xf32>
    %cst_140 = arith.constant 3.200000e+01 : f32
    %368 = vector.broadcast %cst_140 : f32 to vector<2x1xf32>
    %369 = arith.divf %367, %368 : vector<2x1xf32>
    %370 = vector.broadcast %369 : vector<2x1xf32> to vector<2x32xf32>
    %371 = arith.subf %359, %370 : vector<2x32xf32>
    %372 = arith.mulf %371, %371 : vector<2x32xf32>
    %cst_141 = arith.constant dense<0.000000e+00> : vector<2xf32>
    %373 = vector.multi_reduction <add>, %372, %cst_141 [1] : vector<2x32xf32> to vector<2xf32>
    %374 = vector.shape_cast %373 : vector<2xf32> to vector<2x1xf32>
    %cst_142 = arith.constant 3.200000e+01 : f32
    %375 = vector.broadcast %cst_142 : f32 to vector<2x1xf32>
    %376 = arith.divf %374, %375 : vector<2x1xf32>
    %377 = vector.broadcast %369 : vector<2x1xf32> to vector<2x32xf32>
    %378 = arith.subf %359, %377 : vector<2x32xf32>
    %cst_143 = arith.constant 9.99999974E-6 : f32
    %379 = vector.broadcast %cst_143 : f32 to vector<2x1xf32>
    %380 = arith.addf %376, %379 : vector<2x1xf32>
    %381 = math.rsqrt %380 : vector<2x1xf32>
    %382 = vector.broadcast %381 : vector<2x1xf32> to vector<2x32xf32>
    %383 = arith.mulf %378, %382 : vector<2x32xf32>
    %384 = vector.broadcast %362 : vector<1x32xf32> to vector<2x32xf32>
    %385 = arith.mulf %383, %384 : vector<2x32xf32>
    %386 = vector.broadcast %365 : vector<1x32xf32> to vector<2x32xf32>
    %387 = arith.addf %385, %386 : vector<2x32xf32>
    %c3 = arith.constant 3 : index
    %c0_144 = arith.constant 0 : index
    %c0_145 = arith.constant 0 : index
    %388 = vector.load %arg3[%c3, %c0_144, %c0_145] : memref<4x32x96xbf16, #tpu.memory_space<vmem>>, vector<1x32x96xbf16>
    %389 = vector.shape_cast %388 : vector<1x32x96xbf16> to vector<32x96xbf16>
    %390 = arith.truncf %387 : vector<2x32xf32> to vector<2x32xbf16>
    %cst_146 = arith.constant dense<0.000000e+00> : vector<2x96xf32>
    %391 = tpu.matmul %390, %389, %cst_146 {dimension_numbers = #tpu.dot_dimension_numbers<[1], [0], [0], [1], [0, 0, 1, 1], [], []>} : vector<2x32xbf16>, vector<32x96xbf16>, vector<2x96xf32> -> vector<2x96xf32>
    %c3_147 = arith.constant 3 : index
    %c0_148 = arith.constant 0 : index
    %392 = vector.load %arg4[%c3_147, %c0_148] : memref<4x96xf32, #tpu.memory_space<vmem>>, vector<1x96xf32>
    %393 = vector.shape_cast %392 : vector<1x96xf32> to vector<96xf32>
    %394 = vector.shape_cast %393 : vector<96xf32> to vector<1x96xf32>
    %395 = vector.broadcast %394 : vector<1x96xf32> to vector<2x96xf32>
    %396 = arith.addf %391, %395 : vector<2x96xf32>
    %397 = vector.extract_strided_slice %396 {offsets = [0, 0], sizes = [2, 32], strides = [1, 1]} : vector<2x96xf32> to vector<2x32xf32>
    %cst_149 = arith.constant 5.000000e-01 : f32
    %398 = vector.broadcast %cst_149 : f32 to vector<2x32xf32>
    %399 = arith.mulf %397, %398 : vector<2x32xf32>
    %400 = vector.extract_strided_slice %396 {offsets = [0, 32], sizes = [2, 32], strides = [1, 1]} : vector<2x96xf32> to vector<2x32xf32>
    %401 = vector.extract_strided_slice %396 {offsets = [0, 64], sizes = [2, 32], strides = [1, 1]} : vector<2x96xf32> to vector<2x32xf32>
    %402 = vector.shape_cast %399 : vector<2x32xf32> to vector<2x1x32xf32>
    %403 = vector.shape_cast %400 : vector<2x32xf32> to vector<1x2x32xf32>
    %404 = vector.broadcast %402 : vector<2x1x32xf32> to vector<2x2x32xf32>
    %405 = vector.broadcast %403 : vector<1x2x32xf32> to vector<2x2x32xf32>
    %406 = arith.mulf %404, %405 : vector<2x2x32xf32>
    %407 = vector.extract_strided_slice %406 {offsets = [0, 0, 0], sizes = [2, 2, 8], strides = [1, 1, 1]} : vector<2x2x32xf32> to vector<2x2x8xf32>
    %408 = vector.extract_strided_slice %406 {offsets = [0, 0, 8], sizes = [2, 2, 8], strides = [1, 1, 1]} : vector<2x2x32xf32> to vector<2x2x8xf32>
    %409 = arith.addf %407, %408 : vector<2x2x8xf32>
    %410 = vector.extract_strided_slice %406 {offsets = [0, 0, 16], sizes = [2, 2, 8], strides = [1, 1, 1]} : vector<2x2x32xf32> to vector<2x2x8xf32>
    %411 = arith.addf %409, %410 : vector<2x2x8xf32>
    %412 = vector.extract_strided_slice %406 {offsets = [0, 0, 24], sizes = [2, 2, 8], strides = [1, 1, 1]} : vector<2x2x32xf32> to vector<2x2x8xf32>
    %413 = arith.addf %411, %412 : vector<2x2x8xf32>
    %cst_150 = arith.constant dense<0xFF800000> : vector<2x8xf32>
    %414 = vector.multi_reduction <maximumf>, %413, %cst_150 [1] : vector<2x2x8xf32> to vector<2x8xf32>
    %415 = vector.shape_cast %414 : vector<2x8xf32> to vector<2x1x8xf32>
    %416 = vector.broadcast %415 : vector<2x1x8xf32> to vector<2x2x8xf32>
    %417 = arith.subf %413, %416 : vector<2x2x8xf32>
    %418 = math.exp %417 : vector<2x2x8xf32>
    %cst_151 = arith.constant dense<0.000000e+00> : vector<2x8xf32>
    %419 = vector.multi_reduction <add>, %418, %cst_151 [1] : vector<2x2x8xf32> to vector<2x8xf32>
    %420 = vector.shape_cast %419 : vector<2x8xf32> to vector<2x1x8xf32>
    %421 = vector.broadcast %420 : vector<2x1x8xf32> to vector<2x2x8xf32>
    %422 = arith.divf %418, %421 : vector<2x2x8xf32>
    %423 = tpu.concatenate %422, %422, %422, %422 in 2 : vector<2x2x8xf32>, vector<2x2x8xf32>, vector<2x2x8xf32>, vector<2x2x8xf32> -> vector<2x2x32xf32>
    %424 = vector.shape_cast %401 : vector<2x32xf32> to vector<1x2x32xf32>
    %425 = vector.broadcast %424 : vector<1x2x32xf32> to vector<2x2x32xf32>
    %426 = arith.mulf %423, %425 : vector<2x2x32xf32>
    %cst_152 = arith.constant dense<0.000000e+00> : vector<2x32xf32>
    %427 = vector.multi_reduction <add>, %426, %cst_152 [1] : vector<2x2x32xf32> to vector<2x32xf32>
    %c3_153 = arith.constant 3 : index
    %c0_154 = arith.constant 0 : index
    %c0_155 = arith.constant 0 : index
    %428 = vector.load %arg5[%c3_153, %c0_154, %c0_155] : memref<4x32x32xbf16, #tpu.memory_space<vmem>>, vector<1x32x32xbf16>
    %429 = vector.shape_cast %428 : vector<1x32x32xbf16> to vector<32x32xbf16>
    %430 = arith.truncf %427 : vector<2x32xf32> to vector<2x32xbf16>
    %cst_156 = arith.constant dense<0.000000e+00> : vector<2x32xf32>
    %431 = tpu.matmul %430, %429, %cst_156 {dimension_numbers = #tpu.dot_dimension_numbers<[1], [0], [0], [1], [0, 0, 1, 1], [], []>} : vector<2x32xbf16>, vector<32x32xbf16>, vector<2x32xf32> -> vector<2x32xf32>
    %c3_157 = arith.constant 3 : index
    %c0_158 = arith.constant 0 : index
    %432 = vector.load %arg6[%c3_157, %c0_158] : memref<4x32xf32, #tpu.memory_space<vmem>>, vector<1x32xf32>
    %433 = vector.shape_cast %432 : vector<1x32xf32> to vector<32xf32>
    %434 = vector.shape_cast %433 : vector<32xf32> to vector<1x32xf32>
    %435 = vector.broadcast %434 : vector<1x32xf32> to vector<2x32xf32>
    %436 = arith.addf %431, %435 : vector<2x32xf32>
    %437 = arith.addf %387, %436 : vector<2x32xf32>
    %c3_159 = arith.constant 3 : index
    %c0_160 = arith.constant 0 : index
    %438 = vector.load %arg11[%c3_159, %c0_160] : memref<4x32xf32, #tpu.memory_space<vmem>>, vector<1x32xf32>
    %439 = vector.shape_cast %438 : vector<1x32xf32> to vector<32xf32>
    %440 = vector.shape_cast %439 : vector<32xf32> to vector<1x32xf32>
    %c3_161 = arith.constant 3 : index
    %c0_162 = arith.constant 0 : index
    %441 = vector.load %arg12[%c3_161, %c0_162] : memref<4x32xf32, #tpu.memory_space<vmem>>, vector<1x32xf32>
    %442 = vector.shape_cast %441 : vector<1x32xf32> to vector<32xf32>
    %443 = vector.shape_cast %442 : vector<32xf32> to vector<1x32xf32>
    %cst_163 = arith.constant dense<0.000000e+00> : vector<2xf32>
    %444 = vector.multi_reduction <add>, %437, %cst_163 [1] : vector<2x32xf32> to vector<2xf32>
    %445 = vector.shape_cast %444 : vector<2xf32> to vector<2x1xf32>
    %cst_164 = arith.constant 3.200000e+01 : f32
    %446 = vector.broadcast %cst_164 : f32 to vector<2x1xf32>
    %447 = arith.divf %445, %446 : vector<2x1xf32>
    %448 = vector.broadcast %447 : vector<2x1xf32> to vector<2x32xf32>
    %449 = arith.subf %437, %448 : vector<2x32xf32>
    %450 = arith.mulf %449, %449 : vector<2x32xf32>
    %cst_165 = arith.constant dense<0.000000e+00> : vector<2xf32>
    %451 = vector.multi_reduction <add>, %450, %cst_165 [1] : vector<2x32xf32> to vector<2xf32>
    %452 = vector.shape_cast %451 : vector<2xf32> to vector<2x1xf32>
    %cst_166 = arith.constant 3.200000e+01 : f32
    %453 = vector.broadcast %cst_166 : f32 to vector<2x1xf32>
    %454 = arith.divf %452, %453 : vector<2x1xf32>
    %455 = vector.broadcast %447 : vector<2x1xf32> to vector<2x32xf32>
    %456 = arith.subf %437, %455 : vector<2x32xf32>
    %cst_167 = arith.constant 9.99999974E-6 : f32
    %457 = vector.broadcast %cst_167 : f32 to vector<2x1xf32>
    %458 = arith.addf %454, %457 : vector<2x1xf32>
    %459 = math.rsqrt %458 : vector<2x1xf32>
    %460 = vector.broadcast %459 : vector<2x1xf32> to vector<2x32xf32>
    %461 = arith.mulf %456, %460 : vector<2x32xf32>
    %462 = vector.broadcast %440 : vector<1x32xf32> to vector<2x32xf32>
    %463 = arith.mulf %461, %462 : vector<2x32xf32>
    %464 = vector.broadcast %443 : vector<1x32xf32> to vector<2x32xf32>
    %465 = arith.addf %463, %464 : vector<2x32xf32>
    %c3_168 = arith.constant 3 : index
    %c0_169 = arith.constant 0 : index
    %c0_170 = arith.constant 0 : index
    %466 = vector.load %arg7[%c3_168, %c0_169, %c0_170] : memref<4x32x2048xbf16, #tpu.memory_space<vmem>>, vector<1x32x2048xbf16>
    %467 = vector.shape_cast %466 : vector<1x32x2048xbf16> to vector<32x2048xbf16>
    %468 = arith.truncf %465 : vector<2x32xf32> to vector<2x32xbf16>
    %cst_171 = arith.constant dense<0.000000e+00> : vector<2x2048xf32>
    %469 = tpu.matmul %468, %467, %cst_171 {dimension_numbers = #tpu.dot_dimension_numbers<[1], [0], [0], [1], [0, 0, 1, 1], [], []>} : vector<2x32xbf16>, vector<32x2048xbf16>, vector<2x2048xf32> -> vector<2x2048xf32>
    %c3_172 = arith.constant 3 : index
    %c0_173 = arith.constant 0 : index
    %470 = vector.load %arg8[%c3_172, %c0_173] : memref<4x2048xf32, #tpu.memory_space<vmem>>, vector<1x2048xf32>
    %471 = vector.shape_cast %470 : vector<1x2048xf32> to vector<2048xf32>
    %472 = vector.shape_cast %471 : vector<2048xf32> to vector<1x2048xf32>
    %473 = vector.broadcast %472 : vector<1x2048xf32> to vector<2x2048xf32>
    %474 = arith.addf %469, %473 : vector<2x2048xf32>
    %cst_174 = arith.constant 0.000000e+00 : f32
    %475 = vector.broadcast %cst_174 : f32 to vector<2x2048xf32>
    %476 = arith.maximumf %474, %475 : vector<2x2048xf32>
    %c3_175 = arith.constant 3 : index
    %c0_176 = arith.constant 0 : index
    %c0_177 = arith.constant 0 : index
    %477 = vector.load %arg9[%c3_175, %c0_176, %c0_177] : memref<4x2048x32xbf16, #tpu.memory_space<vmem>>, vector<1x2048x32xbf16>
    %478 = vector.shape_cast %477 : vector<1x2048x32xbf16> to vector<2048x32xbf16>
    %479 = arith.truncf %476 : vector<2x2048xf32> to vector<2x2048xbf16>
    %cst_178 = arith.constant dense<0.000000e+00> : vector<2x32xf32>
    %480 = tpu.matmul %479, %478, %cst_178 {dimension_numbers = #tpu.dot_dimension_numbers<[1], [0], [0], [1], [0, 0, 1, 1], [], []>} : vector<2x2048xbf16>, vector<2048x32xbf16>, vector<2x32xf32> -> vector<2x32xf32>
    %c3_179 = arith.constant 3 : index
    %c0_180 = arith.constant 0 : index
    %481 = vector.load %arg10[%c3_179, %c0_180] : memref<4x32xf32, #tpu.memory_space<vmem>>, vector<1x32xf32>
    %482 = vector.shape_cast %481 : vector<1x32xf32> to vector<32xf32>
    %483 = vector.shape_cast %482 : vector<32xf32> to vector<1x32xf32>
    %484 = vector.broadcast %483 : vector<1x32xf32> to vector<2x32xf32>
    %485 = arith.addf %480, %484 : vector<2x32xf32>
    %486 = arith.addf %465, %485 : vector<2x32xf32>
    %c3_181 = arith.constant 3 : index
    %c0_182 = arith.constant 0 : index
    %487 = vector.load %arg13[%c3_181, %c0_182] : memref<4x32xf32, #tpu.memory_space<vmem>>, vector<1x32xf32>
    %488 = vector.shape_cast %487 : vector<1x32xf32> to vector<32xf32>
    %489 = vector.shape_cast %488 : vector<32xf32> to vector<1x32xf32>
    %c3_183 = arith.constant 3 : index
    %c0_184 = arith.constant 0 : index
    %490 = vector.load %arg14[%c3_183, %c0_184] : memref<4x32xf32, #tpu.memory_space<vmem>>, vector<1x32xf32>
    %491 = vector.shape_cast %490 : vector<1x32xf32> to vector<32xf32>
    %492 = vector.shape_cast %491 : vector<32xf32> to vector<1x32xf32>
    %cst_185 = arith.constant dense<0.000000e+00> : vector<2xf32>
    %493 = vector.multi_reduction <add>, %486, %cst_185 [1] : vector<2x32xf32> to vector<2xf32>
    %494 = vector.shape_cast %493 : vector<2xf32> to vector<2x1xf32>
    %cst_186 = arith.constant 3.200000e+01 : f32
    %495 = vector.broadcast %cst_186 : f32 to vector<2x1xf32>
    %496 = arith.divf %494, %495 : vector<2x1xf32>
    %497 = vector.broadcast %496 : vector<2x1xf32> to vector<2x32xf32>
    %498 = arith.subf %486, %497 : vector<2x32xf32>
    %499 = arith.mulf %498, %498 : vector<2x32xf32>
    %cst_187 = arith.constant dense<0.000000e+00> : vector<2xf32>
    %500 = vector.multi_reduction <add>, %499, %cst_187 [1] : vector<2x32xf32> to vector<2xf32>
    %501 = vector.shape_cast %500 : vector<2xf32> to vector<2x1xf32>
    %cst_188 = arith.constant 3.200000e+01 : f32
    %502 = vector.broadcast %cst_188 : f32 to vector<2x1xf32>
    %503 = arith.divf %501, %502 : vector<2x1xf32>
    %504 = vector.broadcast %496 : vector<2x1xf32> to vector<2x32xf32>
    %505 = arith.subf %486, %504 : vector<2x32xf32>
    %cst_189 = arith.constant 9.99999974E-6 : f32
    %506 = vector.broadcast %cst_189 : f32 to vector<2x1xf32>
    %507 = arith.addf %503, %506 : vector<2x1xf32>
    %508 = math.rsqrt %507 : vector<2x1xf32>
    %509 = vector.broadcast %508 : vector<2x1xf32> to vector<2x32xf32>
    %510 = arith.mulf %505, %509 : vector<2x32xf32>
    %511 = vector.broadcast %489 : vector<1x32xf32> to vector<2x32xf32>
    %512 = arith.mulf %510, %511 : vector<2x32xf32>
    %513 = vector.broadcast %492 : vector<1x32xf32> to vector<2x32xf32>
    %514 = arith.addf %512, %513 : vector<2x32xf32>
    %c0_190 = arith.constant 0 : index
    %c0_191 = arith.constant 0 : index
    %515 = vector.load %arg15[%c0_190, %c0_191] : memref<32x512xbf16, #tpu.memory_space<vmem>>, vector<32x512xbf16>
    %c0_192 = arith.constant 0 : index
    %c0_193 = arith.constant 0 : index
    %516 = vector.load %arg16[%c0_192, %c0_193] : memref<128x512xbf16, #tpu.memory_space<vmem>>, vector<128x512xbf16>
    %c0_194 = arith.constant 0 : index
    %c0_195 = arith.constant 0 : index
    %517 = vector.load %arg17[%c0_194, %c0_195] : memref<1x512xf32, #tpu.memory_space<vmem>>, vector<1x512xf32>
    %cst_196 = arith.constant 0.000000e+00 : f32
    %518 = vector.broadcast %cst_196 : f32 to vector<1x128xf32>
    %cst_197 = arith.constant 0.000000e+00 : f32
    %519 = vector.broadcast %cst_197 : f32 to vector<1x128xf32>
    %520 = vector.extract_strided_slice %514 {offsets = [0, 0], sizes = [1, 32], strides = [1, 1]} : vector<2x32xf32> to vector<1x32xf32>
    %521 = arith.truncf %520 : vector<1x32xf32> to vector<1x32xbf16>
    %cst_198 = arith.constant dense<0.000000e+00> : vector<1x512xf32>
    %522 = tpu.matmul %521, %515, %cst_198 {dimension_numbers = #tpu.dot_dimension_numbers<[1], [0], [0], [1], [0, 0, 1, 1], [], []>} : vector<1x32xbf16>, vector<32x512xbf16>, vector<1x512xf32> -> vector<1x512xf32>
    %523 = arith.truncf %518 : vector<1x128xf32> to vector<1x128xbf16>
    %cst_199 = arith.constant dense<0.000000e+00> : vector<1x512xf32>
    %524 = tpu.matmul %523, %516, %cst_199 {dimension_numbers = #tpu.dot_dimension_numbers<[1], [0], [0], [1], [0, 0, 1, 1], [], []>} : vector<1x128xbf16>, vector<128x512xbf16>, vector<1x512xf32> -> vector<1x512xf32>
    %525 = arith.addf %522, %524 : vector<1x512xf32>
    %526 = arith.addf %525, %517 : vector<1x512xf32>
    %527 = vector.extract_strided_slice %526 {offsets = [0, 0], sizes = [1, 128], strides = [1, 1]} : vector<1x512xf32> to vector<1x128xf32>
    %cst_200 = arith.constant 0.000000e+00 : f32
    %528 = vector.broadcast %cst_200 : f32 to vector<1x128xf32>
    %529 = arith.subf %528, %527 : vector<1x128xf32>
    %530 = math.exp %529 : vector<1x128xf32>
    %cst_201 = arith.constant 1.000000e+00 : f32
    %531 = vector.broadcast %cst_201 : f32 to vector<1x128xf32>
    %532 = arith.addf %531, %530 : vector<1x128xf32>
    %cst_202 = arith.constant 1.000000e+00 : f32
    %533 = vector.broadcast %cst_202 : f32 to vector<1x128xf32>
    %534 = arith.divf %533, %532 : vector<1x128xf32>
    %535 = vector.extract_strided_slice %526 {offsets = [0, 128], sizes = [1, 128], strides = [1, 1]} : vector<1x512xf32> to vector<1x128xf32>
    %cst_203 = arith.constant 0.000000e+00 : f32
    %536 = vector.broadcast %cst_203 : f32 to vector<1x128xf32>
    %537 = arith.subf %536, %535 : vector<1x128xf32>
    %538 = math.exp %537 : vector<1x128xf32>
    %cst_204 = arith.constant 1.000000e+00 : f32
    %539 = vector.broadcast %cst_204 : f32 to vector<1x128xf32>
    %540 = arith.addf %539, %538 : vector<1x128xf32>
    %cst_205 = arith.constant 1.000000e+00 : f32
    %541 = vector.broadcast %cst_205 : f32 to vector<1x128xf32>
    %542 = arith.divf %541, %540 : vector<1x128xf32>
    %543 = vector.extract_strided_slice %526 {offsets = [0, 256], sizes = [1, 128], strides = [1, 1]} : vector<1x512xf32> to vector<1x128xf32>
    %544 = math.tanh %543 : vector<1x128xf32>
    %545 = vector.extract_strided_slice %526 {offsets = [0, 384], sizes = [1, 128], strides = [1, 1]} : vector<1x512xf32> to vector<1x128xf32>
    %cst_206 = arith.constant 0.000000e+00 : f32
    %546 = vector.broadcast %cst_206 : f32 to vector<1x128xf32>
    %547 = arith.subf %546, %545 : vector<1x128xf32>
    %548 = math.exp %547 : vector<1x128xf32>
    %cst_207 = arith.constant 1.000000e+00 : f32
    %549 = vector.broadcast %cst_207 : f32 to vector<1x128xf32>
    %550 = arith.addf %549, %548 : vector<1x128xf32>
    %cst_208 = arith.constant 1.000000e+00 : f32
    %551 = vector.broadcast %cst_208 : f32 to vector<1x128xf32>
    %552 = arith.divf %551, %550 : vector<1x128xf32>
    %553 = arith.mulf %542, %519 : vector<1x128xf32>
    %554 = arith.mulf %534, %544 : vector<1x128xf32>
    %555 = arith.addf %553, %554 : vector<1x128xf32>
    %556 = math.tanh %555 : vector<1x128xf32>
    %557 = arith.mulf %552, %556 : vector<1x128xf32>
    %558 = vector.extract_strided_slice %514 {offsets = [1, 0], sizes = [1, 32], strides = [1, 1]} : vector<2x32xf32> to vector<1x32xf32>
    %559 = arith.truncf %558 : vector<1x32xf32> to vector<1x32xbf16>
    %cst_209 = arith.constant dense<0.000000e+00> : vector<1x512xf32>
    %560 = tpu.matmul %559, %515, %cst_209 {dimension_numbers = #tpu.dot_dimension_numbers<[1], [0], [0], [1], [0, 0, 1, 1], [], []>} : vector<1x32xbf16>, vector<32x512xbf16>, vector<1x512xf32> -> vector<1x512xf32>
    %561 = arith.truncf %557 : vector<1x128xf32> to vector<1x128xbf16>
    %cst_210 = arith.constant dense<0.000000e+00> : vector<1x512xf32>
    %562 = tpu.matmul %561, %516, %cst_210 {dimension_numbers = #tpu.dot_dimension_numbers<[1], [0], [0], [1], [0, 0, 1, 1], [], []>} : vector<1x128xbf16>, vector<128x512xbf16>, vector<1x512xf32> -> vector<1x512xf32>
    %563 = arith.addf %560, %562 : vector<1x512xf32>
    %564 = arith.addf %563, %517 : vector<1x512xf32>
    %565 = vector.extract_strided_slice %564 {offsets = [0, 0], sizes = [1, 128], strides = [1, 1]} : vector<1x512xf32> to vector<1x128xf32>
    %cst_211 = arith.constant 0.000000e+00 : f32
    %566 = vector.broadcast %cst_211 : f32 to vector<1x128xf32>
    %567 = arith.subf %566, %565 : vector<1x128xf32>
    %568 = math.exp %567 : vector<1x128xf32>
    %cst_212 = arith.constant 1.000000e+00 : f32
    %569 = vector.broadcast %cst_212 : f32 to vector<1x128xf32>
    %570 = arith.addf %569, %568 : vector<1x128xf32>
    %cst_213 = arith.constant 1.000000e+00 : f32
    %571 = vector.broadcast %cst_213 : f32 to vector<1x128xf32>
    %572 = arith.divf %571, %570 : vector<1x128xf32>
    %573 = vector.extract_strided_slice %564 {offsets = [0, 128], sizes = [1, 128], strides = [1, 1]} : vector<1x512xf32> to vector<1x128xf32>
    %cst_214 = arith.constant 0.000000e+00 : f32
    %574 = vector.broadcast %cst_214 : f32 to vector<1x128xf32>
    %575 = arith.subf %574, %573 : vector<1x128xf32>
    %576 = math.exp %575 : vector<1x128xf32>
    %cst_215 = arith.constant 1.000000e+00 : f32
    %577 = vector.broadcast %cst_215 : f32 to vector<1x128xf32>
    %578 = arith.addf %577, %576 : vector<1x128xf32>
    %cst_216 = arith.constant 1.000000e+00 : f32
    %579 = vector.broadcast %cst_216 : f32 to vector<1x128xf32>
    %580 = arith.divf %579, %578 : vector<1x128xf32>
    %581 = vector.extract_strided_slice %564 {offsets = [0, 256], sizes = [1, 128], strides = [1, 1]} : vector<1x512xf32> to vector<1x128xf32>
    %582 = math.tanh %581 : vector<1x128xf32>
    %583 = vector.extract_strided_slice %564 {offsets = [0, 384], sizes = [1, 128], strides = [1, 1]} : vector<1x512xf32> to vector<1x128xf32>
    %cst_217 = arith.constant 0.000000e+00 : f32
    %584 = vector.broadcast %cst_217 : f32 to vector<1x128xf32>
    %585 = arith.subf %584, %583 : vector<1x128xf32>
    %586 = math.exp %585 : vector<1x128xf32>
    %cst_218 = arith.constant 1.000000e+00 : f32
    %587 = vector.broadcast %cst_218 : f32 to vector<1x128xf32>
    %588 = arith.addf %587, %586 : vector<1x128xf32>
    %cst_219 = arith.constant 1.000000e+00 : f32
    %589 = vector.broadcast %cst_219 : f32 to vector<1x128xf32>
    %590 = arith.divf %589, %588 : vector<1x128xf32>
    %591 = arith.mulf %580, %555 : vector<1x128xf32>
    %592 = arith.mulf %572, %582 : vector<1x128xf32>
    %593 = arith.addf %591, %592 : vector<1x128xf32>
    %594 = math.tanh %593 : vector<1x128xf32>
    %595 = arith.mulf %590, %594 : vector<1x128xf32>
    %596 = tpu.concatenate %557, %595 in 0 : vector<1x128xf32>, vector<1x128xf32> -> vector<2x128xf32>
    %c0_220 = arith.constant 0 : index
    %c0_221 = arith.constant 0 : index
    %597 = vector.load %arg18[%c0_220, %c0_221] : memref<128x1xbf16, #tpu.memory_space<vmem>>, vector<128x1xbf16>
    %598 = arith.truncf %596 : vector<2x128xf32> to vector<2x128xbf16>
    %cst_222 = arith.constant dense<0.000000e+00> : vector<2x1xf32>
    %599 = tpu.matmul %598, %597, %cst_222 {dimension_numbers = #tpu.dot_dimension_numbers<[1], [0], [0], [1], [0, 0, 1, 1], [], []>} : vector<2x128xbf16>, vector<128x1xbf16>, vector<2x1xf32> -> vector<2x1xf32>
    %c0_223 = arith.constant 0 : index
    %c0_224 = arith.constant 0 : index
    %600 = vector.load %arg19[%c0_223, %c0_224] : memref<1x1xf32, #tpu.memory_space<vmem>>, vector<1x1xf32>
    %601 = vector.broadcast %600 : vector<1x1xf32> to vector<2x1xf32>
    %602 = arith.addf %599, %601 : vector<2x1xf32>
    %cst_225 = arith.constant 0.000000e+00 : f32
    %603 = vector.broadcast %cst_225 : f32 to vector<2x1xf32>
    %604 = arith.subf %603, %602 : vector<2x1xf32>
    %605 = math.exp %604 : vector<2x1xf32>
    %cst_226 = arith.constant 1.000000e+00 : f32
    %606 = vector.broadcast %cst_226 : f32 to vector<2x1xf32>
    %607 = arith.addf %606, %605 : vector<2x1xf32>
    %cst_227 = arith.constant 1.000000e+00 : f32
    %608 = vector.broadcast %cst_227 : f32 to vector<2x1xf32>
    %609 = arith.divf %608, %607 : vector<2x1xf32>
    %c0_228 = arith.constant 0 : index
    %c0_229 = arith.constant 0 : index
    %610 = vector.load %arg20[%c0_228, %c0_229] : memref<2x1xf32, #tpu.memory_space<vmem>>, vector<2x1xf32>
    tpu.vector_store %arg20[%c0_228, %c0_229], %609 {strides = array<i32>} : memref<2x1xf32, #tpu.memory_space<vmem>>, vector<2x1xf32>,
    return
  }
}

</mosaic_0001>

<bundles_post_ra>
// kernel: critic_forward.1
= control target key start
LH: loop header
LB: loop body
LE: loop exit
PB: predicated region body
PF: predicated region fallthrough
CT: control target
= control target key end

     0   :  { %v13445_v0 = vmov 0.0   ;;  %vm13446_vm0 = vmmov 0   ;;  %vm85_vm1 = vcmask 130048   ;;  %vm151_vm2 = vcmask 261120   ;;  %s16685_s24 = smov 120   ;;  %s16677_s26 = smov 16   ;;  %s16650_s1 = inlined_call_operand.vmem [shape: bf16[16,32], index: 1, kind: input, shape index: {}]   ;;  %s16651_s0 = inlined_call_operand.vmem [shape: f32[2,16], index: 0, kind: input, shape index: {}]   ;;  %s16652_s3 = inlined_call_operand.vmem [shape: bf16[4,32,96], index: 3, kind: input, shape index: {}]   ;;  %s16653_s2 = inlined_call_operand.vmem [shape: f32[1,32], index: 2, kind: input, shape index: {}]   ;;  %s16654_s4 = inlined_call_operand.vmem [shape: f32[4,96], index: 4, kind: input, shape index: {}]   ;;  %s16655_s5 = inlined_call_operand.vmem [shape: bf16[4,32,32], index: 5, kind: input, shape index: {}]   ;;  %s16656_s6 = inlined_call_operand.vmem [shape: f32[4,32], index: 6, kind: input, shape index: {}]   ;;  %s16657_s7 = inlined_call_operand.vmem [shape: bf16[4,32,2048], index: 7, kind: input, shape index: {}]   ;;  %s16658_s9 = inlined_call_operand.vmem [shape: bf16[4,2048,32], index: 9, kind: input, shape index: {}]   ;;  %s16659_s11 = inlined_call_operand.vmem [shape: f32[4,32], index: 11, kind: input, shape index: {}]   ;;  %s16660_s12 = inlined_call_operand.vmem [shape: f32[4,32], index: 12, kind: input, shape index: {}]   ;;  %s16661_s8 = inlined_call_operand.vmem [shape: f32[4,2048], index: 8, kind: input, shape index: {}]   ;;  %s16662_s10 = inlined_call_operand.vmem [shape: f32[4,32], index: 10, kind: input, shape index: {}]   ;;  %s16663_s13 = inlined_call_operand.vmem [shape: f32[4,32], index: 13, kind: input, shape index: {}]   ;;  %s16664_s14 = inlined_call_operand.vmem [shape: f32[4,32], index: 14, kind: input, shape index: {}]   ;;  %s16665_s16 = inlined_call_operand.vmem [shape: bf16[128,512], index: 16, kind: input, shape index: {}]   ;;  %s16666_s15 = inlined_call_operand.vmem [shape: bf16[32,512], index: 15, kind: input, shape index: {}]   ;;  %s16667_s17 = inlined_call_operand.vmem [shape: f32[1,512], index: 17, kind: input, shape index: {}]   ;;  %s16668_s18 = inlined_call_operand.vmem [shape: bf16[128,1], index: 18, kind: input, shape index: {}]   ;;  %s16669_s19 = inlined_call_operand.<no memory space> [shape: f32[1,1], index: 19, kind: input, shape index: {}]   ;;  %s16670_s20 = inlined_call_operand.vmem [shape: f32[2,1], index: 20, kind: output, shape index: {}]  }
   0x1   :  { %16691 = sst [smem:[#allocation3_spill]] %s16650_s1  ;;  %12662 = vmatprep.subr.bf16.mxu0 %v13445_v0  ;;  %12664 = vmatprep.mubr.msk.bf16.mxu0 %vm13446_vm0, %v13445_v0  ;;  %v13448_v19 = vmov 1966171168   ;;  %v200_v21 = vlaneseq  ;;  %vm261_vm3 = vcmask 58368   ;;  %s16675_s28 = smov 24   ;;  %vm320_vm4 = vcmask 64512  }
   0x2   :  { %16692 = sst [smem:[#allocation4_spill]] %s16651_s0  ;;  %s16701_s23 = sld [smem:[#allocation3_spill]]  ;;  %v198_v20 = vunpack.c.l.s4 %v13448_v19  ;;  %vm325_vm5 = vcmask 195584   ;;  %vm333_vm6 = vcmask 254976   ;;  %vm363_vm7 = vcmask 1041409  }
   0x3   :  { %16693 = sst [smem:[#allocation5_spill]] %s16652_s3  ;;  %s16702_s25 = sld [smem:[#allocation4_spill]]  ;;  %v13600_v23 = vshrl.u32 %v200_v21, 7  ;;  %vm10122_vm8 = vcmask 1040384   ;;  %vm10242_vm9 = vcmask 1024  }
   0x4   :  { %16694 = sst [smem:[#allocation6_spill]] %s16653_s2  ;;  %s16703_s27 = sld [smem:[#allocation5_spill]]  ;;  %v199_v22 = vunpack.c.0.s8 %v198_v20 }
   0x5   :  { %16695 = sst [smem:[#allocation7_spill]] %s16654_s4  ;;  %s16704_s1 = sld [smem:[#allocation6_spill]]  ;;  %v13608_v28 = vsub.s32 0, %v13600_v23 }
   0x6   :  { %16696 = sst [smem:[#allocation8_spill]] %s16666_s15  ;;  %s16705_s22 = sld [smem:[#allocation7_spill]]  ;;  %v13604_v25 = vsub.s32 %v199_v22, %v13600_v23 }
   0x7   :  { %16697 = sst [smem:[#allocation9_spill]] %s16667_s17  ;;  %s16683_s3 = smov 112  }
   0x8   :  { %16698 = sst [smem:[#allocation10_spill]] %s16668_s18  ;;  %v12764_v1 = vld [vmem:[%s16701_s23] sm:$0xff]   ;;  %s16687_s23 = smov 96  }
   0x9   :  { %16699 = sst [smem:[#allocation11_spill]] %s16669_s19  ;;  %v68_v2 = vld [vmem:[%s16702_s25] sm:$0x3]  ;;  %12663 = vmatpush3.bf16.msra.mxu0 %v12764_v1  ;;  %s16681_s25 = smov 104  }
   0xa   :  { %16700 = sst [smem:[#allocation12_spill]] %s16670_s20  ;;  %v71_v3 = vpack.c.bf16 %v68_v2, %v68_v2  ;;  %v12765_v4 = vld [vmem:[%s16703_s27] sm:$0xff]   ;;  %12668 = vmatprep.subr.bf16.mxu0 %v13445_v0  ;;  %v12766_v5 = vld [vmem:[%s16703_s27 + $0x8] sm:$0xff]   ;;  %s16679_s2 = smov 8  }
   0xb   :  { %v10248_v6 = vld [vmem:[%s16704_s1] ss:$0 sm:$0xff]  ;;  %s16673_s4 = smov 64   ;;  %s16710_s30 = smov 64  }
   0xc   :  { %12665 = vmatmul.mubr.msk.bf16.vlgmr.msra.gmra.mrb[0].mxu0 %vm85_vm1, %v71_v3  ;;  %v10251_v13 = vld [vmem:[%s16705_s22] ss:$0 sm:$0xff]  ;;  %s16711_s19 = smov 96   ;;  %s16712_s20 = smov 120  }
   0xd   :  { %12669 = vmatpush3.bf16.msra.mxu0 %v12765_v4  ;;  %12672 = vmatprep.mubr.msk.bf16.mxu0 %vm13446_vm0, %v13445_v0  ;;  %s16714_s1 = sld [smem:[#allocation8_spill]] }
   0xe   :  { %12670 = vmatprep.subr.bf16.mxu0 %v13445_v0 }
  0x11   :  { %12671 = vmatpush3.bf16.msra.mxu0 %v12766_v5 }
  0x12   :  { %12676 = vmatprep.subr.bf16.mxu0 %v13445_v0 }
  0xdf   :  { %v123_v7 = vpop.f32.mrb[0].mxu0 }
  0xe0   :  { %v13586_v8 = vadd.f32 %v10248_v6, %v123_v7  ;;  %v12666_v9 = vpop.f32.mrb[1].mxu0 }
  0xe1   :  { %v126_v10 = vpop.f32.mrb[2].mxu0 }
  0xe2   :  { %v133_v11 = vpack.c.bf16 %v13586_v8, %v13586_v8  ;;  %v12667_v12 = vpop.f32.mrb[3].mxu0 }
  0xe4   :  { %12673 = vmatmul.mubr.msk.bf16.vlgmr.msra.gmra.mrb[4].mxu0 %vm151_vm2, %v133_v11 }
  0xe5   :  { %12680 = vmatprep.mubr.msk.bf16.mxu0 %vm13446_vm0, %v13445_v0 }
 0x1b7   :  { %v189_v14 = vpop.f32.mrb[4].mxu0 }
 0x1b8   :  { %v13596_v15 = vadd.f32 %v10251_v13, %v189_v14  ;;  %v12674_v16 = vpop.f32.mrb[5].mxu0 }
 0x1b9   :  { %v192_v17 = vpop.f32.mrb[6].mxu0 }
 0x1ba   :  { %230 = vrot.lane.b32.xlu0 %v13596_v15, %s16687_s23  ;;  %v12675_v18 = vpop.f32.mrb[7].mxu0  ;;  %v195_v24 = vmul.f32 0.5, %v13596_v15 }
 0x1bc   :  { %v203_v26 = vrot.slane %v195_v24, %v13604_v25 }
 0x1be   :  { %v204_v27 = vcombine.high %v203_v26, %v203_v26  ;;  %v211_v29 = vrot.slane %v203_v26, %v13604_v25 }
 0x1c0   :  { %v218_v30 = vrot.slane %v204_v27, %v13604_v25  ;;  %v222_v31 = vrot.slane %v211_v29, %v13608_v28  ;;  %v12767_v27 = vld [vmem:[%s16655_s5] sm:$0xff]   ;;  %v12768_v29 = vld [vmem:[%s16655_s5 + $0x8] sm:$0xff]  }
 0x1c1   :  { %12677 = vmatpush3.bf16.msra.mxu0 %v12767_v27  ;;  %v466_v27 = vld [vmem:[%s16657_s7 + $0x90] sm:$0xff] }
 0x1c2   :  { %v226_v32 = vrot.slane %v218_v30, %v13608_v28  ;;  %12678 = vmatprep.subr.bf16.mxu0 %v13445_v0 }
 0x1c5   :  { %12679 = vmatpush3.bf16.msra.mxu0 %v12768_v29 }
 0x22c   :  { %v231_v33 = vpop.permute.xlu0 %230 }
 0x22d   :  { %v233_v34 = vmul.f32 %v231_v33, %v222_v31  ;;  %v234_v35 = vmul.f32 %v231_v33, %v226_v32 }
 0x22f   :  { %237 = vrot.lane.b32.xlu0 %v233_v34, %s16685_s24  ;;  %239 = vrot.lane.b32.xlu1 %v234_v35, %s16685_s24 }
 0x233   :  { %247 = vrot.lane.b32.xlu0 %v234_v35, %s16683_s3  ;;  %245 = vrot.lane.b32.xlu1 %v233_v34, %s16683_s3 }
 0x237   :  { %255 = vrot.lane.b32.xlu0 %v234_v35, %s16681_s25  ;;  %253 = vrot.lane.b32.xlu1 %v233_v34, %s16681_s25  ;;  %s16708_s25 = smov 16  }
 0x2a1   :  { %v238_v36 = vpop.permute.xlu0 %237  ;;  %v240_v37 = vpop.permute.xlu1 %239 }
 0x2a2   :  { %v243_v40 = vadd.f32 %v238_v36, %v233_v34  ;;  %v244_v41 = vadd.f32 %v240_v37, %v234_v35 }
 0x2a5   :  { %v248_v38 = vpop.permute.xlu0 %247  ;;  %v246_v39 = vpop.permute.xlu1 %245 }
 0x2a6   :  { %v252_v42 = vadd.f32 %v248_v38, %v244_v41  ;;  %v251_v43 = vadd.f32 %v246_v39, %v243_v40 }
 0x2a9   :  { %v256_v44 = vpop.permute.xlu0 %255  ;;  %v254_v45 = vpop.permute.xlu1 %253 }
 0x2aa   :  { %v260_v46 = vadd.f32 %v256_v44, %v252_v42  ;;  %v259_v47 = vadd.f32 %v254_v45, %v251_v43 }
 0x2ac   :  { %v269_v48 = vsel %vm261_vm3, %v260_v46, -inf  ;;  %v262_v49 = vsel %vm261_vm3, %v259_v47, -inf }
 0x2ad   :  { %v270_v50 = vrot.slane %v269_v48, 4  ;;  %v263_v51 = vrot.slane %v262_v49, 4 }
 0x2af   :  { %v271_v52 = vmax.f32 %v269_v48, %v270_v50  ;;  %v264_v53 = vmax.f32 %v262_v49, %v263_v51 }
 0x2b1   :  { %v272_v54 = vrot.slane %v271_v52, 2  ;;  %v265_v55 = vrot.slane %v264_v53, 2 }
 0x2b3   :  { %v273_v56 = vmax.f32 %v271_v52, %v272_v54  ;;  %v266_v57 = vmax.f32 %v264_v53, %v265_v55 }
 0x2b5   :  { %v274_v58 = vrot.slane %v273_v56, 1  ;;  %v267_v59 = vrot.slane %v266_v57, 1 }
 0x2b7   :  { %v275_v60 = vmax.f32 %v273_v56, %v274_v58  ;;  %v268_v61 = vmax.f32 %v266_v57, %v267_v59 }
 0x2b9   :  { %v277_v62 = vsub.f32 %v260_v46, %v275_v60  ;;  %v276_v63 = vsub.f32 %v259_v47, %v268_v61 }
 0x2bb   :  { %v280_v1 = vmul.f32 1.442695, %v277_v62  ;;  %v278_v2 = vmul.f32 1.442695, %v276_v63 }
 0x2bd   :  { %13361 = vpow2.f32 %v280_v1  ;;  %v10255_v1 = vld [vmem:[%s16656_s6] ss:$0 sm:$0xff] }
 0x2be   :  { %13363 = vpow2.f32 %v278_v2 }
 0x2c7   :  { %v13362_v3 = vpop.eup %13361 }
 0x2c8   :  { %v13364_v4 = vpop.eup %13363  ;;  %v289_v5 = vsel %vm261_vm3, %v13362_v3, 0.0 }
 0x2c9   :  { %v290_v6 = vrot.slane %v289_v5, 4  ;;  %v282_v7 = vsel %vm261_vm3, %v13364_v4, 0.0 }
 0x2ca   :  { %v283_v9 = vrot.slane %v282_v7, 4 }
 0x2cb   :  { %v291_v10 = vadd.f32 %v290_v6, %v289_v5 }
 0x2cc   :  { %v284_v11 = vadd.f32 %v283_v9, %v282_v7 }
 0x2cd   :  { %v292_v12 = vrot.slane %v291_v10, 2 }
 0x2ce   :  { %v285_v13 = vrot.slane %v284_v11, 2 }
 0x2cf   :  { %v293_v14 = vadd.f32 %v292_v12, %v291_v10 }
 0x2d0   :  { %v286_v16 = vadd.f32 %v285_v13, %v284_v11 }
 0x2d1   :  { %v294_v17 = vrot.slane %v293_v14, 1 }
 0x2d2   :  { %v287_v18 = vrot.slane %v286_v16, 1 }
 0x2d3   :  { %v295_v19 = vadd.f32 %v294_v17, %v293_v14  ;;  %v456_v17 = vld [vmem:[%s16657_s7 + $0x40] sm:$0xff] }
 0x2d4   :  { %v288_v20 = vadd.f32 %v287_v18, %v286_v16  ;;  %v448_v16 = vld [vmem:[%s16657_s7] sm:$0xff] }
 0x2d5   :  { %13365 = vrcp.f32 %v295_v19  ;;  %v10263_v18 = vcombine.high %v448_v16, %v456_v17  ;;  %v458_v19 = vld [vmem:[%s16657_s7 + $0x50] sm:$0xff] }
 0x2d6   :  { %13367 = vrcp.f32 %v288_v20  ;;  %v10262_v20 = vcombine.low %v448_v16, %v456_v17 }
 0x2d7   :  { %729 = vmatprep.subr.bf16.mxu0 %v10263_v18  ;;  %v477_v18 = vld [vmem:[%s16657_s7 + $0xe8] sm:$0xff] }
 0x2df   :  { %v13366_v21 = vpop.eup %13365 }
 0x2e0   :  { %v13368_v22 = vpop.eup %13367  ;;  %v299_v24 = vmul.f32 %v13366_v21, %v13362_v3 }
 0x2e1   :  { %v297_v26 = vmul.f32 %v13368_v22, %v13364_v4 }
 0x2e2   :  { %304 = vrot.lane.b32.xlu0 %v299_v24, %s16679_s2 }
 0x2e3   :  { %302 = vrot.lane.b32.xlu1 %v297_v26, %s16679_s2  ;;  %s16709_s2 = smov 24  }
 0x2e6   :  { %310 = vrot.lane.b32.xlu0 %v299_v24, %s16677_s26 }
 0x2e7   :  { %308 = vrot.lane.b32.xlu1 %v297_v26, %s16677_s26  ;;  %s16706_s26 = smov 104  }
 0x2ea   :  { %316 = vrot.lane.b32.xlu0 %v299_v24, %s16675_s28 }
 0x2eb   :  { %314 = vrot.lane.b32.xlu1 %v297_v26, %s16675_s28  ;;  %s16707_s28 = smov 8  }
 0x2ef   :  { %328 = vrot.lane.b32.xlu1 %v13596_v15, %s16673_s4 }
 0x354   :  { %v305_v30 = vpop.permute.xlu0 %304 }
 0x355   :  { %v303_v31 = vpop.permute.xlu1 %302  ;;  %v322_v35 = vsel %vm320_vm4, %v299_v24, %v305_v30  ;;  %v464_v24 = vld [vmem:[%s16657_s7 + $0x80] sm:$0xff]  ;;  %v474_v30 = vld [vmem:[%s16657_s7 + $0xd0] sm:$0xff] }
 0x356   :  { %v321_v36 = vsel %vm320_vm4, %v297_v26, %v303_v31  ;;  %v472_v26 = vld [vmem:[%s16657_s7 + $0xc0] sm:$0xff] }
 0x357   :  { %v10279_v29 = vcombine.high %v464_v24, %v472_v26  ;;  %v10278_v31 = vcombine.low %v464_v24, %v472_v26  ;;  %v463_v24 = vld [vmem:[%s16657_s7 + $0x78] sm:$0xff]  ;;  %v12771_v26 = vld [vmem:[%s16658_s9 + $0x48] sm:$0xff]  }
 0x358   :  { %v311_v32 = vpop.permute.xlu0 %310 }
 0x359   :  { %v309_v33 = vpop.permute.xlu1 %308  ;;  %v324_v37 = vsel %vm85_vm1, %v322_v35, %v311_v32  ;;  %v10283_v32 = vcombine.high %v466_v27, %v474_v30  ;;  %v452_v35 = vld [vmem:[%s16657_s7 + $0x20] sm:$0xff] }
 0x35a   :  { %v323_v38 = vsel %vm85_vm1, %v321_v36, %v309_v33  ;;  %v10282_v33 = vcombine.low %v466_v27, %v474_v30 }
 0x35c   :  { %v317_v15 = vpop.permute.xlu0 %316 }
 0x35d   :  { %v315_v34 = vpop.permute.xlu1 %314  ;;  %v327_v39 = vsel %vm325_vm5, %v324_v37, %v317_v15  ;;  %v457_v15 = vld [vmem:[%s16657_s7 + $0x48] sm:$0xff] }
 0x35e   :  { %v326_v40 = vsel %vm325_vm5, %v323_v38, %v315_v34  ;;  %v449_v34 = vld [vmem:[%s16657_s7 + $0x8] sm:$0xff]  ;;  %v460_v38 = vld [vmem:[%s16657_s7 + $0x60] sm:$0xff] }
 0x35f   :  { %v10264_v36 = vcombine.low %v449_v34, %v457_v15  ;;  %v10265_v37 = vcombine.high %v449_v34, %v457_v15  ;;  %v12775_v15 = vld [vmem:[%s16658_s9 + $0x10] sm:$0xff]  }
 0x361   :  { %v329_v41 = vpop.permute.xlu1 %328 }
 0x362   :  { %v331_v42 = vmul.f32 %v329_v41, %v326_v40  ;;  %v332_v43 = vmul.f32 %v329_v41, %v327_v39  ;;  %v13456_v39 = vmov 0   ;;  %v10270_v40 = vcombine.low %v452_v35, %v460_v38 }
 0x363   :  { %843 = vmatprep.mubr.bf16.mxu1 %v13456_v39  ;;  %v10271_v41 = vcombine.high %v452_v35, %v460_v38  ;;  %v12774_v38 = vld [vmem:[%s16658_s9 + $0xc0] sm:$0xff]  }
 0x364   :  { %v334_v44 = vsel %vm333_vm6, %v331_v42, 0.0  ;;  %v341_v45 = vsel %vm333_vm6, %v332_v43, 0.0 }
 0x365   :  { %v335_v46 = vrot.slane %v334_v44, 4  ;;  %v342_v47 = vrot.slane %v341_v45, 4 }
 0x367   :  { %v336_v48 = vadd.f32 %v335_v46, %v334_v44  ;;  %v343_v49 = vadd.f32 %v342_v47, %v341_v45  ;;  %v10259_v45 = vld [vmem:[%s16659_s11] ss:$0 sm:$0xff] }
 0x368   :  { %v10260_v47 = vld [vmem:[%s16660_s12] ss:$0 sm:$0xff] }
 0x369   :  { %v337_v50 = vrot.slane %v336_v48, 2  ;;  %v344_v51 = vrot.slane %v343_v49, 2 }
 0x36b   :  { %v338_v52 = vadd.f32 %v337_v50, %v336_v48  ;;  %v345_v53 = vadd.f32 %v344_v51, %v343_v49  ;;  %v465_v49 = vld [vmem:[%s16657_s7 + $0x88] sm:$0xff]  ;;  %v468_v51 = vld [vmem:[%s16657_s7 + $0xa0] sm:$0xff] }
 0x36c   :  { %v473_v50 = vld [vmem:[%s16657_s7 + $0xc8] sm:$0xff] }
 0x36d   :  { %v339_v54 = vrot.slane %v338_v52, 1  ;;  %v346_v55 = vrot.slane %v345_v53, 1 }
 0x36f   :  { %v340_v56 = vadd.f32 %v339_v54, %v338_v52  ;;  %v347_v57 = vadd.f32 %v346_v55, %v345_v53  ;;  %v476_v52 = vld [vmem:[%s16657_s7 + $0xe0] sm:$0xff]  ;;  %v451_v55 = vld [vmem:[%s16657_s7 + $0x18] sm:$0xff] }
 0x371   :  { %v352_v58 = vpack.c.bf16 %v340_v56, %v340_v56  ;;  %v353_v59 = vpack.c.bf16 %v347_v57, %v347_v57  ;;  %v459_v56 = vld [vmem:[%s16657_s7 + $0x58] sm:$0xff]  ;;  %v454_v57 = vld [vmem:[%s16657_s7 + $0x30] sm:$0xff] }
 0x373   :  { %v361_v60 = vunpack.c.l.b16 %v352_v58  ;;  %v362_v61 = vunpack.c.l.b16 %v353_v59  ;;  %v462_v58 = vld [vmem:[%s16657_s7 + $0x70] sm:$0xff] }
 0x375   :  { %v364_v62 = vsel %vm363_vm7, %v362_v61, %v361_v60  ;;  %v10281_v60 = vcombine.high %v465_v49, %v473_v50  ;;  %v10287_v61 = vcombine.high %v468_v51, %v476_v52 }
 0x376   :  { %v365_v63 = vpack.c.b16 %v364_v62, %v364_v62  ;;  %v10280_v62 = vcombine.low %v465_v49, %v473_v50  ;;  %v12787_v49 = vld [vmem:[%s16658_s9 + $0x28] sm:$0xff]   ;;  %v12784_v50 = vld [vmem:[%s16658_s9 + $0x90] sm:$0xff]  }
 0x378   :  { %12681 = vmatmul.mubr.msk.bf16.vlgmr.msra.gmra.mrb[8].mxu0 %vm151_vm2, %v365_v63  ;;  %v10286_v63 = vcombine.low %v468_v51, %v476_v52  ;;  %v12786_v51 = vld [vmem:[%s16658_s9 + $0xd8] sm:$0xff]  }
 0x379   :  { %730 = vmatpush1.bf16.msra.mxu0 %v10262_v20  ;;  %761 = vmatprep.mubr.bf16.mxu0 %v13456_v39  ;;  %v12770_v20 = vld [vmem:[%s16658_s9] sm:$0xff]   ;;  %v12788_v52 = vld [vmem:[%s16658_s9 + $0x98] sm:$0xff]  }
 0x37a   :  { %731 = vmatprep.subr.bf16.mxu0 %v10279_v29  ;;  %v12772_v29 = vld [vmem:[%s16658_s9 + $0x8] sm:$0xff]  }
 0x37d   :  { %732 = vmatpush1.bf16.msra.mxu0 %v10278_v31  ;;  %v471_v31 = vld [vmem:[%s16657_s7 + $0xb8] sm:$0xff] }
 0x37e   :  { %770 = vmatprep.subr.bf16.mxu0 %v10265_v37 }
 0x44b   :  { %v415_v2 = vpop.f32.mrb[8].mxu0 }
 0x44c   :  { %v416_v3 = vadd.f32 %v10255_v1, %v415_v2  ;;  %v12682_v4 = vpop.f32.mrb[9].mxu0  ;;  %v467_v1 = vld [vmem:[%s16657_s7 + $0x98] sm:$0xff] }
 0x44d   :  { %v418_v5 = vpop.f32.mrb[10].mxu0  ;;  %v475_v2 = vld [vmem:[%s16657_s7 + $0xd8] sm:$0xff]  ;;  %v478_v4 = vld [vmem:[%s16657_s7 + $0xf0] sm:$0xff] }
 0x44e   :  { %v12683_v6 = vpop.f32.mrb[11].mxu0  ;;  %v421_v7 = vadd.f32 %v416_v3, %v13586_v8  ;;  %v450_v8 = vld [vmem:[%s16657_s7 + $0x10] sm:$0xff]  ;;  %v10269_v5 = vcombine.high %v451_v55, %v459_v56  ;;  %v10284_v16 = vcombine.low %v467_v1, %v475_v2 }
 0x44f   :  { %v10267_v21 = vcombine.high %v450_v8, %v458_v19  ;;  %v10266_v22 = vcombine.low %v450_v8, %v458_v19  ;;  %v470_v3 = vld [vmem:[%s16657_s7 + $0xb0] sm:$0xff]  ;;  %v10275_v6 = vcombine.high %v454_v57, %v462_v58  ;;  %v469_v8 = vld [vmem:[%s16657_s7 + $0xa8] sm:$0xff] }
 0x450   :  { %v424_v9 = vsel %vm333_vm6, %v421_v7, 0.0  ;;  %v10290_v17 = vcombine.low %v470_v3, %v478_v4  ;;  %v10289_v27 = vcombine.high %v469_v8, %v477_v18  ;;  %v10288_v30 = vcombine.low %v469_v8, %v477_v18 }
 0x451   :  { %425 = vadd.xlane.f32.xlu0 %v424_v9  ;;  %811 = vmatprep.subr.bf16.mxu1 %v10267_v21  ;;  %v10274_v9 = vcombine.low %v454_v57, %v462_v58  ;;  %v12792_v57 = vld [vmem:[%s16658_s9 + $0xa0] sm:$0xff]   ;;  %v12793_v58 = vld [vmem:[%s16658_s9 + $0x78] sm:$0xff]  }
 0x452   :  { %812 = vmatpush1.bf16.msra.mxu1 %v10266_v22  ;;  %v455_v22 = vld [vmem:[%s16657_s7 + $0x38] sm:$0xff] }
 0x453   :  { %813 = vmatprep.subr.bf16.mxu1 %v10283_v32  ;;  %v479_v32 = vld [vmem:[%s16657_s7 + $0xf8] sm:$0xff]  ;;  %v10277_v34 = vcombine.high %v455_v22, %v463_v24  ;;  %v10276_v35 = vcombine.low %v455_v22, %v463_v24 }
 0x454   :  { %v10293_v37 = vcombine.high %v471_v31, %v479_v32 }
 0x456   :  { %814 = vmatpush1.bf16.msra.mxu1 %v10282_v33  ;;  %v12773_v33 = vld [vmem:[%s16658_s9 + $0x50] sm:$0xff]  }
 0x457   :  { %893 = vmatprep.subr.bf16.mxu1 %v10271_v41  ;;  %v10292_v41 = vcombine.low %v471_v31, %v479_v32  ;;  %v13921_v31 = vsub.s32 7, %v13600_v23 }
 0x4de   :  { %v426_v10 = vpop.xlane.xlu0 %425 }
 0x4df   :  { %v428_v11 = vmul.f32 0.03125, %v426_v10  ;;  %v453_v10 = vld [vmem:[%s16657_s7 + $0x28] sm:$0xff] }
 0x4e1   :  { %v429_v12 = vsub.f32 %v421_v7, %v428_v11  ;;  %v10268_v7 = vcombine.low %v451_v55, %v459_v56  ;;  %v461_v11 = vld [vmem:[%s16657_s7 + $0x68] sm:$0xff]  ;;  %v12790_v55 = vld [vmem:[%s16658_s9 + $0xe0] sm:$0xff]   ;;  %v12791_v56 = vld [vmem:[%s16658_s9 + $0x30] sm:$0xff]  }
 0x4e2   :  { %v10273_v19 = vcombine.high %v453_v10, %v461_v11  ;;  %v10272_v21 = vcombine.low %v453_v10, %v461_v11  ;;  %v13902_v10 = vsub.s32 3, %v13600_v23  ;;  %v13905_v11 = vsub.s32 6, %v13600_v23 }
 0x4e3   :  { %v430_v13 = vmul.f32 %v429_v12, %v429_v12 }
 0x4e5   :  { %v431_v14 = vsel %vm333_vm6, %v430_v13, 0.0  ;;  %v10291_v13 = vcombine.high %v470_v3, %v478_v4  ;;  %v12803_v3 = vld [vmem:[%s16658_s9 + $0xb8] sm:$0xff]   ;;  %v12806_v4 = vld [vmem:[%s16658_s9 + $0x1c0] sm:$0xff]  }
 0x4e6   :  { %432 = vadd.xlane.f32.xlu1 %v431_v14  ;;  %v12769_v14 = vld [vmem:[%s16658_s9 + $0x40] sm:$0xff]  }
 0x573   :  { %v433_v42 = vpop.xlane.xlu1 %432 }
 0x574   :  { %v434_v43 = vmul.f32 0.03125, %v433_v42  ;;  %v12781_v42 = vld [vmem:[%s16658_s9 + $0x60] sm:$0xff]  }
 0x576   :  { %v435_v44 = vadd.f32 1e-05, %v434_v43  ;;  %v12776_v43 = vld [vmem:[%s16658_s9 + $0x80] sm:$0xff]  }
 0x578   :  { %13369 = vrsqrt.f32 %v435_v44  ;;  %v12778_v44 = vld [vmem:[%s16658_s9 + $0xc8] sm:$0xff]  }
 0x582   :  { %v13370_v46 = vpop.eup %13369 }
 0x583   :  { %v437_v48 = vmul.f32 %v13370_v46, %v429_v12  ;;  %v10285_v12 = vcombine.high %v467_v1, %v475_v2  ;;  %v12785_v46 = vld [vmem:[%s16658_s9 + $0x68] sm:$0xff]   ;;  %v12799_v1 = vld [vmem:[%s16658_s9 + $0xb0] sm:$0xff]   ;;  %v12801_v2 = vld [vmem:[%s16658_s9 + $0xf8] sm:$0xff]  }
 0x585   :  { %v442_v53 = vmul.f32 %v10259_v45, %v437_v48  ;;  %v12783_v45 = vld [vmem:[%s16658_s9 + $0x20] sm:$0xff]   ;;  %v12782_v48 = vld [vmem:[%s16658_s9 + $0xd0] sm:$0xff]  }
 0x587   :  { %v13711_v54 = vadd.f32 %v10260_v47, %v442_v53  ;;  %v12780_v47 = vld [vmem:[%s16658_s9 + $0x88] sm:$0xff]   ;;  %v12789_v53 = vld [vmem:[%s16658_s9 + $0x70] sm:$0xff]  }
 0x589   :  { %v13727_v59 = vpack.c.bf16 %v13711_v54, %v13711_v54 }
 0x58b   :  { %10294 = vmatmul.mubr.msk.bf16.vlgmr.msra.gmra.mrb[12].mxu0 %vm151_vm2, %v13727_v59  ;;  %10296 = vmatmul.mubr.msk.bf16.vlgmr.msra.gmra.mrb[0].mxu1 %vm151_vm2, %v13727_v59 }
 0x58c   :  { %771 = vmatpush1.bf16.msra.mxu0 %v10264_v36  ;;  %894 = vmatpush1.bf16.msra.mxu1 %v10270_v40  ;;  %v12777_v36 = vld [vmem:[%s16658_s9 + $0x58] sm:$0xff]  }
 0x58d   :  { %772 = vmatprep.subr.bf16.mxu0 %v10281_v60  ;;  %895 = vmatprep.subr.bf16.mxu1 %v10287_v61  ;;  %v12779_v40 = vld [vmem:[%s16658_s9 + $0x18] sm:$0xff]   ;;  %v12796_v61 = vld [vmem:[%s16658_s9 + $0xa8] sm:$0xff]  }
 0x58e   :  { %802 = vmatprep.mubr.bf16.mxu0 %v13456_v39  ;;  %925 = vmatprep.mubr.bf16.mxu1 %v13456_v39  ;;  %v12795_v60 = vld [vmem:[%s16658_s9 + $0x38] sm:$0xff]  }
 0x590   :  { %773 = vmatpush1.bf16.msra.mxu0 %v10280_v62  ;;  %896 = vmatpush1.bf16.msra.mxu1 %v10286_v63  ;;  %v12797_v62 = vld [vmem:[%s16658_s9 + $0xf0] sm:$0xff]   ;;  %v12798_v63 = vld [vmem:[%s16658_s9 + $0x140] sm:$0xff]  }
 0x591   :  { %852 = vmatprep.subr.bf16.mxu0 %v10269_v5  ;;  %975 = vmatprep.subr.bf16.mxu1 %v10275_v6  ;;  %v13890_v5 = vsub.s32 4, %v13600_v23  ;;  %v13893_v6 = vsub.s32 1, %v13600_v23 }
 0x593   :  { %10295 = vmatmul.mubr.msk.bf16.vlgmr.msra.gmra.mrb[16].mxu0 %vm151_vm2, %v13727_v59  ;;  %10298 = vmatmul.mubr.msk.bf16.vlgmr.msra.gmra.mrb[4].mxu1 %vm151_vm2, %v13727_v59 }
 0x594   :  { %853 = vmatpush1.bf16.msra.mxu0 %v10268_v7  ;;  %976 = vmatpush1.bf16.msra.mxu1 %v10274_v9  ;;  %v13896_v7 = vsub.s32 5, %v13600_v23  ;;  %v13899_v9 = vsub.s32 2, %v13600_v23 }
 0x595   :  { %854 = vmatprep.subr.bf16.mxu0 %v10285_v12  ;;  %977 = vmatprep.subr.bf16.mxu1 %v10291_v13  ;;  %v13910_v12 = vld [vmem:[%s16661_s8] ss:$4 sm:$0xff] }
 0x596   :  { %884 = vmatprep.mubr.bf16.mxu0 %v13456_v39  ;;  %1007 = vmatprep.mubr.bf16.mxu1 %v13456_v39  ;;  %v489_v13 = vrot.slane %v13910_v12, %v13608_v28 }
 0x598   :  { %855 = vmatpush1.bf16.msra.mxu0 %v10284_v16  ;;  %978 = vmatpush1.bf16.msra.mxu1 %v10290_v17  ;;  %v509_v16 = vrot.slane %v13910_v12, %v13896_v7 }
 0x599   :  { %934 = vmatprep.subr.bf16.mxu0 %v10273_v19  ;;  %11931 = vmatprep.subr.bf16.mxu1 %v12769_v14  ;;  %v493_v14 = vrot.slane %v13910_v12, %v13893_v6 }
 0x59b   :  { %10297 = vmatmul.mubr.msk.bf16.vlgmr.msra.gmra.mrb[20].mxu0 %vm151_vm2, %v13727_v59  ;;  %10300 = vmatmul.mubr.msk.bf16.vlgmr.msra.gmra.mrb[8].mxu1 %vm151_vm2, %v13727_v59 }
 0x59c   :  { %935 = vmatpush1.bf16.msra.mxu0 %v10272_v21  ;;  %966 = vmatprep.mubr.bf16.mxu0 %v13456_v39 }
 0x59d   :  { %936 = vmatprep.subr.bf16.mxu0 %v10289_v27  ;;  %11932 = vmatpush3.bf16.msra.mxu1 %v12770_v20 }
 0x59e   :  { %11933 = vmatprep.subr.bf16.mxu1 %v12771_v26 }
 0x5a0   :  { %937 = vmatpush1.bf16.msra.mxu0 %v10288_v30 }
 0x5a1   :  { %1016 = vmatprep.subr.bf16.mxu0 %v10277_v34  ;;  %11934 = vmatpush3.bf16.msra.mxu1 %v12772_v29  ;;  %v12800_v34 = vld [vmem:[%s16658_s9 + $0x100] sm:$0xff]  }
 0x5a2   :  { %11935 = vmatprep.subr.bf16.mxu1 %v12773_v33 }
 0x5a3   :  { %10299 = vmatmul.mubr.msk.bf16.vlgmr.msra.gmra.mrb[24].mxu0 %vm151_vm2, %v13727_v59 }
 0x5a4   :  { %1017 = vmatpush1.bf16.msra.mxu0 %v10276_v35  ;;  %1048 = vmatprep.mubr.bf16.mxu0 %v13456_v39  ;;  %v12802_v35 = vld [vmem:[%s16658_s9 + $0x148] sm:$0xff]  }
 0x5a5   :  { %1018 = vmatprep.subr.bf16.mxu0 %v10293_v37  ;;  %11936 = vmatpush3.bf16.msra.mxu1 %v12775_v15  ;;  %v497_v15 = vrot.slane %v13910_v12, %v13899_v9  ;;  %v501_v37 = vrot.slane %v13910_v12, %v13902_v10 }
 0x5a6   :  { %11937 = vmatprep.subr.bf16.mxu1 %v12777_v36 }
 0x5a8   :  { %1019 = vmatpush1.bf16.msra.mxu0 %v10292_v41 }
 0x5a9   :  { %11953 = vmatprep.subr.bf16.mxu0 %v12774_v38  ;;  %11938 = vmatpush3.bf16.msra.mxu1 %v12779_v40 }
 0x5aa   :  { %11939 = vmatprep.subr.bf16.mxu1 %v12781_v42  ;;  %v12804_v42 = vld [vmem:[%s16658_s9 + $0x108] sm:$0xff]  }
 0x5ab   :  { %10301 = vmatmul.mubr.msk.bf16.vlgmr.msra.gmra.mrb[28].mxu0 %vm151_vm2, %v13727_v59  ;;  %v12794_v59 = vld [vmem:[%s16658_s9 + $0xe8] sm:$0xff]  }
 0x5ac   :  { %11954 = vmatpush3.bf16.msra.mxu0 %v12776_v43 }
 0x5ad   :  { %11955 = vmatprep.subr.bf16.mxu0 %v12778_v44  ;;  %11940 = vmatpush3.bf16.msra.mxu1 %v12783_v45 }
 0x5ae   :  { %11941 = vmatprep.subr.bf16.mxu1 %v12785_v46 }
 0x5b0   :  { %11956 = vmatpush3.bf16.msra.mxu0 %v12780_v47 }
 0x5b1   :  { %11957 = vmatprep.subr.bf16.mxu0 %v12782_v48  ;;  %11942 = vmatpush3.bf16.msra.mxu1 %v12787_v49 }
 0x5b2   :  { %11943 = vmatprep.subr.bf16.mxu1 %v12789_v53 }
 0x5b4   :  { %11958 = vmatpush3.bf16.msra.mxu0 %v12784_v50 }
 0x5b5   :  { %11959 = vmatprep.subr.bf16.mxu0 %v12786_v51  ;;  %11944 = vmatpush3.bf16.msra.mxu1 %v12791_v56  ;;  %v12808_v56 = vld [vmem:[%s16658_s9 + $0x180] sm:$0xff]  }
 0x5b6   :  { %11945 = vmatprep.subr.bf16.mxu1 %v12793_v58  ;;  %v12810_v58 = vld [vmem:[%s16658_s9 + $0x1c8] sm:$0xff]  }
 0x5b8   :  { %11960 = vmatpush3.bf16.msra.mxu0 %v12788_v52  ;;  %v12805_v52 = vld [vmem:[%s16658_s9 + $0x150] sm:$0xff]  }
 0x5b9   :  { %11961 = vmatprep.subr.bf16.mxu0 %v12790_v55  ;;  %11946 = vmatpush3.bf16.msra.mxu1 %v12795_v60  ;;  %v12807_v55 = vld [vmem:[%s16658_s9 + $0x110] sm:$0xff]   ;;  %v517_v60 = vrot.slane %v13910_v12, %v13921_v31 }
 0x5ba   :  { %11975 = vmatprep.subr.bf16.mxu1 %v12798_v63 }
 0x5bc   :  { %11962 = vmatpush3.bf16.msra.mxu0 %v12792_v57  ;;  %v12809_v57 = vld [vmem:[%s16658_s9 + $0x158] sm:$0xff]  }
 0x5bd   :  { %11963 = vmatprep.subr.bf16.mxu0 %v12794_v59 }
 0x5c0   :  { %11964 = vmatpush3.bf16.msra.mxu0 %v12796_v61 }
 0x5c1   :  { %11965 = vmatprep.subr.bf16.mxu0 %v12797_v62  ;;  %v13958_v62 = vld [vmem:[%s16661_s8 + $0x20] ss:$4 sm:$0xff] }
 0x5c4   :  { %11966 = vmatpush3.bf16.msra.mxu0 %v12799_v1 }
 0x5c5   :  { %11967 = vmatprep.subr.bf16.mxu0 %v12801_v2  ;;  %v12811_v2 = vld [vmem:[%s16658_s9 + $0x118] sm:$0xff]  }
 0x5c8   :  { %11968 = vmatpush3.bf16.msra.mxu0 %v12803_v3  ;;  %v12812_v3 = vld [vmem:[%s16658_s9 + $0x188] sm:$0xff]  }
 0x5c9   :  { %11997 = vmatprep.subr.bf16.mxu0 %v12806_v4 }
 0x65e   :  { %v763_v17 = vpop.f32.mrb[12].mxu0  ;;  %v13918_v8 = vpop.f32.mrb[0].mxu1 }
 0x65f   :  { %v764_v18 = vadd.f32 %v763_v17, %v489_v13  ;;  %v765_v19 = vpop.f32.mrb[13].mxu0  ;;  %v847_v20 = vpop.f32.mrb[1].mxu1 }
 0x660   :  { %v766_v21 = vadd.f32 %v765_v19, %v493_v14  ;;  %v848_v22 = vadd.f32 %v847_v20, %v509_v16  ;;  %v767_v24 = vpop.f32.mrb[14].mxu0  ;;  %v849_v26 = vpop.f32.mrb[2].mxu1  ;;  %v12813_v20 = vld [vmem:[%s16658_s9 + $0x160] sm:$0xff]  }
 0x661   :  { %v1057_v27 = vmax.f32 %v764_v18, 0.0  ;;  %v768_v29 = vpop.f32.mrb[15].mxu0  ;;  %v850_v30 = vpop.f32.mrb[3].mxu1  ;;  %v521_v24 = vrot.slane %v13958_v62, %v13608_v28 }
 0x662   :  { %v1058_v32 = vmax.f32 %v766_v21, 0.0  ;;  %v1062_v33 = vmax.f32 %v848_v22, 0.0  ;;  %v12814_v21 = vld [vmem:[%s16658_s9 + $0x1d0] sm:$0xff]   ;;  %v505_v22 = vrot.slane %v13910_v12, %v13890_v5  ;;  %v12817_v30 = vld [vmem:[%s16658_s9 + $0x168] sm:$0xff]  }
 0x663   :  { %v1329_v38 = vpack.c.bf16 %v1057_v27, %v1057_v27  ;;  %v12815_v27 = vld [vmem:[%s16658_s9 + $0x120] sm:$0xff]   ;;  %v12816_v29 = vld [vmem:[%s16658_s9 + $0x190] sm:$0xff]  }
 0x664   :  { %v1330_v36 = vpack.c.bf16 %v1058_v32, %v1058_v32  ;;  %v1334_v23 = vpack.c.bf16 %v1062_v33, %v1062_v33  ;;  %v12818_v32 = vld [vmem:[%s16658_s9 + $0x1d8] sm:$0xff]  }
 0x666   :  { %v804_v40 = vpop.f32.mrb[16].mxu0  ;;  %v927_v41 = vpop.f32.mrb[4].mxu1  ;;  %2150 = vmatprep.mubr.bf16.mxu1 %v1330_v36 }
 0x667   :  { %v805_v43 = vadd.f32 %v804_v40, %v497_v15  ;;  %v806_v44 = vpop.f32.mrb[17].mxu0  ;;  %v13936_v45 = vpop.f32.mrb[5].mxu1  ;;  %2151 = vmatmul.mubr.bf16.vlgmr.msra.gmra.mrb[12].mxu1 %v1329_v38  ;;  %v13993_v15 = vadd.f32 %v927_v41, %v521_v24  ;;  %v513_v38 = vrot.slane %v13910_v12, %v13905_v11  ;;  %v541_v40 = vrot.slane %v13958_v62, %v13896_v7  ;;  %v12822_v12 = vld [vmem:[%s16658_s9 + $0x1e0] sm:$0xff]  }
 0x668   :  { %v807_v46 = vadd.f32 %v806_v44, %v501_v37  ;;  %11976 = vmatpush3.bf16.msra.mxu1 %v12800_v34  ;;  %v808_v47 = vpop.f32.mrb[18].mxu0  ;;  %v931_v48 = vpop.f32.mrb[6].mxu1  ;;  %2230 = vmatprep.mubr.bf16.mxu1 %v1334_v23  ;;  %v13991_v34 = vadd.f32 %v13918_v8, %v505_v22  ;;  %v12819_v37 = vld [vmem:[%s16658_s9 + $0x128] sm:$0xff]   ;;  %v12820_v8 = vld [vmem:[%s16658_s9 + $0x198] sm:$0xff]  }
 0x669   :  { %v1059_v49 = vmax.f32 %v805_v43, 0.0  ;;  %v809_v50 = vpop.f32.mrb[19].mxu0  ;;  %v932_v51 = vpop.f32.mrb[7].mxu1  ;;  %11977 = vmatprep.subr.bf16.mxu1 %v12802_v35  ;;  %v525_v35 = vrot.slane %v13958_v62, %v13893_v6  ;;  %v529_v43 = vrot.slane %v13958_v62, %v13899_v9  ;;  %v1065_v47 = vmax.f32 %v13993_v15, 0.0  ;;  %v12869_v15 = vld [vmem:[%s16658_s9 + $0x350] sm:$0xff]  }
 0x66a   :  { %v1060_v53 = vmax.f32 %v807_v46, 0.0  ;;  %v1061_v46 = vmax.f32 %v13991_v34, 0.0  ;;  %v12823_v50 = vld [vmem:[%s16658_s9 + $0x130] sm:$0xff]   ;;  %v12824_v51 = vld [vmem:[%s16658_s9 + $0x1a0] sm:$0xff]   ;;  %v12836_v34 = vld [vmem:[%s16658_s9 + $0x208] sm:$0xff]  }
 0x66b   :  { %v1331_v61 = vpack.c.bf16 %v1059_v49, %v1059_v49  ;;  %v930_v48 = vadd.f32 %v13936_v45, %v525_v35  ;;  %v533_v49 = vrot.slane %v13958_v62, %v13902_v10  ;;  %v12826_v45 = vld [vmem:[%s16658_s9 + $0x1e8] sm:$0xff]  }
 0x66c   :  { %v1332_v59 = vpack.c.bf16 %v1060_v53, %v1060_v53  ;;  %11978 = vmatpush3.bf16.msra.mxu1 %v12804_v42  ;;  %v12821_v42 = vld [vmem:[%s16658_s9 + $0x170] sm:$0xff]   ;;  %v545_v53 = vrot.slane %v13958_v62, %v13905_v11 }
 0x66d   :  { %11979 = vmatprep.subr.bf16.mxu1 %v12805_v52 }
 0x66e   :  { %v886_v63 = vpop.f32.mrb[20].mxu0  ;;  %v13960_v1 = vpop.f32.mrb[8].mxu1  ;;  %2190 = vmatprep.mubr.bf16.mxu0 %v1332_v59  ;;  %v1066_v59 = vmax.f32 %v930_v48, 0.0  ;;  %v12847_v48 = vld [vmem:[%s16658_s9 + $0x220] sm:$0xff]  }
 0x66f   :  { %v888_v4 = vpop.f32.mrb[21].mxu0  ;;  %v1011_v13 = vpop.f32.mrb[9].mxu1  ;;  %2191 = vmatmul.mubr.bf16.vlgmr.msra.gmra.mrb[32].mxu0 %v1331_v61  ;;  %v887_v52 = vadd.f32 %v886_v63, %v513_v38  ;;  %v12827_v63 = vld [vmem:[%s16658_s9 + $0x138] sm:$0xff]   ;;  %v12839_v38 = vld [vmem:[%s16658_s9 + $0x210] sm:$0xff]  }
 0x670   :  { %v889_v14 = vadd.f32 %v888_v4, %v517_v60  ;;  %11980 = vmatpush3.bf16.msra.mxu1 %v12807_v55  ;;  %11998 = vmatpush3.bf16.msra.mxu0 %v12808_v56  ;;  %v890_v16 = vpop.f32.mrb[22].mxu0  ;;  %v1013_v17 = vpop.f32.mrb[10].mxu1  ;;  %v12825_v55 = vld [vmem:[%s16658_s9 + $0x178] sm:$0xff]   ;;  %v14034_v56 = vadd.f32 %v1011_v13, %v541_v40  ;;  %v1338_v35 = vpack.c.bf16 %v1066_v59, %v1066_v59  ;;  %v12842_v40 = vld [vmem:[%s16658_s9 + $0x2c8] sm:$0xff]   ;;  %v12856_v59 = vld [vmem:[%s16658_s9 + $0x2a0] sm:$0xff]  }
 0x671   :  { %v891_v18 = vpop.f32.mrb[23].mxu0  ;;  %v1014_v19 = vpop.f32.mrb[11].mxu1  ;;  %11981 = vmatprep.subr.bf16.mxu1 %v12809_v57  ;;  %11999 = vmatprep.subr.bf16.mxu0 %v12810_v58  ;;  %v549_v57 = vrot.slane %v13958_v62, %v13921_v31  ;;  %v12830_v16 = vld [vmem:[%s16658_s9 + $0x240] sm:$0xff]  }
 0x672   :  { %v1064_v26 = vmax.f32 %v889_v14, 0.0  ;;  %v12829_v14 = vld [vmem:[%s16658_s9 + $0x1f0] sm:$0xff]   ;;  %v1070_v17 = vmax.f32 %v14034_v56, 0.0 }
 0x673   :  { %v12871_v56 = vld [vmem:[%s16658_s9 + $0x310] sm:$0xff]  }
 0x674   :  { %v1336_v33 = vpack.c.bf16 %v1064_v26, %v1064_v26  ;;  %11982 = vmatpush3.bf16.msra.mxu1 %v12811_v2  ;;  %12000 = vmatpush3.bf16.msra.mxu0 %v12812_v3  ;;  %v12828_v2 = vld [vmem:[%s16658_s9 + $0x1a8] sm:$0xff]   ;;  %v1063_v3 = vmax.f32 %v887_v52, 0.0  ;;  %v12831_v26 = vld [vmem:[%s16658_s9 + $0x1b0] sm:$0xff]  }
 0x675   :  { %11983 = vmatprep.subr.bf16.mxu1 %v12813_v20  ;;  %12001 = vmatprep.subr.bf16.mxu0 %v12814_v21  ;;  %v12851_v52 = vld [vmem:[%s16658_s9 + $0x228] sm:$0xff]  }
 0x676   :  { %v968_v36 = vpop.f32.mrb[24].mxu0  ;;  %2270 = vmatprep.mubr.bf16.mxu0 %v1336_v33  ;;  %v12835_v33 = vld [vmem:[%s16658_s9 + $0x1b8] sm:$0xff]  }
 0x677   :  { %v970_v23 = vpop.f32.mrb[25].mxu0  ;;  %v14038_v58 = vadd.f32 %v968_v36, %v529_v43  ;;  %v12837_v36 = vld [vmem:[%s16658_s9 + $0x250] sm:$0xff]   ;;  %v12844_v43 = vld [vmem:[%s16658_s9 + $0x288] sm:$0xff]  }
 0x678   :  { %11984 = vmatpush3.bf16.msra.mxu1 %v12815_v27  ;;  %12002 = vmatpush3.bf16.msra.mxu0 %v12816_v29  ;;  %v972_v41 = vpop.f32.mrb[26].mxu0  ;;  %v971_v60 = vadd.f32 %v970_v23, %v533_v49  ;;  %v12832_v27 = vld [vmem:[%s16658_s9 + $0x200] sm:$0xff]   ;;  %v12833_v29 = vld [vmem:[%s16658_s9 + $0x1f8] sm:$0xff]   ;;  %v12848_v49 = vld [vmem:[%s16658_s9 + $0x290] sm:$0xff]  }
 0x679   :  { %v973_v44 = vpop.f32.mrb[27].mxu0  ;;  %11985 = vmatprep.subr.bf16.mxu1 %v12817_v30  ;;  %12003 = vmatprep.subr.bf16.mxu0 %v12818_v32  ;;  %v1067_v20 = vmax.f32 %v14038_v58, 0.0  ;;  %v12834_v30 = vld [vmem:[%s16658_s9 + $0x248] sm:$0xff]   ;;  %v1333_v32 = vpack.c.bf16 %v1061_v46, %v1061_v46  ;;  %v12840_v23 = vld [vmem:[%s16658_s9 + $0x280] sm:$0xff]   ;;  %v1335_v41 = vpack.c.bf16 %v1063_v3, %v1063_v3  ;;  %v12846_v46 = vld [vmem:[%s16658_s9 + $0x2d0] sm:$0xff]  }
 0x67a   :  { %v1068_v22 = vmax.f32 %v971_v60, 0.0  ;;  %v12857_v60 = vld [vmem:[%s16658_s9 + $0x278] sm:$0xff]   ;;  %v12861_v3 = vld [vmem:[%s16658_s9 + $0x2f0] sm:$0xff]   ;;  %v12877_v58 = vld [vmem:[%s16658_s9 + $0x360] sm:$0xff]  }
 0x67c   :  { %11986 = vmatpush3.bf16.msra.mxu1 %v12819_v37  ;;  %12004 = vmatpush3.bf16.msra.mxu0 %v12820_v8  ;;  %v12838_v37 = vld [vmem:[%s16658_s9 + $0x2c0] sm:$0xff]   ;;  %v12841_v8 = vld [vmem:[%s16658_s9 + $0x258] sm:$0xff]   ;;  %v1340_v44 = vpack.c.bf16 %v1068_v22, %v1068_v22  ;;  %v1337_v22 = vpack.c.bf16 %v1065_v47, %v1065_v47 }
 0x67d   :  { %11987 = vmatprep.subr.bf16.mxu1 %v12821_v42  ;;  %12005 = vmatprep.subr.bf16.mxu0 %v12822_v12  ;;  %v12843_v42 = vld [vmem:[%s16658_s9 + $0x218] sm:$0xff]   ;;  %v12845_v12 = vld [vmem:[%s16658_s9 + $0x260] sm:$0xff]  }
 0x67e   :  { %v1050_v61 = vpop.f32.mrb[28].mxu0  ;;  %v12870_v47 = vld [vmem:[%s16658_s9 + $0x3c0] sm:$0xff]  }
 0x67f   :  { %v14046_v4 = vadd.f32 %v1050_v61, %v545_v53  ;;  %v1052_v13 = vpop.f32.mrb[29].mxu0  ;;  %v12852_v53 = vld [vmem:[%s16658_s9 + $0x298] sm:$0xff]   ;;  %v12858_v61 = vld [vmem:[%s16658_s9 + $0x2e8] sm:$0xff]  }
 0x680   :  { %v14055_v18 = vadd.f32 %v1052_v13, %v549_v57  ;;  %11988 = vmatpush3.bf16.msra.mxu1 %v12823_v50  ;;  %12006 = vmatpush3.bf16.msra.mxu0 %v12824_v51  ;;  %v1054_v19 = vpop.f32.mrb[30].mxu0  ;;  %v12849_v50 = vld [vmem:[%s16658_s9 + $0x268] sm:$0xff]   ;;  %v12850_v51 = vld [vmem:[%s16658_s9 + $0x2d8] sm:$0xff]   ;;  %v12855_v57 = vld [vmem:[%s16658_s9 + $0x230] sm:$0xff]  }
 0x681   :  { %v1055_v21 = vpop.f32.mrb[31].mxu0  ;;  %11989 = vmatprep.subr.bf16.mxu1 %v12825_v55  ;;  %12007 = vmatprep.subr.bf16.mxu0 %v12826_v45  ;;  %v12853_v55 = vld [vmem:[%s16658_s9 + $0x270] sm:$0xff]   ;;  %v12854_v45 = vld [vmem:[%s16658_s9 + $0x2e0] sm:$0xff]   ;;  %v12865_v19 = vld [vmem:[%s16658_s9 + $0x2f8] sm:$0xff]  }
 0x682   :  { %v1072_v24 = vmax.f32 %v14055_v18, 0.0  ;;  %v12862_v13 = vld [vmem:[%s16658_s9 + $0x340] sm:$0xff]   ;;  %v12866_v21 = vld [vmem:[%s16658_s9 + $0x348] sm:$0xff]  }
 0x683   :  { %v12879_v18 = vld [vmem:[%s16658_s9 + $0x320] sm:$0xff]  }
 0x684   :  { %11990 = vmatpush3.bf16.msra.mxu1 %v12827_v63  ;;  %12008 = vmatpush3.bf16.msra.mxu0 %v12828_v2  ;;  %v12859_v63 = vld [vmem:[%s16658_s9 + $0x238] sm:$0xff]   ;;  %v12860_v2 = vld [vmem:[%s16658_s9 + $0x2a8] sm:$0xff]  }
 0x685   :  { %12009 = vmatprep.subr.bf16.mxu0 %v12829_v14  ;;  %12019 = vmatprep.subr.bf16.mxu1 %v12830_v16  ;;  %v12863_v14 = vld [vmem:[%s16658_s9 + $0x2b0] sm:$0xff]   ;;  %v12864_v16 = vld [vmem:[%s16658_s9 + $0x300] sm:$0xff]  }
 0x687   :  { %2231 = vmatmul.mubr.bf16.vlgmr.msra.gmra.mrb[16].mxu1 %v1333_v32  ;;  %v12874_v32 = vld [vmem:[%s16658_s9 + $0x3c8] sm:$0xff]  }
 0x688   :  { %12010 = vmatpush3.bf16.msra.mxu0 %v12831_v26  ;;  %12020 = vmatpush3.bf16.msra.mxu1 %v12832_v27  ;;  %v12867_v26 = vld [vmem:[%s16658_s9 + $0x2b8] sm:$0xff]   ;;  %v12868_v27 = vld [vmem:[%s16658_s9 + $0x308] sm:$0xff]  }
 0x689   :  { %2310 = vmatprep.mubr.bf16.mxu1 %v1338_v35  ;;  %12011 = vmatprep.subr.bf16.mxu0 %v12833_v29  ;;  %v1342_v29 = vpack.c.bf16 %v1070_v17, %v1070_v17  ;;  %v12872_v17 = vld [vmem:[%s16658_s9 + $0x380] sm:$0xff]   ;;  %v12876_v35 = vld [vmem:[%s16658_s9 + $0x388] sm:$0xff]  }
 0x68a   :  { %12021 = vmatprep.subr.bf16.mxu1 %v12834_v30  ;;  %v12873_v30 = vld [vmem:[%s16658_s9 + $0x358] sm:$0xff]  }
 0x68c   :  { %12012 = vmatpush3.bf16.msra.mxu0 %v12835_v33  ;;  %12022 = vmatpush3.bf16.msra.mxu1 %v12836_v34  ;;  %v1339_v33 = vpack.c.bf16 %v1067_v20, %v1067_v20  ;;  %v12875_v34 = vld [vmem:[%s16658_s9 + $0x318] sm:$0xff]   ;;  %v12878_v20 = vld [vmem:[%s16658_s9 + $0x3d0] sm:$0xff]  }
 0x68d   :  { %12023 = vmatprep.subr.bf16.mxu1 %v12837_v36  ;;  %12041 = vmatprep.subr.bf16.mxu0 %v12838_v37  ;;  %v1344_v36 = vpack.c.bf16 %v1072_v24, %v1072_v24  ;;  %v12880_v24 = vld [vmem:[%s16658_s9 + $0x390] sm:$0xff]   ;;  %v12881_v37 = vld [vmem:[%s16658_s9 + $0x368] sm:$0xff]  }
 0x68f   :  { %2271 = vmatmul.mubr.bf16.vlgmr.msra.gmra.mrb[36].mxu0 %v1335_v41  ;;  %v12885_v41 = vld [vmem:[%s16658_s9 + $0x370] sm:$0xff]  }
 0x690   :  { %12024 = vmatpush3.bf16.msra.mxu1 %v12839_v38  ;;  %12042 = vmatpush3.bf16.msra.mxu0 %v12840_v23  ;;  %v12882_v38 = vld [vmem:[%s16658_s9 + $0x3d8] sm:$0xff]   ;;  %v12883_v23 = vld [vmem:[%s16658_s9 + $0x328] sm:$0xff]  }
 0x691   :  { %2350 = vmatprep.mubr.bf16.mxu0 %v1340_v44  ;;  %12025 = vmatprep.subr.bf16.mxu1 %v12841_v8  ;;  %v12884_v8 = vld [vmem:[%s16658_s9 + $0x398] sm:$0xff]  }
 0x692   :  { %12043 = vmatprep.subr.bf16.mxu0 %v12842_v40  ;;  %v537_v40 = vrot.slane %v13958_v62, %v13890_v5  ;;  %v12888_v62 = vld [vmem:[%s16658_s9 + $0x3a0] sm:$0xff]  }
 0x694   :  { %12026 = vmatpush3.bf16.msra.mxu1 %v12843_v42  ;;  %12044 = vmatpush3.bf16.msra.mxu0 %v12844_v43  ;;  %v12886_v42 = vld [vmem:[%s16658_s9 + $0x3e0] sm:$0xff]   ;;  %v12887_v43 = vld [vmem:[%s16658_s9 + $0x330] sm:$0xff]   ;;  %v1010_v44 = vadd.f32 %v13960_v1, %v537_v40  ;;  %v12892_v1 = vld [vmem:[%s16658_s9 + $0x3a8] sm:$0xff]  }
 0x695   :  { %12027 = vmatprep.subr.bf16.mxu1 %v12845_v12  ;;  %12045 = vmatprep.subr.bf16.mxu0 %v12846_v46  ;;  %v12889_v12 = vld [vmem:[%s16658_s9 + $0x378] sm:$0xff]   ;;  %v12890_v46 = vld [vmem:[%s16658_s9 + $0x3e8] sm:$0xff]  }
 0x698   :  { %12028 = vmatpush3.bf16.msra.mxu1 %v12847_v48  ;;  %12046 = vmatpush3.bf16.msra.mxu0 %v12848_v49  ;;  %v12891_v48 = vld [vmem:[%s16658_s9 + $0x338] sm:$0xff]   ;;  %v1069_v49 = vmax.f32 %v1010_v44, 0.0 }
 0x699   :  { %12029 = vmatprep.subr.bf16.mxu1 %v12849_v50  ;;  %12047 = vmatprep.subr.bf16.mxu0 %v12850_v51  ;;  %v12893_v50 = vld [vmem:[%s16658_s9 + $0x3f0] sm:$0xff]  }
 0x69a   :  { %v12894_v51 = vld [vmem:[%s16658_s9 + $0x3b0] sm:$0xff]  }
 0x69c   :  { %12030 = vmatpush3.bf16.msra.mxu1 %v12851_v52  ;;  %12048 = vmatpush3.bf16.msra.mxu0 %v12852_v53  ;;  %v1341_v52 = vpack.c.bf16 %v1069_v49, %v1069_v49  ;;  %v12895_v53 = vld [vmem:[%s16658_s9 + $0x3f8] sm:$0xff]  }
 0x69d   :  { %12031 = vmatprep.subr.bf16.mxu1 %v12853_v55  ;;  %12049 = vmatprep.subr.bf16.mxu0 %v12854_v45  ;;  %v12896_v55 = vld [vmem:[%s16658_s9 + $0x3b8] sm:$0xff]   ;;  %v1071_v45 = vmax.f32 %v14046_v4, 0.0 }
 0x6a0   :  { %12032 = vmatpush3.bf16.msra.mxu1 %v12855_v57  ;;  %12050 = vmatpush3.bf16.msra.mxu0 %v12856_v59  ;;  %v1343_v57 = vpack.c.bf16 %v1071_v45, %v1071_v45 }
 0x6a1   :  { %12033 = vmatprep.subr.bf16.mxu1 %v12857_v60  ;;  %12051 = vmatprep.subr.bf16.mxu0 %v12858_v61 }
 0x6a4   :  { %12034 = vmatpush3.bf16.msra.mxu1 %v12859_v63  ;;  %12052 = vmatpush3.bf16.msra.mxu0 %v12860_v2 }
 0x6a5   :  { %12053 = vmatprep.subr.bf16.mxu0 %v12861_v3  ;;  %12063 = vmatprep.subr.bf16.mxu1 %v12862_v13  ;;  %v10302_v3 = vld [vmem:[%s16662_s10] ss:$0 sm:$0xff] }
 0x6a7   :  { %2311 = vmatmul.mubr.bf16.vlgmr.msra.gmra.mrb[20].mxu1 %v1337_v22 }
 0x6a8   :  { %12054 = vmatpush3.bf16.msra.mxu0 %v12863_v14  ;;  %12064 = vmatpush3.bf16.msra.mxu1 %v12864_v16 }
 0x6a9   :  { %2390 = vmatprep.mubr.bf16.mxu1 %v1342_v29  ;;  %12055 = vmatprep.subr.bf16.mxu0 %v12865_v19 }
 0x6aa   :  { %12065 = vmatprep.subr.bf16.mxu1 %v12866_v21 }
 0x6ac   :  { %12056 = vmatpush3.bf16.msra.mxu0 %v12867_v26  ;;  %12066 = vmatpush3.bf16.msra.mxu1 %v12868_v27 }
 0x6ad   :  { %12067 = vmatprep.subr.bf16.mxu1 %v12869_v15  ;;  %12085 = vmatprep.subr.bf16.mxu0 %v12870_v47 }
 0x6af   :  { %2351 = vmatmul.mubr.bf16.vlgmr.msra.gmra.mrb[40].mxu0 %v1339_v33 }
 0x6b0   :  { %12068 = vmatpush3.bf16.msra.mxu1 %v12871_v56  ;;  %12086 = vmatpush3.bf16.msra.mxu0 %v12872_v17 }
 0x6b1   :  { %2430 = vmatprep.mubr.bf16.mxu0 %v1344_v36  ;;  %12069 = vmatprep.subr.bf16.mxu1 %v12873_v30 }
 0x6b2   :  { %12087 = vmatprep.subr.bf16.mxu0 %v12874_v32 }
 0x6b4   :  { %12070 = vmatpush3.bf16.msra.mxu1 %v12875_v34  ;;  %12088 = vmatpush3.bf16.msra.mxu0 %v12876_v35 }
 0x6b5   :  { %12071 = vmatprep.subr.bf16.mxu1 %v12877_v58  ;;  %12089 = vmatprep.subr.bf16.mxu0 %v12878_v20 }
 0x6b8   :  { %12072 = vmatpush3.bf16.msra.mxu1 %v12879_v18  ;;  %12090 = vmatpush3.bf16.msra.mxu0 %v12880_v24 }
 0x6b9   :  { %12073 = vmatprep.subr.bf16.mxu1 %v12881_v37  ;;  %12091 = vmatprep.subr.bf16.mxu0 %v12882_v38 }
 0x6bc   :  { %12074 = vmatpush3.bf16.msra.mxu1 %v12883_v23  ;;  %12092 = vmatpush3.bf16.msra.mxu0 %v12884_v8 }
 0x6bd   :  { %12075 = vmatprep.subr.bf16.mxu1 %v12885_v41  ;;  %12093 = vmatprep.subr.bf16.mxu0 %v12886_v42 }
 0x6c0   :  { %12076 = vmatpush3.bf16.msra.mxu1 %v12887_v43  ;;  %12094 = vmatpush3.bf16.msra.mxu0 %v12888_v62 }
 0x6c1   :  { %12077 = vmatprep.subr.bf16.mxu1 %v12889_v12  ;;  %12095 = vmatprep.subr.bf16.mxu0 %v12890_v46 }
 0x6c4   :  { %12078 = vmatpush3.bf16.msra.mxu1 %v12891_v48  ;;  %12096 = vmatpush3.bf16.msra.mxu0 %v12892_v1 }
 0x6c5   :  { %12097 = vmatprep.subr.bf16.mxu0 %v12893_v50  ;;  %12684 = vmatprep.subr.bf16.mxu1 %v13445_v0 }
 0x6c7   :  { %2391 = vmatmul.mubr.bf16.vlgmr.msra.gmra.mrb[24].mxu1 %v1341_v52 }
 0x6c8   :  { %12098 = vmatpush3.bf16.msra.mxu0 %v12894_v51  ;;  %12688 = vmatprep.mubr.msk.bf16.mxu1 %vm13446_vm0, %v13445_v0 }
 0x6c9   :  { %12099 = vmatprep.subr.bf16.mxu0 %v12895_v53 }
 0x6cc   :  { %12100 = vmatpush3.bf16.msra.mxu0 %v12896_v55 }
 0x6cd   :  { %12692 = vmatprep.subr.bf16.mxu0 %v13445_v0 }
 0x6cf   :  { %2431 = vmatmul.mubr.bf16.vlgmr.msra.gmra.mrb[44].mxu0 %v1343_v57 }
 0x6d0   :  { %12696 = vmatprep.mubr.msk.bf16.mxu0 %vm13446_vm0, %v13445_v0 }
 0x73a   :  { %v11947_v59 = vpop.f32.mrb[12].mxu1 }
 0x73b   :  { %v11948_v60 = vpop.f32.mrb[13].mxu1 }
 0x73c   :  { %v11949_v61 = vadd.f32 %v11948_v60, %v11947_v59  ;;  %v11950_v63 = vpop.f32.mrb[14].mxu1 }
 0x73d   :  { %v11951_v2 = vpop.f32.mrb[15].mxu1 }
 0x73e   :  { %v2153_v14 = vadd.f32 %v11949_v61, %v10302_v3  ;;  %v12897_v2 = vld [vmem:[%s16703_s27 + $0x10] sm:$0xff]   ;;  %v12898_v3 = vld [vmem:[%s16703_s27 + $0x18] sm:$0xff]  }
 0x73f   :  { %12685 = vmatpush3.bf16.msra.mxu1 %v12897_v2 }
 0x740   :  { %12686 = vmatprep.subr.bf16.mxu1 %v13445_v0 }
 0x742   :  { %v11969_v13 = vpop.f32.mrb[32].mxu0 }
 0x743   :  { %v11970_v4 = vpop.f32.mrb[33].mxu0  ;;  %12687 = vmatpush3.bf16.msra.mxu1 %v12898_v3 }
 0x744   :  { %v11971_v16 = vadd.f32 %v11970_v4, %v11969_v13  ;;  %v11972_v19 = vpop.f32.mrb[34].mxu0 }
 0x745   :  { %v11973_v21 = vpop.f32.mrb[35].mxu0 }
 0x746   :  { %v2193_v22 = vadd.f32 %v11971_v16, %v2153_v14  ;;  %v10431_v16 = vld [vmem:[%s16663_s13] ss:$0 sm:$0xff] }
 0x747   :  { %v10432_v21 = vld [vmem:[%s16664_s14] ss:$0 sm:$0xff] }
 0x75a   :  { %v11991_v26 = vpop.f32.mrb[16].mxu1 }
 0x75b   :  { %v11992_v27 = vpop.f32.mrb[17].mxu1 }
 0x75c   :  { %v11993_v29 = vadd.f32 %v11992_v27, %v11991_v26  ;;  %v11994_v15 = vpop.f32.mrb[18].mxu1 }
 0x75d   :  { %v11995_v47 = vpop.f32.mrb[19].mxu1 }
 0x75e   :  { %v2233_v56 = vadd.f32 %v11993_v29, %v2193_v22  ;;  %v10437_v29 = vld [vmem:[%s16705_s22 + $0x1] ss:$0 sm:$0xff] }
 0x762   :  { %v12013_v17 = vpop.f32.mrb[36].mxu0 }
 0x763   :  { %v12014_v30 = vpop.f32.mrb[37].mxu0 }
 0x764   :  { %v12015_v32 = vadd.f32 %v12014_v30, %v12013_v17  ;;  %v12016_v33 = vpop.f32.mrb[38].mxu0 }
 0x765   :  { %v12017_v34 = vpop.f32.mrb[39].mxu0 }
 0x766   :  { %v2273_v35 = vadd.f32 %v12015_v32, %v2233_v56 }
 0x77a   :  { %v12035_v36 = vpop.f32.mrb[20].mxu1 }
 0x77b   :  { %v12036_v58 = vpop.f32.mrb[21].mxu1 }
 0x77c   :  { %v12037_v20 = vadd.f32 %v12036_v58, %v12035_v36  ;;  %v12038_v18 = vpop.f32.mrb[22].mxu1 }
 0x77d   :  { %v12039_v24 = vpop.f32.mrb[23].mxu1 }
 0x77e   :  { %v2313_v37 = vadd.f32 %v12037_v20, %v2273_v35 }
 0x782   :  { %v12057_v38 = vpop.f32.mrb[40].mxu0 }
 0x783   :  { %v12058_v23 = vpop.f32.mrb[41].mxu0 }
 0x784   :  { %v12059_v8 = vadd.f32 %v12058_v23, %v12057_v38  ;;  %v12060_v40 = vpop.f32.mrb[42].mxu0 }
 0x785   :  { %v12061_v41 = vpop.f32.mrb[43].mxu0 }
 0x786   :  { %v2353_v42 = vadd.f32 %v12059_v8, %v2313_v37 }
 0x79a   :  { %v12079_v43 = vpop.f32.mrb[24].mxu1 }
 0x79b   :  { %v12080_v62 = vpop.f32.mrb[25].mxu1 }
 0x79c   :  { %v12081_v44 = vadd.f32 %v12080_v62, %v12079_v43  ;;  %v12082_v12 = vpop.f32.mrb[26].mxu1 }
 0x79d   :  { %v12083_v46 = vpop.f32.mrb[27].mxu1 }
 0x79e   :  { %v2393_v48 = vadd.f32 %v12081_v44, %v2353_v42 }
 0x7a2   :  { %v12101_v1 = vpop.f32.mrb[44].mxu0 }
 0x7a3   :  { %v12102_v49 = vpop.f32.mrb[45].mxu0 }
 0x7a4   :  { %v12103_v50 = vadd.f32 %v12102_v49, %v12101_v1  ;;  %v12104_v51 = vpop.f32.mrb[46].mxu0 }
 0x7a5   :  { %v12105_v52 = vpop.f32.mrb[47].mxu0 }
 0x7a6   :  { %v2433_v53 = vadd.f32 %v12103_v50, %v2393_v48 }
 0x7a8   :  { %v2438_v55 = vadd.f32 %v2433_v53, %v13711_v54 }
 0x7aa   :  { %v2441_v45 = vsel %vm333_vm6, %v2438_v55, 0.0 }
 0x7ab   :  { %2442 = vadd.xlane.f32.xlu0 %v2441_v45 }
 0x838   :  { %v2443_v57 = vpop.xlane.xlu0 %2442 }
 0x839   :  { %v2444_v59 = vmul.f32 0.03125, %v2443_v57 }
 0x83b   :  { %v2445_v60 = vsub.f32 %v2438_v55, %v2444_v59 }
 0x83d   :  { %v2446_v61 = vmul.f32 %v2445_v60, %v2445_v60 }
 0x83f   :  { %v2447_v63 = vsel %vm333_vm6, %v2446_v61, 0.0 }
 0x840   :  { %2448 = vadd.xlane.f32.xlu0 %v2447_v63 }
 0x8cd   :  { %v2449_v54 = vpop.xlane.xlu0 %2448 }
 0x8ce   :  { %v2450_v13 = vmul.f32 0.03125, %v2449_v54 }
 0x8d0   :  { %v2451_v4 = vadd.f32 1e-05, %v2450_v13 }
 0x8d2   :  { %13371 = vrsqrt.f32 %v2451_v4 }
 0x8dc   :  { %v13372_v14 = vpop.eup %13371 }
 0x8dd   :  { %v2453_v19 = vmul.f32 %v13372_v14, %v2445_v60 }
 0x8df   :  { %v2458_v22 = vmul.f32 %v10431_v16, %v2453_v19 }
 0x8e1   :  { %v14298_v26 = vadd.f32 %v10432_v21, %v2458_v22 }
 0x8e3   :  { %v2469_v27 = vpack.c.bf16 %v14298_v26, %v14298_v26 }
 0x8e5   :  { %12689 = vmatmul.mubr.msk.bf16.vlgmr.msra.gmra.mrb[28].mxu1 %vm151_vm2, %v2469_v27 }
 0x8e6   :  { %3093 = vmatprep.mubr.bf16.mxu1 %v13456_v39 }
 0x9b8   :  { %v2524_v15 = vpop.f32.mrb[28].mxu1 }
 0x9b9   :  { %v14307_v47 = vadd.f32 %v10437_v29, %v2524_v15  ;;  %v12690_v56 = vpop.f32.mrb[29].mxu1 }
 0x9ba   :  { %v2527_v17 = vpop.f32.mrb[30].mxu1 }
 0x9bb   :  { %2565 = vrot.lane.b32.xlu1 %v14307_v47, %s16687_s23  ;;  %v12691_v30 = vpop.f32.mrb[31].mxu1  ;;  %v2530_v32 = vmul.f32 0.5, %v14307_v47  ;;  %s16713_s23 = smov 112  }
 0x9bd   :  { %v2538_v33 = vrot.slane %v2530_v32, %v13604_v25 }
 0x9bf   :  { %v2539_v34 = vcombine.high %v2538_v33, %v2538_v33  ;;  %v2546_v35 = vrot.slane %v2538_v33, %v13604_v25 }
 0x9c1   :  { %v2553_v36 = vrot.slane %v2539_v34, %v13604_v25  ;;  %v2557_v58 = vrot.slane %v2546_v35, %v13608_v28 }
 0x9c3   :  { %v2561_v20 = vrot.slane %v2553_v36, %v13608_v28 }
 0xa2d   :  { %v2566_v18 = vpop.permute.xlu1 %2565 }
 0xa2e   :  { %v2568_v24 = vmul.f32 %v2566_v18, %v2557_v58  ;;  %v2569_v37 = vmul.f32 %v2566_v18, %v2561_v20 }
 0xa30   :  { %2572 = vrot.lane.b32.xlu0 %v2568_v24, %s16685_s24  ;;  %2574 = vrot.lane.b32.xlu1 %v2569_v37, %s16685_s24 }
 0xa34   :  { %2582 = vrot.lane.b32.xlu0 %v2569_v37, %s16683_s3  ;;  %2580 = vrot.lane.b32.xlu1 %v2568_v24, %s16683_s3 }
 0xa38   :  { %2590 = vrot.lane.b32.xlu0 %v2569_v37, %s16706_s26  ;;  %2588 = vrot.lane.b32.xlu1 %v2568_v24, %s16706_s26 }
 0xaa2   :  { %v2573_v38 = vpop.permute.xlu0 %2572  ;;  %v2575_v23 = vpop.permute.xlu1 %2574 }
 0xaa3   :  { %v2578_v41 = vadd.f32 %v2573_v38, %v2568_v24  ;;  %v2579_v42 = vadd.f32 %v2575_v23, %v2569_v37  ;;  %v12899_v37 = vld [vmem:[%s16655_s5 + $0x10] sm:$0xff]   ;;  %v12900_v38 = vld [vmem:[%s16655_s5 + $0x18] sm:$0xff]  }
 0xaa4   :  { %12693 = vmatpush3.bf16.msra.mxu0 %v12899_v37 }
 0xaa5   :  { %12694 = vmatprep.subr.bf16.mxu0 %v13445_v0 }
 0xaa6   :  { %v2583_v8 = vpop.permute.xlu0 %2582  ;;  %v2581_v40 = vpop.permute.xlu1 %2580 }
 0xaa7   :  { %v2587_v43 = vadd.f32 %v2583_v8, %v2579_v42  ;;  %v2586_v62 = vadd.f32 %v2581_v40, %v2578_v41 }
 0xaa8   :  { %12695 = vmatpush3.bf16.msra.mxu0 %v12900_v38  ;;  %v10460_v38 = vld [vmem:[%s16657_s7 + $0x148] sm:$0xff] }
 0xaaa   :  { %v2591_v44 = vpop.permute.xlu0 %2590  ;;  %v2589_v12 = vpop.permute.xlu1 %2588 }
 0xaab   :  { %v2595_v46 = vadd.f32 %v2591_v44, %v2587_v43  ;;  %v2594_v48 = vadd.f32 %v2589_v12, %v2586_v62 }
 0xaad   :  { %v2603_v1 = vsel %vm261_vm3, %v2595_v46, -inf  ;;  %v2596_v49 = vsel %vm261_vm3, %v2594_v48, -inf }
 0xaae   :  { %v2604_v50 = vrot.slane %v2603_v1, 4  ;;  %v2597_v51 = vrot.slane %v2596_v49, 4 }
 0xab0   :  { %v2605_v52 = vmax.f32 %v2603_v1, %v2604_v50  ;;  %v2598_v53 = vmax.f32 %v2596_v49, %v2597_v51 }
 0xab2   :  { %v2606_v55 = vrot.slane %v2605_v52, 2  ;;  %v2599_v45 = vrot.slane %v2598_v53, 2 }
 0xab4   :  { %v2607_v57 = vmax.f32 %v2605_v52, %v2606_v55  ;;  %v2600_v59 = vmax.f32 %v2598_v53, %v2599_v45 }
 0xab6   :  { %v2608_v60 = vrot.slane %v2607_v57, 1  ;;  %v2601_v61 = vrot.slane %v2600_v59, 1 }
 0xab8   :  { %v2609_v63 = vmax.f32 %v2607_v57, %v2608_v60  ;;  %v2602_v2 = vmax.f32 %v2600_v59, %v2601_v61 }
 0xaba   :  { %v2611_v3 = vsub.f32 %v2595_v46, %v2609_v63  ;;  %v2610_v54 = vsub.f32 %v2594_v48, %v2602_v2 }
 0xabc   :  { %v2614_v13 = vmul.f32 1.442695, %v2611_v3  ;;  %v2612_v4 = vmul.f32 1.442695, %v2610_v54 }
 0xabe   :  { %13373 = vpow2.f32 %v2614_v13 }
 0xabf   :  { %13375 = vpow2.f32 %v2612_v4 }
 0xac8   :  { %v13374_v14 = vpop.eup %13373 }
 0xac9   :  { %v13376_v16 = vpop.eup %13375  ;;  %v2623_v19 = vsel %vm261_vm3, %v13374_v14, 0.0 }
 0xaca   :  { %v2624_v21 = vrot.slane %v2623_v19, 4  ;;  %v2616_v22 = vsel %vm261_vm3, %v13376_v16, 0.0 }
 0xacb   :  { %v2617_v27 = vrot.slane %v2616_v22, 4 }
 0xacc   :  { %v2625_v29 = vadd.f32 %v2624_v21, %v2623_v19 }
 0xacd   :  { %v2618_v15 = vadd.f32 %v2617_v27, %v2616_v22  ;;  %v10445_v27 = vld [vmem:[%s16656_s6 + $0x1] ss:$0 sm:$0xff] }
 0xace   :  { %v2626_v56 = vrot.slane %v2625_v29, 2 }
 0xacf   :  { %v2619_v17 = vrot.slane %v2618_v15, 2 }
 0xad0   :  { %v2627_v30 = vadd.f32 %v2626_v56, %v2625_v29 }
 0xad1   :  { %v2620_v32 = vadd.f32 %v2619_v17, %v2618_v15 }
 0xad2   :  { %v2628_v33 = vrot.slane %v2627_v30, 1 }
 0xad3   :  { %v2621_v34 = vrot.slane %v2620_v32, 1 }
 0xad4   :  { %v2629_v35 = vadd.f32 %v2628_v33, %v2627_v30 }
 0xad5   :  { %v2622_v36 = vadd.f32 %v2621_v34, %v2620_v32 }
 0xad6   :  { %13377 = vrcp.f32 %v2629_v35 }
 0xad7   :  { %13379 = vrcp.f32 %v2622_v36 }
 0xae0   :  { %v13378_v58 = vpop.eup %13377 }
 0xae1   :  { %v13380_v20 = vpop.eup %13379  ;;  %v2633_v18 = vmul.f32 %v13378_v58, %v13374_v14 }
 0xae2   :  { %v2631_v24 = vmul.f32 %v13380_v20, %v13376_v16 }
 0xae3   :  { %2638 = vrot.lane.b32.xlu0 %v2633_v18, %s16707_s28 }
 0xae4   :  { %2636 = vrot.lane.b32.xlu1 %v2631_v24, %s16707_s28 }
 0xae7   :  { %2644 = vrot.lane.b32.xlu0 %v2633_v18, %s16708_s25 }
 0xae8   :  { %2642 = vrot.lane.b32.xlu1 %v2631_v24, %s16708_s25 }
 0xaeb   :  { %2650 = vrot.lane.b32.xlu0 %v2633_v18, %s16709_s2 }
 0xaec   :  { %2648 = vrot.lane.b32.xlu1 %v2631_v24, %s16709_s2 }
 0xaf0   :  { %2660 = vrot.lane.b32.xlu1 %v14307_v47, %s16710_s30 }
 0xb55   :  { %v2639_v23 = vpop.permute.xlu0 %2638 }
 0xb56   :  { %v2637_v8 = vpop.permute.xlu1 %2636  ;;  %v2655_v47 = vsel %vm320_vm4, %v2633_v18, %v2639_v23  ;;  %v10451_v18 = vld [vmem:[%s16657_s7 + $0x100] sm:$0xff] }
 0xb57   :  { %v2654_v62 = vsel %vm320_vm4, %v2631_v24, %v2637_v8  ;;  %v10459_v24 = vld [vmem:[%s16657_s7 + $0x140] sm:$0xff] }
 0xb58   :  { %v10486_v37 = vcombine.high %v10451_v18, %v10459_v24  ;;  %v10485_v23 = vcombine.low %v10451_v18, %v10459_v24 }
 0xb59   :  { %v2645_v40 = vpop.permute.xlu0 %2644 }
 0xb5a   :  { %v2643_v41 = vpop.permute.xlu1 %2642  ;;  %v2657_v44 = vsel %vm85_vm1, %v2655_v47, %v2645_v40  ;;  %3061 = vmatprep.subr.bf16.mxu1 %v10486_v37  ;;  %v10457_v37 = vld [vmem:[%s16657_s7 + $0x130] sm:$0xff] }
 0xb5b   :  { %v2656_v12 = vsel %vm85_vm1, %v2654_v62, %v2643_v41  ;;  %3062 = vmatpush1.bf16.msra.mxu1 %v10485_v23  ;;  %v10467_v41 = vld [vmem:[%s16657_s7 + $0x180] sm:$0xff]  ;;  %v10476_v62 = vld [vmem:[%s16657_s7 + $0x1c8] sm:$0xff]  ;;  %v10458_v23 = vld [vmem:[%s16657_s7 + $0x138] sm:$0xff] }
 0xb5d   :  { %v2651_v43 = vpop.permute.xlu0 %2650 }
 0xb5e   :  { %v2649_v42 = vpop.permute.xlu1 %2648  ;;  %v2659_v46 = vsel %vm325_vm5, %v2657_v44, %v2651_v43  ;;  %v10468_v43 = vld [vmem:[%s16657_s7 + $0x188] sm:$0xff] }
 0xb5f   :  { %v2658_v48 = vsel %vm325_vm5, %v2656_v12, %v2649_v42  ;;  %v10475_v42 = vld [vmem:[%s16657_s7 + $0x1c0] sm:$0xff]  ;;  %v10503_v12 = vcombine.low %v10468_v43, %v10476_v62 }
 0xb60   :  { %v10502_v47 = vcombine.high %v10467_v41, %v10475_v42  ;;  %v10501_v44 = vcombine.low %v10467_v41, %v10475_v42 }
 0xb62   :  { %v2661_v1 = vpop.permute.xlu1 %2660  ;;  %3063 = vmatprep.subr.bf16.mxu1 %v10502_v47  ;;  %v10473_v47 = vld [vmem:[%s16657_s7 + $0x1b0] sm:$0xff] }
 0xb63   :  { %v2663_v49 = vmul.f32 %v2661_v1, %v2658_v48  ;;  %v2664_v50 = vmul.f32 %v2661_v1, %v2659_v46  ;;  %v10504_v46 = vcombine.high %v10468_v43, %v10476_v62  ;;  %3064 = vmatpush1.bf16.msra.mxu1 %v10501_v44  ;;  %v10453_v48 = vld [vmem:[%s16657_s7 + $0x110] sm:$0xff]  ;;  %v10474_v44 = vld [vmem:[%s16657_s7 + $0x1b8] sm:$0xff] }
 0xb64   :  { %v10461_v1 = vld [vmem:[%s16657_s7 + $0x150] sm:$0xff] }
 0xb65   :  { %v2665_v51 = vsel %vm333_vm6, %v2663_v49, 0.0  ;;  %v2672_v52 = vsel %vm333_vm6, %v2664_v50, 0.0  ;;  %v10454_v49 = vld [vmem:[%s16657_s7 + $0x118] sm:$0xff]  ;;  %v10490_v50 = vcombine.high %v10453_v48, %v10461_v1  ;;  %v10481_v62 = vld [vmem:[%s16657_s7 + $0x1f0] sm:$0xff] }
 0xb66   :  { %v2666_v53 = vrot.slane %v2665_v51, 4  ;;  %v2673_v55 = vrot.slane %v2672_v52, 4 }
 0xb67   :  { %3143 = vmatprep.subr.bf16.mxu1 %v10490_v50  ;;  %v10513_v50 = vcombine.low %v10473_v47, %v10481_v62 }
 0xb68   :  { %v2667_v45 = vadd.f32 %v2666_v53, %v2665_v51  ;;  %v2674_v57 = vadd.f32 %v2673_v55, %v2672_v52  ;;  %v10462_v51 = vld [vmem:[%s16657_s7 + $0x158] sm:$0xff]  ;;  %v10489_v52 = vcombine.low %v10453_v48, %v10461_v1  ;;  %v10514_v1 = vcombine.high %v10473_v47, %v10481_v62 }
 0xb69   :  { %v10491_v53 = vcombine.low %v10454_v49, %v10462_v51  ;;  %v10492_v55 = vcombine.high %v10454_v49, %v10462_v51 }
 0xb6a   :  { %v2668_v59 = vrot.slane %v2667_v45, 2  ;;  %v2675_v60 = vrot.slane %v2674_v57, 2 }
 0xb6c   :  { %v2669_v61 = vadd.f32 %v2668_v59, %v2667_v45  ;;  %v2676_v63 = vadd.f32 %v2675_v60, %v2674_v57 }
 0xb6e   :  { %v2670_v2 = vrot.slane %v2669_v61, 1  ;;  %v2677_v3 = vrot.slane %v2676_v63, 1 }
 0xb70   :  { %v2671_v54 = vadd.f32 %v2670_v2, %v2669_v61  ;;  %v2678_v13 = vadd.f32 %v2677_v3, %v2676_v63  ;;  %v10449_v61 = vld [vmem:[%s16659_s11 + $0x1] ss:$0 sm:$0xff] }
 0xb71   :  { %v10450_v2 = vld [vmem:[%s16660_s12 + $0x1] ss:$0 sm:$0xff] }
 0xb72   :  { %v2684_v4 = vpack.c.bf16 %v2671_v54, %v2671_v54  ;;  %v2685_v14 = vpack.c.bf16 %v2678_v13, %v2678_v13  ;;  %v10469_v54 = vld [vmem:[%s16657_s7 + $0x190] sm:$0xff] }
 0xb73   :  { %v10477_v13 = vld [vmem:[%s16657_s7 + $0x1d0] sm:$0xff] }
 0xb74   :  { %v2693_v16 = vunpack.c.l.b16 %v2684_v4  ;;  %v2694_v19 = vunpack.c.l.b16 %v2685_v14  ;;  %v10470_v4 = vld [vmem:[%s16657_s7 + $0x198] sm:$0xff] }
 0xb75   :  { %v10478_v14 = vld [vmem:[%s16657_s7 + $0x1d8] sm:$0xff] }
 0xb76   :  { %v2695_v21 = vsel %vm363_vm7, %v2694_v19, %v2693_v16 }
 0xb77   :  { %v2696_v22 = vpack.c.b16 %v2695_v21, %v2695_v21  ;;  %v10506_v21 = vcombine.high %v10469_v54, %v10477_v13 }
 0xb79   :  { %12697 = vmatmul.mubr.msk.bf16.vlgmr.msra.gmra.mrb[48].mxu0 %vm151_vm2, %v2696_v22  ;;  %v10508_v22 = vcombine.high %v10470_v4, %v10478_v14 }
 0xb7a   :  { %3134 = vmatprep.mubr.bf16.mxu0 %v13456_v39 }
 0xc4c   :  { %v2746_v29 = vpop.f32.mrb[48].mxu0 }
 0xc4d   :  { %v2747_v15 = vadd.f32 %v10445_v27, %v2746_v29  ;;  %v12698_v56 = vpop.f32.mrb[49].mxu0  ;;  %v10455_v27 = vld [vmem:[%s16657_s7 + $0x120] sm:$0xff] }
 0xc4e   :  { %v2749_v17 = vpop.f32.mrb[50].mxu0  ;;  %v10463_v29 = vld [vmem:[%s16657_s7 + $0x160] sm:$0xff]  ;;  %v10464_v56 = vld [vmem:[%s16657_s7 + $0x168] sm:$0xff] }
 0xc4f   :  { %v12699_v30 = vpop.f32.mrb[51].mxu0  ;;  %v2752_v32 = vadd.f32 %v2747_v15, %v14298_v26  ;;  %v10452_v26 = vld [vmem:[%s16657_s7 + $0x108] sm:$0xff]  ;;  %v10505_v17 = vcombine.low %v10469_v54, %v10477_v13  ;;  %v12912_v54 = vld [vmem:[%s16658_s9 + $0x490] sm:$0xff]   ;;  %v12913_v13 = vld [vmem:[%s16658_s9 + $0x458] sm:$0xff]  }
 0xc50   :  { %v10487_v8 = vcombine.low %v10452_v26, %v10460_v38  ;;  %v10488_v40 = vcombine.high %v10452_v26, %v10460_v38  ;;  %v10456_v15 = vld [vmem:[%s16657_s7 + $0x128] sm:$0xff]  ;;  %v10507_v30 = vcombine.low %v10470_v4, %v10478_v14  ;;  %v10465_v38 = vld [vmem:[%s16657_s7 + $0x170] sm:$0xff]  ;;  %v12914_v4 = vld [vmem:[%s16658_s9 + $0x4d8] sm:$0xff]  }
 0xc51   :  { %v2755_v33 = vsel %vm333_vm6, %v2752_v32, 0.0  ;;  %v10495_v18 = vcombine.low %v10456_v15, %v10464_v56  ;;  %v10498_v42 = vcombine.high %v10457_v37, %v10465_v38  ;;  %v12915_v14 = vld [vmem:[%s16658_s9 + $0x418] sm:$0xff]  }
 0xc52   :  { %2756 = vadd.xlane.f32.xlu0 %v2755_v33  ;;  %3102 = vmatprep.subr.bf16.mxu0 %v10488_v40  ;;  %v10496_v33 = vcombine.high %v10456_v15, %v10464_v56  ;;  %v12921_v15 = vld [vmem:[%s16658_s9 + $0x468] sm:$0xff]  }
 0xc53   :  { %3103 = vmatpush1.bf16.msra.mxu0 %v10487_v8  ;;  %v10466_v8 = vld [vmem:[%s16657_s7 + $0x178] sm:$0xff]  ;;  %v12922_v56 = vld [vmem:[%s16658_s9 + $0x4e8] sm:$0xff]  }
 0xc54   :  { %3104 = vmatprep.subr.bf16.mxu0 %v10504_v46  ;;  %v10500_v43 = vcombine.high %v10458_v23, %v10466_v8  ;;  %v10497_v46 = vcombine.low %v10457_v37, %v10465_v38  ;;  %v10499_v48 = vcombine.low %v10458_v23, %v10466_v8  ;;  %v14594_v37 = vld [vmem:[%s16661_s8 + $0x1] ss:$4 sm:$0xff] }
 0xc55   :  { %v2821_v38 = vrot.slane %v14594_v37, %v13608_v28  ;;  %v2829_v23 = vrot.slane %v14594_v37, %v13899_v9  ;;  %v2825_v8 = vrot.slane %v14594_v37, %v13893_v6 }
 0xc57   :  { %3105 = vmatpush1.bf16.msra.mxu0 %v10503_v12  ;;  %v10482_v12 = vld [vmem:[%s16657_s7 + $0x1f8] sm:$0xff] }
 0xc58   :  { %3184 = vmatprep.subr.bf16.mxu0 %v10492_v55  ;;  %v10516_v49 = vcombine.high %v10474_v44, %v10482_v12  ;;  %v10515_v51 = vcombine.low %v10474_v44, %v10482_v12  ;;  %v12903_v55 = vld [vmem:[%s16658_s9 + $0x400] sm:$0xff]  }
 0xcdf   :  { %v2757_v34 = vpop.xlane.xlu0 %2756 }
 0xce0   :  { %v2758_v35 = vmul.f32 0.03125, %v2757_v34  ;;  %v10471_v34 = vld [vmem:[%s16657_s7 + $0x1a0] sm:$0xff] }
 0xce2   :  { %v2759_v36 = vsub.f32 %v2752_v32, %v2758_v35  ;;  %v10494_v32 = vcombine.high %v10455_v27, %v10463_v29  ;;  %v10479_v35 = vld [vmem:[%s16657_s7 + $0x1e0] sm:$0xff] }
 0xce3   :  { %v10510_v24 = vcombine.high %v10471_v34, %v10479_v35  ;;  %v10509_v40 = vcombine.low %v10471_v34, %v10479_v35  ;;  %v12927_v34 = vld [vmem:[%s16658_s9 + $0x430] sm:$0xff]  }
 0xce4   :  { %v2760_v58 = vmul.f32 %v2759_v36, %v2759_v36  ;;  %v12928_v35 = vld [vmem:[%s16658_s9 + $0x4b0] sm:$0xff]  }
 0xce6   :  { %v2761_v20 = vsel %vm333_vm6, %v2760_v58, 0.0  ;;  %v10480_v58 = vld [vmem:[%s16657_s7 + $0x1e8] sm:$0xff] }
 0xce7   :  { %2762 = vadd.xlane.f32.xlu1 %v2761_v20  ;;  %v10493_v20 = vcombine.low %v10455_v27, %v10463_v29  ;;  %v12919_v27 = vld [vmem:[%s16658_s9 + $0x420] sm:$0xff]  }
 0xce8   :  { %v12920_v29 = vld [vmem:[%s16658_s9 + $0x4a0] sm:$0xff]  }
 0xd74   :  { %v2763_v45 = vpop.xlane.xlu1 %2762 }
 0xd75   :  { %v2764_v57 = vmul.f32 0.03125, %v2763_v45  ;;  %v12904_v45 = vld [vmem:[%s16658_s9 + $0x480] sm:$0xff]  }
 0xd77   :  { %v2765_v59 = vadd.f32 1e-05, %v2764_v57  ;;  %v12905_v57 = vld [vmem:[%s16658_s9 + $0x448] sm:$0xff]  }
 0xd79   :  { %13381 = vrsqrt.f32 %v2765_v59  ;;  %v12906_v59 = vld [vmem:[%s16658_s9 + $0x4c8] sm:$0xff]  }
 0xd83   :  { %v13382_v60 = vpop.eup %13381 }
 0xd84   :  { %v2767_v63 = vmul.f32 %v13382_v60, %v2759_v36  ;;  %v10472_v36 = vld [vmem:[%s16657_s7 + $0x1a8] sm:$0xff] }
 0xd85   :  { %v10512_v26 = vcombine.high %v10472_v36, %v10480_v58  ;;  %v10511_v41 = vcombine.low %v10472_v36, %v10480_v58  ;;  %v12907_v60 = vld [vmem:[%s16658_s9 + $0x408] sm:$0xff]   ;;  %v12929_v36 = vld [vmem:[%s16658_s9 + $0x478] sm:$0xff]  }
 0xd86   :  { %v2772_v3 = vmul.f32 %v10449_v61, %v2767_v63  ;;  %v12908_v61 = vld [vmem:[%s16658_s9 + $0x488] sm:$0xff]   ;;  %v12909_v63 = vld [vmem:[%s16658_s9 + $0x450] sm:$0xff]   ;;  %v12930_v58 = vld [vmem:[%s16658_s9 + $0x4f8] sm:$0xff]  }
 0xd88   :  { %v14413_v16 = vadd.f32 %v10450_v2, %v2772_v3  ;;  %v12910_v2 = vld [vmem:[%s16658_s9 + $0x4d0] sm:$0xff]  }
 0xd89   :  { %v12911_v3 = vld [vmem:[%s16658_s9 + $0x410] sm:$0xff]  }
 0xd8a   :  { %v14417_v19 = vpack.c.bf16 %v14413_v16, %v14413_v16 }
 0xd8c   :  { %10517 = vmatmul.mubr.msk.bf16.vlgmr.msra.gmra.mrb[32].mxu1 %vm151_vm2, %v14417_v19  ;;  %10518 = vmatmul.mubr.msk.bf16.vlgmr.msra.gmra.mrb[52].mxu0 %vm151_vm2, %v14417_v19 }
 0xd8d   :  { %3144 = vmatpush1.bf16.msra.mxu1 %v10489_v52  ;;  %3185 = vmatpush1.bf16.msra.mxu0 %v10491_v53  ;;  %v12901_v52 = vld [vmem:[%s16658_s9 + $0x440] sm:$0xff]  }
 0xd8e   :  { %3145 = vmatprep.subr.bf16.mxu1 %v10506_v21  ;;  %3186 = vmatprep.subr.bf16.mxu0 %v10508_v22  ;;  %v12902_v53 = vld [vmem:[%s16658_s9 + $0x4c0] sm:$0xff]  }
 0xd8f   :  { %3175 = vmatprep.mubr.bf16.mxu1 %v13456_v39  ;;  %3216 = vmatprep.mubr.bf16.mxu0 %v13456_v39  ;;  %v12917_v21 = vld [vmem:[%s16658_s9 + $0x460] sm:$0xff]  }
 0xd90   :  { %v12918_v22 = vld [vmem:[%s16658_s9 + $0x4e0] sm:$0xff]  }
 0xd91   :  { %3146 = vmatpush1.bf16.msra.mxu1 %v10505_v17  ;;  %3187 = vmatpush1.bf16.msra.mxu0 %v10507_v30  ;;  %v12923_v17 = vld [vmem:[%s16658_s9 + $0x428] sm:$0xff]  }
 0xd92   :  { %3225 = vmatprep.subr.bf16.mxu1 %v10494_v32  ;;  %3266 = vmatprep.subr.bf16.mxu0 %v10496_v33  ;;  %v12924_v30 = vld [vmem:[%s16658_s9 + $0x4a8] sm:$0xff]   ;;  %v12925_v32 = vld [vmem:[%s16658_s9 + $0x470] sm:$0xff]  }
 0xd93   :  { %v12926_v33 = vld [vmem:[%s16658_s9 + $0x4f0] sm:$0xff]  }
 0xd94   :  { %10519 = vmatmul.mubr.msk.bf16.vlgmr.msra.gmra.mrb[36].mxu1 %vm151_vm2, %v14417_v19  ;;  %10520 = vmatmul.mubr.msk.bf16.vlgmr.msra.gmra.mrb[56].mxu0 %vm151_vm2, %v14417_v19 }
 0xd95   :  { %3226 = vmatpush1.bf16.msra.mxu1 %v10493_v20  ;;  %3267 = vmatpush1.bf16.msra.mxu0 %v10495_v18  ;;  %v12931_v20 = vld [vmem:[%s16658_s9 + $0x438] sm:$0xff]  }
 0xd96   :  { %3227 = vmatprep.subr.bf16.mxu1 %v10510_v24  ;;  %3268 = vmatprep.subr.bf16.mxu0 %v10512_v26  ;;  %v12932_v18 = vld [vmem:[%s16658_s9 + $0x4b8] sm:$0xff]   ;;  %v12933_v24 = vld [vmem:[%s16658_s9 + $0x540] sm:$0xff]  }
 0xd97   :  { %3257 = vmatprep.mubr.bf16.mxu1 %v13456_v39  ;;  %3298 = vmatprep.mubr.bf16.mxu0 %v13456_v39  ;;  %v12934_v26 = vld [vmem:[%s16658_s9 + $0x5c0] sm:$0xff]  }
 0xd99   :  { %3228 = vmatpush1.bf16.msra.mxu1 %v10509_v40  ;;  %3269 = vmatpush1.bf16.msra.mxu0 %v10511_v41  ;;  %v2833_v40 = vrot.slane %v14594_v37, %v13902_v10 }
 0xd9a   :  { %3307 = vmatprep.subr.bf16.mxu1 %v10498_v42  ;;  %3348 = vmatprep.subr.bf16.mxu0 %v10500_v43 }
 0xd9c   :  { %10521 = vmatmul.mubr.msk.bf16.vlgmr.msra.gmra.mrb[40].mxu1 %vm151_vm2, %v14417_v19  ;;  %10522 = vmatmul.mubr.msk.bf16.vlgmr.msra.gmra.mrb[60].mxu0 %vm151_vm2, %v14417_v19 }
 0xd9d   :  { %3308 = vmatpush1.bf16.msra.mxu1 %v10497_v46  ;;  %3349 = vmatpush1.bf16.msra.mxu0 %v10499_v48 }
 0xd9e   :  { %3309 = vmatprep.subr.bf16.mxu1 %v10514_v1  ;;  %3350 = vmatprep.subr.bf16.mxu0 %v10516_v49 }
 0xd9f   :  { %3339 = vmatprep.mubr.bf16.mxu1 %v13456_v39  ;;  %3380 = vmatprep.mubr.bf16.mxu0 %v13456_v39 }
 0xda1   :  { %3310 = vmatpush1.bf16.msra.mxu1 %v10513_v50  ;;  %3351 = vmatpush1.bf16.msra.mxu0 %v10515_v51 }
 0xda2   :  { %12113 = vmatprep.subr.bf16.mxu1 %v12901_v52  ;;  %12135 = vmatprep.subr.bf16.mxu0 %v12902_v53 }
 0xda4   :  { %10523 = vmatmul.mubr.msk.bf16.vlgmr.msra.gmra.mrb[44].mxu1 %vm151_vm2, %v14417_v19  ;;  %10524 = vmatmul.mubr.msk.bf16.vlgmr.msra.gmra.mrb[64].mxu0 %vm151_vm2, %v14417_v19  ;;  %v12916_v19 = vld [vmem:[%s16658_s9 + $0x498] sm:$0xff]  }
 0xda5   :  { %12114 = vmatpush3.bf16.msra.mxu1 %v12903_v55  ;;  %12136 = vmatpush3.bf16.msra.mxu0 %v12904_v45 }
 0xda6   :  { %12115 = vmatprep.subr.bf16.mxu1 %v12905_v57  ;;  %12137 = vmatprep.subr.bf16.mxu0 %v12906_v59  ;;  %v2841_v59 = vrot.slane %v14594_v37, %v13896_v7 }
 0xda9   :  { %12116 = vmatpush3.bf16.msra.mxu1 %v12907_v60  ;;  %12138 = vmatpush3.bf16.msra.mxu0 %v12908_v61  ;;  %v2849_v60 = vrot.slane %v14594_v37, %v13921_v31  ;;  %v12935_v61 = vld [vmem:[%s16658_s9 + $0x500] sm:$0xff]  }
 0xdaa   :  { %12117 = vmatprep.subr.bf16.mxu1 %v12909_v63  ;;  %12139 = vmatprep.subr.bf16.mxu0 %v12910_v2  ;;  %v12936_v63 = vld [vmem:[%s16658_s9 + $0x580] sm:$0xff]  }
 0xdad   :  { %12118 = vmatpush3.bf16.msra.mxu1 %v12911_v3  ;;  %12140 = vmatpush3.bf16.msra.mxu0 %v12912_v54  ;;  %v12937_v54 = vld [vmem:[%s16658_s9 + $0x548] sm:$0xff]  }
 0xdae   :  { %12119 = vmatprep.subr.bf16.mxu1 %v12913_v13  ;;  %12141 = vmatprep.subr.bf16.mxu0 %v12914_v4  ;;  %v12938_v13 = vld [vmem:[%s16658_s9 + $0x5c8] sm:$0xff]  }
 0xdb1   :  { %12120 = vmatpush3.bf16.msra.mxu1 %v12915_v14  ;;  %12142 = vmatpush3.bf16.msra.mxu0 %v12916_v19 }
 0xdb2   :  { %12121 = vmatprep.subr.bf16.mxu1 %v12917_v21  ;;  %12143 = vmatprep.subr.bf16.mxu0 %v12918_v22 }
 0xdb5   :  { %12122 = vmatpush3.bf16.msra.mxu1 %v12919_v27  ;;  %12144 = vmatpush3.bf16.msra.mxu0 %v12920_v29 }
 0xdb6   :  { %12123 = vmatprep.subr.bf16.mxu1 %v12921_v15  ;;  %12145 = vmatprep.subr.bf16.mxu0 %v12922_v56  ;;  %v12939_v56 = vld [vmem:[%s16658_s9 + $0x508] sm:$0xff]  }
 0xdb9   :  { %12124 = vmatpush3.bf16.msra.mxu1 %v12923_v17  ;;  %12146 = vmatpush3.bf16.msra.mxu0 %v12924_v30  ;;  %v12940_v17 = vld [vmem:[%s16658_s9 + $0x588] sm:$0xff]  }
 0xdba   :  { %12125 = vmatprep.subr.bf16.mxu1 %v12925_v32  ;;  %12147 = vmatprep.subr.bf16.mxu0 %v12926_v33  ;;  %v12941_v33 = vld [vmem:[%s16658_s9 + $0x550] sm:$0xff]  }
 0xdbd   :  { %12126 = vmatpush3.bf16.msra.mxu1 %v12927_v34  ;;  %12148 = vmatpush3.bf16.msra.mxu0 %v12928_v35  ;;  %v12942_v34 = vld [vmem:[%s16658_s9 + $0x5d0] sm:$0xff]  }
 0xdbe   :  { %12127 = vmatprep.subr.bf16.mxu1 %v12929_v36  ;;  %12149 = vmatprep.subr.bf16.mxu0 %v12930_v58 }
 0xdc1   :  { %12128 = vmatpush3.bf16.msra.mxu1 %v12931_v20  ;;  %12150 = vmatpush3.bf16.msra.mxu0 %v12932_v18  ;;  %v12943_v18 = vld [vmem:[%s16658_s9 + $0x510] sm:$0xff]  }
 0xdc2   :  { %12157 = vmatprep.subr.bf16.mxu1 %v12933_v24  ;;  %12179 = vmatprep.subr.bf16.mxu0 %v12934_v26  ;;  %v12944_v24 = vld [vmem:[%s16658_s9 + $0x590] sm:$0xff]   ;;  %v12945_v26 = vld [vmem:[%s16658_s9 + $0x558] sm:$0xff]  }
 0xe5f   :  { %v3095_v41 = vpop.f32.mrb[32].mxu1  ;;  %v3136_v42 = vpop.f32.mrb[52].mxu0 }
 0xe60   :  { %v3096_v43 = vadd.f32 %v3095_v41, %v2821_v38  ;;  %v3137_v47 = vadd.f32 %v3136_v42, %v2829_v23  ;;  %v3097_v62 = vpop.f32.mrb[33].mxu1  ;;  %v3138_v44 = vpop.f32.mrb[53].mxu0  ;;  %v12946_v38 = vld [vmem:[%s16658_s9 + $0x5d8] sm:$0xff]  }
 0xe61   :  { %v3098_v12 = vadd.f32 %v3097_v62, %v2825_v8  ;;  %v3139_v46 = vadd.f32 %v3138_v44, %v2833_v40  ;;  %v3099_v48 = vpop.f32.mrb[34].mxu1  ;;  %v3140_v1 = vpop.f32.mrb[54].mxu0  ;;  %v12948_v62 = vld [vmem:[%s16658_s9 + $0x598] sm:$0xff]  }
 0xe62   :  { %v3389_v49 = vmax.f32 %v3096_v43, 0.0  ;;  %v3391_v50 = vmax.f32 %v3137_v47, 0.0  ;;  %v3100_v51 = vpop.f32.mrb[35].mxu1  ;;  %v3141_v52 = vpop.f32.mrb[55].mxu0  ;;  %v12947_v47 = vld [vmem:[%s16658_s9 + $0x518] sm:$0xff]   ;;  %v12950_v48 = vld [vmem:[%s16658_s9 + $0x5e0] sm:$0xff]  }
 0xe63   :  { %v3390_v53 = vmax.f32 %v3098_v12, 0.0  ;;  %v3392_v55 = vmax.f32 %v3139_v46, 0.0  ;;  %v12949_v46 = vld [vmem:[%s16658_s9 + $0x560] sm:$0xff]   ;;  %v12953_v52 = vld [vmem:[%s16658_s9 + $0x568] sm:$0xff]  }
 0xe64   :  { %v3662_v2 = vpack.c.bf16 %v3389_v49, %v3389_v49  ;;  %v3664_v3 = vpack.c.bf16 %v3391_v50, %v3391_v50  ;;  %v14667_v1 = vld [vmem:[%s16661_s8 + $0x21] ss:$4 sm:$0xff] }
 0xe65   :  { %v3663_v45 = vpack.c.bf16 %v3390_v53, %v3390_v53  ;;  %v3665_v57 = vpack.c.bf16 %v3392_v55, %v3392_v55  ;;  %v2877_v49 = vrot.slane %v14667_v1, %v13905_v11  ;;  %v12951_v50 = vld [vmem:[%s16658_s9 + $0x520] sm:$0xff]   ;;  %v12954_v53 = vld [vmem:[%s16658_s9 + $0x5e8] sm:$0xff]  }
 0xe66   :  { %v12952_v51 = vld [vmem:[%s16658_s9 + $0x5a0] sm:$0xff]  }
 0xe67   :  { %v14620_v4 = vpop.f32.mrb[36].mxu1  ;;  %v14622_v14 = vpop.f32.mrb[56].mxu0  ;;  %4483 = vmatprep.mubr.bf16.mxu1 %v3663_v45  ;;  %4523 = vmatprep.mubr.bf16.mxu0 %v3665_v57 }
 0xe68   :  { %v3179_v19 = vpop.f32.mrb[37].mxu1  ;;  %v3220_v21 = vpop.f32.mrb[57].mxu0  ;;  %4484 = vmatmul.mubr.bf16.vlgmr.msra.gmra.mrb[48].mxu1 %v3662_v2  ;;  %4524 = vmatmul.mubr.bf16.vlgmr.msra.gmra.mrb[68].mxu0 %v3664_v3  ;;  %v12955_v2 = vld [vmem:[%s16658_s9 + $0x528] sm:$0xff]  }
 0xe69   :  { %v3180_v22 = vadd.f32 %v3179_v19, %v2841_v59  ;;  %v3221_v27 = vadd.f32 %v3220_v21, %v2849_v60  ;;  %12158 = vmatpush3.bf16.msra.mxu1 %v12935_v61  ;;  %12180 = vmatpush3.bf16.msra.mxu0 %v12936_v63  ;;  %v3181_v29 = vpop.f32.mrb[38].mxu1  ;;  %v3222_v15 = vpop.f32.mrb[58].mxu0  ;;  %v12956_v3 = vld [vmem:[%s16658_s9 + $0x5a8] sm:$0xff]  }
 0xe6a   :  { %v3182_v30 = vpop.f32.mrb[39].mxu1  ;;  %v3223_v32 = vpop.f32.mrb[59].mxu0  ;;  %12159 = vmatprep.subr.bf16.mxu1 %v12937_v54  ;;  %12181 = vmatprep.subr.bf16.mxu0 %v12938_v13  ;;  %v2837_v54 = vrot.slane %v14594_v37, %v13890_v5  ;;  %v2845_v13 = vrot.slane %v14594_v37, %v13905_v11  ;;  %v2857_v29 = vrot.slane %v14667_v1, %v13893_v6  ;;  %v12959_v37 = vld [vmem:[%s16658_s9 + $0x530] sm:$0xff]  }
 0xe6b   :  { %v3394_v35 = vmax.f32 %v3180_v22, 0.0  ;;  %v3396_v36 = vmax.f32 %v3221_v27, 0.0  ;;  %v12957_v22 = vld [vmem:[%s16658_s9 + $0x570] sm:$0xff]   ;;  %v2865_v15 = vrot.slane %v14667_v1, %v13902_v10  ;;  %v12961_v32 = vld [vmem:[%s16658_s9 + $0x578] sm:$0xff]  }
 0xe6c   :  { %v12958_v27 = vld [vmem:[%s16658_s9 + $0x5f0] sm:$0xff]   ;;  %v3219_v30 = vadd.f32 %v14622_v14, %v2845_v13  ;;  %v12964_v14 = vld [vmem:[%s16658_s9 + $0x5b8] sm:$0xff]   ;;  %v12985_v13 = vld [vmem:[%s16658_s9 + $0x668] sm:$0xff]  }
 0xe6d   :  { %v3667_v58 = vpack.c.bf16 %v3394_v35, %v3394_v35  ;;  %v3669_v20 = vpack.c.bf16 %v3396_v36, %v3396_v36  ;;  %12160 = vmatpush3.bf16.msra.mxu1 %v12939_v56  ;;  %12182 = vmatpush3.bf16.msra.mxu0 %v12940_v17  ;;  %v12960_v56 = vld [vmem:[%s16658_s9 + $0x5b0] sm:$0xff]   ;;  %v3178_v17 = vadd.f32 %v14620_v4, %v2837_v54  ;;  %v12963_v4 = vld [vmem:[%s16658_s9 + $0x538] sm:$0xff]   ;;  %v12984_v54 = vld [vmem:[%s16658_s9 + $0x6a0] sm:$0xff]  }
 0xe6e   :  { %12161 = vmatprep.subr.bf16.mxu1 %v12941_v33  ;;  %12183 = vmatprep.subr.bf16.mxu0 %v12942_v34  ;;  %v12962_v33 = vld [vmem:[%s16658_s9 + $0x5f8] sm:$0xff]  }
 0xe6f   :  { %v14648_v23 = vpop.f32.mrb[40].mxu1  ;;  %v14650_v8 = vpop.f32.mrb[60].mxu0  ;;  %4563 = vmatprep.mubr.bf16.mxu1 %v3667_v58  ;;  %4603 = vmatprep.mubr.bf16.mxu0 %v3669_v20  ;;  %v3393_v36 = vmax.f32 %v3178_v17, 0.0  ;;  %v3395_v58 = vmax.f32 %v3219_v30, 0.0  ;;  %v12965_v20 = vld [vmem:[%s16658_s9 + $0x640] sm:$0xff]   ;;  %v2881_v17 = vrot.slane %v14667_v1, %v13921_v31  ;;  %v12991_v30 = vld [vmem:[%s16658_s9 + $0x630] sm:$0xff]  }
 0xe70   :  { %v3261_v40 = vpop.f32.mrb[41].mxu1  ;;  %v3302_v41 = vpop.f32.mrb[61].mxu0 }
 0xe71   :  { %12162 = vmatpush3.bf16.msra.mxu1 %v12943_v18  ;;  %12184 = vmatpush3.bf16.msra.mxu0 %v12944_v24  ;;  %v3263_v42 = vpop.f32.mrb[42].mxu1  ;;  %v3304_v43 = vpop.f32.mrb[62].mxu0  ;;  %v3262_v34 = vadd.f32 %v3261_v40, %v2857_v29  ;;  %v3303_v35 = vadd.f32 %v3302_v41, %v2865_v15  ;;  %v12966_v18 = vld [vmem:[%s16658_s9 + $0x6c0] sm:$0xff]   ;;  %v3666_v40 = vpack.c.bf16 %v3393_v36, %v3393_v36  ;;  %v12989_v29 = vld [vmem:[%s16658_s9 + $0x670] sm:$0xff]   ;;  %v12995_v36 = vld [vmem:[%s16658_s9 + $0x638] sm:$0xff]  }
 0xe72   :  { %v3264_v44 = vpop.f32.mrb[43].mxu1  ;;  %v3305_v12 = vpop.f32.mrb[63].mxu0  ;;  %12163 = vmatprep.subr.bf16.mxu1 %v12945_v26  ;;  %12185 = vmatprep.subr.bf16.mxu0 %v12946_v38  ;;  %v12967_v38 = vld [vmem:[%s16658_s9 + $0x600] sm:$0xff]   ;;  %v3668_v41 = vpack.c.bf16 %v3395_v58, %v3395_v58  ;;  %v2861_v15 = vrot.slane %v14667_v1, %v13899_v9 }
 0xe73   :  { %v3398_v24 = vmax.f32 %v3262_v34, 0.0  ;;  %v3400_v26 = vmax.f32 %v3303_v35, 0.0  ;;  %v12968_v42 = vld [vmem:[%s16658_s9 + $0x680] sm:$0xff]   ;;  %v12971_v12 = vld [vmem:[%s16658_s9 + $0x608] sm:$0xff]   ;;  %v12993_v34 = vld [vmem:[%s16658_s9 + $0x678] sm:$0xff]  }
 0xe74   :  { %v3301_v35 = vadd.f32 %v14650_v8, %v2861_v15  ;;  %v12996_v8 = vld [vmem:[%s16658_s9 + $0x6b8] sm:$0xff]  }
 0xe75   :  { %12164 = vmatpush3.bf16.msra.mxu1 %v12947_v47  ;;  %12186 = vmatpush3.bf16.msra.mxu0 %v12948_v62  ;;  %v3671_v43 = vpack.c.bf16 %v3398_v24, %v3398_v24  ;;  %v12969_v47 = vld [vmem:[%s16658_s9 + $0x648] sm:$0xff]   ;;  %v3673_v44 = vpack.c.bf16 %v3400_v26, %v3400_v26  ;;  %v12999_v26 = vld [vmem:[%s16658_s9 + $0x700] sm:$0xff]  }
 0xe76   :  { %12165 = vmatprep.subr.bf16.mxu1 %v12949_v46  ;;  %12187 = vmatprep.subr.bf16.mxu0 %v12950_v48  ;;  %v12970_v62 = vld [vmem:[%s16658_s9 + $0x6c8] sm:$0xff]   ;;  %v12973_v48 = vld [vmem:[%s16658_s9 + $0x650] sm:$0xff]  }
 0xe77   :  { %v14683_v55 = vpop.f32.mrb[44].mxu1  ;;  %v3382_v45 = vpop.f32.mrb[64].mxu0  ;;  %v12972_v46 = vld [vmem:[%s16658_s9 + $0x688] sm:$0xff]  }
 0xe78   :  { %v14685_v57 = vadd.f32 %v3382_v45, %v2877_v49  ;;  %v14687_v59 = vpop.f32.mrb[45].mxu1  ;;  %v14689_v60 = vpop.f32.mrb[65].mxu0  ;;  %v12974_v49 = vld [vmem:[%s16658_s9 + $0x6d0] sm:$0xff]   ;;  %v12979_v45 = vld [vmem:[%s16658_s9 + $0x618] sm:$0xff]  }
 0xe79   :  { %12166 = vmatpush3.bf16.msra.mxu1 %v12951_v50  ;;  %12188 = vmatpush3.bf16.msra.mxu0 %v12952_v51  ;;  %v3345_v61 = vpop.f32.mrb[46].mxu1  ;;  %v3386_v63 = vpop.f32.mrb[66].mxu0  ;;  %v12975_v50 = vld [vmem:[%s16658_s9 + $0x610] sm:$0xff]  }
 0xe7a   :  { %v3346_v19 = vpop.f32.mrb[47].mxu1  ;;  %v3387_v21 = vpop.f32.mrb[67].mxu0  ;;  %12167 = vmatprep.subr.bf16.mxu1 %v12953_v52  ;;  %12189 = vmatprep.subr.bf16.mxu0 %v12954_v53  ;;  %v12976_v51 = vld [vmem:[%s16658_s9 + $0x690] sm:$0xff]   ;;  %v12977_v52 = vld [vmem:[%s16658_s9 + $0x658] sm:$0xff]   ;;  %v12981_v63 = vld [vmem:[%s16658_s9 + $0x660] sm:$0xff]  }
 0xe7b   :  { %v12978_v53 = vld [vmem:[%s16658_s9 + $0x6d8] sm:$0xff]   ;;  %v12986_v19 = vld [vmem:[%s16658_s9 + $0x6e8] sm:$0xff]  }
 0xe7c   :  { %v12980_v61 = vld [vmem:[%s16658_s9 + $0x698] sm:$0xff]   ;;  %v12987_v21 = vld [vmem:[%s16658_s9 + $0x628] sm:$0xff]  }
 0xe7d   :  { %12168 = vmatpush3.bf16.msra.mxu1 %v12955_v2  ;;  %12190 = vmatpush3.bf16.msra.mxu0 %v12956_v3  ;;  %v12982_v2 = vld [vmem:[%s16658_s9 + $0x6e0] sm:$0xff]  }
 0xe7e   :  { %12169 = vmatprep.subr.bf16.mxu1 %v12957_v22  ;;  %12191 = vmatprep.subr.bf16.mxu0 %v12958_v27  ;;  %v12983_v3 = vld [vmem:[%s16658_s9 + $0x620] sm:$0xff]   ;;  %v2853_v22 = vrot.slane %v14667_v1, %v13608_v28  ;;  %v12988_v27 = vld [vmem:[%s16658_s9 + $0x6a8] sm:$0xff]  }
 0xe81   :  { %12170 = vmatpush3.bf16.msra.mxu1 %v12959_v37  ;;  %12192 = vmatpush3.bf16.msra.mxu0 %v12960_v56  ;;  %v12990_v37 = vld [vmem:[%s16658_s9 + $0x6f0] sm:$0xff]   ;;  %v2873_v56 = vrot.slane %v14667_v1, %v13896_v7 }
 0xe82   :  { %12171 = vmatprep.subr.bf16.mxu1 %v12961_v32  ;;  %12193 = vmatprep.subr.bf16.mxu0 %v12962_v33  ;;  %v3260_v32 = vadd.f32 %v14648_v23, %v2853_v22  ;;  %v12992_v33 = vld [vmem:[%s16658_s9 + $0x6b0] sm:$0xff]   ;;  %v3385_v23 = vadd.f32 %v14689_v60, %v2881_v17  ;;  %v13020_v22 = vld [vmem:[%s16658_s9 + $0x7a8] sm:$0xff]   ;;  %v13026_v17 = vld [vmem:[%s16658_s9 + $0x7f8] sm:$0xff]  }
 0xe84   :  { %v3397_v58 = vmax.f32 %v3260_v32, 0.0  ;;  %v3404_v24 = vmax.f32 %v3385_v23, 0.0  ;;  %v13028_v32 = vld [vmem:[%s16658_s9 + $0x7b8] sm:$0xff]  }
 0xe85   :  { %12172 = vmatpush3.bf16.msra.mxu1 %v12963_v4  ;;  %12194 = vmatpush3.bf16.msra.mxu0 %v12964_v14  ;;  %v12994_v4 = vld [vmem:[%s16658_s9 + $0x6f8] sm:$0xff]   ;;  %v3344_v14 = vadd.f32 %v14687_v59, %v2873_v56  ;;  %v12998_v59 = vld [vmem:[%s16658_s9 + $0x7c0] sm:$0xff]  }
 0xe86   :  { %12201 = vmatprep.subr.bf16.mxu1 %v12965_v20  ;;  %12223 = vmatprep.subr.bf16.mxu0 %v12966_v18  ;;  %v12997_v20 = vld [vmem:[%s16658_s9 + $0x740] sm:$0xff]   ;;  %v3399_v18 = vmax.f32 %v3301_v35, 0.0  ;;  %v13025_v56 = vld [vmem:[%s16658_s9 + $0x778] sm:$0xff]  }
 0xe87   :  { %v3402_v60 = vmax.f32 %v3344_v14, 0.0 }
 0xe88   :  { %4564 = vmatmul.mubr.bf16.vlgmr.msra.gmra.mrb[52].mxu1 %v3666_v40  ;;  %4604 = vmatmul.mubr.bf16.vlgmr.msra.gmra.mrb[72].mxu0 %v3668_v41  ;;  %v13000_v40 = vld [vmem:[%s16658_s9 + $0x780] sm:$0xff]   ;;  %v3672_v41 = vpack.c.bf16 %v3399_v18, %v3399_v18 }
 0xe89   :  { %12202 = vmatpush3.bf16.msra.mxu1 %v12967_v38  ;;  %4643 = vmatprep.mubr.bf16.mxu1 %v3671_v43  ;;  %v3670_v38 = vpack.c.bf16 %v3397_v58, %v3397_v58  ;;  %v3675_v43 = vpack.c.bf16 %v3402_v60, %v3402_v60 }
 0xe8a   :  { %12224 = vmatpush3.bf16.msra.mxu0 %v12968_v42  ;;  %4683 = vmatprep.mubr.bf16.mxu0 %v3673_v44  ;;  %v13001_v42 = vld [vmem:[%s16658_s9 + $0x748] sm:$0xff]  }
 0xe8b   :  { %12203 = vmatprep.subr.bf16.mxu1 %v12969_v47  ;;  %12225 = vmatprep.subr.bf16.mxu0 %v12970_v62  ;;  %v13002_v47 = vld [vmem:[%s16658_s9 + $0x7c8] sm:$0xff]   ;;  %v3677_v62 = vpack.c.bf16 %v3404_v24, %v3404_v24 }
 0xe8c   :  { %v13003_v44 = vld [vmem:[%s16658_s9 + $0x708] sm:$0xff]  }
 0xe8d   :  { %12204 = vmatpush3.bf16.msra.mxu1 %v12971_v12  ;;  %v13004_v12 = vld [vmem:[%s16658_s9 + $0x788] sm:$0xff]  }
 0xe8e   :  { %12226 = vmatpush3.bf16.msra.mxu0 %v12972_v46  ;;  %12205 = vmatprep.subr.bf16.mxu1 %v12973_v48  ;;  %v13005_v46 = vld [vmem:[%s16658_s9 + $0x750] sm:$0xff]  }
 0xe8f   :  { %12227 = vmatprep.subr.bf16.mxu0 %v12974_v49  ;;  %v13006_v48 = vld [vmem:[%s16658_s9 + $0x7d0] sm:$0xff]  }
 0xe90   :  { %v13007_v49 = vld [vmem:[%s16658_s9 + $0x710] sm:$0xff]  }
 0xe91   :  { %12206 = vmatpush3.bf16.msra.mxu1 %v12975_v50  ;;  %v13008_v50 = vld [vmem:[%s16658_s9 + $0x790] sm:$0xff]  }
 0xe92   :  { %12228 = vmatpush3.bf16.msra.mxu0 %v12976_v51  ;;  %12207 = vmatprep.subr.bf16.mxu1 %v12977_v52  ;;  %v13009_v51 = vld [vmem:[%s16658_s9 + $0x758] sm:$0xff]  }
 0xe93   :  { %12229 = vmatprep.subr.bf16.mxu0 %v12978_v53  ;;  %v13010_v52 = vld [vmem:[%s16658_s9 + $0x7d8] sm:$0xff]  }
 0xe94   :  { %v13011_v53 = vld [vmem:[%s16658_s9 + $0x718] sm:$0xff]  }
 0xe95   :  { %12208 = vmatpush3.bf16.msra.mxu1 %v12979_v45  ;;  %v13012_v45 = vld [vmem:[%s16658_s9 + $0x798] sm:$0xff]  }
 0xe96   :  { %12230 = vmatpush3.bf16.msra.mxu0 %v12980_v61  ;;  %12209 = vmatprep.subr.bf16.mxu1 %v12981_v63  ;;  %v13013_v61 = vld [vmem:[%s16658_s9 + $0x760] sm:$0xff]  }
 0xe97   :  { %12231 = vmatprep.subr.bf16.mxu0 %v12982_v2  ;;  %v13014_v63 = vld [vmem:[%s16658_s9 + $0x7e0] sm:$0xff]  }
 0xe98   :  { %v13015_v2 = vld [vmem:[%s16658_s9 + $0x720] sm:$0xff]  }
 0xe99   :  { %12210 = vmatpush3.bf16.msra.mxu1 %v12983_v3  ;;  %v13016_v3 = vld [vmem:[%s16658_s9 + $0x7a0] sm:$0xff]  }
 0xe9a   :  { %12232 = vmatpush3.bf16.msra.mxu0 %v12984_v54  ;;  %12211 = vmatprep.subr.bf16.mxu1 %v12985_v13  ;;  %v13017_v54 = vld [vmem:[%s16658_s9 + $0x768] sm:$0xff]  }
 0xe9b   :  { %12233 = vmatprep.subr.bf16.mxu0 %v12986_v19  ;;  %v13018_v13 = vld [vmem:[%s16658_s9 + $0x7e8] sm:$0xff]  }
 0xe9c   :  { %v13019_v19 = vld [vmem:[%s16658_s9 + $0x728] sm:$0xff]  }
 0xe9d   :  { %12212 = vmatpush3.bf16.msra.mxu1 %v12987_v21  ;;  %v2869_v21 = vrot.slane %v14667_v1, %v13890_v5  ;;  %v13023_v1 = vld [vmem:[%s16658_s9 + $0x730] sm:$0xff]  }
 0xe9e   :  { %12234 = vmatpush3.bf16.msra.mxu0 %v12988_v27  ;;  %12213 = vmatprep.subr.bf16.mxu1 %v12989_v29  ;;  %v13021_v27 = vld [vmem:[%s16658_s9 + $0x770] sm:$0xff]  }
 0xe9f   :  { %12235 = vmatprep.subr.bf16.mxu0 %v12990_v37  ;;  %v13022_v29 = vld [vmem:[%s16658_s9 + $0x7f0] sm:$0xff]   ;;  %v3342_v15 = vadd.f32 %v14683_v55, %v2869_v21  ;;  %v13027_v55 = vld [vmem:[%s16658_s9 + $0x738] sm:$0xff]  }
 0xea0   :  { %v13024_v37 = vld [vmem:[%s16658_s9 + $0x7b0] sm:$0xff]  }
 0xea1   :  { %12214 = vmatpush3.bf16.msra.mxu1 %v12991_v30  ;;  %v3401_v30 = vmax.f32 %v3342_v15, 0.0 }
 0xea2   :  { %12236 = vmatpush3.bf16.msra.mxu0 %v12992_v33  ;;  %12215 = vmatprep.subr.bf16.mxu1 %v12993_v34  ;;  %v3403_v33 = vmax.f32 %v14685_v57, 0.0  ;;  %v10781_v57 = vld [vmem:[%s16662_s10 + $0x1] ss:$0 sm:$0xff] }
 0xea3   :  { %12237 = vmatprep.subr.bf16.mxu0 %v12994_v4  ;;  %v3674_v34 = vpack.c.bf16 %v3401_v30, %v3401_v30 }
 0xea4   :  { %v3676_v35 = vpack.c.bf16 %v3403_v33, %v3403_v33 }
 0xea5   :  { %12216 = vmatpush3.bf16.msra.mxu1 %v12995_v36 }
 0xea6   :  { %12238 = vmatpush3.bf16.msra.mxu0 %v12996_v8  ;;  %12245 = vmatprep.subr.bf16.mxu1 %v12997_v20 }
 0xea7   :  { %12267 = vmatprep.subr.bf16.mxu0 %v12998_v59 }
 0xea8   :  { %4644 = vmatmul.mubr.bf16.vlgmr.msra.gmra.mrb[56].mxu1 %v3670_v38 }
 0xea9   :  { %4684 = vmatmul.mubr.bf16.vlgmr.msra.gmra.mrb[76].mxu0 %v3672_v41  ;;  %12246 = vmatpush3.bf16.msra.mxu1 %v12999_v26 }
 0xeaa   :  { %4723 = vmatprep.mubr.bf16.mxu1 %v3675_v43  ;;  %12268 = vmatpush3.bf16.msra.mxu0 %v13000_v40 }
 0xeab   :  { %4763 = vmatprep.mubr.bf16.mxu0 %v3677_v62  ;;  %12247 = vmatprep.subr.bf16.mxu1 %v13001_v42 }
 0xeac   :  { %12269 = vmatprep.subr.bf16.mxu0 %v13002_v47 }
 0xead   :  { %12248 = vmatpush3.bf16.msra.mxu1 %v13003_v44 }
 0xeae   :  { %12270 = vmatpush3.bf16.msra.mxu0 %v13004_v12  ;;  %12249 = vmatprep.subr.bf16.mxu1 %v13005_v46 }
 0xeaf   :  { %12271 = vmatprep.subr.bf16.mxu0 %v13006_v48 }
 0xeb1   :  { %12250 = vmatpush3.bf16.msra.mxu1 %v13007_v49 }
 0xeb2   :  { %12272 = vmatpush3.bf16.msra.mxu0 %v13008_v50  ;;  %12251 = vmatprep.subr.bf16.mxu1 %v13009_v51 }
 0xeb3   :  { %12273 = vmatprep.subr.bf16.mxu0 %v13010_v52 }
 0xeb5   :  { %12252 = vmatpush3.bf16.msra.mxu1 %v13011_v53 }
 0xeb6   :  { %12274 = vmatpush3.bf16.msra.mxu0 %v13012_v45  ;;  %12253 = vmatprep.subr.bf16.mxu1 %v13013_v61 }
 0xeb7   :  { %12275 = vmatprep.subr.bf16.mxu0 %v13014_v63 }
 0xeb9   :  { %12254 = vmatpush3.bf16.msra.mxu1 %v13015_v2 }
 0xeba   :  { %12276 = vmatpush3.bf16.msra.mxu0 %v13016_v3  ;;  %12255 = vmatprep.subr.bf16.mxu1 %v13017_v54 }
 0xebb   :  { %12277 = vmatprep.subr.bf16.mxu0 %v13018_v13 }
 0xebd   :  { %12256 = vmatpush3.bf16.msra.mxu1 %v13019_v19 }
 0xebe   :  { %12278 = vmatpush3.bf16.msra.mxu0 %v13020_v22  ;;  %12257 = vmatprep.subr.bf16.mxu1 %v13021_v27 }
 0xebf   :  { %12279 = vmatprep.subr.bf16.mxu0 %v13022_v29 }
 0xec1   :  { %12258 = vmatpush3.bf16.msra.mxu1 %v13023_v1 }
 0xec2   :  { %12280 = vmatpush3.bf16.msra.mxu0 %v13024_v37  ;;  %12259 = vmatprep.subr.bf16.mxu1 %v13025_v56 }
 0xec3   :  { %12281 = vmatprep.subr.bf16.mxu0 %v13026_v17 }
 0xec5   :  { %12260 = vmatpush3.bf16.msra.mxu1 %v13027_v55 }
 0xec6   :  { %12282 = vmatpush3.bf16.msra.mxu0 %v13028_v32  ;;  %12700 = vmatprep.subr.bf16.mxu1 %v13445_v0 }
 0xec7   :  { %12708 = vmatprep.subr.bf16.mxu0 %v13445_v0 }
 0xec8   :  { %4724 = vmatmul.mubr.bf16.vlgmr.msra.gmra.mrb[60].mxu1 %v3674_v34 }
 0xec9   :  { %4764 = vmatmul.mubr.bf16.vlgmr.msra.gmra.mrb[80].mxu0 %v3676_v35  ;;  %12704 = vmatprep.mubr.msk.bf16.mxu1 %vm13446_vm0, %v13445_v0 }
 0xeca   :  { %12712 = vmatprep.mubr.msk.bf16.mxu0 %vm13446_vm0, %v13445_v0 }
 0xf3b   :  { %v12129_v4 = vpop.f32.mrb[48].mxu1  ;;  %v12151_v14 = vpop.f32.mrb[68].mxu0 }
 0xf3c   :  { %v12130_v23 = vpop.f32.mrb[49].mxu1  ;;  %v12152_v36 = vpop.f32.mrb[69].mxu0 }
 0xf3d   :  { %v12131_v58 = vadd.f32 %v12130_v23, %v12129_v4  ;;  %v12153_v8 = vadd.f32 %v12152_v36, %v12151_v14  ;;  %v12132_v20 = vpop.f32.mrb[50].mxu1  ;;  %v12154_v18 = vpop.f32.mrb[70].mxu0  ;;  %v13029_v36 = vld [vmem:[%s16703_s27 + $0x20] sm:$0xff]  }
 0xf3e   :  { %v12133_v59 = vpop.f32.mrb[51].mxu1  ;;  %v12155_v60 = vpop.f32.mrb[71].mxu0  ;;  %12701 = vmatpush3.bf16.msra.mxu1 %v13029_v36 }
 0xf3f   :  { %v4486_v24 = vadd.f32 %v12131_v58, %v10781_v57  ;;  %v13030_v58 = vld [vmem:[%s16703_s27 + $0x28] sm:$0xff]   ;;  %12702 = vmatprep.subr.bf16.mxu1 %v13445_v0  ;;  %v10910_v59 = vld [vmem:[%s16663_s13 + $0x1] ss:$0 sm:$0xff] }
 0xf41   :  { %v4526_v26 = vadd.f32 %v12153_v8, %v4486_v24  ;;  %v10911_v24 = vld [vmem:[%s16664_s14 + $0x1] ss:$0 sm:$0xff] }
 0xf42   :  { %12703 = vmatpush3.bf16.msra.mxu1 %v13030_v58 }
 0xf5b   :  { %v12173_v38 = vpop.f32.mrb[52].mxu1  ;;  %v12195_v40 = vpop.f32.mrb[72].mxu0 }
 0xf5c   :  { %v12174_v41 = vpop.f32.mrb[53].mxu1  ;;  %v12196_v42 = vpop.f32.mrb[73].mxu0 }
 0xf5d   :  { %v12175_v43 = vadd.f32 %v12174_v41, %v12173_v38  ;;  %v12197_v47 = vadd.f32 %v12196_v42, %v12195_v40  ;;  %v12176_v62 = vpop.f32.mrb[54].mxu1  ;;  %v12198_v44 = vpop.f32.mrb[74].mxu0  ;;  %v10916_v41 = vld [vmem:[%s16705_s22 + $0x2] ss:$0 sm:$0xff] }
 0xf5e   :  { %v12177_v12 = vpop.f32.mrb[55].mxu1  ;;  %v12199_v46 = vpop.f32.mrb[75].mxu0 }
 0xf5f   :  { %v4566_v48 = vadd.f32 %v12175_v43, %v4526_v26 }
 0xf61   :  { %v4606_v49 = vadd.f32 %v12197_v47, %v4566_v48 }
 0xf7b   :  { %v12217_v50 = vpop.f32.mrb[56].mxu1 }
 0xf7c   :  { %v12239_v51 = vpop.f32.mrb[76].mxu0  ;;  %v12218_v52 = vpop.f32.mrb[57].mxu1 }
 0xf7d   :  { %v12219_v53 = vadd.f32 %v12218_v52, %v12217_v50  ;;  %v12240_v45 = vpop.f32.mrb[77].mxu0  ;;  %v12220_v61 = vpop.f32.mrb[58].mxu1 }
 0xf7e   :  { %v12241_v63 = vadd.f32 %v12240_v45, %v12239_v51  ;;  %v12242_v2 = vpop.f32.mrb[78].mxu0  ;;  %v12221_v3 = vpop.f32.mrb[59].mxu1 }
 0xf7f   :  { %v4646_v54 = vadd.f32 %v12219_v53, %v4606_v49  ;;  %v12243_v13 = vpop.f32.mrb[79].mxu0 }
 0xf81   :  { %v4686_v19 = vadd.f32 %v12241_v63, %v4646_v54 }
 0xf9b   :  { %v12261_v21 = vpop.f32.mrb[60].mxu1 }
 0xf9c   :  { %v12283_v22 = vpop.f32.mrb[80].mxu0  ;;  %v12262_v27 = vpop.f32.mrb[61].mxu1 }
 0xf9d   :  { %v12263_v29 = vadd.f32 %v12262_v27, %v12261_v21  ;;  %v12284_v1 = vpop.f32.mrb[81].mxu0  ;;  %v12264_v15 = vpop.f32.mrb[62].mxu1 }
 0xf9e   :  { %v12285_v37 = vadd.f32 %v12284_v1, %v12283_v22  ;;  %v12286_v56 = vpop.f32.mrb[82].mxu0  ;;  %v12265_v17 = vpop.f32.mrb[63].mxu1 }
 0xf9f   :  { %v4726_v55 = vadd.f32 %v12263_v29, %v4686_v19  ;;  %v12287_v30 = vpop.f32.mrb[83].mxu0 }
 0xfa1   :  { %v4766_v32 = vadd.f32 %v12285_v37, %v4726_v55 }
 0xfa3   :  { %v4771_v33 = vadd.f32 %v4766_v32, %v14413_v16 }
 0xfa5   :  { %v4774_v34 = vsel %vm333_vm6, %v4771_v33, 0.0 }
 0xfa6   :  { %4775 = vadd.xlane.f32.xlu0 %v4774_v34 }
0x1033   :  { %v4776_v35 = vpop.xlane.xlu0 %4775 }
0x1034   :  { %v4777_v4 = vmul.f32 0.03125, %v4776_v35 }
0x1036   :  { %v4778_v14 = vsub.f32 %v4771_v33, %v4777_v4 }
0x1038   :  { %v4779_v57 = vmul.f32 %v4778_v14, %v4778_v14 }
0x103a   :  { %v4780_v23 = vsel %vm333_vm6, %v4779_v57, 0.0 }
0x103b   :  { %4781 = vadd.xlane.f32.xlu0 %v4780_v23 }
0x10c8   :  { %v4782_v16 = vpop.xlane.xlu0 %4781 }
0x10c9   :  { %v4783_v8 = vmul.f32 0.03125, %v4782_v16 }
0x10cb   :  { %v4784_v20 = vadd.f32 1e-05, %v4783_v8 }
0x10cd   :  { %13383 = vrsqrt.f32 %v4784_v20 }
0x10d7   :  { %v13384_v18 = vpop.eup %13383 }
0x10d8   :  { %v4786_v60 = vmul.f32 %v13384_v18, %v4778_v14 }
0x10da   :  { %v4791_v26 = vmul.f32 %v10910_v59, %v4786_v60 }
0x10dc   :  { %v14964_v38 = vadd.f32 %v10911_v24, %v4791_v26 }
0x10de   :  { %v4802_v40 = vpack.c.bf16 %v14964_v38, %v14964_v38 }
0x10e0   :  { %12705 = vmatmul.mubr.msk.bf16.vlgmr.msra.gmra.mrb[64].mxu1 %vm151_vm2, %v4802_v40 }
0x10e1   :  { %5426 = vmatprep.mubr.bf16.mxu1 %v13456_v39 }
0x11b3   :  { %v4857_v42 = vpop.f32.mrb[64].mxu1 }
0x11b4   :  { %v14973_v43 = vadd.f32 %v10916_v41, %v4857_v42  ;;  %v12706_v47 = vpop.f32.mrb[65].mxu1 }
0x11b5   :  { %v4860_v62 = vpop.f32.mrb[66].mxu1 }
0x11b6   :  { %4898 = vrot.lane.b32.xlu1 %v14973_v43, %s16711_s19  ;;  %v12707_v44 = vpop.f32.mrb[67].mxu1  ;;  %v4863_v12 = vmul.f32 0.5, %v14973_v43 }
0x11b8   :  { %v4871_v46 = vrot.slane %v4863_v12, %v13604_v25 }
0x11ba   :  { %v4872_v48 = vcombine.high %v4871_v46, %v4871_v46  ;;  %v4879_v49 = vrot.slane %v4871_v46, %v13604_v25 }
0x11bc   :  { %v4886_v50 = vrot.slane %v4872_v48, %v13604_v25  ;;  %v4890_v51 = vrot.slane %v4879_v49, %v13608_v28 }
0x11be   :  { %v4894_v52 = vrot.slane %v4886_v50, %v13608_v28 }
0x1228   :  { %v4899_v53 = vpop.permute.xlu1 %4898 }
0x1229   :  { %v4901_v45 = vmul.f32 %v4899_v53, %v4890_v51  ;;  %v4902_v61 = vmul.f32 %v4899_v53, %v4894_v52 }
0x122b   :  { %4905 = vrot.lane.b32.xlu0 %v4901_v45, %s16712_s20  ;;  %4907 = vrot.lane.b32.xlu1 %v4902_v61, %s16712_s20 }
0x122f   :  { %4915 = vrot.lane.b32.xlu0 %v4902_v61, %s16713_s23  ;;  %4913 = vrot.lane.b32.xlu1 %v4901_v45, %s16713_s23 }
0x1233   :  { %4923 = vrot.lane.b32.xlu0 %v4902_v61, %s16706_s26  ;;  %4921 = vrot.lane.b32.xlu1 %v4901_v45, %s16706_s26 }
0x129d   :  { %v4906_v63 = vpop.permute.xlu0 %4905  ;;  %v4908_v2 = vpop.permute.xlu1 %4907 }
0x129e   :  { %v4911_v13 = vadd.f32 %v4906_v63, %v4901_v45  ;;  %v4912_v19 = vadd.f32 %v4908_v2, %v4902_v61  ;;  %v13031_v61 = vld [vmem:[%s16655_s5 + $0x20] sm:$0xff]   ;;  %v13032_v63 = vld [vmem:[%s16655_s5 + $0x28] sm:$0xff]  }
0x129f   :  { %12709 = vmatpush3.bf16.msra.mxu0 %v13031_v61 }
0x12a0   :  { %12710 = vmatprep.subr.bf16.mxu0 %v13445_v0 }
0x12a1   :  { %v4916_v3 = vpop.permute.xlu0 %4915  ;;  %v4914_v54 = vpop.permute.xlu1 %4913 }
0x12a2   :  { %v4920_v21 = vadd.f32 %v4916_v3, %v4912_v19  ;;  %v4919_v22 = vadd.f32 %v4914_v54, %v4911_v13 }
0x12a3   :  { %12711 = vmatpush3.bf16.msra.mxu0 %v13032_v63  ;;  %v10939_v63 = vld [vmem:[%s16657_s7 + $0x248] sm:$0xff] }
0x12a5   :  { %v4924_v27 = vpop.permute.xlu0 %4923  ;;  %v4922_v29 = vpop.permute.xlu1 %4921 }
0x12a6   :  { %v4928_v1 = vadd.f32 %v4924_v27, %v4920_v21  ;;  %v4927_v15 = vadd.f32 %v4922_v29, %v4919_v22 }
0x12a8   :  { %v4936_v37 = vsel %vm261_vm3, %v4928_v1, -inf  ;;  %v4929_v56 = vsel %vm261_vm3, %v4927_v15, -inf }
0x12a9   :  { %v4937_v17 = vrot.slane %v4936_v37, 4  ;;  %v4930_v55 = vrot.slane %v4929_v56, 4 }
0x12ab   :  { %v4938_v30 = vmax.f32 %v4936_v37, %v4937_v17  ;;  %v4931_v32 = vmax.f32 %v4929_v56, %v4930_v55 }
0x12ad   :  { %v4939_v33 = vrot.slane %v4938_v30, 2  ;;  %v4932_v34 = vrot.slane %v4931_v32, 2 }
0x12af   :  { %v4940_v35 = vmax.f32 %v4938_v30, %v4939_v33  ;;  %v4933_v4 = vmax.f32 %v4931_v32, %v4932_v34 }
0x12b1   :  { %v4941_v14 = vrot.slane %v4940_v35, 1  ;;  %v4934_v57 = vrot.slane %v4933_v4, 1 }
0x12b3   :  { %v4942_v23 = vmax.f32 %v4940_v35, %v4941_v14  ;;  %v4935_v36 = vmax.f32 %v4933_v4, %v4934_v57 }
0x12b5   :  { %v4944_v58 = vsub.f32 %v4928_v1, %v4942_v23  ;;  %v4943_v16 = vsub.f32 %v4927_v15, %v4935_v36 }
0x12b7   :  { %v4947_v8 = vmul.f32 1.442695, %v4944_v58  ;;  %v4945_v20 = vmul.f32 1.442695, %v4943_v16 }
0x12b9   :  { %13385 = vpow2.f32 %v4947_v8 }
0x12ba   :  { %13387 = vpow2.f32 %v4945_v20 }
0x12c3   :  { %v13386_v18 = vpop.eup %13385 }
0x12c4   :  { %v13388_v59 = vpop.eup %13387  ;;  %v4956_v60 = vsel %vm261_vm3, %v13386_v18, 0.0 }
0x12c5   :  { %v4957_v24 = vrot.slane %v4956_v60, 4  ;;  %v4949_v26 = vsel %vm261_vm3, %v13388_v59, 0.0 }
0x12c6   :  { %v4950_v40 = vrot.slane %v4949_v26, 4 }
0x12c7   :  { %v4958_v41 = vadd.f32 %v4957_v24, %v4956_v60 }
0x12c8   :  { %v4951_v42 = vadd.f32 %v4950_v40, %v4949_v26  ;;  %v10924_v40 = vld [vmem:[%s16656_s6 + $0x2] ss:$0 sm:$0xff] }
0x12c9   :  { %v4959_v47 = vrot.slane %v4958_v41, 2 }
0x12ca   :  { %v4952_v62 = vrot.slane %v4951_v42, 2 }
0x12cb   :  { %v4960_v44 = vadd.f32 %v4959_v47, %v4958_v41 }
0x12cc   :  { %v4953_v12 = vadd.f32 %v4952_v62, %v4951_v42 }
0x12cd   :  { %v4961_v46 = vrot.slane %v4960_v44, 1 }
0x12ce   :  { %v4954_v48 = vrot.slane %v4953_v12, 1 }
0x12cf   :  { %v4962_v49 = vadd.f32 %v4961_v46, %v4960_v44 }
0x12d0   :  { %v4955_v50 = vadd.f32 %v4954_v48, %v4953_v12 }
0x12d1   :  { %13389 = vrcp.f32 %v4962_v49 }
0x12d2   :  { %13391 = vrcp.f32 %v4955_v50 }
0x12db   :  { %v13390_v51 = vpop.eup %13389 }
0x12dc   :  { %v13392_v52 = vpop.eup %13391  ;;  %v4966_v53 = vmul.f32 %v13390_v51, %v13386_v18 }
0x12dd   :  { %v4964_v45 = vmul.f32 %v13392_v52, %v13388_v59 }
0x12de   :  { %4971 = vrot.lane.b32.xlu0 %v4966_v53, %s16707_s28 }
0x12df   :  { %4969 = vrot.lane.b32.xlu1 %v4964_v45, %s16707_s28 }
0x12e2   :  { %4977 = vrot.lane.b32.xlu0 %v4966_v53, %s16708_s25 }
0x12e3   :  { %4975 = vrot.lane.b32.xlu1 %v4964_v45, %s16708_s25 }
0x12e6   :  { %4983 = vrot.lane.b32.xlu0 %v4966_v53, %s16709_s2 }
0x12e7   :  { %4981 = vrot.lane.b32.xlu1 %v4964_v45, %s16709_s2 }
0x12eb   :  { %4993 = vrot.lane.b32.xlu1 %v14973_v43, %s16710_s30 }
0x1350   :  { %v4972_v2 = vpop.permute.xlu0 %4971 }
0x1351   :  { %v4970_v3 = vpop.permute.xlu1 %4969  ;;  %v4988_v43 = vsel %vm320_vm4, %v4966_v53, %v4972_v2  ;;  %v10930_v53 = vld [vmem:[%s16657_s7 + $0x200] sm:$0xff] }
0x1352   :  { %v4987_v22 = vsel %vm320_vm4, %v4964_v45, %v4970_v3  ;;  %v10938_v45 = vld [vmem:[%s16657_s7 + $0x240] sm:$0xff] }
0x1353   :  { %v10965_v61 = vcombine.high %v10930_v53, %v10938_v45  ;;  %v10964_v2 = vcombine.low %v10930_v53, %v10938_v45 }
0x1354   :  { %v4978_v54 = vpop.permute.xlu0 %4977 }
0x1355   :  { %v4976_v13 = vpop.permute.xlu1 %4975  ;;  %v4990_v27 = vsel %vm85_vm1, %v4988_v43, %v4978_v54  ;;  %5394 = vmatprep.subr.bf16.mxu1 %v10965_v61  ;;  %v10936_v61 = vld [vmem:[%s16657_s7 + $0x230] sm:$0xff] }
0x1356   :  { %v4989_v29 = vsel %vm85_vm1, %v4987_v22, %v4976_v13  ;;  %5395 = vmatpush1.bf16.msra.mxu1 %v10964_v2  ;;  %v10946_v13 = vld [vmem:[%s16657_s7 + $0x280] sm:$0xff]  ;;  %v10955_v22 = vld [vmem:[%s16657_s7 + $0x2c8] sm:$0xff]  ;;  %v10937_v2 = vld [vmem:[%s16657_s7 + $0x238] sm:$0xff] }
0x1358   :  { %v4984_v21 = vpop.permute.xlu0 %4983 }
0x1359   :  { %v4982_v19 = vpop.permute.xlu1 %4981  ;;  %v4992_v1 = vsel %vm325_vm5, %v4990_v27, %v4984_v21  ;;  %v10947_v21 = vld [vmem:[%s16657_s7 + $0x288] sm:$0xff] }
0x135a   :  { %v4991_v15 = vsel %vm325_vm5, %v4989_v29, %v4982_v19  ;;  %v10954_v19 = vld [vmem:[%s16657_s7 + $0x2c0] sm:$0xff]  ;;  %v10982_v29 = vcombine.low %v10947_v21, %v10955_v22 }
0x135b   :  { %v10981_v43 = vcombine.high %v10946_v13, %v10954_v19  ;;  %v10980_v27 = vcombine.low %v10946_v13, %v10954_v19 }
0x135d   :  { %v4994_v37 = vpop.permute.xlu1 %4993  ;;  %5396 = vmatprep.subr.bf16.mxu1 %v10981_v43  ;;  %v10952_v43 = vld [vmem:[%s16657_s7 + $0x2b0] sm:$0xff] }
0x135e   :  { %v4996_v56 = vmul.f32 %v4994_v37, %v4991_v15  ;;  %v4997_v17 = vmul.f32 %v4994_v37, %v4992_v1  ;;  %v10983_v1 = vcombine.high %v10947_v21, %v10955_v22  ;;  %5397 = vmatpush1.bf16.msra.mxu1 %v10980_v27  ;;  %v10932_v15 = vld [vmem:[%s16657_s7 + $0x210] sm:$0xff]  ;;  %v10953_v27 = vld [vmem:[%s16657_s7 + $0x2b8] sm:$0xff] }
0x135f   :  { %v10940_v37 = vld [vmem:[%s16657_s7 + $0x250] sm:$0xff] }
0x1360   :  { %v4998_v55 = vsel %vm333_vm6, %v4996_v56, 0.0  ;;  %v5005_v30 = vsel %vm333_vm6, %v4997_v17, 0.0  ;;  %v10933_v56 = vld [vmem:[%s16657_s7 + $0x218] sm:$0xff]  ;;  %v10969_v17 = vcombine.high %v10932_v15, %v10940_v37  ;;  %v10960_v22 = vld [vmem:[%s16657_s7 + $0x2f0] sm:$0xff] }
0x1361   :  { %v4999_v32 = vrot.slane %v4998_v55, 4  ;;  %v5006_v33 = vrot.slane %v5005_v30, 4 }
0x1362   :  { %5476 = vmatprep.subr.bf16.mxu1 %v10969_v17  ;;  %v10992_v17 = vcombine.low %v10952_v43, %v10960_v22 }
0x1363   :  { %v5000_v34 = vadd.f32 %v4999_v32, %v4998_v55  ;;  %v5007_v35 = vadd.f32 %v5006_v33, %v5005_v30  ;;  %v10941_v55 = vld [vmem:[%s16657_s7 + $0x258] sm:$0xff]  ;;  %v10968_v30 = vcombine.low %v10932_v15, %v10940_v37  ;;  %v10993_v37 = vcombine.high %v10952_v43, %v10960_v22 }
0x1364   :  { %v10970_v32 = vcombine.low %v10933_v56, %v10941_v55  ;;  %v10971_v33 = vcombine.high %v10933_v56, %v10941_v55 }
0x1365   :  { %v5001_v4 = vrot.slane %v5000_v34, 2  ;;  %v5008_v14 = vrot.slane %v5007_v35, 2 }
0x1367   :  { %v5002_v57 = vadd.f32 %v5001_v4, %v5000_v34  ;;  %v5009_v23 = vadd.f32 %v5008_v14, %v5007_v35 }
0x1369   :  { %v5003_v36 = vrot.slane %v5002_v57, 1  ;;  %v5010_v58 = vrot.slane %v5009_v23, 1 }
0x136b   :  { %v5004_v16 = vadd.f32 %v5003_v36, %v5002_v57  ;;  %v5011_v8 = vadd.f32 %v5010_v58, %v5009_v23  ;;  %v10928_v57 = vld [vmem:[%s16659_s11 + $0x2] ss:$0 sm:$0xff] }
0x136c   :  { %v10929_v36 = vld [vmem:[%s16660_s12 + $0x2] ss:$0 sm:$0xff] }
0x136d   :  { %v5017_v20 = vpack.c.bf16 %v5004_v16, %v5004_v16  ;;  %v5018_v18 = vpack.c.bf16 %v5011_v8, %v5011_v8  ;;  %v10948_v16 = vld [vmem:[%s16657_s7 + $0x290] sm:$0xff] }
0x136e   :  { %v10956_v8 = vld [vmem:[%s16657_s7 + $0x2d0] sm:$0xff] }
0x136f   :  { %v5026_v59 = vunpack.c.l.b16 %v5017_v20  ;;  %v5027_v60 = vunpack.c.l.b16 %v5018_v18  ;;  %v10949_v20 = vld [vmem:[%s16657_s7 + $0x298] sm:$0xff] }
0x1370   :  { %v10957_v18 = vld [vmem:[%s16657_s7 + $0x2d8] sm:$0xff] }
0x1371   :  { %v5028_v24 = vsel %vm363_vm7, %v5027_v60, %v5026_v59 }
0x1372   :  { %v5029_v26 = vpack.c.b16 %v5028_v24, %v5028_v24  ;;  %v10985_v24 = vcombine.high %v10948_v16, %v10956_v8 }
0x1374   :  { %12713 = vmatmul.mubr.msk.bf16.vlgmr.msra.gmra.mrb[84].mxu0 %vm151_vm2, %v5029_v26  ;;  %v10987_v26 = vcombine.high %v10949_v20, %v10957_v18 }
0x1375   :  { %5467 = vmatprep.mubr.bf16.mxu0 %v13456_v39 }
0x1447   :  { %v5079_v41 = vpop.f32.mrb[84].mxu0 }
0x1448   :  { %v5080_v42 = vadd.f32 %v10924_v40, %v5079_v41  ;;  %v12714_v47 = vpop.f32.mrb[85].mxu0  ;;  %v10934_v40 = vld [vmem:[%s16657_s7 + $0x220] sm:$0xff] }
0x1449   :  { %v5082_v62 = vpop.f32.mrb[86].mxu0  ;;  %v10942_v41 = vld [vmem:[%s16657_s7 + $0x260] sm:$0xff]  ;;  %v10943_v47 = vld [vmem:[%s16657_s7 + $0x268] sm:$0xff] }
0x144a   :  { %v12715_v44 = vpop.f32.mrb[87].mxu0  ;;  %v5085_v12 = vadd.f32 %v5080_v42, %v14964_v38  ;;  %v10931_v38 = vld [vmem:[%s16657_s7 + $0x208] sm:$0xff]  ;;  %v10984_v62 = vcombine.low %v10948_v16, %v10956_v8  ;;  %v13044_v16 = vld [vmem:[%s16658_s9 + $0x890] sm:$0xff]   ;;  %v13045_v8 = vld [vmem:[%s16658_s9 + $0x858] sm:$0xff]  }
0x144b   :  { %v10966_v3 = vcombine.low %v10931_v38, %v10939_v63  ;;  %v10967_v54 = vcombine.high %v10931_v38, %v10939_v63  ;;  %v10935_v42 = vld [vmem:[%s16657_s7 + $0x228] sm:$0xff]  ;;  %v10986_v44 = vcombine.low %v10949_v20, %v10957_v18  ;;  %v10944_v63 = vld [vmem:[%s16657_s7 + $0x270] sm:$0xff]  ;;  %v13046_v20 = vld [vmem:[%s16658_s9 + $0x8d8] sm:$0xff]  }
0x144c   :  { %v5088_v46 = vsel %vm333_vm6, %v5085_v12, 0.0  ;;  %v10974_v53 = vcombine.low %v10935_v42, %v10943_v47  ;;  %v10977_v19 = vcombine.high %v10936_v61, %v10944_v63  ;;  %v13047_v18 = vld [vmem:[%s16658_s9 + $0x818] sm:$0xff]  }
0x144d   :  { %5089 = vadd.xlane.f32.xlu0 %v5088_v46  ;;  %5435 = vmatprep.subr.bf16.mxu0 %v10967_v54  ;;  %v10975_v46 = vcombine.high %v10935_v42, %v10943_v47  ;;  %v13053_v42 = vld [vmem:[%s16658_s9 + $0x868] sm:$0xff]  }
0x144e   :  { %5436 = vmatpush1.bf16.msra.mxu0 %v10966_v3  ;;  %v10945_v3 = vld [vmem:[%s16657_s7 + $0x278] sm:$0xff]  ;;  %v13054_v47 = vld [vmem:[%s16658_s9 + $0x8e8] sm:$0xff]  }
0x144f   :  { %5437 = vmatprep.subr.bf16.mxu0 %v10983_v1  ;;  %v10979_v21 = vcombine.high %v10937_v2, %v10945_v3  ;;  %v10976_v1 = vcombine.low %v10936_v61, %v10944_v63  ;;  %v10978_v15 = vcombine.low %v10937_v2, %v10945_v3  ;;  %v15260_v61 = vld [vmem:[%s16661_s8 + $0x2] ss:$4 sm:$0xff] }
0x1450   :  { %v5154_v63 = vrot.slane %v15260_v61, %v13608_v28  ;;  %v5162_v2 = vrot.slane %v15260_v61, %v13899_v9  ;;  %v5158_v3 = vrot.slane %v15260_v61, %v13893_v6 }
0x1452   :  { %5438 = vmatpush1.bf16.msra.mxu0 %v10982_v29  ;;  %v10961_v29 = vld [vmem:[%s16657_s7 + $0x2f8] sm:$0xff] }
0x1453   :  { %5517 = vmatprep.subr.bf16.mxu0 %v10971_v33  ;;  %v10995_v56 = vcombine.high %v10953_v27, %v10961_v29  ;;  %v10994_v55 = vcombine.low %v10953_v27, %v10961_v29  ;;  %v13035_v33 = vld [vmem:[%s16658_s9 + $0x800] sm:$0xff]  }
0x14da   :  { %v5090_v48 = vpop.xlane.xlu0 %5089 }
0x14db   :  { %v5091_v49 = vmul.f32 0.03125, %v5090_v48  ;;  %v10950_v48 = vld [vmem:[%s16657_s7 + $0x2a0] sm:$0xff] }
0x14dd   :  { %v5092_v50 = vsub.f32 %v5085_v12, %v5091_v49  ;;  %v10973_v12 = vcombine.high %v10934_v40, %v10942_v41  ;;  %v10958_v49 = vld [vmem:[%s16657_s7 + $0x2e0] sm:$0xff] }
0x14de   :  { %v10989_v45 = vcombine.high %v10950_v48, %v10958_v49  ;;  %v10988_v54 = vcombine.low %v10950_v48, %v10958_v49  ;;  %v13059_v48 = vld [vmem:[%s16658_s9 + $0x830] sm:$0xff]  }
0x14df   :  { %v5093_v51 = vmul.f32 %v5092_v50, %v5092_v50  ;;  %v13060_v49 = vld [vmem:[%s16658_s9 + $0x8b0] sm:$0xff]  }
0x14e1   :  { %v5094_v52 = vsel %vm333_vm6, %v5093_v51, 0.0  ;;  %v10959_v51 = vld [vmem:[%s16657_s7 + $0x2e8] sm:$0xff] }
0x14e2   :  { %5095 = vadd.xlane.f32.xlu1 %v5094_v52  ;;  %v10972_v52 = vcombine.low %v10934_v40, %v10942_v41  ;;  %v13051_v40 = vld [vmem:[%s16658_s9 + $0x820] sm:$0xff]  }
0x14e3   :  { %v13052_v41 = vld [vmem:[%s16658_s9 + $0x8a0] sm:$0xff]  }
0x156f   :  { %v5096_v34 = vpop.xlane.xlu1 %5095 }
0x1570   :  { %v5097_v35 = vmul.f32 0.03125, %v5096_v34  ;;  %v13036_v34 = vld [vmem:[%s16658_s9 + $0x880] sm:$0xff]  }
0x1572   :  { %v5098_v4 = vadd.f32 1e-05, %v5097_v35  ;;  %v13037_v35 = vld [vmem:[%s16658_s9 + $0x848] sm:$0xff]  }
0x1574   :  { %13393 = vrsqrt.f32 %v5098_v4  ;;  %v13038_v4 = vld [vmem:[%s16658_s9 + $0x8c8] sm:$0xff]  }
0x157e   :  { %v13394_v14 = vpop.eup %13393 }
0x157f   :  { %v5100_v23 = vmul.f32 %v13394_v14, %v5092_v50  ;;  %v10951_v50 = vld [vmem:[%s16657_s7 + $0x2a8] sm:$0xff] }
0x1580   :  { %v10991_v38 = vcombine.high %v10951_v50, %v10959_v51  ;;  %v10990_v13 = vcombine.low %v10951_v50, %v10959_v51  ;;  %v13039_v14 = vld [vmem:[%s16658_s9 + $0x808] sm:$0xff]   ;;  %v13061_v50 = vld [vmem:[%s16658_s9 + $0x878] sm:$0xff]  }
0x1581   :  { %v5105_v58 = vmul.f32 %v10928_v57, %v5100_v23  ;;  %v13040_v57 = vld [vmem:[%s16658_s9 + $0x888] sm:$0xff]   ;;  %v13041_v23 = vld [vmem:[%s16658_s9 + $0x850] sm:$0xff]   ;;  %v13062_v51 = vld [vmem:[%s16658_s9 + $0x8f8] sm:$0xff]  }
0x1583   :  { %v15079_v59 = vadd.f32 %v10929_v36, %v5105_v58  ;;  %v13042_v36 = vld [vmem:[%s16658_s9 + $0x8d0] sm:$0xff]  }
0x1584   :  { %v13043_v58 = vld [vmem:[%s16658_s9 + $0x810] sm:$0xff]  }
0x1585   :  { %v15083_v60 = vpack.c.bf16 %v15079_v59, %v15079_v59 }
0x1587   :  { %10996 = vmatmul.mubr.msk.bf16.vlgmr.msra.gmra.mrb[68].mxu1 %vm151_vm2, %v15083_v60  ;;  %10997 = vmatmul.mubr.msk.bf16.vlgmr.msra.gmra.mrb[88].mxu0 %vm151_vm2, %v15083_v60 }
0x1588   :  { %5477 = vmatpush1.bf16.msra.mxu1 %v10968_v30  ;;  %5518 = vmatpush1.bf16.msra.mxu0 %v10970_v32  ;;  %v13033_v30 = vld [vmem:[%s16658_s9 + $0x840] sm:$0xff]  }
0x1589   :  { %5478 = vmatprep.subr.bf16.mxu1 %v10985_v24  ;;  %5519 = vmatprep.subr.bf16.mxu0 %v10987_v26  ;;  %v13034_v32 = vld [vmem:[%s16658_s9 + $0x8c0] sm:$0xff]  }
0x158a   :  { %5508 = vmatprep.mubr.bf16.mxu1 %v13456_v39  ;;  %5549 = vmatprep.mubr.bf16.mxu0 %v13456_v39  ;;  %v13049_v24 = vld [vmem:[%s16658_s9 + $0x860] sm:$0xff]  }
0x158b   :  { %v13050_v26 = vld [vmem:[%s16658_s9 + $0x8e0] sm:$0xff]  }
0x158c   :  { %5479 = vmatpush1.bf16.msra.mxu1 %v10984_v62  ;;  %5520 = vmatpush1.bf16.msra.mxu0 %v10986_v44  ;;  %v13055_v62 = vld [vmem:[%s16658_s9 + $0x828] sm:$0xff]  }
0x158d   :  { %5558 = vmatprep.subr.bf16.mxu1 %v10973_v12  ;;  %5599 = vmatprep.subr.bf16.mxu0 %v10975_v46  ;;  %v13056_v44 = vld [vmem:[%s16658_s9 + $0x8a8] sm:$0xff]   ;;  %v13057_v12 = vld [vmem:[%s16658_s9 + $0x870] sm:$0xff]  }
0x158e   :  { %v13058_v46 = vld [vmem:[%s16658_s9 + $0x8f0] sm:$0xff]  }
0x158f   :  { %10998 = vmatmul.mubr.msk.bf16.vlgmr.msra.gmra.mrb[72].mxu1 %vm151_vm2, %v15083_v60  ;;  %10999 = vmatmul.mubr.msk.bf16.vlgmr.msra.gmra.mrb[92].mxu0 %vm151_vm2, %v15083_v60 }
0x1590   :  { %5559 = vmatpush1.bf16.msra.mxu1 %v10972_v52  ;;  %5600 = vmatpush1.bf16.msra.mxu0 %v10974_v53  ;;  %v13063_v52 = vld [vmem:[%s16658_s9 + $0x838] sm:$0xff]  }
0x1591   :  { %5560 = vmatprep.subr.bf16.mxu1 %v10989_v45  ;;  %5601 = vmatprep.subr.bf16.mxu0 %v10991_v38  ;;  %v13064_v53 = vld [vmem:[%s16658_s9 + $0x8b8] sm:$0xff]   ;;  %v13065_v45 = vld [vmem:[%s16658_s9 + $0x940] sm:$0xff]  }
0x1592   :  { %5590 = vmatprep.mubr.bf16.mxu1 %v13456_v39  ;;  %5631 = vmatprep.mubr.bf16.mxu0 %v13456_v39  ;;  %v13066_v38 = vld [vmem:[%s16658_s9 + $0x9c0] sm:$0xff]  }
0x1594   :  { %5561 = vmatpush1.bf16.msra.mxu1 %v10988_v54  ;;  %5602 = vmatpush1.bf16.msra.mxu0 %v10990_v13  ;;  %v5166_v54 = vrot.slane %v15260_v61, %v13902_v10 }
0x1595   :  { %5640 = vmatprep.subr.bf16.mxu1 %v10977_v19  ;;  %5681 = vmatprep.subr.bf16.mxu0 %v10979_v21 }
0x1597   :  { %11000 = vmatmul.mubr.msk.bf16.vlgmr.msra.gmra.mrb[76].mxu1 %vm151_vm2, %v15083_v60  ;;  %11001 = vmatmul.mubr.msk.bf16.vlgmr.msra.gmra.mrb[96].mxu0 %vm151_vm2, %v15083_v60 }
0x1598   :  { %5641 = vmatpush1.bf16.msra.mxu1 %v10976_v1  ;;  %5682 = vmatpush1.bf16.msra.mxu0 %v10978_v15 }
0x1599   :  { %5642 = vmatprep.subr.bf16.mxu1 %v10993_v37  ;;  %5683 = vmatprep.subr.bf16.mxu0 %v10995_v56 }
0x159a   :  { %5672 = vmatprep.mubr.bf16.mxu1 %v13456_v39  ;;  %5713 = vmatprep.mubr.bf16.mxu0 %v13456_v39 }
0x159c   :  { %5643 = vmatpush1.bf16.msra.mxu1 %v10992_v17  ;;  %5684 = vmatpush1.bf16.msra.mxu0 %v10994_v55 }
0x159d   :  { %12295 = vmatprep.subr.bf16.mxu1 %v13033_v30  ;;  %12317 = vmatprep.subr.bf16.mxu0 %v13034_v32 }
0x159f   :  { %11002 = vmatmul.mubr.msk.bf16.vlgmr.msra.gmra.mrb[80].mxu1 %vm151_vm2, %v15083_v60  ;;  %11003 = vmatmul.mubr.msk.bf16.vlgmr.msra.gmra.mrb[100].mxu0 %vm151_vm2, %v15083_v60  ;;  %v13048_v60 = vld [vmem:[%s16658_s9 + $0x898] sm:$0xff]  }
0x15a0   :  { %12296 = vmatpush3.bf16.msra.mxu1 %v13035_v33  ;;  %12318 = vmatpush3.bf16.msra.mxu0 %v13036_v34 }
0x15a1   :  { %12297 = vmatprep.subr.bf16.mxu1 %v13037_v35  ;;  %12319 = vmatprep.subr.bf16.mxu0 %v13038_v4  ;;  %v5174_v4 = vrot.slane %v15260_v61, %v13896_v7 }
0x15a4   :  { %12298 = vmatpush3.bf16.msra.mxu1 %v13039_v14  ;;  %12320 = vmatpush3.bf16.msra.mxu0 %v13040_v57  ;;  %v5182_v14 = vrot.slane %v15260_v61, %v13921_v31  ;;  %v13067_v57 = vld [vmem:[%s16658_s9 + $0x900] sm:$0xff]  }
0x15a5   :  { %12299 = vmatprep.subr.bf16.mxu1 %v13041_v23  ;;  %12321 = vmatprep.subr.bf16.mxu0 %v13042_v36  ;;  %v13068_v23 = vld [vmem:[%s16658_s9 + $0x980] sm:$0xff]  }
0x15a8   :  { %12300 = vmatpush3.bf16.msra.mxu1 %v13043_v58  ;;  %12322 = vmatpush3.bf16.msra.mxu0 %v13044_v16  ;;  %v13069_v16 = vld [vmem:[%s16658_s9 + $0x948] sm:$0xff]  }
0x15a9   :  { %12301 = vmatprep.subr.bf16.mxu1 %v13045_v8  ;;  %12323 = vmatprep.subr.bf16.mxu0 %v13046_v20  ;;  %v13070_v8 = vld [vmem:[%s16658_s9 + $0x9c8] sm:$0xff]  }
0x15ac   :  { %12302 = vmatpush3.bf16.msra.mxu1 %v13047_v18  ;;  %12324 = vmatpush3.bf16.msra.mxu0 %v13048_v60 }
0x15ad   :  { %12303 = vmatprep.subr.bf16.mxu1 %v13049_v24  ;;  %12325 = vmatprep.subr.bf16.mxu0 %v13050_v26 }
0x15b0   :  { %12304 = vmatpush3.bf16.msra.mxu1 %v13051_v40  ;;  %12326 = vmatpush3.bf16.msra.mxu0 %v13052_v41 }
0x15b1   :  { %12305 = vmatprep.subr.bf16.mxu1 %v13053_v42  ;;  %12327 = vmatprep.subr.bf16.mxu0 %v13054_v47  ;;  %v13071_v47 = vld [vmem:[%s16658_s9 + $0x908] sm:$0xff]  }
0x15b4   :  { %12306 = vmatpush3.bf16.msra.mxu1 %v13055_v62  ;;  %12328 = vmatpush3.bf16.msra.mxu0 %v13056_v44  ;;  %v13072_v62 = vld [vmem:[%s16658_s9 + $0x988] sm:$0xff]  }
0x15b5   :  { %12307 = vmatprep.subr.bf16.mxu1 %v13057_v12  ;;  %12329 = vmatprep.subr.bf16.mxu0 %v13058_v46  ;;  %v13073_v46 = vld [vmem:[%s16658_s9 + $0x950] sm:$0xff]  }
0x15b8   :  { %12308 = vmatpush3.bf16.msra.mxu1 %v13059_v48  ;;  %12330 = vmatpush3.bf16.msra.mxu0 %v13060_v49  ;;  %v13074_v48 = vld [vmem:[%s16658_s9 + $0x9d0] sm:$0xff]  }
0x15b9   :  { %12309 = vmatprep.subr.bf16.mxu1 %v13061_v50  ;;  %12331 = vmatprep.subr.bf16.mxu0 %v13062_v51 }
0x15bc   :  { %12310 = vmatpush3.bf16.msra.mxu1 %v13063_v52  ;;  %12332 = vmatpush3.bf16.msra.mxu0 %v13064_v53  ;;  %v13075_v53 = vld [vmem:[%s16658_s9 + $0x910] sm:$0xff]  }
0x15bd   :  { %12339 = vmatprep.subr.bf16.mxu1 %v13065_v45  ;;  %12361 = vmatprep.subr.bf16.mxu0 %v13066_v38  ;;  %v13076_v45 = vld [vmem:[%s16658_s9 + $0x990] sm:$0xff]   ;;  %v13077_v38 = vld [vmem:[%s16658_s9 + $0x958] sm:$0xff]  }
0x165a   :  { %v5428_v13 = vpop.f32.mrb[68].mxu1  ;;  %v5469_v19 = vpop.f32.mrb[88].mxu0 }
0x165b   :  { %v5429_v21 = vadd.f32 %v5428_v13, %v5154_v63  ;;  %v5470_v43 = vadd.f32 %v5469_v19, %v5162_v2  ;;  %v5430_v22 = vpop.f32.mrb[69].mxu1  ;;  %v5471_v27 = vpop.f32.mrb[89].mxu0  ;;  %v13078_v63 = vld [vmem:[%s16658_s9 + $0x9d8] sm:$0xff]  }
0x165c   :  { %v5431_v29 = vadd.f32 %v5430_v22, %v5158_v3  ;;  %v5472_v1 = vadd.f32 %v5471_v27, %v5166_v54  ;;  %v5432_v15 = vpop.f32.mrb[70].mxu1  ;;  %v5473_v37 = vpop.f32.mrb[90].mxu0  ;;  %v13080_v22 = vld [vmem:[%s16658_s9 + $0x998] sm:$0xff]  }
0x165d   :  { %v5722_v56 = vmax.f32 %v5429_v21, 0.0  ;;  %v5724_v17 = vmax.f32 %v5470_v43, 0.0  ;;  %v5433_v55 = vpop.f32.mrb[71].mxu1  ;;  %v5474_v30 = vpop.f32.mrb[91].mxu0  ;;  %v13079_v43 = vld [vmem:[%s16658_s9 + $0x918] sm:$0xff]   ;;  %v13082_v15 = vld [vmem:[%s16658_s9 + $0x9e0] sm:$0xff]  }
0x165e   :  { %v5723_v32 = vmax.f32 %v5431_v29, 0.0  ;;  %v5725_v33 = vmax.f32 %v5472_v1, 0.0  ;;  %v13081_v1 = vld [vmem:[%s16658_s9 + $0x960] sm:$0xff]   ;;  %v13085_v30 = vld [vmem:[%s16658_s9 + $0x968] sm:$0xff]  }
0x165f   :  { %v5995_v36 = vpack.c.bf16 %v5722_v56, %v5722_v56  ;;  %v5997_v58 = vpack.c.bf16 %v5724_v17, %v5724_v17  ;;  %v15333_v37 = vld [vmem:[%s16661_s8 + $0x22] ss:$4 sm:$0xff] }
0x1660   :  { %v5996_v34 = vpack.c.bf16 %v5723_v32, %v5723_v32  ;;  %v5998_v35 = vpack.c.bf16 %v5725_v33, %v5725_v33  ;;  %v5210_v56 = vrot.slane %v15333_v37, %v13905_v11  ;;  %v13083_v17 = vld [vmem:[%s16658_s9 + $0x920] sm:$0xff]   ;;  %v13086_v32 = vld [vmem:[%s16658_s9 + $0x9e8] sm:$0xff]  }
0x1661   :  { %v13084_v55 = vld [vmem:[%s16658_s9 + $0x9a0] sm:$0xff]  }
0x1662   :  { %v15286_v20 = vpop.f32.mrb[72].mxu1  ;;  %v15288_v18 = vpop.f32.mrb[92].mxu0  ;;  %6816 = vmatprep.mubr.bf16.mxu1 %v5996_v34  ;;  %6856 = vmatprep.mubr.bf16.mxu0 %v5998_v35 }
0x1663   :  { %v5512_v60 = vpop.f32.mrb[73].mxu1  ;;  %v5553_v24 = vpop.f32.mrb[93].mxu0  ;;  %6817 = vmatmul.mubr.bf16.vlgmr.msra.gmra.mrb[84].mxu1 %v5995_v36  ;;  %6857 = vmatmul.mubr.bf16.vlgmr.msra.gmra.mrb[104].mxu0 %v5997_v58  ;;  %v13087_v36 = vld [vmem:[%s16658_s9 + $0x928] sm:$0xff]  }
0x1664   :  { %v5513_v26 = vadd.f32 %v5512_v60, %v5174_v4  ;;  %v5554_v40 = vadd.f32 %v5553_v24, %v5182_v14  ;;  %12340 = vmatpush3.bf16.msra.mxu1 %v13067_v57  ;;  %12362 = vmatpush3.bf16.msra.mxu0 %v13068_v23  ;;  %v5514_v41 = vpop.f32.mrb[74].mxu1  ;;  %v5555_v42 = vpop.f32.mrb[94].mxu0  ;;  %v13088_v58 = vld [vmem:[%s16658_s9 + $0x9a8] sm:$0xff]  }
0x1665   :  { %v5515_v44 = vpop.f32.mrb[75].mxu1  ;;  %v5556_v12 = vpop.f32.mrb[95].mxu0  ;;  %12341 = vmatprep.subr.bf16.mxu1 %v13069_v16  ;;  %12363 = vmatprep.subr.bf16.mxu0 %v13070_v8  ;;  %v5170_v16 = vrot.slane %v15260_v61, %v13890_v5  ;;  %v5178_v8 = vrot.slane %v15260_v61, %v13905_v11  ;;  %v5190_v41 = vrot.slane %v15333_v37, %v13893_v6  ;;  %v13091_v61 = vld [vmem:[%s16658_s9 + $0x930] sm:$0xff]  }
0x1666   :  { %v5727_v49 = vmax.f32 %v5513_v26, 0.0  ;;  %v5729_v50 = vmax.f32 %v5554_v40, 0.0  ;;  %v13089_v26 = vld [vmem:[%s16658_s9 + $0x970] sm:$0xff]   ;;  %v5198_v42 = vrot.slane %v15333_v37, %v13902_v10  ;;  %v13093_v12 = vld [vmem:[%s16658_s9 + $0x978] sm:$0xff]  }
0x1667   :  { %v13090_v40 = vld [vmem:[%s16658_s9 + $0x9f0] sm:$0xff]   ;;  %v5552_v44 = vadd.f32 %v15288_v18, %v5178_v8  ;;  %v13096_v18 = vld [vmem:[%s16658_s9 + $0x9b8] sm:$0xff]   ;;  %v13117_v8 = vld [vmem:[%s16658_s9 + $0xa68] sm:$0xff]  }
0x1668   :  { %v6000_v51 = vpack.c.bf16 %v5727_v49, %v5727_v49  ;;  %v6002_v52 = vpack.c.bf16 %v5729_v50, %v5729_v50  ;;  %12342 = vmatpush3.bf16.msra.mxu1 %v13071_v47  ;;  %12364 = vmatpush3.bf16.msra.mxu0 %v13072_v62  ;;  %v13092_v47 = vld [vmem:[%s16658_s9 + $0x9b0] sm:$0xff]   ;;  %v5511_v62 = vadd.f32 %v15286_v20, %v5170_v16  ;;  %v13095_v20 = vld [vmem:[%s16658_s9 + $0x938] sm:$0xff]   ;;  %v13116_v16 = vld [vmem:[%s16658_s9 + $0xaa0] sm:$0xff]  }
0x1669   :  { %12343 = vmatprep.subr.bf16.mxu1 %v13073_v46  ;;  %12365 = vmatprep.subr.bf16.mxu0 %v13074_v48  ;;  %v13094_v46 = vld [vmem:[%s16658_s9 + $0x9f8] sm:$0xff]  }
0x166a   :  { %v15314_v2 = vpop.f32.mrb[76].mxu1  ;;  %v15316_v3 = vpop.f32.mrb[96].mxu0  ;;  %6896 = vmatprep.mubr.bf16.mxu1 %v6000_v51  ;;  %6936 = vmatprep.mubr.bf16.mxu0 %v6002_v52  ;;  %v5726_v50 = vmax.f32 %v5511_v62, 0.0  ;;  %v5728_v51 = vmax.f32 %v5552_v44, 0.0  ;;  %v13097_v52 = vld [vmem:[%s16658_s9 + $0xa40] sm:$0xff]   ;;  %v5214_v62 = vrot.slane %v15333_v37, %v13921_v31  ;;  %v13123_v44 = vld [vmem:[%s16658_s9 + $0xa30] sm:$0xff]  }
0x166b   :  { %v5594_v54 = vpop.f32.mrb[77].mxu1  ;;  %v5635_v13 = vpop.f32.mrb[97].mxu0 }
0x166c   :  { %12344 = vmatpush3.bf16.msra.mxu1 %v13075_v53  ;;  %12366 = vmatpush3.bf16.msra.mxu0 %v13076_v45  ;;  %v5596_v19 = vpop.f32.mrb[78].mxu1  ;;  %v5637_v21 = vpop.f32.mrb[98].mxu0  ;;  %v5595_v48 = vadd.f32 %v5594_v54, %v5190_v41  ;;  %v5636_v49 = vadd.f32 %v5635_v13, %v5198_v42  ;;  %v13098_v53 = vld [vmem:[%s16658_s9 + $0xac0] sm:$0xff]   ;;  %v5999_v54 = vpack.c.bf16 %v5726_v50, %v5726_v50  ;;  %v13121_v41 = vld [vmem:[%s16658_s9 + $0xa70] sm:$0xff]   ;;  %v13127_v50 = vld [vmem:[%s16658_s9 + $0xa38] sm:$0xff]  }
0x166d   :  { %v5597_v27 = vpop.f32.mrb[79].mxu1  ;;  %v5638_v29 = vpop.f32.mrb[99].mxu0  ;;  %12345 = vmatprep.subr.bf16.mxu1 %v13077_v38  ;;  %12367 = vmatprep.subr.bf16.mxu0 %v13078_v63  ;;  %v13099_v63 = vld [vmem:[%s16658_s9 + $0xa00] sm:$0xff]   ;;  %v6001_v13 = vpack.c.bf16 %v5728_v51, %v5728_v51  ;;  %v5194_v42 = vrot.slane %v15333_v37, %v13899_v9 }
0x166e   :  { %v5731_v45 = vmax.f32 %v5595_v48, 0.0  ;;  %v5733_v38 = vmax.f32 %v5636_v49, 0.0  ;;  %v13100_v19 = vld [vmem:[%s16658_s9 + $0xa80] sm:$0xff]   ;;  %v13103_v29 = vld [vmem:[%s16658_s9 + $0xa08] sm:$0xff]   ;;  %v13125_v48 = vld [vmem:[%s16658_s9 + $0xa78] sm:$0xff]  }
0x166f   :  { %v5634_v49 = vadd.f32 %v15316_v3, %v5194_v42  ;;  %v13128_v3 = vld [vmem:[%s16658_s9 + $0xab8] sm:$0xff]  }
0x1670   :  { %12346 = vmatpush3.bf16.msra.mxu1 %v13079_v43  ;;  %12368 = vmatpush3.bf16.msra.mxu0 %v13080_v22  ;;  %v6004_v21 = vpack.c.bf16 %v5731_v45, %v5731_v45  ;;  %v13101_v43 = vld [vmem:[%s16658_s9 + $0xa48] sm:$0xff]   ;;  %v6006_v27 = vpack.c.bf16 %v5733_v38, %v5733_v38  ;;  %v13131_v38 = vld [vmem:[%s16658_s9 + $0xb00] sm:$0xff]  }
0x1671   :  { %12347 = vmatprep.subr.bf16.mxu1 %v13081_v1  ;;  %12369 = vmatprep.subr.bf16.mxu0 %v13082_v15  ;;  %v13102_v22 = vld [vmem:[%s16658_s9 + $0xac8] sm:$0xff]   ;;  %v13105_v15 = vld [vmem:[%s16658_s9 + $0xa50] sm:$0xff]  }
0x1672   :  { %v15349_v33 = vpop.f32.mrb[80].mxu1  ;;  %v5715_v34 = vpop.f32.mrb[100].mxu0  ;;  %v13104_v1 = vld [vmem:[%s16658_s9 + $0xa88] sm:$0xff]  }
0x1673   :  { %v15351_v35 = vadd.f32 %v5715_v34, %v5210_v56  ;;  %v15353_v4 = vpop.f32.mrb[81].mxu1  ;;  %v15355_v14 = vpop.f32.mrb[101].mxu0  ;;  %v13106_v56 = vld [vmem:[%s16658_s9 + $0xad0] sm:$0xff]   ;;  %v13111_v34 = vld [vmem:[%s16658_s9 + $0xa18] sm:$0xff]  }
0x1674   :  { %12348 = vmatpush3.bf16.msra.mxu1 %v13083_v17  ;;  %12370 = vmatpush3.bf16.msra.mxu0 %v13084_v55  ;;  %v5678_v57 = vpop.f32.mrb[82].mxu1  ;;  %v5719_v23 = vpop.f32.mrb[102].mxu0  ;;  %v13107_v17 = vld [vmem:[%s16658_s9 + $0xa10] sm:$0xff]  }
0x1675   :  { %v5679_v60 = vpop.f32.mrb[83].mxu1  ;;  %v5720_v24 = vpop.f32.mrb[103].mxu0  ;;  %12349 = vmatprep.subr.bf16.mxu1 %v13085_v30  ;;  %12371 = vmatprep.subr.bf16.mxu0 %v13086_v32  ;;  %v13108_v55 = vld [vmem:[%s16658_s9 + $0xa90] sm:$0xff]   ;;  %v13109_v30 = vld [vmem:[%s16658_s9 + $0xa58] sm:$0xff]   ;;  %v13113_v23 = vld [vmem:[%s16658_s9 + $0xa60] sm:$0xff]  }
0x1676   :  { %v13110_v32 = vld [vmem:[%s16658_s9 + $0xad8] sm:$0xff]   ;;  %v13118_v60 = vld [vmem:[%s16658_s9 + $0xae8] sm:$0xff]  }
0x1677   :  { %v13112_v57 = vld [vmem:[%s16658_s9 + $0xa98] sm:$0xff]   ;;  %v13119_v24 = vld [vmem:[%s16658_s9 + $0xa28] sm:$0xff]  }
0x1678   :  { %12350 = vmatpush3.bf16.msra.mxu1 %v13087_v36  ;;  %12372 = vmatpush3.bf16.msra.mxu0 %v13088_v58  ;;  %v13114_v36 = vld [vmem:[%s16658_s9 + $0xae0] sm:$0xff]  }
0x1679   :  { %12351 = vmatprep.subr.bf16.mxu1 %v13089_v26  ;;  %12373 = vmatprep.subr.bf16.mxu0 %v13090_v40  ;;  %v13115_v58 = vld [vmem:[%s16658_s9 + $0xa20] sm:$0xff]   ;;  %v5186_v26 = vrot.slane %v15333_v37, %v13608_v28  ;;  %v13120_v40 = vld [vmem:[%s16658_s9 + $0xaa8] sm:$0xff]  }
0x167c   :  { %12352 = vmatpush3.bf16.msra.mxu1 %v13091_v61  ;;  %12374 = vmatpush3.bf16.msra.mxu0 %v13092_v47  ;;  %v13122_v61 = vld [vmem:[%s16658_s9 + $0xaf0] sm:$0xff]   ;;  %v5206_v47 = vrot.slane %v15333_v37, %v13896_v7 }
0x167d   :  { %12353 = vmatprep.subr.bf16.mxu1 %v13093_v12  ;;  %12375 = vmatprep.subr.bf16.mxu0 %v13094_v46  ;;  %v5593_v12 = vadd.f32 %v15314_v2, %v5186_v26  ;;  %v13124_v46 = vld [vmem:[%s16658_s9 + $0xab0] sm:$0xff]   ;;  %v5718_v2 = vadd.f32 %v15355_v14, %v5214_v62  ;;  %v13152_v26 = vld [vmem:[%s16658_s9 + $0xba8] sm:$0xff]   ;;  %v13158_v62 = vld [vmem:[%s16658_s9 + $0xbf8] sm:$0xff]  }
0x167f   :  { %v5730_v51 = vmax.f32 %v5593_v12, 0.0  ;;  %v5737_v45 = vmax.f32 %v5718_v2, 0.0  ;;  %v13160_v12 = vld [vmem:[%s16658_s9 + $0xbb8] sm:$0xff]  }
0x1680   :  { %12354 = vmatpush3.bf16.msra.mxu1 %v13095_v20  ;;  %12376 = vmatpush3.bf16.msra.mxu0 %v13096_v18  ;;  %v13126_v20 = vld [vmem:[%s16658_s9 + $0xaf8] sm:$0xff]   ;;  %v5677_v18 = vadd.f32 %v15353_v4, %v5206_v47  ;;  %v13130_v4 = vld [vmem:[%s16658_s9 + $0xbc0] sm:$0xff]  }
0x1681   :  { %12383 = vmatprep.subr.bf16.mxu1 %v13097_v52  ;;  %12405 = vmatprep.subr.bf16.mxu0 %v13098_v53  ;;  %v13129_v52 = vld [vmem:[%s16658_s9 + $0xb40] sm:$0xff]   ;;  %v5732_v53 = vmax.f32 %v5634_v49, 0.0  ;;  %v13157_v47 = vld [vmem:[%s16658_s9 + $0xb78] sm:$0xff]  }
0x1682   :  { %v5735_v14 = vmax.f32 %v5677_v18, 0.0 }
0x1683   :  { %6897 = vmatmul.mubr.bf16.vlgmr.msra.gmra.mrb[88].mxu1 %v5999_v54  ;;  %6937 = vmatmul.mubr.bf16.vlgmr.msra.gmra.mrb[108].mxu0 %v6001_v13  ;;  %v13132_v54 = vld [vmem:[%s16658_s9 + $0xb80] sm:$0xff]   ;;  %v6005_v13 = vpack.c.bf16 %v5732_v53, %v5732_v53 }
0x1684   :  { %12384 = vmatpush3.bf16.msra.mxu1 %v13099_v63  ;;  %6976 = vmatprep.mubr.bf16.mxu1 %v6004_v21  ;;  %v6003_v63 = vpack.c.bf16 %v5730_v51, %v5730_v51  ;;  %v6008_v21 = vpack.c.bf16 %v5735_v14, %v5735_v14 }
0x1685   :  { %12406 = vmatpush3.bf16.msra.mxu0 %v13100_v19  ;;  %7016 = vmatprep.mubr.bf16.mxu0 %v6006_v27  ;;  %v13133_v19 = vld [vmem:[%s16658_s9 + $0xb48] sm:$0xff]  }
0x1686   :  { %12385 = vmatprep.subr.bf16.mxu1 %v13101_v43  ;;  %12407 = vmatprep.subr.bf16.mxu0 %v13102_v22  ;;  %v13134_v43 = vld [vmem:[%s16658_s9 + $0xbc8] sm:$0xff]   ;;  %v6010_v22 = vpack.c.bf16 %v5737_v45, %v5737_v45 }
0x1687   :  { %v13135_v27 = vld [vmem:[%s16658_s9 + $0xb08] sm:$0xff]  }
0x1688   :  { %12386 = vmatpush3.bf16.msra.mxu1 %v13103_v29  ;;  %v13136_v29 = vld [vmem:[%s16658_s9 + $0xb88] sm:$0xff]  }
0x1689   :  { %12408 = vmatpush3.bf16.msra.mxu0 %v13104_v1  ;;  %12387 = vmatprep.subr.bf16.mxu1 %v13105_v15  ;;  %v13137_v1 = vld [vmem:[%s16658_s9 + $0xb50] sm:$0xff]  }
0x168a   :  { %12409 = vmatprep.subr.bf16.mxu0 %v13106_v56  ;;  %v13138_v15 = vld [vmem:[%s16658_s9 + $0xbd0] sm:$0xff]  }
0x168b   :  { %v13139_v56 = vld [vmem:[%s16658_s9 + $0xb10] sm:$0xff]  }
0x168c   :  { %12388 = vmatpush3.bf16.msra.mxu1 %v13107_v17  ;;  %v13140_v17 = vld [vmem:[%s16658_s9 + $0xb90] sm:$0xff]  }
0x168d   :  { %12410 = vmatpush3.bf16.msra.mxu0 %v13108_v55  ;;  %12389 = vmatprep.subr.bf16.mxu1 %v13109_v30  ;;  %v13141_v55 = vld [vmem:[%s16658_s9 + $0xb58] sm:$0xff]  }
0x168e   :  { %12411 = vmatprep.subr.bf16.mxu0 %v13110_v32  ;;  %v13142_v30 = vld [vmem:[%s16658_s9 + $0xbd8] sm:$0xff]  }
0x168f   :  { %v13143_v32 = vld [vmem:[%s16658_s9 + $0xb18] sm:$0xff]  }
0x1690   :  { %12390 = vmatpush3.bf16.msra.mxu1 %v13111_v34  ;;  %v13144_v34 = vld [vmem:[%s16658_s9 + $0xb98] sm:$0xff]  }
0x1691   :  { %12412 = vmatpush3.bf16.msra.mxu0 %v13112_v57  ;;  %12391 = vmatprep.subr.bf16.mxu1 %v13113_v23  ;;  %v13145_v57 = vld [vmem:[%s16658_s9 + $0xb60] sm:$0xff]  }
0x1692   :  { %12413 = vmatprep.subr.bf16.mxu0 %v13114_v36  ;;  %v13146_v23 = vld [vmem:[%s16658_s9 + $0xbe0] sm:$0xff]  }
0x1693   :  { %v13147_v36 = vld [vmem:[%s16658_s9 + $0xb20] sm:$0xff]  }
0x1694   :  { %12392 = vmatpush3.bf16.msra.mxu1 %v13115_v58  ;;  %v13148_v58 = vld [vmem:[%s16658_s9 + $0xba0] sm:$0xff]  }
0x1695   :  { %12414 = vmatpush3.bf16.msra.mxu0 %v13116_v16  ;;  %12393 = vmatprep.subr.bf16.mxu1 %v13117_v8  ;;  %v13149_v16 = vld [vmem:[%s16658_s9 + $0xb68] sm:$0xff]  }
0x1696   :  { %12415 = vmatprep.subr.bf16.mxu0 %v13118_v60  ;;  %v13150_v8 = vld [vmem:[%s16658_s9 + $0xbe8] sm:$0xff]  }
0x1697   :  { %v13151_v60 = vld [vmem:[%s16658_s9 + $0xb28] sm:$0xff]  }
0x1698   :  { %12394 = vmatpush3.bf16.msra.mxu1 %v13119_v24  ;;  %v5202_v24 = vrot.slane %v15333_v37, %v13890_v5  ;;  %v13155_v37 = vld [vmem:[%s16658_s9 + $0xb30] sm:$0xff]  }
0x1699   :  { %12416 = vmatpush3.bf16.msra.mxu0 %v13120_v40  ;;  %12395 = vmatprep.subr.bf16.mxu1 %v13121_v41  ;;  %v13153_v40 = vld [vmem:[%s16658_s9 + $0xb70] sm:$0xff]  }
0x169a   :  { %12417 = vmatprep.subr.bf16.mxu0 %v13122_v61  ;;  %v13154_v41 = vld [vmem:[%s16658_s9 + $0xbf0] sm:$0xff]   ;;  %v5675_v42 = vadd.f32 %v15349_v33, %v5202_v24  ;;  %v13159_v33 = vld [vmem:[%s16658_s9 + $0xb38] sm:$0xff]  }
0x169b   :  { %v13156_v61 = vld [vmem:[%s16658_s9 + $0xbb0] sm:$0xff]  }
0x169c   :  { %12396 = vmatpush3.bf16.msra.mxu1 %v13123_v44  ;;  %v5734_v44 = vmax.f32 %v5675_v42, 0.0 }
0x169d   :  { %12418 = vmatpush3.bf16.msra.mxu0 %v13124_v46  ;;  %12397 = vmatprep.subr.bf16.mxu1 %v13125_v48  ;;  %v5736_v46 = vmax.f32 %v15351_v35, 0.0  ;;  %v11260_v35 = vld [vmem:[%s16662_s10 + $0x2] ss:$0 sm:$0xff] }
0x169e   :  { %12419 = vmatprep.subr.bf16.mxu0 %v13126_v20  ;;  %v6007_v48 = vpack.c.bf16 %v5734_v44, %v5734_v44 }
0x169f   :  { %v6009_v49 = vpack.c.bf16 %v5736_v46, %v5736_v46 }
0x16a0   :  { %12398 = vmatpush3.bf16.msra.mxu1 %v13127_v50 }
0x16a1   :  { %12420 = vmatpush3.bf16.msra.mxu0 %v13128_v3  ;;  %12427 = vmatprep.subr.bf16.mxu1 %v13129_v52 }
0x16a2   :  { %12449 = vmatprep.subr.bf16.mxu0 %v13130_v4 }
0x16a3   :  { %6977 = vmatmul.mubr.bf16.vlgmr.msra.gmra.mrb[92].mxu1 %v6003_v63 }
0x16a4   :  { %7017 = vmatmul.mubr.bf16.vlgmr.msra.gmra.mrb[112].mxu0 %v6005_v13  ;;  %12428 = vmatpush3.bf16.msra.mxu1 %v13131_v38 }
0x16a5   :  { %7056 = vmatprep.mubr.bf16.mxu1 %v6008_v21  ;;  %12450 = vmatpush3.bf16.msra.mxu0 %v13132_v54 }
0x16a6   :  { %7096 = vmatprep.mubr.bf16.mxu0 %v6010_v22  ;;  %12429 = vmatprep.subr.bf16.mxu1 %v13133_v19 }
0x16a7   :  { %12451 = vmatprep.subr.bf16.mxu0 %v13134_v43 }
0x16a8   :  { %12430 = vmatpush3.bf16.msra.mxu1 %v13135_v27 }
0x16a9   :  { %12452 = vmatpush3.bf16.msra.mxu0 %v13136_v29  ;;  %12431 = vmatprep.subr.bf16.mxu1 %v13137_v1 }
0x16aa   :  { %12453 = vmatprep.subr.bf16.mxu0 %v13138_v15 }
0x16ac   :  { %12432 = vmatpush3.bf16.msra.mxu1 %v13139_v56 }
0x16ad   :  { %12454 = vmatpush3.bf16.msra.mxu0 %v13140_v17  ;;  %12433 = vmatprep.subr.bf16.mxu1 %v13141_v55 }
0x16ae   :  { %12455 = vmatprep.subr.bf16.mxu0 %v13142_v30 }
0x16b0   :  { %12434 = vmatpush3.bf16.msra.mxu1 %v13143_v32 }
0x16b1   :  { %12456 = vmatpush3.bf16.msra.mxu0 %v13144_v34  ;;  %12435 = vmatprep.subr.bf16.mxu1 %v13145_v57 }
0x16b2   :  { %12457 = vmatprep.subr.bf16.mxu0 %v13146_v23 }
0x16b4   :  { %12436 = vmatpush3.bf16.msra.mxu1 %v13147_v36 }
0x16b5   :  { %12458 = vmatpush3.bf16.msra.mxu0 %v13148_v58  ;;  %12437 = vmatprep.subr.bf16.mxu1 %v13149_v16 }
0x16b6   :  { %12459 = vmatprep.subr.bf16.mxu0 %v13150_v8 }
0x16b8   :  { %12438 = vmatpush3.bf16.msra.mxu1 %v13151_v60 }
0x16b9   :  { %12460 = vmatpush3.bf16.msra.mxu0 %v13152_v26  ;;  %12439 = vmatprep.subr.bf16.mxu1 %v13153_v40 }
0x16ba   :  { %12461 = vmatprep.subr.bf16.mxu0 %v13154_v41 }
0x16bc   :  { %12440 = vmatpush3.bf16.msra.mxu1 %v13155_v37 }
0x16bd   :  { %12462 = vmatpush3.bf16.msra.mxu0 %v13156_v61  ;;  %12441 = vmatprep.subr.bf16.mxu1 %v13157_v47 }
0x16be   :  { %12463 = vmatprep.subr.bf16.mxu0 %v13158_v62 }
0x16c0   :  { %12442 = vmatpush3.bf16.msra.mxu1 %v13159_v33 }
0x16c1   :  { %12464 = vmatpush3.bf16.msra.mxu0 %v13160_v12  ;;  %12716 = vmatprep.subr.bf16.mxu1 %v13445_v0 }
0x16c2   :  { %12724 = vmatprep.subr.bf16.mxu0 %v13445_v0 }
0x16c3   :  { %7057 = vmatmul.mubr.bf16.vlgmr.msra.gmra.mrb[96].mxu1 %v6007_v48 }
0x16c4   :  { %7097 = vmatmul.mubr.bf16.vlgmr.msra.gmra.mrb[116].mxu0 %v6009_v49  ;;  %12720 = vmatprep.mubr.msk.bf16.mxu1 %vm13446_vm0, %v13445_v0 }
0x16c5   :  { %12728 = vmatprep.mubr.msk.bf16.mxu0 %vm13446_vm0, %v13445_v0 }
0x1736   :  { %v12311_v20 = vpop.f32.mrb[84].mxu1  ;;  %v12333_v18 = vpop.f32.mrb[104].mxu0 }
0x1737   :  { %v12312_v2 = vpop.f32.mrb[85].mxu1  ;;  %v12334_v50 = vpop.f32.mrb[105].mxu0 }
0x1738   :  { %v12313_v51 = vadd.f32 %v12312_v2, %v12311_v20  ;;  %v12335_v3 = vadd.f32 %v12334_v50, %v12333_v18  ;;  %v12314_v52 = vpop.f32.mrb[86].mxu1  ;;  %v12336_v53 = vpop.f32.mrb[106].mxu0  ;;  %v13161_v50 = vld [vmem:[%s16703_s27 + $0x30] sm:$0xff]  }
0x1739   :  { %v12315_v4 = vpop.f32.mrb[87].mxu1  ;;  %v12337_v14 = vpop.f32.mrb[107].mxu0  ;;  %12717 = vmatpush3.bf16.msra.mxu1 %v13161_v50 }
0x173a   :  { %v6819_v45 = vadd.f32 %v12313_v51, %v11260_v35  ;;  %v13162_v51 = vld [vmem:[%s16703_s27 + $0x38] sm:$0xff]   ;;  %12718 = vmatprep.subr.bf16.mxu1 %v13445_v0  ;;  %v11389_v4 = vld [vmem:[%s16663_s13 + $0x2] ss:$0 sm:$0xff] }
0x173c   :  { %v6859_v38 = vadd.f32 %v12335_v3, %v6819_v45  ;;  %v11390_v45 = vld [vmem:[%s16664_s14 + $0x2] ss:$0 sm:$0xff] }
0x173d   :  { %12719 = vmatpush3.bf16.msra.mxu1 %v13162_v51 }
0x1756   :  { %v12355_v63 = vpop.f32.mrb[88].mxu1  ;;  %v12377_v54 = vpop.f32.mrb[108].mxu0 }
0x1757   :  { %v12356_v13 = vpop.f32.mrb[89].mxu1  ;;  %v12378_v19 = vpop.f32.mrb[109].mxu0 }
0x1758   :  { %v12357_v21 = vadd.f32 %v12356_v13, %v12355_v63  ;;  %v12379_v43 = vadd.f32 %v12378_v19, %v12377_v54  ;;  %v12358_v22 = vpop.f32.mrb[90].mxu1  ;;  %v12380_v27 = vpop.f32.mrb[110].mxu0  ;;  %v11395_v13 = vld [vmem:[%s16705_s22 + $0x3] ss:$0 sm:$0xff] }
0x1759   :  { %v12359_v29 = vpop.f32.mrb[91].mxu1  ;;  %v12381_v1 = vpop.f32.mrb[111].mxu0 }
0x175a   :  { %v6899_v15 = vadd.f32 %v12357_v21, %v6859_v38 }
0x175c   :  { %v6939_v56 = vadd.f32 %v12379_v43, %v6899_v15 }
0x1776   :  { %v12399_v17 = vpop.f32.mrb[92].mxu1 }
0x1777   :  { %v12421_v55 = vpop.f32.mrb[112].mxu0  ;;  %v12400_v30 = vpop.f32.mrb[93].mxu1 }
0x1778   :  { %v12401_v32 = vadd.f32 %v12400_v30, %v12399_v17  ;;  %v12422_v34 = vpop.f32.mrb[113].mxu0  ;;  %v12402_v57 = vpop.f32.mrb[94].mxu1 }
0x1779   :  { %v12423_v23 = vadd.f32 %v12422_v34, %v12421_v55  ;;  %v12424_v36 = vpop.f32.mrb[114].mxu0  ;;  %v12403_v58 = vpop.f32.mrb[95].mxu1 }
0x177a   :  { %v6979_v16 = vadd.f32 %v12401_v32, %v6939_v56  ;;  %v12425_v8 = vpop.f32.mrb[115].mxu0 }
0x177c   :  { %v7019_v60 = vadd.f32 %v12423_v23, %v6979_v16 }
0x1796   :  { %v12443_v24 = vpop.f32.mrb[96].mxu1 }
0x1797   :  { %v12465_v26 = vpop.f32.mrb[116].mxu0  ;;  %v12444_v40 = vpop.f32.mrb[97].mxu1 }
0x1798   :  { %v12445_v41 = vadd.f32 %v12444_v40, %v12443_v24  ;;  %v12466_v37 = vpop.f32.mrb[117].mxu0  ;;  %v12446_v42 = vpop.f32.mrb[98].mxu1 }
0x1799   :  { %v12467_v61 = vadd.f32 %v12466_v37, %v12465_v26  ;;  %v12468_v47 = vpop.f32.mrb[118].mxu0  ;;  %v12447_v62 = vpop.f32.mrb[99].mxu1 }
0x179a   :  { %v7059_v33 = vadd.f32 %v12445_v41, %v7019_v60  ;;  %v12469_v44 = vpop.f32.mrb[119].mxu0 }
0x179c   :  { %v7099_v12 = vadd.f32 %v12467_v61, %v7059_v33 }
0x179e   :  { %v7104_v46 = vadd.f32 %v7099_v12, %v15079_v59 }
0x17a0   :  { %v7107_v48 = vsel %vm333_vm6, %v7104_v46, 0.0 }
0x17a1   :  { %7108 = vadd.xlane.f32.xlu0 %v7107_v48 }
0x182e   :  { %v7109_v49 = vpop.xlane.xlu0 %7108 }
0x182f   :  { %v7110_v20 = vmul.f32 0.03125, %v7109_v49 }
0x1831   :  { %v7111_v18 = vsub.f32 %v7104_v46, %v7110_v20 }
0x1833   :  { %v7112_v35 = vmul.f32 %v7111_v18, %v7111_v18 }
0x1835   :  { %v7113_v2 = vsel %vm333_vm6, %v7112_v35, 0.0 }
0x1836   :  { %7114 = vadd.xlane.f32.xlu0 %v7113_v2 }
0x18c3   :  { %v7115_v59 = vpop.xlane.xlu0 %7114 }
0x18c4   :  { %v7116_v3 = vmul.f32 0.03125, %v7115_v59 }
0x18c6   :  { %v7117_v52 = vadd.f32 1e-05, %v7116_v3 }
0x18c8   :  { %13395 = vrsqrt.f32 %v7117_v52 }
0x18d2   :  { %v13396_v53 = vpop.eup %13395 }
0x18d3   :  { %v7119_v14 = vmul.f32 %v13396_v53, %v7111_v18 }
0x18d5   :  { %v7124_v38 = vmul.f32 %v11389_v4, %v7119_v14 }
0x18d7   :  { %v15630_v63 = vadd.f32 %v11390_v45, %v7124_v38 }
0x18d9   :  { %v7135_v54 = vpack.c.bf16 %v15630_v63, %v15630_v63 }
0x18db   :  { %12721 = vmatmul.mubr.msk.bf16.vlgmr.msra.gmra.mrb[100].mxu1 %vm151_vm2, %v7135_v54 }
0x18dc   :  { %7759 = vmatprep.mubr.bf16.mxu1 %v13456_v39 }
0x19ae   :  { %v7190_v19 = vpop.f32.mrb[100].mxu1 }
0x19af   :  { %v15639_v21 = vadd.f32 %v11395_v13, %v7190_v19  ;;  %v12722_v43 = vpop.f32.mrb[101].mxu1 }
0x19b0   :  { %v7193_v22 = vpop.f32.mrb[102].mxu1 }
0x19b1   :  { %7231 = vrot.lane.b32.xlu1 %v15639_v21, %s16711_s19  ;;  %v12723_v27 = vpop.f32.mrb[103].mxu1  ;;  %v7196_v29 = vmul.f32 0.5, %v15639_v21 }
0x19b3   :  { %v7204_v1 = vrot.slane %v7196_v29, %v13604_v25 }
0x19b5   :  { %v7205_v15 = vcombine.high %v7204_v1, %v7204_v1  ;;  %v7212_v56 = vrot.slane %v7204_v1, %v13604_v25 }
0x19b7   :  { %v7219_v17 = vrot.slane %v7205_v15, %v13604_v25  ;;  %v7223_v55 = vrot.slane %v7212_v56, %v13608_v28 }
0x19b9   :  { %v7227_v30 = vrot.slane %v7219_v17, %v13608_v28 }
0x1a23   :  { %v7232_v32 = vpop.permute.xlu1 %7231 }
0x1a24   :  { %v7234_v34 = vmul.f32 %v7232_v32, %v7223_v55  ;;  %v7235_v57 = vmul.f32 %v7232_v32, %v7227_v30 }
0x1a26   :  { %7238 = vrot.lane.b32.xlu0 %v7234_v34, %s16712_s20  ;;  %7240 = vrot.lane.b32.xlu1 %v7235_v57, %s16712_s20 }
0x1a2a   :  { %7248 = vrot.lane.b32.xlu0 %v7235_v57, %s16713_s23  ;;  %7246 = vrot.lane.b32.xlu1 %v7234_v34, %s16713_s23  ;;  %s16716_s23 = sld [smem:[#allocation10_spill]] }
0x1a2e   :  { %7256 = vrot.lane.b32.xlu0 %v7235_v57, %s16706_s26  ;;  %7254 = vrot.lane.b32.xlu1 %v7234_v34, %s16706_s26  ;;  %s16717_s26 = sld [smem:[#allocation11_spill]] }
0x1a98   :  { %v7239_v25 = vpop.permute.xlu0 %7238  ;;  %v7241_v23 = vpop.permute.xlu1 %7240 }
0x1a99   :  { %v7244_v16 = vadd.f32 %v7239_v25, %v7234_v34  ;;  %v7245_v8 = vadd.f32 %v7241_v23, %v7235_v57  ;;  %v13163_v34 = vld [vmem:[%s16655_s5 + $0x30] sm:$0xff]   ;;  %v13164_v57 = vld [vmem:[%s16655_s5 + $0x38] sm:$0xff]  }
0x1a9a   :  { %12725 = vmatpush3.bf16.msra.mxu0 %v13163_v34  ;;  %v11418_v34 = vld [vmem:[%s16657_s7 + $0x348] sm:$0xff] }
0x1a9b   :  { %12726 = vmatprep.subr.bf16.mxu0 %v13445_v0 }
0x1a9c   :  { %v7249_v36 = vpop.permute.xlu0 %7248  ;;  %v7247_v58 = vpop.permute.xlu1 %7246 }
0x1a9d   :  { %v7253_v60 = vadd.f32 %v7249_v36, %v7245_v8  ;;  %v7252_v24 = vadd.f32 %v7247_v58, %v7244_v16 }
0x1a9e   :  { %12727 = vmatpush3.bf16.msra.mxu0 %v13164_v57 }
0x1aa0   :  { %v7257_v26 = vpop.permute.xlu0 %7256  ;;  %v7255_v40 = vpop.permute.xlu1 %7254 }
0x1aa1   :  { %v7261_v41 = vadd.f32 %v7257_v26, %v7253_v60  ;;  %v7260_v37 = vadd.f32 %v7255_v40, %v7252_v24 }
0x1aa3   :  { %v7269_v42 = vsel %vm261_vm3, %v7261_v41, -inf  ;;  %v7262_v61 = vsel %vm261_vm3, %v7260_v37, -inf }
0x1aa4   :  { %v7270_v47 = vrot.slane %v7269_v42, 4  ;;  %v7263_v62 = vrot.slane %v7262_v61, 4 }
0x1aa6   :  { %v7271_v33 = vmax.f32 %v7269_v42, %v7270_v47  ;;  %v7264_v44 = vmax.f32 %v7262_v61, %v7263_v62 }
0x1aa8   :  { %v7272_v12 = vrot.slane %v7271_v33, 2  ;;  %v7265_v46 = vrot.slane %v7264_v44, 2 }
0x1aaa   :  { %v7273_v48 = vmax.f32 %v7271_v33, %v7272_v12  ;;  %v7266_v49 = vmax.f32 %v7264_v44, %v7265_v46 }
0x1aac   :  { %v7274_v20 = vrot.slane %v7273_v48, 1  ;;  %v7267_v18 = vrot.slane %v7266_v49, 1 }
0x1aae   :  { %v7275_v35 = vmax.f32 %v7273_v48, %v7274_v20  ;;  %v7268_v2 = vmax.f32 %v7266_v49, %v7267_v18 }
0x1ab0   :  { %v7277_v50 = vsub.f32 %v7261_v41, %v7275_v35  ;;  %v7276_v51 = vsub.f32 %v7260_v37, %v7268_v2 }
0x1ab2   :  { %v7280_v59 = vmul.f32 1.442695, %v7277_v50  ;;  %v7278_v3 = vmul.f32 1.442695, %v7276_v51 }
0x1ab4   :  { %13397 = vpow2.f32 %v7280_v59 }
0x1ab5   :  { %13399 = vpow2.f32 %v7278_v3 }
0x1abe   :  { %v13398_v52 = vpop.eup %13397 }
0x1abf   :  { %v13400_v53 = vpop.eup %13399  ;;  %v7289_v4 = vsel %vm261_vm3, %v13398_v52, 0.0 }
0x1ac0   :  { %v7290_v14 = vrot.slane %v7289_v4, 4  ;;  %v7282_v45 = vsel %vm261_vm3, %v13400_v53, 0.0 }
0x1ac1   :  { %v7283_v38 = vrot.slane %v7282_v45, 4 }
0x1ac2   :  { %v7291_v54 = vadd.f32 %v7290_v14, %v7289_v4 }
0x1ac3   :  { %v7284_v13 = vadd.f32 %v7283_v38, %v7282_v45  ;;  %v11403_v45 = vld [vmem:[%s16656_s6 + $0x3] ss:$0 sm:$0xff] }
0x1ac4   :  { %v7292_v19 = vrot.slane %v7291_v54, 2 }
0x1ac5   :  { %v7285_v43 = vrot.slane %v7284_v13, 2 }
0x1ac6   :  { %v7293_v22 = vadd.f32 %v7292_v19, %v7291_v54 }
0x1ac7   :  { %v7286_v27 = vadd.f32 %v7285_v43, %v7284_v13 }
0x1ac8   :  { %v7294_v29 = vrot.slane %v7293_v22, 1 }
0x1ac9   :  { %v7287_v1 = vrot.slane %v7286_v27, 1 }
0x1aca   :  { %v7295_v15 = vadd.f32 %v7294_v29, %v7293_v22 }
0x1acb   :  { %v7288_v56 = vadd.f32 %v7287_v1, %v7286_v27 }
0x1acc   :  { %13401 = vrcp.f32 %v7295_v15 }
0x1acd   :  { %13403 = vrcp.f32 %v7288_v56 }
0x1ad6   :  { %v13402_v17 = vpop.eup %13401 }
0x1ad7   :  { %v13404_v55 = vpop.eup %13403  ;;  %v7299_v30 = vmul.f32 %v13402_v17, %v13398_v52 }
0x1ad8   :  { %v7297_v32 = vmul.f32 %v13404_v55, %v13400_v53  ;;  %v11409_v55 = vld [vmem:[%s16657_s7 + $0x300] sm:$0xff] }
0x1ad9   :  { %7304 = vrot.lane.b32.xlu0 %v7299_v30, %s16707_s28 }
0x1ada   :  { %7302 = vrot.lane.b32.xlu1 %v7297_v32, %s16707_s28 }
0x1add   :  { %7310 = vrot.lane.b32.xlu0 %v7299_v30, %s16708_s25 }
0x1ade   :  { %7308 = vrot.lane.b32.xlu1 %v7297_v32, %s16708_s25 }
0x1ae1   :  { %7316 = vrot.lane.b32.xlu0 %v7299_v30, %s16709_s2 }
0x1ae2   :  { %7314 = vrot.lane.b32.xlu1 %v7297_v32, %s16709_s2 }
0x1ae6   :  { %7326 = vrot.lane.b32.xlu1 %v15639_v21, %s16710_s30 }
0x1b4b   :  { %v7305_v25 = vpop.permute.xlu0 %7304 }
0x1b4c   :  { %v7303_v23 = vpop.permute.xlu1 %7302  ;;  %v7321_v21 = vsel %vm320_vm4, %v7299_v30, %v7305_v25  ;;  %v11417_v30 = vld [vmem:[%s16657_s7 + $0x340] sm:$0xff] }
0x1b4d   :  { %v7320_v60 = vsel %vm320_vm4, %v7297_v32, %v7303_v23  ;;  %v11444_v32 = vcombine.high %v11409_v55, %v11417_v30  ;;  %v11443_v57 = vcombine.low %v11409_v55, %v11417_v30 }
0x1b4f   :  { %v7311_v36 = vpop.permute.xlu0 %7310  ;;  %7727 = vmatprep.subr.bf16.mxu1 %v11444_v32  ;;  %v11423_v32 = vld [vmem:[%s16657_s7 + $0x370] sm:$0xff] }
0x1b50   :  { %v7309_v58 = vpop.permute.xlu1 %7308  ;;  %v7323_v24 = vsel %vm85_vm1, %v7321_v21, %v7311_v36  ;;  %7728 = vmatpush1.bf16.msra.mxu1 %v11443_v57  ;;  %v11425_v36 = vld [vmem:[%s16657_s7 + $0x380] sm:$0xff]  ;;  %v11434_v21 = vld [vmem:[%s16657_s7 + $0x3c8] sm:$0xff]  ;;  %v11424_v57 = vld [vmem:[%s16657_s7 + $0x378] sm:$0xff] }
0x1b51   :  { %v7322_v26 = vsel %vm85_vm1, %v7320_v60, %v7309_v58  ;;  %v11433_v58 = vld [vmem:[%s16657_s7 + $0x3c0] sm:$0xff] }
0x1b52   :  { %v11459_v60 = vcombine.low %v11425_v36, %v11433_v58 }
0x1b53   :  { %v7317_v8 = vpop.permute.xlu0 %7316 }
0x1b54   :  { %v7315_v16 = vpop.permute.xlu1 %7314  ;;  %v7325_v40 = vsel %vm325_vm5, %v7323_v24, %v7317_v8  ;;  %v11460_v8 = vcombine.high %v11425_v36, %v11433_v58 }
0x1b55   :  { %v7324_v41 = vsel %vm325_vm5, %v7322_v26, %v7315_v16  ;;  %v11426_v16 = vld [vmem:[%s16657_s7 + $0x388] sm:$0xff] }
0x1b56   :  { %v11461_v24 = vcombine.low %v11426_v16, %v11434_v21  ;;  %v11462_v26 = vcombine.high %v11426_v16, %v11434_v21  ;;  %7729 = vmatprep.subr.bf16.mxu1 %v11460_v8  ;;  %v11431_v16 = vld [vmem:[%s16657_s7 + $0x3b0] sm:$0xff]  ;;  %v11432_v21 = vld [vmem:[%s16657_s7 + $0x3b8] sm:$0xff] }
0x1b57   :  { %7730 = vmatpush1.bf16.msra.mxu1 %v11459_v60  ;;  %v11439_v8 = vld [vmem:[%s16657_s7 + $0x3f0] sm:$0xff]  ;;  %v11440_v60 = vld [vmem:[%s16657_s7 + $0x3f8] sm:$0xff] }
0x1b58   :  { %v7327_v37 = vpop.permute.xlu1 %7326 }
0x1b59   :  { %v7329_v42 = vmul.f32 %v7327_v37, %v7324_v41  ;;  %v7330_v61 = vmul.f32 %v7327_v37, %v7325_v40  ;;  %v11411_v40 = vld [vmem:[%s16657_s7 + $0x310] sm:$0xff]  ;;  %v11412_v37 = vld [vmem:[%s16657_s7 + $0x318] sm:$0xff] }
0x1b5a   :  { %v11419_v41 = vld [vmem:[%s16657_s7 + $0x350] sm:$0xff] }
0x1b5b   :  { %v7331_v47 = vsel %vm333_vm6, %v7329_v42, 0.0  ;;  %v7338_v62 = vsel %vm333_vm6, %v7330_v61, 0.0  ;;  %v11448_v42 = vcombine.high %v11411_v40, %v11419_v41  ;;  %v11420_v61 = vld [vmem:[%s16657_s7 + $0x358] sm:$0xff] }
0x1b5c   :  { %v7332_v33 = vrot.slane %v7331_v47, 4  ;;  %v7339_v44 = vrot.slane %v7338_v62, 4 }
0x1b5d   :  { %7809 = vmatprep.subr.bf16.mxu1 %v11448_v42  ;;  %v11473_v42 = vcombine.low %v11432_v21, %v11440_v60 }
0x1b5e   :  { %v7333_v12 = vadd.f32 %v7332_v33, %v7331_v47  ;;  %v7340_v46 = vadd.f32 %v7339_v44, %v7338_v62  ;;  %v11447_v47 = vcombine.low %v11411_v40, %v11419_v41  ;;  %v11449_v62 = vcombine.low %v11412_v37, %v11420_v61 }
0x1b5f   :  { %v11450_v33 = vcombine.high %v11412_v37, %v11420_v61  ;;  %v11472_v40 = vcombine.high %v11431_v16, %v11439_v8  ;;  %v11474_v41 = vcombine.high %v11432_v21, %v11440_v60  ;;  %v11471_v37 = vcombine.low %v11431_v16, %v11439_v8  ;;  %v13165_v61 = vld [vmem:[%s16658_s9 + $0xc40] sm:$0xff]  }
0x1b60   :  { %v7334_v48 = vrot.slane %v7333_v12, 2  ;;  %v7341_v49 = vrot.slane %v7340_v46, 2 }
0x1b62   :  { %v7335_v20 = vadd.f32 %v7334_v48, %v7333_v12  ;;  %v7342_v18 = vadd.f32 %v7341_v49, %v7340_v46  ;;  %v11407_v49 = vld [vmem:[%s16659_s11 + $0x3] ss:$0 sm:$0xff] }
0x1b64   :  { %v7336_v35 = vrot.slane %v7335_v20, 1  ;;  %v7343_v2 = vrot.slane %v7342_v18, 1 }
0x1b66   :  { %v7337_v50 = vadd.f32 %v7336_v35, %v7335_v20  ;;  %v7344_v51 = vadd.f32 %v7343_v2, %v7342_v18  ;;  %v11408_v18 = vld [vmem:[%s16660_s12 + $0x3] ss:$0 sm:$0xff]  ;;  %v11427_v2 = vld [vmem:[%s16657_s7 + $0x390] sm:$0xff] }
0x1b68   :  { %v7350_v59 = vpack.c.bf16 %v7337_v50, %v7337_v50  ;;  %v7351_v3 = vpack.c.bf16 %v7344_v51, %v7344_v51  ;;  %v11435_v50 = vld [vmem:[%s16657_s7 + $0x3d0] sm:$0xff]  ;;  %v11428_v51 = vld [vmem:[%s16657_s7 + $0x398] sm:$0xff] }
0x1b6a   :  { %v7359_v52 = vunpack.c.l.b16 %v7350_v59  ;;  %v7360_v53 = vunpack.c.l.b16 %v7351_v3  ;;  %v11436_v59 = vld [vmem:[%s16657_s7 + $0x3d8] sm:$0xff] }
0x1b6c   :  { %v7361_v4 = vsel %vm363_vm7, %v7360_v53, %v7359_v52  ;;  %v11464_v53 = vcombine.high %v11427_v2, %v11435_v50 }
0x1b6d   :  { %v7362_v14 = vpack.c.b16 %v7361_v4, %v7361_v4  ;;  %v11466_v4 = vcombine.high %v11428_v51, %v11436_v59 }
0x1b6f   :  { %12729 = vmatmul.mubr.msk.bf16.vlgmr.msra.gmra.mrb[120].mxu0 %vm151_vm2, %v7362_v14  ;;  %v11413_v14 = vld [vmem:[%s16657_s7 + $0x320] sm:$0xff] }
0x1b70   :  { %7800 = vmatprep.mubr.bf16.mxu0 %v13456_v39 }
0x1c42   :  { %v7412_v38 = vpop.f32.mrb[120].mxu0 }
0x1c43   :  { %v7413_v54 = vadd.f32 %v11403_v45, %v7412_v38  ;;  %v12730_v13 = vpop.f32.mrb[121].mxu0  ;;  %v11421_v45 = vld [vmem:[%s16657_s7 + $0x360] sm:$0xff]  ;;  %v11414_v38 = vld [vmem:[%s16657_s7 + $0x328] sm:$0xff] }
0x1c44   :  { %v7415_v19 = vpop.f32.mrb[122].mxu0  ;;  %v11463_v13 = vcombine.low %v11427_v2, %v11435_v50  ;;  %v13177_v2 = vld [vmem:[%s16658_s9 + $0xc58] sm:$0xff]  }
0x1c45   :  { %v12731_v43 = vpop.f32.mrb[123].mxu0  ;;  %v7418_v22 = vadd.f32 %v7413_v54, %v15630_v63  ;;  %v11410_v63 = vld [vmem:[%s16657_s7 + $0x308] sm:$0xff]  ;;  %v11465_v19 = vcombine.low %v11428_v51, %v11436_v59  ;;  %v13178_v50 = vld [vmem:[%s16658_s9 + $0xcd8] sm:$0xff]  }
0x1c46   :  { %v11445_v25 = vcombine.low %v11410_v63, %v11418_v34  ;;  %v11446_v23 = vcombine.high %v11410_v63, %v11418_v34  ;;  %v11422_v54 = vld [vmem:[%s16657_s7 + $0x368] sm:$0xff]  ;;  %v11452_v43 = vcombine.high %v11413_v14, %v11421_v45  ;;  %v11415_v63 = vld [vmem:[%s16657_s7 + $0x330] sm:$0xff]  ;;  %v11416_v34 = vld [vmem:[%s16657_s7 + $0x338] sm:$0xff] }
0x1c47   :  { %v7421_v27 = vsel %vm333_vm6, %v7418_v22, 0.0  ;;  %v11456_v36 = vcombine.high %v11415_v63, %v11423_v32  ;;  %v11458_v58 = vcombine.high %v11416_v34, %v11424_v57  ;;  %v13179_v51 = vld [vmem:[%s16658_s9 + $0xc18] sm:$0xff]  }
0x1c48   :  { %7422 = vadd.xlane.f32.xlu0 %v7421_v27  ;;  %7768 = vmatprep.subr.bf16.mxu0 %v11446_v23  ;;  %v11429_v27 = vld [vmem:[%s16657_s7 + $0x3a0] sm:$0xff]  ;;  %v13180_v59 = vld [vmem:[%s16658_s9 + $0xc98] sm:$0xff]  }
0x1c49   :  { %7769 = vmatpush1.bf16.msra.mxu0 %v11445_v25 }
0x1c4a   :  { %7770 = vmatprep.subr.bf16.mxu0 %v11462_v26  ;;  %v11457_v26 = vcombine.low %v11416_v34, %v11424_v57 }
0x1c4d   :  { %7771 = vmatpush1.bf16.msra.mxu0 %v11461_v24  ;;  %v11455_v24 = vcombine.low %v11415_v63, %v11423_v32 }
0x1c4e   :  { %7850 = vmatprep.subr.bf16.mxu0 %v11450_v33  ;;  %v13168_v33 = vld [vmem:[%s16658_s9 + $0xc80] sm:$0xff]  }
0x1cd5   :  { %v7423_v29 = vpop.xlane.xlu0 %7422 }
0x1cd6   :  { %v7424_v1 = vmul.f32 0.03125, %v7423_v29  ;;  %v11437_v29 = vld [vmem:[%s16657_s7 + $0x3e0] sm:$0xff] }
0x1cd7   :  { %v11468_v55 = vcombine.high %v11429_v27, %v11437_v29  ;;  %v11467_v25 = vcombine.low %v11429_v27, %v11437_v29  ;;  %v13192_v27 = vld [vmem:[%s16658_s9 + $0xcb0] sm:$0xff]   ;;  %v13193_v29 = vld [vmem:[%s16658_s9 + $0xc78] sm:$0xff]  }
0x1cd8   :  { %v7425_v15 = vsub.f32 %v7418_v22, %v7424_v1  ;;  %v11454_v22 = vcombine.high %v11414_v38, %v11422_v54  ;;  %v11430_v1 = vld [vmem:[%s16657_s7 + $0x3a8] sm:$0xff] }
0x1cda   :  { %v7426_v56 = vmul.f32 %v7425_v15, %v7425_v15 }
0x1cdc   :  { %v7427_v17 = vsel %vm333_vm6, %v7426_v56, 0.0  ;;  %v11451_v56 = vcombine.low %v11413_v14, %v11421_v45  ;;  %v13184_v14 = vld [vmem:[%s16658_s9 + $0xca0] sm:$0xff]   ;;  %v13185_v45 = vld [vmem:[%s16658_s9 + $0xc68] sm:$0xff]  }
0x1cdd   :  { %7428 = vadd.xlane.f32.xlu1 %v7427_v17  ;;  %v11453_v17 = vcombine.low %v11414_v38, %v11422_v54  ;;  %v13186_v38 = vld [vmem:[%s16658_s9 + $0xce8] sm:$0xff]  }
0x1cde   :  { %v13187_v54 = vld [vmem:[%s16658_s9 + $0xc28] sm:$0xff]  }
0x1d6a   :  { %v7429_v44 = vpop.xlane.xlu1 %7428 }
0x1d6b   :  { %v7430_v12 = vmul.f32 0.03125, %v7429_v44  ;;  %v13169_v44 = vld [vmem:[%s16658_s9 + $0xc48] sm:$0xff]  }
0x1d6d   :  { %v7431_v46 = vadd.f32 1e-05, %v7430_v12  ;;  %v13170_v12 = vld [vmem:[%s16658_s9 + $0xcc8] sm:$0xff]  }
0x1d6f   :  { %13405 = vrsqrt.f32 %v7431_v46  ;;  %v13171_v46 = vld [vmem:[%s16658_s9 + $0xc08] sm:$0xff]  }
0x1d79   :  { %v13406_v48 = vpop.eup %13405 }
0x1d7a   :  { %v7433_v20 = vmul.f32 %v13406_v48, %v7425_v15  ;;  %v11438_v15 = vld [vmem:[%s16657_s7 + $0x3e8] sm:$0xff]  ;;  %s16718_s7 = sld [smem:[#allocation12_spill]] }
0x1d7b   :  { %v11470_v30 = vcombine.high %v11430_v1, %v11438_v15  ;;  %v11469_v23 = vcombine.low %v11430_v1, %v11438_v15  ;;  %v13172_v48 = vld [vmem:[%s16658_s9 + $0xc88] sm:$0xff]   ;;  %v13194_v1 = vld [vmem:[%s16658_s9 + $0xcf8] sm:$0xff]  }
0x1d7c   :  { %v7438_v35 = vmul.f32 %v11407_v49, %v7433_v20  ;;  %v13173_v49 = vld [vmem:[%s16658_s9 + $0xc50] sm:$0xff]   ;;  %v13195_v15 = vld [vmem:[%s16658_s9 + $0xc38] sm:$0xff]  }
0x1d7d   :  { %v13174_v20 = vld [vmem:[%s16658_s9 + $0xcd0] sm:$0xff]  }
0x1d7e   :  { %v15745_v3 = vadd.f32 %v11408_v18, %v7438_v35  ;;  %v13175_v18 = vld [vmem:[%s16658_s9 + $0xc10] sm:$0xff]  }
0x1d7f   :  { %v13176_v35 = vld [vmem:[%s16658_s9 + $0xc90] sm:$0xff]  }
0x1d80   :  { %v15749_v52 = vpack.c.bf16 %v15745_v3, %v15745_v3 }
0x1d82   :  { %11475 = vmatmul.mubr.msk.bf16.vlgmr.msra.gmra.mrb[104].mxu1 %vm151_vm2, %v15749_v52  ;;  %11476 = vmatmul.mubr.msk.bf16.vlgmr.msra.gmra.mrb[124].mxu0 %vm151_vm2, %v15749_v52 }
0x1d83   :  { %7810 = vmatpush1.bf16.msra.mxu1 %v11447_v47  ;;  %7851 = vmatpush1.bf16.msra.mxu0 %v11449_v62  ;;  %v13166_v47 = vld [vmem:[%s16658_s9 + $0xcc0] sm:$0xff]  }
0x1d84   :  { %7811 = vmatprep.subr.bf16.mxu1 %v11464_v53  ;;  %7852 = vmatprep.subr.bf16.mxu0 %v11466_v4  ;;  %v13167_v62 = vld [vmem:[%s16658_s9 + $0xc00] sm:$0xff]  }
0x1d85   :  { %7841 = vmatprep.mubr.bf16.mxu1 %v13456_v39  ;;  %7882 = vmatprep.mubr.bf16.mxu0 %v13456_v39  ;;  %v13182_v53 = vld [vmem:[%s16658_s9 + $0xce0] sm:$0xff]  }
0x1d86   :  { %v13183_v4 = vld [vmem:[%s16658_s9 + $0xc20] sm:$0xff]  }
0x1d87   :  { %7812 = vmatpush1.bf16.msra.mxu1 %v11463_v13  ;;  %7853 = vmatpush1.bf16.msra.mxu0 %v11465_v19  ;;  %v13188_v13 = vld [vmem:[%s16658_s9 + $0xca8] sm:$0xff]   ;;  %v13189_v19 = vld [vmem:[%s16658_s9 + $0xc70] sm:$0xff]  }
0x1d88   :  { %7891 = vmatprep.subr.bf16.mxu1 %v11452_v43  ;;  %7932 = vmatprep.subr.bf16.mxu0 %v11454_v22  ;;  %v13190_v43 = vld [vmem:[%s16658_s9 + $0xcf0] sm:$0xff]  }
0x1d89   :  { %v13191_v22 = vld [vmem:[%s16658_s9 + $0xc30] sm:$0xff]  }
0x1d8a   :  { %11477 = vmatmul.mubr.msk.bf16.vlgmr.msra.gmra.mrb[108].mxu1 %vm151_vm2, %v15749_v52  ;;  %11478 = vmatmul.mubr.msk.bf16.vlgmr.msra.gmra.mrb[128].mxu0 %vm151_vm2, %v15749_v52 }
0x1d8b   :  { %7892 = vmatpush1.bf16.msra.mxu1 %v11451_v56  ;;  %7933 = vmatpush1.bf16.msra.mxu0 %v11453_v17  ;;  %v13196_v56 = vld [vmem:[%s16658_s9 + $0xcb8] sm:$0xff]   ;;  %v13197_v17 = vld [vmem:[%s16658_s9 + $0xd40] sm:$0xff]  }
0x1d8c   :  { %7893 = vmatprep.subr.bf16.mxu1 %v11468_v55  ;;  %7934 = vmatprep.subr.bf16.mxu0 %v11470_v30  ;;  %v13198_v55 = vld [vmem:[%s16658_s9 + $0xdc0] sm:$0xff]  }
0x1d8d   :  { %7923 = vmatprep.mubr.bf16.mxu1 %v13456_v39  ;;  %7964 = vmatprep.mubr.bf16.mxu0 %v13456_v39  ;;  %v15926_v30 = vld [vmem:[%s16661_s8 + $0x3] ss:$4 sm:$0xff] }
0x1d8e   :  { %v7487_v63 = vrot.slane %v15926_v30, %v13608_v28  ;;  %v7495_v32 = vrot.slane %v15926_v30, %v13899_v9  ;;  %v7491_v34 = vrot.slane %v15926_v30, %v13893_v6  ;;  %v7499_v57 = vrot.slane %v15926_v30, %v13902_v10 }
0x1d8f   :  { %7894 = vmatpush1.bf16.msra.mxu1 %v11467_v25  ;;  %7935 = vmatpush1.bf16.msra.mxu0 %v11469_v23 }
0x1d90   :  { %7973 = vmatprep.subr.bf16.mxu1 %v11456_v36  ;;  %8014 = vmatprep.subr.bf16.mxu0 %v11458_v58 }
0x1d92   :  { %11479 = vmatmul.mubr.msk.bf16.vlgmr.msra.gmra.mrb[112].mxu1 %vm151_vm2, %v15749_v52  ;;  %11480 = vmatmul.mubr.msk.bf16.vlgmr.msra.gmra.mrb[132].mxu0 %vm151_vm2, %v15749_v52 }
0x1d93   :  { %7974 = vmatpush1.bf16.msra.mxu1 %v11455_v24  ;;  %8015 = vmatpush1.bf16.msra.mxu0 %v11457_v26 }
0x1d94   :  { %7975 = vmatprep.subr.bf16.mxu1 %v11472_v40  ;;  %8016 = vmatprep.subr.bf16.mxu0 %v11474_v41 }
0x1d95   :  { %8005 = vmatprep.mubr.bf16.mxu1 %v13456_v39  ;;  %8046 = vmatprep.mubr.bf16.mxu0 %v13456_v39 }
0x1d97   :  { %7976 = vmatpush1.bf16.msra.mxu1 %v11471_v37  ;;  %8017 = vmatpush1.bf16.msra.mxu0 %v11473_v42 }
0x1d98   :  { %12477 = vmatprep.subr.bf16.mxu1 %v13165_v61  ;;  %12499 = vmatprep.subr.bf16.mxu0 %v13166_v47 }
0x1d9a   :  { %11481 = vmatmul.mubr.msk.bf16.vlgmr.msra.gmra.mrb[116].mxu1 %vm151_vm2, %v15749_v52  ;;  %11482 = vmatmul.mubr.msk.bf16.vlgmr.msra.gmra.mrb[136].mxu0 %vm151_vm2, %v15749_v52  ;;  %v13181_v52 = vld [vmem:[%s16658_s9 + $0xc60] sm:$0xff]  }
0x1d9b   :  { %12478 = vmatpush3.bf16.msra.mxu1 %v13167_v62  ;;  %12500 = vmatpush3.bf16.msra.mxu0 %v13168_v33 }
0x1d9c   :  { %12479 = vmatprep.subr.bf16.mxu1 %v13169_v44  ;;  %12501 = vmatprep.subr.bf16.mxu0 %v13170_v12  ;;  %v7507_v44 = vrot.slane %v15926_v30, %v13896_v7  ;;  %v7515_v12 = vrot.slane %v15926_v30, %v13921_v31 }
0x1d9f   :  { %12480 = vmatpush3.bf16.msra.mxu1 %v13171_v46  ;;  %12502 = vmatpush3.bf16.msra.mxu0 %v13172_v48  ;;  %v13199_v46 = vld [vmem:[%s16658_s9 + $0xd00] sm:$0xff]  }
0x1da0   :  { %12481 = vmatprep.subr.bf16.mxu1 %v13173_v49  ;;  %12503 = vmatprep.subr.bf16.mxu0 %v13174_v20  ;;  %v13200_v48 = vld [vmem:[%s16658_s9 + $0xd80] sm:$0xff]  }
0x1da3   :  { %12482 = vmatpush3.bf16.msra.mxu1 %v13175_v18  ;;  %12504 = vmatpush3.bf16.msra.mxu0 %v13176_v35  ;;  %v13201_v18 = vld [vmem:[%s16658_s9 + $0xd48] sm:$0xff]  }
0x1da4   :  { %12483 = vmatprep.subr.bf16.mxu1 %v13177_v2  ;;  %12505 = vmatprep.subr.bf16.mxu0 %v13178_v50  ;;  %v13202_v35 = vld [vmem:[%s16658_s9 + $0xdc8] sm:$0xff]  }
0x1da7   :  { %12484 = vmatpush3.bf16.msra.mxu1 %v13179_v51  ;;  %12506 = vmatpush3.bf16.msra.mxu0 %v13180_v59 }
0x1da8   :  { %12485 = vmatprep.subr.bf16.mxu1 %v13181_v52  ;;  %12507 = vmatprep.subr.bf16.mxu0 %v13182_v53 }
0x1dab   :  { %12486 = vmatpush3.bf16.msra.mxu1 %v13183_v4  ;;  %12508 = vmatpush3.bf16.msra.mxu0 %v13184_v14 }
0x1dac   :  { %12487 = vmatprep.subr.bf16.mxu1 %v13185_v45  ;;  %12509 = vmatprep.subr.bf16.mxu0 %v13186_v38  ;;  %v13203_v45 = vld [vmem:[%s16658_s9 + $0xd08] sm:$0xff]  }
0x1dad   :  { %v13204_v38 = vld [vmem:[%s16658_s9 + $0xd88] sm:$0xff]  }
0x1daf   :  { %12488 = vmatpush3.bf16.msra.mxu1 %v13187_v54  ;;  %12510 = vmatpush3.bf16.msra.mxu0 %v13188_v13 }
0x1db0   :  { %12489 = vmatprep.subr.bf16.mxu1 %v13189_v19  ;;  %12511 = vmatprep.subr.bf16.mxu0 %v13190_v43  ;;  %v13205_v19 = vld [vmem:[%s16658_s9 + $0xd50] sm:$0xff]  }
0x1db1   :  { %v13206_v43 = vld [vmem:[%s16658_s9 + $0xdd0] sm:$0xff]  }
0x1db3   :  { %12490 = vmatpush3.bf16.msra.mxu1 %v13191_v22  ;;  %12512 = vmatpush3.bf16.msra.mxu0 %v13192_v27 }
0x1db4   :  { %12491 = vmatprep.subr.bf16.mxu1 %v13193_v29  ;;  %12513 = vmatprep.subr.bf16.mxu0 %v13194_v1 }
0x1db7   :  { %12492 = vmatpush3.bf16.msra.mxu1 %v13195_v15  ;;  %12514 = vmatpush3.bf16.msra.mxu0 %v13196_v56  ;;  %v13207_v15 = vld [vmem:[%s16658_s9 + $0xd10] sm:$0xff]  }
0x1db8   :  { %12521 = vmatprep.subr.bf16.mxu1 %v13197_v17  ;;  %12543 = vmatprep.subr.bf16.mxu0 %v13198_v55  ;;  %v13208_v56 = vld [vmem:[%s16658_s9 + $0xd90] sm:$0xff]   ;;  %v13209_v17 = vld [vmem:[%s16658_s9 + $0xd58] sm:$0xff]  }
0x1db9   :  { %v13210_v55 = vld [vmem:[%s16658_s9 + $0xdd8] sm:$0xff]  }
0x1e55   :  { %v7761_v25 = vpop.f32.mrb[104].mxu1  ;;  %v7802_v23 = vpop.f32.mrb[124].mxu0 }
0x1e56   :  { %v7762_v36 = vadd.f32 %v7761_v25, %v7487_v63  ;;  %v7803_v58 = vadd.f32 %v7802_v23, %v7495_v32  ;;  %v7763_v16 = vpop.f32.mrb[105].mxu1  ;;  %v7804_v8 = vpop.f32.mrb[125].mxu0 }
0x1e57   :  { %v7764_v21 = vadd.f32 %v7763_v16, %v7491_v34  ;;  %v7805_v60 = vadd.f32 %v7804_v8, %v7499_v57  ;;  %v7765_v24 = vpop.f32.mrb[106].mxu1  ;;  %v7806_v26 = vpop.f32.mrb[126].mxu0 }
0x1e58   :  { %v8055_v40 = vmax.f32 %v7762_v36, 0.0  ;;  %v8057_v41 = vmax.f32 %v7803_v58, 0.0  ;;  %v7766_v37 = vpop.f32.mrb[107].mxu1  ;;  %v7807_v42 = vpop.f32.mrb[127].mxu0  ;;  %v13211_v36 = vld [vmem:[%s16658_s9 + $0xd18] sm:$0xff]  }
0x1e59   :  { %v8056_v61 = vmax.f32 %v7764_v21, 0.0  ;;  %v8058_v47 = vmax.f32 %v7805_v60, 0.0  ;;  %v13212_v58 = vld [vmem:[%s16658_s9 + $0xd98] sm:$0xff]   ;;  %v13213_v21 = vld [vmem:[%s16658_s9 + $0xd60] sm:$0xff]   ;;  %v13217_v37 = vld [vmem:[%s16658_s9 + $0xd68] sm:$0xff]  }
0x1e5a   :  { %v8328_v49 = vpack.c.bf16 %v8055_v40, %v8055_v40  ;;  %v8330_v20 = vpack.c.bf16 %v8057_v41, %v8057_v41  ;;  %v13214_v60 = vld [vmem:[%s16658_s9 + $0xde0] sm:$0xff]   ;;  %v13218_v42 = vld [vmem:[%s16658_s9 + $0xde8] sm:$0xff]  }
0x1e5b   :  { %v8329_v62 = vpack.c.bf16 %v8056_v61, %v8056_v61  ;;  %v8331_v33 = vpack.c.bf16 %v8058_v47, %v8058_v47  ;;  %v15999_v24 = vld [vmem:[%s16661_s8 + $0x23] ss:$4 sm:$0xff] }
0x1e5c   :  { %v7543_v26 = vrot.slane %v15999_v24, %v13905_v11  ;;  %v13215_v40 = vld [vmem:[%s16658_s9 + $0xd20] sm:$0xff]  }
0x1e5d   :  { %v15952_v2 = vpop.f32.mrb[108].mxu1  ;;  %v15954_v50 = vpop.f32.mrb[128].mxu0  ;;  %9149 = vmatprep.mubr.bf16.mxu1 %v8329_v62  ;;  %9189 = vmatprep.mubr.bf16.mxu0 %v8331_v33  ;;  %v13216_v41 = vld [vmem:[%s16658_s9 + $0xda0] sm:$0xff]  }
0x1e5e   :  { %v7845_v51 = vpop.f32.mrb[109].mxu1  ;;  %v7886_v59 = vpop.f32.mrb[129].mxu0  ;;  %9150 = vmatmul.mubr.bf16.vlgmr.msra.gmra.mrb[120].mxu1 %v8328_v49  ;;  %9190 = vmatmul.mubr.bf16.vlgmr.msra.gmra.mrb[140].mxu0 %v8330_v20  ;;  %v13220_v49 = vld [vmem:[%s16658_s9 + $0xda8] sm:$0xff]   ;;  %v7503_v20 = vrot.slane %v15926_v30, %v13890_v5 }
0x1e5f   :  { %v7846_v52 = vadd.f32 %v7845_v51, %v7507_v44  ;;  %v7887_v53 = vadd.f32 %v7886_v59, %v7515_v12  ;;  %12522 = vmatpush3.bf16.msra.mxu1 %v13199_v46  ;;  %12544 = vmatpush3.bf16.msra.mxu0 %v13200_v48  ;;  %v7847_v4 = vpop.f32.mrb[110].mxu1  ;;  %v7888_v14 = vpop.f32.mrb[130].mxu0  ;;  %v13219_v48 = vld [vmem:[%s16658_s9 + $0xd28] sm:$0xff]   ;;  %v13221_v59 = vld [vmem:[%s16658_s9 + $0xd70] sm:$0xff]  }
0x1e60   :  { %v7848_v54 = vpop.f32.mrb[111].mxu1  ;;  %v7889_v13 = vpop.f32.mrb[131].mxu0  ;;  %12523 = vmatprep.subr.bf16.mxu1 %v13201_v18  ;;  %12545 = vmatprep.subr.bf16.mxu0 %v13202_v35  ;;  %v7511_v18 = vrot.slane %v15926_v30, %v13905_v11  ;;  %v7531_v4 = vrot.slane %v15999_v24, %v13902_v10  ;;  %v13223_v11 = vld [vmem:[%s16658_s9 + $0xd30] sm:$0xff]   ;;  %v7844_v14 = vadd.f32 %v15952_v2, %v7503_v20  ;;  %v13227_v2 = vld [vmem:[%s16658_s9 + $0xd38] sm:$0xff]   ;;  %v13250_v20 = vld [vmem:[%s16658_s9 + $0xee8] sm:$0xff]  }
0x1e61   :  { %v8060_v22 = vmax.f32 %v7846_v52, 0.0  ;;  %v8062_v27 = vmax.f32 %v7887_v53, 0.0  ;;  %v13222_v52 = vld [vmem:[%s16658_s9 + $0xdf0] sm:$0xff]   ;;  %v7523_v53 = vrot.slane %v15999_v24, %v13893_v6  ;;  %v13226_v54 = vld [vmem:[%s16658_s9 + $0xdf8] sm:$0xff]  }
0x1e62   :  { %v13224_v30 = vld [vmem:[%s16658_s9 + $0xdb0] sm:$0xff]  }
0x1e63   :  { %v8333_v29 = vpack.c.bf16 %v8060_v22, %v8060_v22  ;;  %v8335_v1 = vpack.c.bf16 %v8062_v27, %v8062_v27  ;;  %12524 = vmatpush3.bf16.msra.mxu1 %v13203_v45  ;;  %12546 = vmatpush3.bf16.msra.mxu0 %v13204_v38  ;;  %v7885_v45 = vadd.f32 %v15954_v50, %v7511_v18  ;;  %v13225_v38 = vld [vmem:[%s16658_s9 + $0xd78] sm:$0xff]   ;;  %v13229_v27 = vld [vmem:[%s16658_s9 + $0xe40] sm:$0xff]   ;;  %v13251_v18 = vld [vmem:[%s16658_s9 + $0xe28] sm:$0xff]  }
0x1e64   :  { %12525 = vmatprep.subr.bf16.mxu1 %v13205_v19  ;;  %12547 = vmatprep.subr.bf16.mxu0 %v13206_v43  ;;  %v13228_v50 = vld [vmem:[%s16658_s9 + $0xdb8] sm:$0xff]   ;;  %v8059_v43 = vmax.f32 %v7844_v14, 0.0 }
0x1e65   :  { %v15980_v63 = vpop.f32.mrb[112].mxu1  ;;  %v15982_v32 = vpop.f32.mrb[132].mxu0  ;;  %9229 = vmatprep.mubr.bf16.mxu1 %v8333_v29  ;;  %9269 = vmatprep.mubr.bf16.mxu0 %v8335_v1  ;;  %v8061_v22 = vmax.f32 %v7885_v45, 0.0  ;;  %v13230_v29 = vld [vmem:[%s16658_s9 + $0xec0] sm:$0xff]   ;;  %v13256_v45 = vld [vmem:[%s16658_s9 + $0xeb0] sm:$0xff]  }
0x1e66   :  { %v7927_v34 = vpop.f32.mrb[113].mxu1  ;;  %v7968_v57 = vpop.f32.mrb[133].mxu0 }
0x1e67   :  { %12526 = vmatpush3.bf16.msra.mxu1 %v13207_v15  ;;  %12548 = vmatpush3.bf16.msra.mxu0 %v13208_v56  ;;  %v7929_v25 = vpop.f32.mrb[114].mxu1  ;;  %v7970_v23 = vpop.f32.mrb[134].mxu0  ;;  %v7928_v13 = vadd.f32 %v7927_v34, %v7523_v53  ;;  %v7969_v19 = vadd.f32 %v7968_v57, %v7531_v4  ;;  %v13231_v56 = vld [vmem:[%s16658_s9 + $0xe00] sm:$0xff]   ;;  %v13254_v53 = vld [vmem:[%s16658_s9 + $0xef0] sm:$0xff]   ;;  %v7539_v4 = vrot.slane %v15999_v24, %v13896_v7  ;;  %v13257_v7 = vld [vmem:[%s16658_s9 + $0xe78] sm:$0xff]  }
0x1e68   :  { %v7930_v16 = vpop.f32.mrb[115].mxu1  ;;  %v7971_v8 = vpop.f32.mrb[135].mxu0  ;;  %12527 = vmatprep.subr.bf16.mxu1 %v13209_v17  ;;  %12549 = vmatprep.subr.bf16.mxu0 %v13210_v55  ;;  %v8332_v17 = vpack.c.bf16 %v8059_v43, %v8059_v43  ;;  %v8334_v55 = vpack.c.bf16 %v8061_v22, %v8061_v22  ;;  %v13232_v34 = vld [vmem:[%s16658_s9 + $0xe80] sm:$0xff]   ;;  %v13233_v25 = vld [vmem:[%s16658_s9 + $0xe48] sm:$0xff]  }
0x1e69   :  { %v8064_v1 = vmax.f32 %v7928_v13, 0.0  ;;  %v8066_v15 = vmax.f32 %v7969_v19, 0.0  ;;  %v13234_v23 = vld [vmem:[%s16658_s9 + $0xec8] sm:$0xff]   ;;  %v13237_v8 = vld [vmem:[%s16658_s9 + $0xe50] sm:$0xff]   ;;  %v13259_v13 = vld [vmem:[%s16658_s9 + $0xe38] sm:$0xff]  }
0x1e6a   :  { %v13236_v16 = vld [vmem:[%s16658_s9 + $0xe88] sm:$0xff]   ;;  %v13263_v22 = vld [vmem:[%s16658_s9 + $0xf00] sm:$0xff]  }
0x1e6b   :  { %12528 = vmatpush3.bf16.msra.mxu1 %v13211_v36  ;;  %12550 = vmatpush3.bf16.msra.mxu0 %v13212_v58  ;;  %v8337_v57 = vpack.c.bf16 %v8064_v1, %v8064_v1  ;;  %v8339_v36 = vpack.c.bf16 %v8066_v15, %v8066_v15  ;;  %v13235_v58 = vld [vmem:[%s16658_s9 + $0xe08] sm:$0xff]  }
0x1e6c   :  { %12529 = vmatprep.subr.bf16.mxu1 %v13213_v21  ;;  %12551 = vmatprep.subr.bf16.mxu0 %v13214_v60  ;;  %v13238_v21 = vld [vmem:[%s16658_s9 + $0xed0] sm:$0xff]   ;;  %v13265_v15 = vld [vmem:[%s16658_s9 + $0xf48] sm:$0xff]  }
0x1e6d   :  { %v16015_v61 = vpop.f32.mrb[116].mxu1  ;;  %v8048_v47 = vpop.f32.mrb[136].mxu0  ;;  %v13239_v60 = vld [vmem:[%s16658_s9 + $0xe10] sm:$0xff]  }
0x1e6e   :  { %v16017_v62 = vadd.f32 %v8048_v47, %v7543_v26  ;;  %v16019_v33 = vpop.f32.mrb[117].mxu1  ;;  %v16021_v44 = vpop.f32.mrb[137].mxu0  ;;  %v13240_v26 = vld [vmem:[%s16658_s9 + $0xe90] sm:$0xff]   ;;  %v13245_v47 = vld [vmem:[%s16658_s9 + $0xe60] sm:$0xff]  }
0x1e6f   :  { %12530 = vmatpush3.bf16.msra.mxu1 %v13215_v40  ;;  %12552 = vmatpush3.bf16.msra.mxu0 %v13216_v41  ;;  %v8011_v12 = vpop.f32.mrb[118].mxu1  ;;  %v8052_v46 = vpop.f32.mrb[138].mxu0  ;;  %v13241_v40 = vld [vmem:[%s16658_s9 + $0xe58] sm:$0xff]  }
0x1e70   :  { %v8012_v35 = vpop.f32.mrb[119].mxu1  ;;  %v8053_v51 = vpop.f32.mrb[139].mxu0  ;;  %12531 = vmatprep.subr.bf16.mxu1 %v13217_v37  ;;  %12553 = vmatprep.subr.bf16.mxu0 %v13218_v42  ;;  %v13242_v41 = vld [vmem:[%s16658_s9 + $0xed8] sm:$0xff]   ;;  %v13246_v12 = vld [vmem:[%s16658_s9 + $0xee0] sm:$0xff]  }
0x1e71   :  { %v13243_v37 = vld [vmem:[%s16658_s9 + $0xe18] sm:$0xff]   ;;  %v13247_v46 = vld [vmem:[%s16658_s9 + $0xe20] sm:$0xff]   ;;  %v7519_v35 = vrot.slane %v15999_v24, %v13608_v28  ;;  %v13252_v51 = vld [vmem:[%s16658_s9 + $0xea8] sm:$0xff]  }
0x1e72   :  { %v13244_v42 = vld [vmem:[%s16658_s9 + $0xe98] sm:$0xff]  }
0x1e73   :  { %12532 = vmatpush3.bf16.msra.mxu1 %v13219_v48  ;;  %12554 = vmatpush3.bf16.msra.mxu0 %v13220_v49  ;;  %v13248_v48 = vld [vmem:[%s16658_s9 + $0xea0] sm:$0xff]   ;;  %v13249_v49 = vld [vmem:[%s16658_s9 + $0xe68] sm:$0xff]   ;;  %v7926_v14 = vadd.f32 %v15980_v63, %v7519_v35  ;;  %v13289_v35 = vld [vmem:[%s16658_s9 + $0xf78] sm:$0xff]  }
0x1e74   :  { %12533 = vmatprep.subr.bf16.mxu1 %v13221_v59  ;;  %12555 = vmatprep.subr.bf16.mxu0 %v13222_v52  ;;  %v13253_v59 = vld [vmem:[%s16658_s9 + $0xe70] sm:$0xff]   ;;  %v7527_v52 = vrot.slane %v15999_v24, %v13899_v9 }
0x1e75   :  { %v8063_v19 = vmax.f32 %v7926_v14, 0.0 }
0x1e77   :  { %12534 = vmatpush3.bf16.msra.mxu1 %v13223_v11  ;;  %12556 = vmatpush3.bf16.msra.mxu0 %v13224_v30  ;;  %v7547_v11 = vrot.slane %v15999_v24, %v13921_v31  ;;  %v13255_v30 = vld [vmem:[%s16658_s9 + $0xe30] sm:$0xff]   ;;  %v13258_v31 = vld [vmem:[%s16658_s9 + $0xef8] sm:$0xff]  }
0x1e78   :  { %12535 = vmatprep.subr.bf16.mxu1 %v13225_v38  ;;  %12557 = vmatprep.subr.bf16.mxu0 %v13226_v54  ;;  %v7967_v38 = vadd.f32 %v15982_v32, %v7527_v52  ;;  %v8010_v54 = vadd.f32 %v16019_v33, %v7539_v4  ;;  %v13260_v32 = vld [vmem:[%s16658_s9 + $0xeb8] sm:$0xff]   ;;  %v13262_v33 = vld [vmem:[%s16658_s9 + $0xfc0] sm:$0xff]  }
0x1e79   :  { %v8051_v63 = vadd.f32 %v16021_v44, %v7547_v11  ;;  %v13292_v52 = vld [vmem:[%s16658_s9 + $0xfb8] sm:$0xff]  }
0x1e7a   :  { %v8068_v44 = vmax.f32 %v8010_v54, 0.0 }
0x1e7b   :  { %12536 = vmatpush3.bf16.msra.mxu1 %v13227_v2  ;;  %12558 = vmatpush3.bf16.msra.mxu0 %v13228_v50  ;;  %v13261_v2 = vld [vmem:[%s16658_s9 + $0xf40] sm:$0xff]   ;;  %v8065_v50 = vmax.f32 %v7967_v38, 0.0  ;;  %v8070_v43 = vmax.f32 %v8051_v63, 0.0 }
0x1e7c   :  { %12565 = vmatprep.subr.bf16.mxu1 %v13229_v27  ;;  %12587 = vmatprep.subr.bf16.mxu0 %v13230_v29  ;;  %v8336_v27 = vpack.c.bf16 %v8063_v19, %v8063_v19  ;;  %v13264_v29 = vld [vmem:[%s16658_s9 + $0xf80] sm:$0xff]  }
0x1e7d   :  { %v8338_v1 = vpack.c.bf16 %v8065_v50, %v8065_v50 }
0x1e7e   :  { %9230 = vmatmul.mubr.bf16.vlgmr.msra.gmra.mrb[124].mxu1 %v8332_v17  ;;  %9270 = vmatmul.mubr.bf16.vlgmr.msra.gmra.mrb[144].mxu0 %v8334_v55  ;;  %v13266_v17 = vld [vmem:[%s16658_s9 + $0xfc8] sm:$0xff]   ;;  %v8343_v55 = vpack.c.bf16 %v8070_v43, %v8070_v43 }
0x1e7f   :  { %12566 = vmatpush3.bf16.msra.mxu1 %v13231_v56  ;;  %9309 = vmatprep.mubr.bf16.mxu1 %v8337_v57  ;;  %v8341_v56 = vpack.c.bf16 %v8068_v44, %v8068_v44  ;;  %v13268_v57 = vld [vmem:[%s16658_s9 + $0xf88] sm:$0xff]  }
0x1e80   :  { %12588 = vmatpush3.bf16.msra.mxu0 %v13232_v34  ;;  %9349 = vmatprep.mubr.bf16.mxu0 %v8339_v36  ;;  %v13267_v34 = vld [vmem:[%s16658_s9 + $0xf08] sm:$0xff]   ;;  %v13271_v36 = vld [vmem:[%s16658_s9 + $0xf10] sm:$0xff]  }
0x1e81   :  { %12567 = vmatprep.subr.bf16.mxu1 %v13233_v25  ;;  %12589 = vmatprep.subr.bf16.mxu0 %v13234_v23  ;;  %v13269_v25 = vld [vmem:[%s16658_s9 + $0xf50] sm:$0xff]  }
0x1e82   :  { %v13270_v23 = vld [vmem:[%s16658_s9 + $0xfd0] sm:$0xff]  }
0x1e83   :  { %12568 = vmatpush3.bf16.msra.mxu1 %v13235_v58  ;;  %v13272_v58 = vld [vmem:[%s16658_s9 + $0xf90] sm:$0xff]  }
0x1e84   :  { %12590 = vmatpush3.bf16.msra.mxu0 %v13236_v16  ;;  %12569 = vmatprep.subr.bf16.mxu1 %v13237_v8  ;;  %v13273_v16 = vld [vmem:[%s16658_s9 + $0xf58] sm:$0xff]  }
0x1e85   :  { %12591 = vmatprep.subr.bf16.mxu0 %v13238_v21  ;;  %v13274_v8 = vld [vmem:[%s16658_s9 + $0xfd8] sm:$0xff]  }
0x1e86   :  { %v13275_v21 = vld [vmem:[%s16658_s9 + $0xf18] sm:$0xff]  }
0x1e87   :  { %12570 = vmatpush3.bf16.msra.mxu1 %v13239_v60  ;;  %v13276_v60 = vld [vmem:[%s16658_s9 + $0xf98] sm:$0xff]  }
0x1e88   :  { %12592 = vmatpush3.bf16.msra.mxu0 %v13240_v26  ;;  %12571 = vmatprep.subr.bf16.mxu1 %v13241_v40  ;;  %v13277_v26 = vld [vmem:[%s16658_s9 + $0xf60] sm:$0xff]  }
0x1e89   :  { %12593 = vmatprep.subr.bf16.mxu0 %v13242_v41  ;;  %v13278_v40 = vld [vmem:[%s16658_s9 + $0xfe0] sm:$0xff]  }
0x1e8a   :  { %v13279_v41 = vld [vmem:[%s16658_s9 + $0xf20] sm:$0xff]  }
0x1e8b   :  { %12572 = vmatpush3.bf16.msra.mxu1 %v13243_v37  ;;  %v13280_v37 = vld [vmem:[%s16658_s9 + $0xfa0] sm:$0xff]  }
0x1e8c   :  { %12594 = vmatpush3.bf16.msra.mxu0 %v13244_v42  ;;  %12573 = vmatprep.subr.bf16.mxu1 %v13245_v47  ;;  %v13281_v42 = vld [vmem:[%s16658_s9 + $0xf68] sm:$0xff]  }
0x1e8d   :  { %12595 = vmatprep.subr.bf16.mxu0 %v13246_v12  ;;  %v13282_v47 = vld [vmem:[%s16658_s9 + $0xfe8] sm:$0xff]  }
0x1e8e   :  { %v13283_v12 = vld [vmem:[%s16658_s9 + $0xf28] sm:$0xff]  }
0x1e8f   :  { %12574 = vmatpush3.bf16.msra.mxu1 %v13247_v46  ;;  %v7535_v46 = vrot.slane %v15999_v24, %v13890_v5  ;;  %v13287_v5 = vld [vmem:[%s16658_s9 + $0xf30] sm:$0xff]  }
0x1e90   :  { %12596 = vmatpush3.bf16.msra.mxu0 %v13248_v48  ;;  %12575 = vmatprep.subr.bf16.mxu1 %v13249_v49  ;;  %v13284_v48 = vld [vmem:[%s16658_s9 + $0xfa8] sm:$0xff]   ;;  %v13285_v49 = vld [vmem:[%s16658_s9 + $0xf70] sm:$0xff]  }
0x1e91   :  { %12597 = vmatprep.subr.bf16.mxu0 %v13250_v20  ;;  %v13286_v20 = vld [vmem:[%s16658_s9 + $0xff0] sm:$0xff]   ;;  %v8008_v24 = vadd.f32 %v16015_v61, %v7535_v46  ;;  %v13291_v61 = vld [vmem:[%s16658_s9 + $0xf38] sm:$0xff]  }
0x1e93   :  { %12576 = vmatpush3.bf16.msra.mxu1 %v13251_v18  ;;  %v13288_v18 = vld [vmem:[%s16658_s9 + $0xfb0] sm:$0xff]  }
0x1e94   :  { %12598 = vmatpush3.bf16.msra.mxu0 %v13252_v51  ;;  %12577 = vmatprep.subr.bf16.mxu1 %v13253_v59  ;;  %v13290_v51 = vld [vmem:[%s16658_s9 + $0xff8] sm:$0xff]   ;;  %v8067_v59 = vmax.f32 %v8008_v24, 0.0  ;;  %s16715_s9 = sld [smem:[#allocation9_spill]] }
0x1e95   :  { %12599 = vmatprep.subr.bf16.mxu0 %v13254_v53  ;;  %v8069_v53 = vmax.f32 %v16017_v62, 0.0 }
0x1e96   :  { %v8340_v4 = vpack.c.bf16 %v8067_v59, %v8067_v59  ;;  %v16286_v59 = vld [vmem:[%s16665_s16 + $0x4] ss:$16 sps:$4 sm:$0xff]  }
0x1e97   :  { %12578 = vmatpush3.bf16.msra.mxu1 %v13255_v30  ;;  %v8342_v11 = vpack.c.bf16 %v8069_v53, %v8069_v53  ;;  %v16302_v53 = vld [vmem:[%s16665_s16 + $0x20] ss:$16 sps:$4 sm:$0xff]  }
0x1e98   :  { %12600 = vmatpush3.bf16.msra.mxu0 %v13256_v45  ;;  %12579 = vmatprep.subr.bf16.mxu1 %v13257_v7  ;;  %v11739_v45 = vld [vmem:[%s16662_s10 + $0x3] ss:$0 sm:$0xff] }
0x1e99   :  { %12601 = vmatprep.subr.bf16.mxu0 %v13258_v31 }
0x1e9b   :  { %12580 = vmatpush3.bf16.msra.mxu1 %v13259_v13 }
0x1e9c   :  { %12602 = vmatpush3.bf16.msra.mxu0 %v13260_v32  ;;  %12609 = vmatprep.subr.bf16.mxu1 %v13261_v2 }
0x1e9d   :  { %12631 = vmatprep.subr.bf16.mxu0 %v13262_v33 }
0x1e9e   :  { %9310 = vmatmul.mubr.bf16.vlgmr.msra.gmra.mrb[128].mxu1 %v8336_v27 }
0x1e9f   :  { %9350 = vmatmul.mubr.bf16.vlgmr.msra.gmra.mrb[148].mxu0 %v8338_v1  ;;  %12610 = vmatpush3.bf16.msra.mxu1 %v13263_v22 }
0x1ea0   :  { %9389 = vmatprep.mubr.bf16.mxu1 %v8341_v56  ;;  %12632 = vmatpush3.bf16.msra.mxu0 %v13264_v29 }
0x1ea1   :  { %9429 = vmatprep.mubr.bf16.mxu0 %v8343_v55  ;;  %12611 = vmatprep.subr.bf16.mxu1 %v13265_v15 }
0x1ea2   :  { %12633 = vmatprep.subr.bf16.mxu0 %v13266_v17 }
0x1ea3   :  { %12612 = vmatpush3.bf16.msra.mxu1 %v13267_v34 }
0x1ea4   :  { %12634 = vmatpush3.bf16.msra.mxu0 %v13268_v57  ;;  %12613 = vmatprep.subr.bf16.mxu1 %v13269_v25 }
0x1ea5   :  { %12635 = vmatprep.subr.bf16.mxu0 %v13270_v23 }
0x1ea7   :  { %12614 = vmatpush3.bf16.msra.mxu1 %v13271_v36 }
0x1ea8   :  { %12636 = vmatpush3.bf16.msra.mxu0 %v13272_v58  ;;  %12615 = vmatprep.subr.bf16.mxu1 %v13273_v16 }
0x1ea9   :  { %12637 = vmatprep.subr.bf16.mxu0 %v13274_v8 }
0x1eab   :  { %12616 = vmatpush3.bf16.msra.mxu1 %v13275_v21 }
0x1eac   :  { %12638 = vmatpush3.bf16.msra.mxu0 %v13276_v60  ;;  %12617 = vmatprep.subr.bf16.mxu1 %v13277_v26 }
0x1ead   :  { %12639 = vmatprep.subr.bf16.mxu0 %v13278_v40 }
0x1eaf   :  { %12618 = vmatpush3.bf16.msra.mxu1 %v13279_v41 }
0x1eb0   :  { %12640 = vmatpush3.bf16.msra.mxu0 %v13280_v37  ;;  %12619 = vmatprep.subr.bf16.mxu1 %v13281_v42 }
0x1eb1   :  { %12641 = vmatprep.subr.bf16.mxu0 %v13282_v47 }
0x1eb3   :  { %12620 = vmatpush3.bf16.msra.mxu1 %v13283_v12 }
0x1eb4   :  { %12642 = vmatpush3.bf16.msra.mxu0 %v13284_v48  ;;  %12621 = vmatprep.subr.bf16.mxu1 %v13285_v49 }
0x1eb5   :  { %12643 = vmatprep.subr.bf16.mxu0 %v13286_v20 }
0x1eb7   :  { %12622 = vmatpush3.bf16.msra.mxu1 %v13287_v5 }
0x1eb8   :  { %12644 = vmatpush3.bf16.msra.mxu0 %v13288_v18  ;;  %12623 = vmatprep.subr.bf16.mxu1 %v13289_v35 }
0x1eb9   :  { %12645 = vmatprep.subr.bf16.mxu0 %v13290_v51 }
0x1ebb   :  { %12624 = vmatpush3.bf16.msra.mxu1 %v13291_v61  ;;  %v16281_v61 = vld [vmem:[%s16665_s16] ss:$16 sps:$4 sm:$0xff]  }
0x1ebc   :  { %12646 = vmatpush3.bf16.msra.mxu0 %v13292_v52  ;;  %v16291_v52 = vld [vmem:[%s16665_s16 + $0x8] ss:$16 sps:$4 sm:$0xff]   ;;  %9665 = vmatprep.subr.bf16.mxu1 %v16286_v59 }
0x1ebe   :  { %9390 = vmatmul.mubr.bf16.vlgmr.msra.gmra.mrb[132].mxu1 %v8340_v4  ;;  %v16307_v4 = vld [vmem:[%s16665_s16 + $0x24] ss:$16 sps:$4 sm:$0xff]  }
0x1ebf   :  { %9430 = vmatmul.mubr.bf16.vlgmr.msra.gmra.mrb[152].mxu0 %v8342_v11  ;;  %9697 = vmatprep.mubr.bf16.mxu1 %v13456_v39  ;;  %v16314_v11 = vld [vmem:[%s16665_s16 + $0x28] ss:$16 sps:$4 sm:$0xff]  }
0x1ec0   :  { %9738 = vmatprep.mubr.bf16.mxu0 %v13456_v39  ;;  %9666 = vmatpush1.bf16.msra.mxu1 %v16281_v61 }
0x1ec1   :  { %9667 = vmatprep.subr.bf16.mxu1 %v16307_v4 }
0x1ec4   :  { %9668 = vmatpush1.bf16.msra.mxu1 %v16302_v53 }
0x1f31   :  { %v12493_v30 = vpop.f32.mrb[120].mxu1  ;;  %v12515_v14 = vpop.f32.mrb[140].mxu0 }
0x1f32   :  { %v12494_v7 = vpop.f32.mrb[121].mxu1  ;;  %v12516_v38 = vpop.f32.mrb[141].mxu0 }
0x1f33   :  { %v12495_v62 = vadd.f32 %v12494_v7, %v12493_v30  ;;  %v12517_v31 = vadd.f32 %v12516_v38, %v12515_v14  ;;  %v12496_v54 = vpop.f32.mrb[122].mxu1  ;;  %v12518_v63 = vpop.f32.mrb[142].mxu0  ;;  %v16321_v30 = vld [vmem:[%s16665_s16 + $0x2c] ss:$16 sps:$4 sm:$0xff]   ;;  %v16326_v14 = vld [vmem:[%s16665_s16 + $0x44] ss:$16 sps:$4 sm:$0xff]  }
0x1f34   :  { %v12497_v13 = vpop.f32.mrb[123].mxu1  ;;  %v12519_v19 = vpop.f32.mrb[143].mxu0  ;;  %v16337_v7 = vld [vmem:[%s16665_s16 + $0x4c] ss:$16 sps:$4 sm:$0xff]   ;;  %v16343_v38 = vld [vmem:[%s16665_s16 + $0x48] ss:$16 sps:$4 sm:$0xff]   ;;  %9669 = vmatprep.subr.bf16.mxu1 %v16326_v14 }
0x1f35   :  { %v9152_v32 = vadd.f32 %v12495_v62, %v11739_v45  ;;  %v16332_v45 = vld [vmem:[%s16665_s16 + $0x40] ss:$16 sps:$4 sm:$0xff]   ;;  %v16350_v62 = vld [vmem:[%s16665_s16 + $0x64] ss:$16 sps:$4 sm:$0xff]   ;;  %v16366_v63 = vld [vmem:[%s16665_s16 + $0x68] ss:$16 sps:$4 sm:$0xff]  }
0x1f36   :  { %v16361_v54 = vld [vmem:[%s16665_s16 + $0x60] ss:$16 sps:$4 sm:$0xff]   ;;  %9670 = vmatpush1.bf16.msra.mxu1 %v16332_v45  ;;  %v16372_v13 = vld [vmem:[%s16665_s16 + $0x84] ss:$16 sps:$4 sm:$0xff]   ;;  %v16379_v19 = vld [vmem:[%s16665_s16 + $0x8c] ss:$16 sps:$4 sm:$0xff]  }
0x1f37   :  { %v9192_v2 = vadd.f32 %v12517_v31, %v9152_v32  ;;  %v16356_v31 = vld [vmem:[%s16665_s16 + $0x6c] ss:$16 sps:$4 sm:$0xff]   ;;  %9671 = vmatprep.subr.bf16.mxu1 %v16350_v62  ;;  %v16385_v32 = vld [vmem:[%s16665_s16 + $0x80] ss:$16 sps:$4 sm:$0xff]  }
0x1f3a   :  { %9672 = vmatpush1.bf16.msra.mxu1 %v16361_v54 }
0x1f3b   :  { %9673 = vmatprep.subr.bf16.mxu1 %v16372_v13 }
0x1f3e   :  { %9674 = vmatpush1.bf16.msra.mxu1 %v16385_v32 }
0x1f51   :  { %v12537_v50 = vpop.f32.mrb[124].mxu1  ;;  %v12559_v33 = vpop.f32.mrb[144].mxu0 }
0x1f52   :  { %v12538_v44 = vpop.f32.mrb[125].mxu1  ;;  %v12560_v43 = vpop.f32.mrb[145].mxu0 }
0x1f53   :  { %v12539_v22 = vadd.f32 %v12538_v44, %v12537_v50  ;;  %v12561_v27 = vadd.f32 %v12560_v43, %v12559_v33  ;;  %v12540_v29 = vpop.f32.mrb[126].mxu1  ;;  %v12562_v1 = vpop.f32.mrb[146].mxu0 }
0x1f54   :  { %v12541_v15 = vpop.f32.mrb[127].mxu1  ;;  %v12563_v56 = vpop.f32.mrb[147].mxu0  ;;  %v16407_v29 = vld [vmem:[%s16665_s16 + $0xa0] ss:$16 sps:$4 sm:$0xff]   ;;  %v16414_v1 = vld [vmem:[%s16665_s16 + $0xac] ss:$16 sps:$4 sm:$0xff]  }
0x1f55   :  { %v9232_v17 = vadd.f32 %v12539_v22, %v9192_v2  ;;  %v16393_v2 = vld [vmem:[%s16665_s16 + $0x88] ss:$16 sps:$4 sm:$0xff]   ;;  %v16424_v56 = vld [vmem:[%s16665_s16 + $0xc4] ss:$16 sps:$4 sm:$0xff]  }
0x1f56   :  { %v16419_v15 = vld [vmem:[%s16665_s16 + $0xa8] ss:$16 sps:$4 sm:$0xff]  }
0x1f57   :  { %v9272_v55 = vadd.f32 %v12561_v27, %v9232_v17  ;;  %v16402_v27 = vld [vmem:[%s16665_s16 + $0xa4] ss:$16 sps:$4 sm:$0xff]   ;;  %v16430_v17 = vld [vmem:[%s16665_s16 + $0xc0] ss:$16 sps:$4 sm:$0xff]  }
0x1f58   :  { %9675 = vmatprep.subr.bf16.mxu1 %v16402_v27 }
0x1f59   :  { %9676 = vmatpush1.bf16.msra.mxu1 %v16407_v29 }
0x1f5a   :  { %9677 = vmatprep.subr.bf16.mxu1 %v16424_v56 }
0x1f5d   :  { %9678 = vmatpush1.bf16.msra.mxu1 %v16430_v17 }
0x1f71   :  { %v12581_v34 = vpop.f32.mrb[128].mxu1 }
0x1f72   :  { %v12603_v57 = vpop.f32.mrb[148].mxu0  ;;  %v12582_v25 = vpop.f32.mrb[129].mxu1 }
0x1f73   :  { %v12583_v23 = vadd.f32 %v12582_v25, %v12581_v34  ;;  %v12604_v36 = vpop.f32.mrb[149].mxu0  ;;  %v12584_v58 = vpop.f32.mrb[130].mxu1  ;;  %v16443_v34 = vld [vmem:[%s16665_s16 + $0xc8] ss:$16 sps:$4 sm:$0xff]   ;;  %v16454_v25 = vld [vmem:[%s16665_s16 + $0xe0] ss:$16 sps:$4 sm:$0xff]  }
0x1f74   :  { %v12605_v16 = vadd.f32 %v12604_v36, %v12603_v57  ;;  %v12606_v8 = vpop.f32.mrb[150].mxu0  ;;  %v12585_v21 = vpop.f32.mrb[131].mxu1  ;;  %v16448_v57 = vld [vmem:[%s16665_s16 + $0xe4] ss:$16 sps:$4 sm:$0xff]   ;;  %v16467_v36 = vld [vmem:[%s16665_s16 + $0xe8] ss:$16 sps:$4 sm:$0xff]  }
0x1f75   :  { %v9312_v60 = vadd.f32 %v12583_v23, %v9272_v55  ;;  %v12607_v26 = vpop.f32.mrb[151].mxu0  ;;  %v16438_v55 = vld [vmem:[%s16665_s16 + $0xcc] ss:$16 sps:$4 sm:$0xff]   ;;  %9679 = vmatprep.subr.bf16.mxu1 %v16448_v57  ;;  %v16475_v58 = vld [vmem:[%s16714_s1 + $0x4] ss:$16 sps:$4 sm:$0xff]  }
0x1f76   :  { %9680 = vmatpush1.bf16.msra.mxu1 %v16454_v25  ;;  %v16462_v23 = vld [vmem:[%s16665_s16 + $0xec] ss:$16 sps:$4 sm:$0xff]   ;;  %v16488_v8 = vld [vmem:[%s16714_s1 + $0x8] ss:$16 sps:$4 sm:$0xff]   ;;  %v16502_v26 = vld [vmem:[%s16714_s1 + $0x24] ss:$16 sps:$4 sm:$0xff]  }
0x1f77   :  { %v9352_v40 = vadd.f32 %v12605_v16, %v9312_v60  ;;  %v16481_v16 = vld [vmem:[%s16714_s1] ss:$16 sps:$4 sm:$0xff]   ;;  %9790 = vmatprep.subr.bf16.mxu1 %v16475_v58  ;;  %v13346_v21 = vld [vmem:[%s16714_s1 + $0xc] ss:$16 sps:$4 sm:$0xff]  }
0x1f78   :  { %v16497_v60 = vld [vmem:[%s16714_s1 + $0x20] ss:$16 sps:$4 sm:$0xff]  }
0x1f79   :  { %9698 = vmatmul.mubr.bf16.vlgmr.msra.gmra.mrb[136].mxu1 %v13456_v39 }
0x1f7a   :  { %9822 = vmatprep.mubr.bf16.mxu1 %v13456_v39  ;;  %9791 = vmatpush1.bf16.msra.mxu1 %v16481_v16 }
0x1f7b   :  { %9792 = vmatprep.subr.bf16.mxu1 %v16502_v26 }
0x1f7e   :  { %9793 = vmatpush1.bf16.msra.mxu1 %v16497_v60 }
0x1f7f   :  { %9922 = vmatprep.subr.bf16.mxu1 %v16286_v59 }
0x1f91   :  { %v12625_v41 = vpop.f32.mrb[132].mxu1 }
0x1f92   :  { %v12647_v37 = vpop.f32.mrb[152].mxu0  ;;  %v12626_v42 = vpop.f32.mrb[133].mxu1 }
0x1f93   :  { %v12627_v47 = vadd.f32 %v12626_v42, %v12625_v41  ;;  %v12648_v12 = vpop.f32.mrb[153].mxu0  ;;  %v12628_v46 = vpop.f32.mrb[134].mxu1  ;;  %v16515_v41 = vld [vmem:[%s16714_s1 + $0x2c] ss:$16 sps:$4 sm:$0xff]  }
0x1f94   :  { %v12649_v48 = vadd.f32 %v12648_v12, %v12647_v37  ;;  %v12650_v49 = vpop.f32.mrb[154].mxu0  ;;  %v12629_v20 = vpop.f32.mrb[135].mxu1  ;;  %v11868_v46 = vld [vmem:[%s16663_s13 + $0x3] ss:$0 sm:$0xff] }
0x1f95   :  { %v9392_v5 = vadd.f32 %v12627_v47, %v9352_v40  ;;  %v12651_v24 = vpop.f32.mrb[155].mxu0  ;;  %v16510_v40 = vld [vmem:[%s16714_s1 + $0x28] ss:$16 sps:$4 sm:$0xff]   ;;  %v11869_v49 = vld [vmem:[%s16664_s14 + $0x3] ss:$0 sm:$0xff] }
0x1f97   :  { %v9432_v18 = vadd.f32 %v12649_v48, %v9392_v5 }
0x1f99   :  { %v9437_v35 = vadd.f32 %v9432_v18, %v15745_v3  ;;  %v16296_v3 = vld [vmem:[%s16665_s16 + $0xc] ss:$16 sps:$4 sm:$0xff]  }
0x1f9a   :  { %9706 = vmatprep.subr.bf16.mxu0 %v16296_v3 }
0x1f9b   :  { %v9440_v51 = vsel %vm333_vm6, %v9437_v35, 0.0  ;;  %9707 = vmatpush1.bf16.msra.mxu0 %v16291_v52 }
0x1f9c   :  { %9441 = vadd.xlane.f32.xlu0 %v9440_v51  ;;  %9708 = vmatprep.subr.bf16.mxu0 %v16321_v30 }
0x1f9f   :  { %9709 = vmatpush1.bf16.msra.mxu0 %v16314_v11 }
0x1fa0   :  { %9710 = vmatprep.subr.bf16.mxu0 %v16337_v7 }
0x1fa3   :  { %9711 = vmatpush1.bf16.msra.mxu0 %v16343_v38 }
0x1fa4   :  { %9712 = vmatprep.subr.bf16.mxu0 %v16356_v31 }
0x1fa7   :  { %9713 = vmatpush1.bf16.msra.mxu0 %v16366_v63 }
0x1fa8   :  { %9714 = vmatprep.subr.bf16.mxu0 %v16379_v19 }
0x1fab   :  { %9715 = vmatpush1.bf16.msra.mxu0 %v16393_v2 }
0x1fac   :  { %9716 = vmatprep.subr.bf16.mxu0 %v16414_v1 }
0x1faf   :  { %9717 = vmatpush1.bf16.msra.mxu0 %v16419_v15 }
0x1fb0   :  { %9718 = vmatprep.subr.bf16.mxu0 %v16438_v55 }
0x1fb3   :  { %9719 = vmatpush1.bf16.msra.mxu0 %v16443_v34 }
0x1fb4   :  { %9720 = vmatprep.subr.bf16.mxu0 %v16462_v23 }
0x1fb7   :  { %9721 = vmatpush1.bf16.msra.mxu0 %v16467_v36 }
0x1fb8   :  { %9831 = vmatprep.subr.bf16.mxu0 %v13346_v21 }
0x1fba   :  { %9739 = vmatmul.mubr.bf16.vlgmr.msra.gmra.mrb[156].mxu0 %v13456_v39 }
0x1fbb   :  { %9863 = vmatprep.mubr.bf16.mxu0 %v13456_v39  ;;  %9832 = vmatpush1.bf16.msra.mxu0 %v16488_v8 }
0x1fbc   :  { %9833 = vmatprep.subr.bf16.mxu0 %v16515_v41 }
0x1fbf   :  { %9834 = vmatpush1.bf16.msra.mxu0 %v16510_v40 }
0x1fc0   :  { %9963 = vmatprep.subr.bf16.mxu0 %v16296_v3 }
0x2029   :  { %v9442_v50 = vpop.xlane.xlu0 %9441 }
0x202a   :  { %v9443_v33 = vmul.f32 0.03125, %v9442_v50 }
0x202c   :  { %v9444_v44 = vsub.f32 %v9437_v35, %v9443_v33 }
0x202e   :  { %v9445_v43 = vmul.f32 %v9444_v44, %v9444_v44 }
0x2030   :  { %v9446_v22 = vsel %vm333_vm6, %v9445_v43, 0.0 }
0x2031   :  { %9447 = vadd.xlane.f32.xlu0 %v9446_v22 }
0x204c   :  { %v9699_v18 = vpop.f32.mrb[136].mxu1 }
0x204d   :  { %v9701_v35 = vpop.f32.mrb[137].mxu1 }
0x204e   :  { %v9703_v51 = vpop.f32.mrb[138].mxu1 }
0x208d   :  { %v9740_v59 = vpop.f32.mrb[156].mxu0 }
0x20be   :  { %v9448_v37 = vpop.xlane.xlu0 %9447 }
0x20bf   :  { %v9449_v42 = vmul.f32 0.03125, %v9448_v37 }
0x20c1   :  { %v9450_v47 = vadd.f32 1e-05, %v9449_v42 }
0x20c3   :  { %13407 = vrsqrt.f32 %v9450_v47 }
0x20cd   :  { %v13408_v12 = vpop.eup %13407 }
0x20ce   :  { %v9452_v48 = vmul.f32 %v13408_v12, %v9444_v44 }
0x20d0   :  { %v9457_v20 = vmul.f32 %v11868_v46, %v9452_v48 }
0x20d2   :  { %v9462_v5 = vadd.f32 %v11869_v49, %v9457_v20  ;;  %v13360_v49 = vld [vmem:[%s16716_s23 + $0x38] sm:$0xff]   ;;  %v25_v20 = vstv %s16717_s26 }
0x20d3   :  { %26 = vst [vmem:[#allocation2] sm:$0x1] %v25_v20 }
0x20d4   :  { %v16528_v24 = vpack.c.bf16 %v9462_v5, %v9462_v5 }
0x20d6   :  { %11910 = vmatmul.mubr.msk.bf16.vlgmr.msra.gmra.mrb[140].mxu1 %vm151_vm2, %v16528_v24  ;;  %11911 = vmatmul.mubr.msk.bf16.vlgmr.msra.gmra.mrb[160].mxu0 %vm151_vm2, %v16528_v24  ;;  %v10004_v48 = vshrl.u32 %v16528_v24, 16 }
0x20d7   :  { %9923 = vmatpush1.bf16.msra.mxu1 %v16281_v61  ;;  %9964 = vmatpush1.bf16.msra.mxu0 %v16291_v52  ;;  %v9704_v61 = vpop.f32.mrb[139].mxu1  ;;  %v9742_v52 = vpop.f32.mrb[157].mxu0 }
0x20d8   :  { %9924 = vmatprep.subr.bf16.mxu1 %v16307_v4  ;;  %9965 = vmatprep.subr.bf16.mxu0 %v16321_v30  ;;  %v9744_v3 = vpop.f32.mrb[158].mxu0  ;;  %v9503_v4 = vld [vmem:[%s16715_s9] sm:$0xf] }
0x20d9   :  { %9954 = vmatprep.mubr.bf16.mxu1 %v13456_v39  ;;  %9995 = vmatprep.mubr.bf16.mxu0 %v13456_v39  ;;  %v16579_v33 = vrot.slane %v9503_v4, %v13902_v10 }
0x20db   :  { %9925 = vmatpush1.bf16.msra.mxu1 %v16302_v53  ;;  %9966 = vmatpush1.bf16.msra.mxu0 %v16314_v11  ;;  %v9745_v53 = vpop.f32.mrb[159].mxu0  ;;  %v16571_v11 = vrot.slane %v9503_v4, %v13608_v28 }
0x20dc   :  { %9926 = vmatprep.subr.bf16.mxu1 %v16326_v14  ;;  %9967 = vmatprep.subr.bf16.mxu0 %v16337_v7 }
0x20df   :  { %9927 = vmatpush1.bf16.msra.mxu1 %v16332_v45  ;;  %9968 = vmatpush1.bf16.msra.mxu0 %v16343_v38  ;;  %v16574_v45 = vrot.slane %v9503_v4, %v13893_v6 }
0x20e0   :  { %9928 = vmatprep.subr.bf16.mxu1 %v16350_v62  ;;  %9969 = vmatprep.subr.bf16.mxu0 %v16356_v31 }
0x20e3   :  { %9929 = vmatpush1.bf16.msra.mxu1 %v16361_v54  ;;  %9970 = vmatpush1.bf16.msra.mxu0 %v16366_v63 }
0x20e4   :  { %9930 = vmatprep.subr.bf16.mxu1 %v16372_v13  ;;  %9971 = vmatprep.subr.bf16.mxu0 %v16379_v19 }
0x20e7   :  { %9931 = vmatpush1.bf16.msra.mxu1 %v16385_v32  ;;  %9972 = vmatpush1.bf16.msra.mxu0 %v16393_v2 }
0x20e8   :  { %9932 = vmatprep.subr.bf16.mxu1 %v16402_v27  ;;  %9973 = vmatprep.subr.bf16.mxu0 %v16414_v1  ;;  %v16583_v1 = vrot.slane %v9503_v4, %v13899_v9 }
0x20eb   :  { %9933 = vmatpush1.bf16.msra.mxu1 %v16407_v29  ;;  %9974 = vmatpush1.bf16.msra.mxu0 %v16419_v15 }
0x20ec   :  { %9934 = vmatprep.subr.bf16.mxu1 %v16424_v56  ;;  %9975 = vmatprep.subr.bf16.mxu0 %v16438_v55 }
0x20ef   :  { %9935 = vmatpush1.bf16.msra.mxu1 %v16430_v17  ;;  %9976 = vmatpush1.bf16.msra.mxu0 %v16443_v34 }
0x20f0   :  { %9936 = vmatprep.subr.bf16.mxu1 %v16448_v57  ;;  %9977 = vmatprep.subr.bf16.mxu0 %v16462_v23 }
0x20f3   :  { %9937 = vmatpush1.bf16.msra.mxu1 %v16454_v25  ;;  %9978 = vmatpush1.bf16.msra.mxu0 %v16467_v36 }
0x20f4   :  { %10009 = vmatprep.subr.bf16.mxu1 %v16475_v58  ;;  %10050 = vmatprep.subr.bf16.mxu0 %v13346_v21 }
0x21a9   :  { %v9824_v30 = vpop.f32.mrb[140].mxu1  ;;  %v9865_v14 = vpop.f32.mrb[160].mxu0 }
0x21aa   :  { %v9825_v7 = vadd.f32 %v9824_v30, %v9699_v18  ;;  %v9866_v38 = vadd.f32 %v9865_v14, %v9740_v59  ;;  %v9826_v62 = vpop.f32.mrb[141].mxu1  ;;  %v9867_v31 = vpop.f32.mrb[161].mxu0 }
0x21ab   :  { %v9827_v54 = vadd.f32 %v9826_v62, %v9701_v35  ;;  %v9868_v63 = vadd.f32 %v9867_v31, %v9742_v52  ;;  %v9828_v13 = vpop.f32.mrb[142].mxu1  ;;  %v9869_v19 = vpop.f32.mrb[162].mxu0 }
0x21ac   :  { %v9893_v32 = vadd.f32 %v16571_v11, %v9825_v7  ;;  %v9829_v2 = vpop.f32.mrb[143].mxu1  ;;  %v9870_v50 = vpop.f32.mrb[163].mxu0  ;;  %v9895_v56 = vadd.f32 %v16583_v1, %v9866_v38 }
0x21ad   :  { %v9894_v28 = vadd.f32 %v16574_v45, %v9827_v54  ;;  %v9896_v27 = vadd.f32 %v16579_v33, %v9868_v63 }
0x21ae   :  { %v9897_v44 = vsub.f32 0.0, %v9893_v32 }
0x21af   :  { %v9903_v6 = vsub.f32 0.0, %v9894_v28  ;;  %v9910_v29 = vsub.f32 0.0, %v9896_v27 }
0x21b0   :  { %v9898_v43 = vmul.f32 1.442695, %v9897_v44 }
0x21b1   :  { %v9904_v22 = vmul.f32 1.442695, %v9903_v6  ;;  %v9911_v15 = vmul.f32 1.442695, %v9910_v29 }
0x21b2   :  { %13409 = vpow2.f32 %v9898_v43 }
0x21b3   :  { %13411 = vpow2.f32 %v9904_v22 }
0x21b4   :  { %13413 = vpow2.f32 %v9911_v15 }
0x21b5   :  { %13415 = vtanh.f32 %v9895_v56 }
0x21bc   :  { %v13410_v17 = vpop.eup %13409 }
0x21bd   :  { %v13412_v55 = vpop.eup %13411  ;;  %v9900_v34 = vadd.f32 1.0, %v13410_v17 }
0x21be   :  { %v9906_v10 = vadd.f32 1.0, %v13412_v55  ;;  %v13414_v57 = vpop.eup %13413 }
0x21bf   :  { %13417 = vrcp.f32 %v9900_v34  ;;  %v13416_v25 = vpop.eup %13415  ;;  %v9913_v21 = vadd.f32 1.0, %v13414_v57 }
0x21c0   :  { %13419 = vrcp.f32 %v9906_v10 }
0x21c1   :  { %13421 = vrcp.f32 %v9913_v21 }
0x21c9   :  { %v13418_v23 = vpop.eup %13417 }
0x21ca   :  { %v13420_v36 = vpop.eup %13419  ;;  %v9917_v58 = vmul.f32 %v13418_v23, %v13416_v25 }
0x21cb   :  { %v9916_v37 = vmul.f32 0.0, %v13420_v36  ;;  %v13422_v42 = vpop.eup %13421 }
0x21cd   :  { %v16586_v9 = vadd.f32 %v9917_v58, %v9916_v37  ;;  %v11914_v37 = vld [vmem:[#allocation2] ss:$0 sm:$0xff] }
0x21cf   :  { %13423 = vtanh.f32 %v16586_v9 }
0x21d9   :  { %v13424_v47 = vpop.eup %13423 }
0x21da   :  { %v16589_v12 = vmul.f32 %v13424_v47, %v13422_v42 }
0x21dc   :  { %v9921_v46 = vpack.c.bf16 %v16589_v12, %v16589_v12 }
0x21de   :  { %9955 = vmatmul.mubr.bf16.vlgmr.msra.gmra.mrb[144].mxu1 %v9921_v46  ;;  %9996 = vmatmul.mubr.bf16.vlgmr.msra.gmra.mrb[164].mxu0 %v9921_v46 }
0x21df   :  { %10010 = vmatpush1.bf16.msra.mxu1 %v16481_v16  ;;  %10051 = vmatpush1.bf16.msra.mxu0 %v16488_v8  ;;  %v13353_v16 = vld [vmem:[%s16716_s23] sm:$0xff]   ;;  %v13355_v8 = vld [vmem:[%s16716_s23 + $0x10] sm:$0xff]  }
0x21e0   :  { %10011 = vmatprep.subr.bf16.mxu1 %v16502_v26  ;;  %10052 = vmatprep.subr.bf16.mxu0 %v16515_v41  ;;  %v13357_v26 = vld [vmem:[%s16716_s23 + $0x20] sm:$0xff]   ;;  %v13359_v41 = vld [vmem:[%s16716_s23 + $0x30] sm:$0xff]  }
0x21e1   :  { %10041 = vmatprep.mubr.bf16.mxu1 %v13456_v39  ;;  %10082 = vmatprep.mubr.bf16.mxu0 %v13456_v39  ;;  %v13354_v39 = vld [vmem:[%s16716_s23 + $0x8] sm:$0xff]  }
0x21e3   :  { %10012 = vmatpush1.bf16.msra.mxu1 %v16497_v60  ;;  %10053 = vmatpush1.bf16.msra.mxu0 %v16510_v40  ;;  %v13356_v60 = vld [vmem:[%s16716_s23 + $0x18] sm:$0xff]   ;;  %v13358_v40 = vld [vmem:[%s16716_s23 + $0x28] sm:$0xff]  }
0x21e4   :  { %12732 = vmatprep.subr.bf16.mxu1 %v13445_v0 }
0x21e6   :  { %11912 = vmatmul.mubr.msk.bf16.vlgmr.msra.gmra.mrb[148].mxu1 %vm151_vm2, %v10004_v48  ;;  %11913 = vmatmul.mubr.msk.bf16.vlgmr.msra.gmra.mrb[168].mxu0 %vm151_vm2, %v10004_v48 }
0x21e7   :  { %12748 = vmatprep.mubr.msk.bf16.mxu1 %vm13446_vm0, %v13445_v0  ;;  %12733 = vmatpush3.bf16.msra.mxu1 %v13353_v16 }
0x21e8   :  { %12734 = vmatprep.subr.bf16.mxu1 %v13445_v0 }
0x21eb   :  { %12735 = vmatpush3.bf16.msra.mxu1 %v13354_v39 }
0x21ec   :  { %12736 = vmatprep.subr.bf16.mxu1 %v13445_v0 }
0x21ef   :  { %12737 = vmatpush3.bf16.msra.mxu1 %v13355_v8 }
0x21f0   :  { %12738 = vmatprep.subr.bf16.mxu1 %v13445_v0 }
0x21f3   :  { %12739 = vmatpush3.bf16.msra.mxu1 %v13356_v60 }
0x21f4   :  { %12740 = vmatprep.subr.bf16.mxu1 %v13445_v0 }
0x21f7   :  { %12741 = vmatpush3.bf16.msra.mxu1 %v13357_v26 }
0x21f8   :  { %12742 = vmatprep.subr.bf16.mxu1 %v13445_v0 }
0x21fb   :  { %12743 = vmatpush3.bf16.msra.mxu1 %v13358_v40 }
0x21fc   :  { %12744 = vmatprep.subr.bf16.mxu1 %v13445_v0 }
0x21ff   :  { %12745 = vmatpush3.bf16.msra.mxu1 %v13359_v41 }
0x2200   :  { %12746 = vmatprep.subr.bf16.mxu1 %v13445_v0 }
0x2203   :  { %12747 = vmatpush3.bf16.msra.mxu1 %v13360_v49 }
0x22b1   :  { %v9956_v5 = vpop.f32.mrb[144].mxu1  ;;  %v9997_v24 = vpop.f32.mrb[164].mxu0 }
0x22b2   :  { %v9958_v18 = vpop.f32.mrb[145].mxu1  ;;  %v9999_v35 = vpop.f32.mrb[165].mxu0 }
0x22b3   :  { %v9960_v51 = vpop.f32.mrb[146].mxu1  ;;  %v10001_v61 = vpop.f32.mrb[166].mxu0 }
0x22b4   :  { %v9961_v59 = vpop.f32.mrb[147].mxu1  ;;  %v10002_v52 = vpop.f32.mrb[167].mxu0 }
0x22b9   :  { %v10043_v3 = vpop.f32.mrb[148].mxu1  ;;  %v10084_v53 = vpop.f32.mrb[168].mxu0 }
0x22ba   :  { %v10044_v4 = vadd.f32 %v10043_v3, %v9956_v5  ;;  %v10085_v30 = vadd.f32 %v10084_v53, %v9997_v24  ;;  %v10045_v14 = vpop.f32.mrb[149].mxu1  ;;  %v10086_v0 = vpop.f32.mrb[169].mxu0 }
0x22bb   :  { %v10046_v7 = vadd.f32 %v10045_v14, %v9958_v18  ;;  %v10087_v38 = vadd.f32 %v10086_v0, %v9999_v35  ;;  %v10047_v62 = vpop.f32.mrb[150].mxu1  ;;  %v10088_v31 = vpop.f32.mrb[170].mxu0 }
0x22bc   :  { %v10091_v54 = vadd.f32 %v10044_v4, %v16571_v11  ;;  %v10048_v63 = vpop.f32.mrb[151].mxu1  ;;  %v10089_v13 = vpop.f32.mrb[171].mxu0  ;;  %v10093_v22 = vadd.f32 %v10085_v30, %v16583_v1 }
0x22bd   :  { %v10092_v19 = vadd.f32 %v10046_v7, %v16574_v45  ;;  %v10094_v44 = vadd.f32 %v10087_v38, %v16579_v33 }
0x22be   :  { %v10095_v32 = vsub.f32 0.0, %v10091_v54 }
0x22bf   :  { %v10101_v2 = vsub.f32 0.0, %v10092_v19  ;;  %v10108_v6 = vsub.f32 0.0, %v10094_v44 }
0x22c0   :  { %v10096_v50 = vmul.f32 1.442695, %v10095_v32 }
0x22c1   :  { %v10102_v28 = vmul.f32 1.442695, %v10101_v2  ;;  %v10109_v43 = vmul.f32 1.442695, %v10108_v6 }
0x22c2   :  { %13425 = vpow2.f32 %v10096_v50 }
0x22c3   :  { %13427 = vpow2.f32 %v10102_v28 }
0x22c4   :  { %13429 = vpow2.f32 %v10109_v43 }
0x22c5   :  { %13431 = vtanh.f32 %v10093_v22 }
0x22cc   :  { %v13426_v27 = vpop.eup %13425 }
0x22cd   :  { %v13428_v29 = vpop.eup %13427  ;;  %v10098_v15 = vadd.f32 1.0, %v13426_v27 }
0x22ce   :  { %v10104_v11 = vadd.f32 1.0, %v13428_v29  ;;  %v13430_v45 = vpop.eup %13429 }
0x22cf   :  { %13433 = vrcp.f32 %v10098_v15  ;;  %v13432_v56 = vpop.eup %13431  ;;  %v10111_v33 = vadd.f32 1.0, %v13430_v45 }
0x22d0   :  { %13435 = vrcp.f32 %v10104_v11 }
0x22d1   :  { %13437 = vrcp.f32 %v10111_v33 }
0x22d9   :  { %v13434_v17 = vpop.eup %13433 }
0x22da   :  { %v13436_v55 = vpop.eup %13435  ;;  %v10115_v34 = vmul.f32 %v13434_v17, %v13432_v56 }
0x22db   :  { %v10114_v10 = vmul.f32 %v13436_v55, %v16586_v9  ;;  %v13438_v1 = vpop.eup %13437 }
0x22dd   :  { %v10116_v57 = vadd.f32 %v10115_v34, %v10114_v10 }
0x22df   :  { %13439 = vtanh.f32 %v10116_v57 }
0x22e9   :  { %v13440_v25 = vpop.eup %13439 }
0x22ea   :  { %v10118_v23 = vmul.f32 %v13440_v25, %v13438_v1 }
0x22ec   :  { %v10120_v36 = vrot.slane %v10118_v23, 7 }
0x22ee   :  { %v10123_v58 = vsel %vm10122_vm8, %v16589_v12, %v10120_v36 }
0x22ef   :  { %v10140_v21 = vpack.c.bf16 %v10123_v58, %v10123_v58 }
0x22f1   :  { %12749 = vmatmul.mubr.bf16.vlgmr.msra.gmra.mrb[152].mxu1 %v10140_v21 }
0x23c4   :  { %v10230_v42 = vpop.f32.mrb[152].mxu1 }
0x23c5   :  { %v10231_v47 = vadd.f32 %v11914_v37, %v10230_v42  ;;  %v12750_v46 = vpop.f32.mrb[153].mxu1 }
0x23c6   :  { %v10233_v48 = vpop.f32.mrb[154].mxu1 }
0x23c7   :  { %v10236_v16 = vsub.f32 0.0, %v10231_v47  ;;  %v12751_v39 = vpop.f32.mrb[155].mxu1 }
0x23c9   :  { %v10237_v9 = vmul.f32 1.442695, %v10236_v16 }
0x23cb   :  { %13441 = vpow2.f32 %v10237_v9 }
0x23d5   :  { %v13442_v8 = vpop.eup %13441 }
0x23d6   :  { %v10239_v60 = vadd.f32 1.0, %v13442_v8 }
0x23d8   :  { %13443 = vrcp.f32 %v10239_v60 }
0x23e2   :  { %v13444_v26 = vpop.eup %13443 }
0x23e3   :  { %10243 = vst.msk [vmem:[%s16718_s7] sm:$0x3] %vm10242_vm9, %v13444_v26 }

</bundles_post_ra>
